<compile_context>
chip_gen: v5e
topology: v5e:2x2
jax: 0.10.0
libtpu: 0.0.40
codegen_flags: <defaults>
</compile_context>

<pallas_src>
from functools import partial

import jax
import jax.numpy as jnp
from jax.experimental import pallas as pl
from jax.experimental.pallas import tpu as pltpu

IN_C = 3 * 23     # 69 true input features
IN_PAD = 128      # lane-padded input feature dim (padded in bf16)
HID = 256
OUT_C = 3         # true output features
OUT_PAD = 8       # small output pad: 16x less HBM writeback than 128-lane f32


def _leaky_relu(x, slope=0.2):
    # For slope in (0,1): max(x, slope*x) == leaky_relu(x). One vmul + one vmax.
    return jnp.maximum(x, x * jnp.asarray(slope, x.dtype))


def insp_kernel(x_ref,
                w1_ref, b1_ref,
                w2_ref, b2_ref,
                w3_ref, b3_ref,
                w5_ref, b5_ref,
                w4_ref, b4_ref,
                o_ref, *, act_dtype):
    """Fused fc1->fc2->fc3->fc5->fc4 with leaky_relu(0.2) between layers.

    MXU inputs are bf16 with f32 accumulation. Bias-add + leaky_relu run in
    `act_dtype` (bf16 on v6e/v7x, f32 on v5e) and the activation is handed to
    the next matmul as bf16 either way.
    """
    def layer(h, w_ref, b_ref):
        acc = jnp.dot(h, w_ref[...], preferred_element_type=jnp.float32)
        a = acc.astype(act_dtype) + b_ref[...]
        return _leaky_relu(a).astype(jnp.bfloat16)

    h = layer(x_ref[...], w1_ref, b1_ref)          # (tm, 256)
    h = layer(h, w2_ref, b2_ref)
    h = layer(h, w3_ref, b3_ref)
    h = layer(h, w5_ref, b5_ref)

    out = jnp.dot(h, w4_ref[...], preferred_element_type=jnp.float32) + b4_ref[...]
    o_ref[...] = out.astype(o_ref.dtype)            # (tm, OUT_PAD) f32


def prepare_params(p, *, bf16_elementwise=True):
    """Pad + cast raw f32 params once (hoisted out of the forward call).

    Weights -> bf16 (w1 rows padded 69->128, w4/b4 cols padded 3->8);
    biases -> bf16 when the elementwise path is bf16, else f32.
    """
    act_dtype = jnp.bfloat16 if bf16_elementwise else jnp.float32
    w1 = jnp.pad(p["w1"], ((0, IN_PAD - IN_C), (0, 0))).astype(jnp.bfloat16)
    w4 = jnp.pad(p["w4"], ((0, 0), (0, OUT_PAD - OUT_C))).astype(jnp.bfloat16)
    b4 = jnp.pad(p["b4"], ((0, 0), (0, OUT_PAD - OUT_C))).astype(jnp.float32)
    return dict(
        w1=w1, b1=p["b1"].astype(act_dtype),
        w2=p["w2"].astype(jnp.bfloat16), b2=p["b2"].astype(act_dtype),
        w3=p["w3"].astype(jnp.bfloat16), b3=p["b3"].astype(act_dtype),
        w5=p["w5"].astype(jnp.bfloat16), b5=p["b5"].astype(act_dtype),
        w4=w4, b4=b4,
    )


def _round_up(v, m):
    return ((v + m - 1) // m) * m


def _pick_tm(n, *, tm_max=2048, align=256):
    """Largest-ish row tile that still gives >= 2 grid steps (v7x megacore)."""
    half = (n + 1) // 2
    tm = min(tm_max, _round_up(max(half, 1), align))
    return max(tm, align)


def default_bf16_elementwise():
    """bf16 bias/relu path only where the VPU natively supports bf16 (v6e/v7x)."""
    try:
        kind = jax.devices()[0].device_kind.lower()
    except Exception:  # pragma: no cover - be conservative
        return False
    return any(tag in kind for tag in ("v6", "v7", "tpu7"))


@partial(jax.jit, static_argnames=("tm", "bf16_elementwise"))
def _insp_forward_impl(x, prep, *, tm, bf16_elementwise):
    N, in_c = x.shape
    assert in_c == IN_C

    n_tiles = max(1, (N + tm - 1) // tm)
    n_pad = n_tiles * tm
    # Rows padded to a tile multiple, features lane-padded 69 -> 128, in bf16
    # (halves input DMA vs. f32 and removes the in-kernel cast).
    x_p = jnp.pad(x.astype(jnp.bfloat16),
                  ((0, n_pad - N), (0, IN_PAD - IN_C)))

    def full_spec(shape):
        # Full-array block, same block every grid step -> resident in VMEM.
        return pl.BlockSpec(shape, lambda i: (0,) * len(shape))

    in_specs = [
        pl.BlockSpec((tm, IN_PAD), lambda i: (i, 0)),        # x row tile (bf16)
        full_spec((IN_PAD, HID)),  full_spec((1, HID)),      # fc1
        full_spec((HID, HID)),     full_spec((1, HID)),      # fc2
        full_spec((HID, HID)),     full_spec((1, HID)),      # fc3
        full_spec((HID, HID)),     full_spec((1, HID)),      # fc5
        full_spec((HID, OUT_PAD)), full_spec((1, OUT_PAD)),  # fc4 (8-col pad)
    ]
    out_spec = pl.BlockSpec((tm, OUT_PAD), lambda i: (i, 0))

    act_dtype = jnp.bfloat16 if bf16_elementwise else jnp.float32
    kernel = partial(insp_kernel, act_dtype=act_dtype)

    out = pl.pallas_call(
        kernel,
        out_shape=jax.ShapeDtypeStruct((n_pad, OUT_PAD), jnp.float32),
        grid_spec=pltpu.PrefetchScalarGridSpec(
            num_scalar_prefetch=0,
            grid=(n_tiles,),
            in_specs=in_specs,
            out_specs=out_spec,
        ),
        compiler_params=pltpu.CompilerParams(
            dimension_semantics=("parallel",)),
    )(x_p,
      prep["w1"], prep["b1"],
      prep["w2"], prep["b2"],
      prep["w3"], prep["b3"],
      prep["w5"], prep["b5"],
      prep["w4"], prep["b4"])

    return out[:N, :OUT_C]


def insp_forward(x, prep, *, tm=None, bf16_elementwise=True):
    """x: [N, 69] float32; prep: output of prepare_params.

    Returns [N, 3] float32 (the 'new_img' of the torch module). Ragged N is
    handled by zero-padding rows to a tile multiple and slicing at the end.
    """
    if tm is None:
        tm = _pick_tm(x.shape[0])
    return _insp_forward_impl(x, prep, tm=tm, bf16_elementwise=bf16_elementwise)


def init_params(key):
    """Deterministic init mimicking nn.Linear default (uniform +/- 1/sqrt(fan_in))."""
    def linear(key, fan_in, fan_out):
        kw, kb = jax.random.split(key)
        bound = 1.0 / jnp.sqrt(fan_in)
        w = jax.random.uniform(kw, (fan_in, fan_out), jnp.float32, -bound, bound)
        b = jax.random.uniform(kb, (1, fan_out), jnp.float32, -bound, bound)
        return w, b

    keys = jax.random.split(key, 5)
    w1, b1 = linear(keys[0], IN_C, HID)
    w2, b2 = linear(keys[1], HID, HID)
    w3, b3 = linear(keys[2], HID, HID)
    w5, b5 = linear(keys[3], HID, HID)
    w4, b4 = linear(keys[4], HID, OUT_C)
    return dict(w1=w1, b1=b1, w2=w2, b2=b2, w3=w3, b3=b3,
                w5=w5, b5=b5, w4=w4, b4=b4)


def insp_reference(x, p):
    """Pure-JAX f32 reference. Weights are bf16-rounded (then upcast) to match
    the kernel's weight storage; the residual difference vs. the kernel is the
    bf16 rounding of activations (and, on v6e/v7x, of the bias-add)."""
    def wq(w):
        return w.astype(jnp.bfloat16).astype(jnp.float32)
    h = _leaky_relu(x @ wq(p["w1"]) + p["b1"])
    h = _leaky_relu(h @ wq(p["w2"]) + p["b2"])
    h = _leaky_relu(h @ wq(p["w3"]) + p["b3"])
    h = _leaky_relu(h @ wq(p["w5"]) + p["b5"])
    return h @ wq(p["w4"]) + p["b4"]


if __name__ == "__main__":
    key = jax.random.PRNGKey(0)
    k_param, k_x = jax.random.split(key)

    params = init_params(k_param)

    # data['grad'] : N sample points, each with 3*23 = 69 gradient features.
    # N deliberately not a multiple of the row tile to exercise the ragged path.
    N = 1000
    x = jax.random.normal(k_x, (N, IN_C), jnp.float32)

    use_bf16_act = default_bf16_elementwise()
    prep = prepare_params(params, bf16_elementwise=use_bf16_act)   # hoisted once

    out = insp_forward(x, prep, bf16_elementwise=use_bf16_act)     # {'new_img': out}
    out = jax.block_until_ready(out)

    ref = insp_reference(x, params)
    assert out.shape == (N, OUT_C)
    max_err = float(jnp.max(jnp.abs(out - ref)))
    assert jnp.allclose(out, ref, atol=1e-2, rtol=2e-2), (
        f"mismatch vs. JAX reference (max abs err {max_err:.3e})")

    print("KERNEL_OK")
</pallas_src>

<mosaic_0001>
module attributes {stable_mosaic.version = 11 : i64} {
  func.func @insp_kernel(%arg0: i32, %arg1: memref<512x128xbf16, #tpu.memory_space<vmem>>, %arg2: memref<128x256xbf16, #tpu.memory_space<vmem>>, %arg3: memref<1x256xf32, #tpu.memory_space<vmem>>, %arg4: memref<256x256xbf16, #tpu.memory_space<vmem>>, %arg5: memref<1x256xf32, #tpu.memory_space<vmem>>, %arg6: memref<256x256xbf16, #tpu.memory_space<vmem>>, %arg7: memref<1x256xf32, #tpu.memory_space<vmem>>, %arg8: memref<256x256xbf16, #tpu.memory_space<vmem>>, %arg9: memref<1x256xf32, #tpu.memory_space<vmem>>, %arg10: memref<256x8xbf16, #tpu.memory_space<vmem>>, %arg11: memref<1x8xf32, #tpu.memory_space<vmem>>, %arg12: memref<512x8xf32, #tpu.memory_space<vmem>>) attributes {dimension_semantics = [#tpu.dimension_semantics<parallel>], iteration_bounds = array<i64: 2>, scalar_prefetch = 0 : i64, scratch_operands = 0 : i64, tpu.core_type = #tpu.core_type<tc>, window_params = [{transform_indices = @transform_0, window_bounds = array<i64: 512, 128>}, {pipeline_mode = #tpu.pipeline_mode<synchronous>, transform_indices = @transform_1, window_bounds = array<i64: 128, 256>}, {pipeline_mode = #tpu.pipeline_mode<synchronous>, transform_indices = @transform_2, window_bounds = array<i64: 1, 256>}, {pipeline_mode = #tpu.pipeline_mode<synchronous>, transform_indices = @transform_3, window_bounds = array<i64: 256, 256>}, {pipeline_mode = #tpu.pipeline_mode<synchronous>, transform_indices = @transform_4, window_bounds = array<i64: 1, 256>}, {pipeline_mode = #tpu.pipeline_mode<synchronous>, transform_indices = @transform_5, window_bounds = array<i64: 256, 256>}, {pipeline_mode = #tpu.pipeline_mode<synchronous>, transform_indices = @transform_6, window_bounds = array<i64: 1, 256>}, {pipeline_mode = #tpu.pipeline_mode<synchronous>, transform_indices = @transform_7, window_bounds = array<i64: 256, 256>}, {pipeline_mode = #tpu.pipeline_mode<synchronous>, transform_indices = @transform_8, window_bounds = array<i64: 1, 256>}, {pipeline_mode = #tpu.pipeline_mode<synchronous>, transform_indices = @transform_9, window_bounds = array<i64: 256, 8>}, {pipeline_mode = #tpu.pipeline_mode<synchronous>, transform_indices = @transform_10, window_bounds = array<i64: 1, 8>}, {transform_indices = @transform_11, window_bounds = array<i64: 512, 8>}]} {
    %c0 = arith.constant 0 : index
    %c0_0 = arith.constant 0 : index
    %0 = vector.load %arg1[%c0, %c0_0] : memref<512x128xbf16, #tpu.memory_space<vmem>>, vector<512x128xbf16>
    %c0_1 = arith.constant 0 : index
    %c0_2 = arith.constant 0 : index
    %1 = vector.load %arg2[%c0_1, %c0_2] : memref<128x256xbf16, #tpu.memory_space<vmem>>, vector<128x256xbf16>
    %cst = arith.constant dense<0.000000e+00> : vector<512x256xf32>
    %2 = tpu.matmul %0, %1, %cst {dimension_numbers = #tpu.dot_dimension_numbers<[1], [0], [0], [1], [0, 0, 1, 1], [], []>} : vector<512x128xbf16>, vector<128x256xbf16>, vector<512x256xf32> -> vector<512x256xf32>
    %c0_3 = arith.constant 0 : index
    %c0_4 = arith.constant 0 : index
    %3 = vector.load %arg3[%c0_3, %c0_4] : memref<1x256xf32, #tpu.memory_space<vmem>>, vector<1x256xf32>
    %4 = vector.broadcast %3 : vector<1x256xf32> to vector<512x256xf32>
    %5 = arith.addf %2, %4 : vector<512x256xf32>
    %cst_5 = arith.constant 2.000000e-01 : f32
    %6 = vector.broadcast %cst_5 : f32 to vector<512x256xf32>
    %7 = arith.mulf %5, %6 : vector<512x256xf32>
    %8 = arith.maximumf %5, %7 : vector<512x256xf32>
    %9 = arith.truncf %8 : vector<512x256xf32> to vector<512x256xbf16>
    %c0_6 = arith.constant 0 : index
    %c0_7 = arith.constant 0 : index
    %10 = vector.load %arg4[%c0_6, %c0_7] : memref<256x256xbf16, #tpu.memory_space<vmem>>, vector<256x256xbf16>
    %cst_8 = arith.constant dense<0.000000e+00> : vector<512x256xf32>
    %11 = tpu.matmul %9, %10, %cst_8 {dimension_numbers = #tpu.dot_dimension_numbers<[1], [0], [0], [1], [0, 0, 1, 1], [], []>} : vector<512x256xbf16>, vector<256x256xbf16>, vector<512x256xf32> -> vector<512x256xf32>
    %c0_9 = arith.constant 0 : index
    %c0_10 = arith.constant 0 : index
    %12 = vector.load %arg5[%c0_9, %c0_10] : memref<1x256xf32, #tpu.memory_space<vmem>>, vector<1x256xf32>
    %13 = vector.broadcast %12 : vector<1x256xf32> to vector<512x256xf32>
    %14 = arith.addf %11, %13 : vector<512x256xf32>
    %cst_11 = arith.constant 2.000000e-01 : f32
    %15 = vector.broadcast %cst_11 : f32 to vector<512x256xf32>
    %16 = arith.mulf %14, %15 : vector<512x256xf32>
    %17 = arith.maximumf %14, %16 : vector<512x256xf32>
    %18 = arith.truncf %17 : vector<512x256xf32> to vector<512x256xbf16>
    %c0_12 = arith.constant 0 : index
    %c0_13 = arith.constant 0 : index
    %19 = vector.load %arg6[%c0_12, %c0_13] : memref<256x256xbf16, #tpu.memory_space<vmem>>, vector<256x256xbf16>
    %cst_14 = arith.constant dense<0.000000e+00> : vector<512x256xf32>
    %20 = tpu.matmul %18, %19, %cst_14 {dimension_numbers = #tpu.dot_dimension_numbers<[1], [0], [0], [1], [0, 0, 1, 1], [], []>} : vector<512x256xbf16>, vector<256x256xbf16>, vector<512x256xf32> -> vector<512x256xf32>
    %c0_15 = arith.constant 0 : index
    %c0_16 = arith.constant 0 : index
    %21 = vector.load %arg7[%c0_15, %c0_16] : memref<1x256xf32, #tpu.memory_space<vmem>>, vector<1x256xf32>
    %22 = vector.broadcast %21 : vector<1x256xf32> to vector<512x256xf32>
    %23 = arith.addf %20, %22 : vector<512x256xf32>
    %cst_17 = arith.constant 2.000000e-01 : f32
    %24 = vector.broadcast %cst_17 : f32 to vector<512x256xf32>
    %25 = arith.mulf %23, %24 : vector<512x256xf32>
    %26 = arith.maximumf %23, %25 : vector<512x256xf32>
    %27 = arith.truncf %26 : vector<512x256xf32> to vector<512x256xbf16>
    %c0_18 = arith.constant 0 : index
    %c0_19 = arith.constant 0 : index
    %28 = vector.load %arg8[%c0_18, %c0_19] : memref<256x256xbf16, #tpu.memory_space<vmem>>, vector<256x256xbf16>
    %cst_20 = arith.constant dense<0.000000e+00> : vector<512x256xf32>
    %29 = tpu.matmul %27, %28, %cst_20 {dimension_numbers = #tpu.dot_dimension_numbers<[1], [0], [0], [1], [0, 0, 1, 1], [], []>} : vector<512x256xbf16>, vector<256x256xbf16>, vector<512x256xf32> -> vector<512x256xf32>
    %c0_21 = arith.constant 0 : index
    %c0_22 = arith.constant 0 : index
    %30 = vector.load %arg9[%c0_21, %c0_22] : memref<1x256xf32, #tpu.memory_space<vmem>>, vector<1x256xf32>
    %31 = vector.broadcast %30 : vector<1x256xf32> to vector<512x256xf32>
    %32 = arith.addf %29, %31 : vector<512x256xf32>
    %cst_23 = arith.constant 2.000000e-01 : f32
    %33 = vector.broadcast %cst_23 : f32 to vector<512x256xf32>
    %34 = arith.mulf %32, %33 : vector<512x256xf32>
    %35 = arith.maximumf %32, %34 : vector<512x256xf32>
    %36 = arith.truncf %35 : vector<512x256xf32> to vector<512x256xbf16>
    %c0_24 = arith.constant 0 : index
    %c0_25 = arith.constant 0 : index
    %37 = vector.load %arg10[%c0_24, %c0_25] : memref<256x8xbf16, #tpu.memory_space<vmem>>, vector<256x8xbf16>
    %cst_26 = arith.constant dense<0.000000e+00> : vector<512x8xf32>
    %38 = tpu.matmul %36, %37, %cst_26 {dimension_numbers = #tpu.dot_dimension_numbers<[1], [0], [0], [1], [0, 0, 1, 1], [], []>} : vector<512x256xbf16>, vector<256x8xbf16>, vector<512x8xf32> -> vector<512x8xf32>
    %c0_27 = arith.constant 0 : index
    %c0_28 = arith.constant 0 : index
    %39 = vector.load %arg11[%c0_27, %c0_28] : memref<1x8xf32, #tpu.memory_space<vmem>>, vector<1x8xf32>
    %40 = vector.broadcast %39 : vector<1x8xf32> to vector<512x8xf32>
    %41 = arith.addf %38, %40 : vector<512x8xf32>
    %c0_29 = arith.constant 0 : index
    %c0_30 = arith.constant 0 : index
    %42 = vector.load %arg12[%c0_29, %c0_30] : memref<512x8xf32, #tpu.memory_space<vmem>>, vector<512x8xf32>
    tpu.vector_store %arg12[%c0_29, %c0_30], %41 {strides = array<i32>} : memref<512x8xf32, #tpu.memory_space<vmem>>, vector<512x8xf32>,
    return
  }
  func.func @transform_0(%arg0: i32) -> (i32, i32) {
    %c0_i32 = arith.constant 0 : i32
    %c0_i32_0 = arith.constant 0 : i32
    return %arg0, %c0_i32 : i32, i32
  }
  func.func @transform_1(%arg0: i32) -> (i32, i32) {
    %c0_i32 = arith.constant 0 : i32
    %c0_i32_0 = arith.constant 0 : i32
    %c0_i32_1 = arith.constant 0 : i32
    return %c0_i32, %c0_i32_0 : i32, i32
  }
  func.func @transform_2(%arg0: i32) -> (i32, i32) {
    %c0_i32 = arith.constant 0 : i32
    %c0_i32_0 = arith.constant 0 : i32
    %c0_i32_1 = arith.constant 0 : i32
    return %c0_i32, %c0_i32_0 : i32, i32
  }
  func.func @transform_3(%arg0: i32) -> (i32, i32) {
    %c0_i32 = arith.constant 0 : i32
    %c0_i32_0 = arith.constant 0 : i32
    %c0_i32_1 = arith.constant 0 : i32
    return %c0_i32, %c0_i32_0 : i32, i32
  }
  func.func @transform_4(%arg0: i32) -> (i32, i32) {
    %c0_i32 = arith.constant 0 : i32
    %c0_i32_0 = arith.constant 0 : i32
    %c0_i32_1 = arith.constant 0 : i32
    return %c0_i32, %c0_i32_0 : i32, i32
  }
  func.func @transform_5(%arg0: i32) -> (i32, i32) {
    %c0_i32 = arith.constant 0 : i32
    %c0_i32_0 = arith.constant 0 : i32
    %c0_i32_1 = arith.constant 0 : i32
    return %c0_i32, %c0_i32_0 : i32, i32
  }
  func.func @transform_6(%arg0: i32) -> (i32, i32) {
    %c0_i32 = arith.constant 0 : i32
    %c0_i32_0 = arith.constant 0 : i32
    %c0_i32_1 = arith.constant 0 : i32
    return %c0_i32, %c0_i32_0 : i32, i32
  }
  func.func @transform_7(%arg0: i32) -> (i32, i32) {
    %c0_i32 = arith.constant 0 : i32
    %c0_i32_0 = arith.constant 0 : i32
    %c0_i32_1 = arith.constant 0 : i32
    return %c0_i32, %c0_i32_0 : i32, i32
  }
  func.func @transform_8(%arg0: i32) -> (i32, i32) {
    %c0_i32 = arith.constant 0 : i32
    %c0_i32_0 = arith.constant 0 : i32
    %c0_i32_1 = arith.constant 0 : i32
    return %c0_i32, %c0_i32_0 : i32, i32
  }
  func.func @transform_9(%arg0: i32) -> (i32, i32) {
    %c0_i32 = arith.constant 0 : i32
    %c0_i32_0 = arith.constant 0 : i32
    %c0_i32_1 = arith.constant 0 : i32
    return %c0_i32, %c0_i32_0 : i32, i32
  }
  func.func @transform_10(%arg0: i32) -> (i32, i32) {
    %c0_i32 = arith.constant 0 : i32
    %c0_i32_0 = arith.constant 0 : i32
    %c0_i32_1 = arith.constant 0 : i32
    return %c0_i32, %c0_i32_0 : i32, i32
  }
  func.func @transform_11(%arg0: i32) -> (i32, i32) {
    %c0_i32 = arith.constant 0 : i32
    %c0_i32_0 = arith.constant 0 : i32
    return %arg0, %c0_i32 : i32, i32
  }
}

</mosaic_0001>

<bundles_post_ra>
// kernel: _insp_forward_impl.1
= control target key start
LH: loop header
LB: loop body
LE: loop exit
PB: predicated region body
PF: predicated region fallthrough
CT: control target
= control target key end

     0   :  { %s6471_s17 = smov 0   ;;  %s8865_s0 = inlined_call_operand.vmem [shape: bf16[1024,128], index: 0, kind: input, shape index: {}]   ;;  %s8866_s1 = inlined_call_operand.vmem [shape: bf16[128,256], index: 1, kind: input, shape index: {}]   ;;  %s8867_s2 = inlined_call_operand.vmem [shape: f32[1,256], index: 2, kind: input, shape index: {}]   ;;  %s8868_s3 = inlined_call_operand.vmem [shape: bf16[256,256], index: 3, kind: input, shape index: {}]   ;;  %s8869_s4 = inlined_call_operand.vmem [shape: f32[1,256], index: 4, kind: input, shape index: {}]   ;;  %s8870_s5 = inlined_call_operand.vmem [shape: bf16[256,256], index: 5, kind: input, shape index: {}]   ;;  %s8871_s6 = inlined_call_operand.vmem [shape: f32[1,256], index: 6, kind: input, shape index: {}]   ;;  %s8872_s7 = inlined_call_operand.vmem [shape: bf16[256,256], index: 7, kind: input, shape index: {}]   ;;  %s8873_s8 = inlined_call_operand.vmem [shape: f32[1,256], index: 8, kind: input, shape index: {}]   ;;  %s8874_s9 = inlined_call_operand.vmem [shape: bf16[256,8], index: 9, kind: input, shape index: {}]   ;;  %s8875_s10 = inlined_call_operand.vmem [shape: f32[1,8], index: 10, kind: input, shape index: {}]   ;;  %s8876_s11 = inlined_call_operand.vmem [shape: f32[1024,8], index: 11, kind: output, shape index: {}]  }
   0x1 LB: > { %s5579_s18 = sadd.s32 4294967295, %s6409_s17   ;;  %p5583_p0 = scmp.ge.s32.totalorder %s6409_s17, 1  ;;  %s6409_s17 = sphi %s6471_s17, %s21_s17  }
   0x2   : > { %p338_p1 = scmp.lt.s32.totalorder %s6409_s17, 3 }
   0x4   : > { %p339_p2 = pnand %p5583_p0, %p338_p1 }
   0x6   : > { %342 = sbr.rel (%p339_p2) target bundleno = 2364 (0x93c), region = 64 }
   0xb   : > { %v5774_v0 = vld [vmem:[%s8866_s1 + $0x70] sm:$0xf]  ;;  %v6277_v1 = vld [vmem:[%s8866_s1 + $0x74] sm:$0xf0]  ;;  %v6276_v2 = vld [vmem:[%s8866_s1 + $0x74] sm:$0xf] }
   0xc   : > { %v5775_v3 = vor.u32 %v6277_v1, %v5774_v0  ;;  %v5776_v4 = vld [vmem:[%s8866_s1 + $0x78] sm:$0xf0]  ;;  %v5766_v5 = vld [vmem:[%s8866_s1 + $0x60] sm:$0xf]  ;;  %v6275_v6 = vld [vmem:[%s8866_s1 + $0x64] sm:$0xf0] }
   0xd   : > { %v5779_v7 = vor.u32 %v6276_v2, %v5776_v4  ;;  %v6274_v8 = vld [vmem:[%s8866_s1 + $0x64] sm:$0xf]  ;;  %v5768_v9 = vld [vmem:[%s8866_s1 + $0x68] sm:$0xf0]  ;;  %v5767_v10 = vor.u32 %v6275_v6, %v5766_v5  ;;  %v5758_v12 = vld [vmem:[%s8866_s1 + $0x50] sm:$0xf] }
   0xe   : > { %748 = vmatpush.bf16.msra.mxu0 %v5775_v3  ;;  %v5771_v11 = vor.u32 %v6274_v8, %v5768_v9  ;;  %v6273_v13 = vld [vmem:[%s8866_s1 + $0x54] sm:$0xf0]  ;;  %v6272_v14 = vld [vmem:[%s8866_s1 + $0x54] sm:$0xf]  ;;  %v5760_v15 = vld [vmem:[%s8866_s1 + $0x58] sm:$0xf0] }
   0xf   : > { %917 = vmatpush.bf16.msra.mxu1 %v5779_v7  ;;  %v5759_v16 = vor.u32 %v6273_v13, %v5758_v12  ;;  %v5763_v17 = vor.u32 %v6272_v14, %v5760_v15  ;;  %v5750_v18 = vld [vmem:[%s8866_s1 + $0x40] sm:$0xf]  ;;  %v6271_v19 = vld [vmem:[%s8866_s1 + $0x44] sm:$0xf0]  ;;  %v6270_v20 = vld [vmem:[%s8866_s1 + $0x44] sm:$0xf] }
  0x10   : > { %v5752_v21 = vld [vmem:[%s8866_s1 + $0x48] sm:$0xf0]  ;;  %v5751_v22 = vor.u32 %v6271_v19, %v5750_v18  ;;  %v5742_v24 = vld [vmem:[%s8866_s1 + $0x30] sm:$0xf]  ;;  %v6269_v25 = vld [vmem:[%s8866_s1 + $0x34] sm:$0xf0] }
  0x11   : > { %v5755_v23 = vor.u32 %v6270_v20, %v5752_v21  ;;  %v6268_v26 = vld [vmem:[%s8866_s1 + $0x34] sm:$0xf]  ;;  %v5744_v27 = vld [vmem:[%s8866_s1 + $0x38] sm:$0xf0]  ;;  %s5584_s25 = sshll.u32 %s5579_s18, 6  ;;  %v5743_v28 = vor.u32 %v6269_v25, %v5742_v24  ;;  %vm5458_vm0 = vcmask 64512  }
  0x12   : > { %749 = vmatpush.bf16.msra.mxu0 %v5767_v10  ;;  %v5747_v29 = vor.u32 %v6268_v26, %v5744_v27  ;;  %v5734_v30 = vld [vmem:[%s8866_s1 + $0x20] sm:$0xf]  ;;  %v6267_v31 = vld [vmem:[%s8866_s1 + $0x24] sm:$0xf0]  ;;  %p379_p3 = scmp.lt.s32.totalorder %s5584_s25, 127 }
  0x13   : > { %918 = vmatpush.bf16.msra.mxu1 %v5771_v11  ;;  %v6266_v32 = vld [vmem:[%s8866_s1 + $0x24] sm:$0xf]  ;;  %v5736_v33 = vld [vmem:[%s8866_s1 + $0x28] sm:$0xf0]  ;;  %v5735_v34 = vor.u32 %v6267_v31, %v5734_v30  ;;  %v5726_v36 = vld [vmem:[%s8866_s1 + $0x10] sm:$0xf] }
  0x14   : > { %v5739_v35 = vor.u32 %v6266_v32, %v5736_v33  ;;  %v6265_v37 = vld [vmem:[%s8866_s1 + $0x14] sm:$0xf0]  ;;  %s9175_s25 = smov (!%p379_p3, %s5584_s25), 127  ;;  %v6264_v38 = vld [vmem:[%s8866_s1 + $0x14] sm:$0xf] }
  0x15   : > { %v5728_v39 = vld [vmem:[%s8866_s1 + $0x18] sm:$0xf0]  ;;  %v5727_v40 = vor.u32 %v6265_v37, %v5726_v36  ;;  %v5718_v41 = vld [vmem:[%s8866_s1] sm:$0xf]  ;;  %v6263_v43 = vld [vmem:[%s8866_s1 + $0x4] sm:$0xf0] }
  0x16   : > { %750 = vmatpush.bf16.msra.mxu0 %v5759_v16  ;;  %v5731_v42 = vor.u32 %v6264_v38, %v5728_v39  ;;  %v6262_v44 = vld [vmem:[%s8866_s1 + $0x4] sm:$0xf]  ;;  %s5585_s12 = sshll.u32 %s9175_s25, 2  ;;  %v5720_v45 = vld [vmem:[%s8866_s1 + $0x8] sm:$0xf0]  ;;  %v5719_v50 = vor.u32 %v6263_v43, %v5718_v41  ;;  %s5587_s19 = sshll.u32 %s9175_s25, 3 }
  0x17   : > { %919 = vmatpush.bf16.msra.mxu1 %v5763_v17  ;;  %v6292_v46 = vld [vmem:[%s8868_s3 + $0x74] sm:$0xf]  ;;  %v5840_v47 = vld [vmem:[%s8868_s3 + $0x78] sm:$0xf0]  ;;  %s6595_s27 = scalar_lea.vmem %s8865_s0, %s5585_s12  ;;  %v5723_v51 = vor.u32 %v6262_v44, %v5720_v45  ;;  %v6290_v57 = vld [vmem:[%s8868_s3 + $0x64] sm:$0xf]  ;;  %s8568_s22 = scalar_lea.vmem %s8876_s11, %s5587_s19 }
  0x18   : > { %v6308_v48 = vld [vmem:[%s8868_s3 + $0xf4] sm:$0xf]  ;;  %v5904_v49 = vld [vmem:[%s8868_s3 + $0xf8] sm:$0xf0]  ;;  %v5843_v52 = vor.u32 %v6292_v46, %v5840_v47  ;;  %v6230_v54 = vld [vmem:[%s6595_s27] sm:$0xff] }
  0x19   : > { %v5907_v53 = vor.u32 %v6308_v48, %v5904_v49  ;;  %v6231_v55 = vld [vmem:[%s6595_s27 + $0x8] sm:$0xff]  ;;  %v6232_v56 = vld [vmem:[%s6595_s27 + $0x10] sm:$0xff]  ;;  %v6306_v59 = vld [vmem:[%s8868_s3 + $0xe4] sm:$0xf] }
  0x1a   : > { %751 = vmatpush.bf16.msra.mxu0 %v5751_v22  ;;  %v5832_v58 = vld [vmem:[%s8868_s3 + $0x68] sm:$0xf0]  ;;  %v6233_v63 = vld [vmem:[%s6595_s27 + $0x18] sm:$0xff]  ;;  %v6234_v0 = vld [vmem:[%s6595_s27 + $0x20] sm:$0xff] }
  0x1b   : > { %920 = vmatpush.bf16.msra.mxu1 %v5755_v23  ;;  %v5835_v60 = vor.u32 %v6290_v57, %v5832_v58  ;;  %v5896_v61 = vld [vmem:[%s8868_s3 + $0xe8] sm:$0xf0]  ;;  %v5838_v1 = vld [vmem:[%s8868_s3 + $0x70] sm:$0xf]  ;;  %v6293_v2 = vld [vmem:[%s8868_s3 + $0x74] sm:$0xf0] }
  0x1c   : > { %v5899_v62 = vor.u32 %v6306_v59, %v5896_v61  ;;  %v5902_v3 = vld [vmem:[%s8868_s3 + $0xf0] sm:$0xf]  ;;  %v5839_v4 = vor.u32 %v6293_v2, %v5838_v1  ;;  %v6309_v5 = vld [vmem:[%s8868_s3 + $0xf4] sm:$0xf0]  ;;  %v6235_v7 = vld [vmem:[%s6595_s27 + $0x28] sm:$0xff] }
  0x1d   : > { %v5903_v6 = vor.u32 %v6309_v5, %v5902_v3  ;;  %v5830_v8 = vld [vmem:[%s8868_s3 + $0x60] sm:$0xf]  ;;  %v6291_v9 = vld [vmem:[%s8868_s3 + $0x64] sm:$0xf0]  ;;  %v5822_v13 = vld [vmem:[%s8868_s3 + $0x50] sm:$0xf] }
  0x1e   : > { %752 = vmatpush.bf16.msra.mxu0 %v5743_v28  ;;  %1604 = vmatpush.bf16.msra.mxu2 %v5839_v4  ;;  %v5894_v10 = vld [vmem:[%s8868_s3 + $0xe0] sm:$0xf]  ;;  %v5831_v11 = vor.u32 %v6291_v9, %v5830_v8  ;;  %v6307_v12 = vld [vmem:[%s8868_s3 + $0xe4] sm:$0xf0]  ;;  %v6289_v14 = vld [vmem:[%s8868_s3 + $0x54] sm:$0xf0] }
  0x1f   : > { %921 = vmatpush.bf16.msra.mxu1 %v5747_v29  ;;  %1773 = vmatpush.bf16.msra.mxu3 %v5903_v6  ;;  %v5895_v15 = vor.u32 %v6307_v12, %v5894_v10  ;;  %v5886_v16 = vld [vmem:[%s8868_s3 + $0xd0] sm:$0xf]  ;;  %v6305_v17 = vld [vmem:[%s8868_s3 + $0xd4] sm:$0xf0]  ;;  %v5823_v18 = vor.u32 %v6289_v14, %v5822_v13  ;;  %v5814_v20 = vld [vmem:[%s8868_s3 + $0x40] sm:$0xf] }
  0x20   : > { %v5887_v19 = vor.u32 %v6305_v17, %v5886_v16  ;;  %v6287_v21 = vld [vmem:[%s8868_s3 + $0x44] sm:$0xf0]  ;;  %v5878_v22 = vld [vmem:[%s8868_s3 + $0xc0] sm:$0xf]  ;;  %v6236_v26 = vld [vmem:[%s6595_s27 + $0x30] sm:$0xff] }
  0x21   : > { %v6303_v23 = vld [vmem:[%s8868_s3 + $0xc4] sm:$0xf0]  ;;  %v5815_v24 = vor.u32 %v6287_v21, %v5814_v20  ;;  %v5806_v27 = vld [vmem:[%s8868_s3 + $0x30] sm:$0xf]  ;;  %v6285_v28 = vld [vmem:[%s8868_s3 + $0x34] sm:$0xf0] }
  0x22   : > { %753 = vmatpush.bf16.msra.mxu0 %v5735_v34  ;;  %1605 = vmatpush.bf16.msra.mxu2 %v5831_v11  ;;  %v5879_v25 = vor.u32 %v6303_v23, %v5878_v22  ;;  %v5807_v29 = vor.u32 %v6285_v28, %v5806_v27  ;;  %v5870_v30 = vld [vmem:[%s8868_s3 + $0xb0] sm:$0xf]  ;;  %v6301_v31 = vld [vmem:[%s8868_s3 + $0xb4] sm:$0xf0]  ;;  %v5798_v33 = vld [vmem:[%s8868_s3 + $0x20] sm:$0xf] }
  0x23   : > { %922 = vmatpush.bf16.msra.mxu1 %v5739_v35  ;;  %1774 = vmatpush.bf16.msra.mxu3 %v5895_v15  ;;  %v5871_v32 = vor.u32 %v6301_v31, %v5870_v30  ;;  %v6283_v34 = vld [vmem:[%s8868_s3 + $0x24] sm:$0xf0]  ;;  %v5862_v35 = vld [vmem:[%s8868_s3 + $0xa0] sm:$0xf]  ;;  %v6288_v38 = vld [vmem:[%s8868_s3 + $0x54] sm:$0xf] }
  0x24   : > { %v5799_v36 = vor.u32 %v6283_v34, %v5798_v33  ;;  %v6299_v37 = vld [vmem:[%s8868_s3 + $0xa4] sm:$0xf0]  ;;  %v5824_v39 = vld [vmem:[%s8868_s3 + $0x58] sm:$0xf0]  ;;  %v5790_v45 = vld [vmem:[%s8868_s3 + $0x10] sm:$0xf] }
  0x25   : > { %v5863_v41 = vor.u32 %v6299_v37, %v5862_v35  ;;  %v5888_v43 = vld [vmem:[%s8868_s3 + $0xd8] sm:$0xf0]  ;;  %v6281_v46 = vld [vmem:[%s8868_s3 + $0x14] sm:$0xf0]  ;;  %v5854_v47 = vld [vmem:[%s8868_s3 + $0x90] sm:$0xf] }
  0x26   : > { %754 = vmatpush.bf16.msra.mxu0 %v5727_v40  ;;  %1606 = vmatpush.bf16.msra.mxu2 %v5823_v18  ;;  %v6304_v40 = vld [vmem:[%s8868_s3 + $0xd4] sm:$0xf]  ;;  %v5791_v48 = vor.u32 %v6281_v46, %v5790_v45  ;;  %v6297_v49 = vld [vmem:[%s8868_s3 + $0x94] sm:$0xf0]  ;;  %v5966_v58 = vld [vmem:[%s8870_s5 + $0x70] sm:$0xf] }
  0x27   : > { %923 = vmatpush.bf16.msra.mxu1 %v5731_v42  ;;  %1775 = vmatpush.bf16.msra.mxu3 %v5887_v19  ;;  %v5827_v42 = vor.u32 %v6288_v38, %v5824_v39  ;;  %v5891_v44 = vor.u32 %v6304_v40, %v5888_v43  ;;  %v6237_v57 = vld [vmem:[%s6595_s27 + $0x38] sm:$0xff]  ;;  %v6238_v1 = vld [vmem:[%s6595_s27 + $0x40] sm:$0xff]  ;;  %v6239_v21 = vld [vmem:[%s6595_s27 + $0x48] sm:$0xff] }
  0x28   : > { %v6325_v59 = vld [vmem:[%s8870_s5 + $0x74] sm:$0xf0]  ;;  %v6240_v40 = vld [vmem:[%s6595_s27 + $0x50] sm:$0xff]  ;;  %v6286_v46 = vld [vmem:[%s8868_s3 + $0x44] sm:$0xf] }
  0x29   : > { %v5967_v61 = vor.u32 %v6325_v59, %v5966_v58 }
  0x2a   : > { %755 = vmatpush.bf16.msra.mxu0 %v5719_v50  ;;  %1607 = vmatpush.bf16.msra.mxu2 %v5815_v24  ;;  %v5855_v50 = vor.u32 %v6297_v49, %v5854_v47  ;;  %v5816_v47 = vld [vmem:[%s8868_s3 + $0x48] sm:$0xf0] }
  0x2b   : > { %924 = vmatpush.bf16.msra.mxu1 %v5723_v51  ;;  %1776 = vmatpush.bf16.msra.mxu3 %v5879_v25  ;;  %v5782_v51 = vld [vmem:[%s8868_s3] sm:$0xf]  ;;  %v5819_v49 = vor.u32 %v6286_v46, %v5816_v47 }
  0x2d   : > { %756 = vmatmul.bf16.vlgmr.msra.gmra.mxu0 %v6230_v54 }
  0x2e   : > { %1942 = vmatpush.bf16.msrb.mxu0 %v5843_v52  ;;  %925 = vmatmul.bf16.vlgmr.msra.gmra.mxu1 %v6230_v54  ;;  %v6279_v52 = vld [vmem:[%s8868_s3 + $0x4] sm:$0xf0] }
  0x2f   : > { %2111 = vmatpush.bf16.msrb.mxu1 %v5907_v53  ;;  %1608 = vmatpush.bf16.msra.mxu2 %v5807_v29  ;;  %v5846_v53 = vld [vmem:[%s8868_s3 + $0x80] sm:$0xf]  ;;  %v5783_v54 = vor.u32 %v6279_v52, %v5782_v51 }
  0x30   : > { %1777 = vmatpush.bf16.msra.mxu3 %v5871_v32 }
  0x32   : > { %1943 = vmatpush.bf16.msrb.mxu0 %v5835_v60  ;;  %v6030_v60 = vld [vmem:[%s8870_s5 + $0xf0] sm:$0xf] }
  0x33   : > { %2112 = vmatpush.bf16.msrb.mxu1 %v5899_v62  ;;  %1609 = vmatpush.bf16.msra.mxu2 %v5799_v36  ;;  %v6341_v62 = vld [vmem:[%s8870_s5 + $0xf4] sm:$0xf0] }
  0x34   : > { %1778 = vmatpush.bf16.msra.mxu3 %v5863_v41 }
  0x36   : > { %1944 = vmatpush.bf16.msrb.mxu0 %v5827_v42 }
  0x37   : > { %2113 = vmatpush.bf16.msrb.mxu1 %v5891_v44  ;;  %1610 = vmatpush.bf16.msra.mxu2 %v5791_v48  ;;  %v6302_v48 = vld [vmem:[%s8868_s3 + $0xc4] sm:$0xf] }
  0x38   : > { %1779 = vmatpush.bf16.msra.mxu3 %v5855_v50  ;;  %v5880_v50 = vld [vmem:[%s8868_s3 + $0xc8] sm:$0xf0] }
  0x39   : > { %v5883_v52 = vor.u32 %v6302_v48, %v5880_v50 }
  0x3a   : > { %1945 = vmatpush.bf16.msrb.mxu0 %v5819_v49 }
  0x3b   : > { %1611 = vmatpush.bf16.msra.mxu2 %v5783_v54  ;;  %2114 = vmatpush.bf16.msrb.mxu1 %v5883_v52 }
  0x3d   : > { %761 = vmatmul.bf16.gmra.mxu0 %v6231_v55 }
  0x3e   : > { %930 = vmatmul.bf16.gmra.mxu1 %v6231_v55  ;;  %v6295_v55 = vld [vmem:[%s8868_s3 + $0x84] sm:$0xf0] }
  0x3f   : > { %2798 = vmatpush.bf16.msrb.mxu2 %v5967_v61 }
  0x4d   : > { %766 = vmatmul.bf16.gmra.mxu0 %v6232_v56 }
  0x4e   : > { %935 = vmatmul.bf16.gmra.mxu1 %v6232_v56  ;;  %v5847_v56 = vor.u32 %v6295_v55, %v5846_v53 }
  0x50   : > { %1780 = vmatpush.bf16.msra.mxu3 %v5847_v56 }
  0x5d   : > { %771 = vmatmul.bf16.gmra.mxu0 %v6233_v63 }
  0x5e   : > { %940 = vmatmul.bf16.gmra.mxu1 %v6233_v63  ;;  %v6031_v63 = vor.u32 %v6341_v62, %v6030_v60 }
  0x60   : > { %2967 = vmatpush.bf16.msrb.mxu3 %v6031_v63 }
  0x6d   : > { %776 = vmatmul.bf16.gmra.mxu0 %v6234_v0 }
  0x6e   : > { %945 = vmatmul.bf16.gmra.mxu1 %v6234_v0  ;;  %v470_v0 = vld [vmem:[%s8867_s2] sm:$0x3] }
  0x6f   : > { %v6741_v3 = vperm.slane %v470_v0, 0  ;;  %v6743_v5 = vperm.slane %v470_v0, 1 }
  0x7d   : > { %781 = vmatmul.bf16.gmra.mxu0 %v6235_v7 }
  0x7e   : > { %950 = vmatmul.bf16.gmra.mxu1 %v6235_v7 }
  0x8d   : > { %786 = vmatmul.bf16.gmra.mxu0 %v6236_v26 }
  0x8e   : > { %955 = vmatmul.bf16.gmra.mxu1 %v6236_v26 }
  0x9d   : > { %791 = vmatmul.bf16.gmra.mxu0 %v6237_v57 }
  0x9e   : > { %960 = vmatmul.bf16.gmra.mxu1 %v6237_v57 }
  0xaa   : > { %v757_v2 = vpop.f32.mrf.mxu0 }
  0xab   : > { %v926_v4 = vpop.f32.mrf.mxu1  ;;  %v758_v6 = vadd.f32 %v757_v2, %v6741_v3 }
  0xac   : > { %v927_v7 = vadd.f32 %v926_v4, %v6743_v5 }
  0xad   : > { %796 = vmatmul.bf16.gmra.mxu0 %v6238_v1  ;;  %v1086_v9 = vmul.f32 0.2, %v758_v6 }
  0xae   : > { %965 = vmatmul.bf16.gmra.mxu1 %v6238_v1  ;;  %v1087_v12 = vmul.f32 0.2, %v927_v7  ;;  %v6241_v1 = vld [vmem:[%s6595_s27 + $0x58] sm:$0xff] }
  0xaf   : > { %v1214_v16 = vmax.f32 %v758_v6, %v1086_v9  ;;  %v5958_v9 = vld [vmem:[%s8870_s5 + $0x60] sm:$0xf] }
  0xb0   : > { %v1215_v18 = vmax.f32 %v927_v7, %v1087_v12 }
  0xb2   : > { %v759_v8 = vpop.f32.mrf.mxu0 }
  0xb3   : > { %v760_v10 = vadd.f32 %v759_v8, %v6741_v3  ;;  %v928_v11 = vpop.f32.mrf.mxu1 }
  0xb4   : > { %v929_v13 = vadd.f32 %v928_v11, %v6743_v5  ;;  %v6022_v11 = vld [vmem:[%s8870_s5 + $0xe0] sm:$0xf] }
  0xb5   : > { %v1088_v14 = vmul.f32 0.2, %v760_v10 }
  0xb6   : > { %v1089_v15 = vmul.f32 0.2, %v929_v13 }
  0xb7   : > { %v1216_v17 = vmax.f32 %v760_v10, %v1088_v14  ;;  %v6323_v10 = vld [vmem:[%s8870_s5 + $0x64] sm:$0xf0] }
  0xb8   : > { %v1217_v19 = vmax.f32 %v929_v13, %v1089_v15  ;;  %v5959_v12 = vor.u32 %v6323_v10, %v5958_v9  ;;  %v6339_v13 = vld [vmem:[%s8870_s5 + $0xe4] sm:$0xf0]  ;;  %v6244_v10 = vld [vmem:[%s6595_s27 + $0x70] sm:$0xff] }
  0xb9   : > { %v6749_v20 = vpack.c.bf16 %v1216_v17, %v1214_v16  ;;  %v6023_v15 = vor.u32 %v6339_v13, %v6022_v11 }
  0xba   : > { %v762_v22 = vpop.f32.mrf.mxu0  ;;  %v6752_v23 = vpack.c.bf16 %v1217_v19, %v1215_v18  ;;  %2799 = vmatpush.bf16.msrb.mxu2 %v5959_v12 }
  0xbb   : > { %v931_v24 = vpop.f32.mrf.mxu1  ;;  %1612 = vmatmul.bf16.vlgmr.msra.gmra.mxu2 %v6749_v20  ;;  %v763_v25 = vadd.f32 %v762_v22, %v6741_v3  ;;  %2968 = vmatpush.bf16.msrb.mxu3 %v6023_v15 }
  0xbc   : > { %1781 = vmatmul.bf16.vlgmr.msra.gmra.mxu3 %v6752_v23  ;;  %v932_v26 = vadd.f32 %v931_v24, %v6743_v5 }
  0xbd   : > { %801 = vmatmul.bf16.gmra.mxu0 %v6239_v21  ;;  %v1090_v28 = vmul.f32 0.2, %v763_v25 }
  0xbe   : > { %970 = vmatmul.bf16.gmra.mxu1 %v6239_v21  ;;  %v1091_v31 = vmul.f32 0.2, %v932_v26 }
  0xbf   : > { %v1218_v35 = vmax.f32 %v763_v25, %v1090_v28 }
  0xc0   : > { %v1219_v37 = vmax.f32 %v932_v26, %v1091_v31 }
  0xc2   : > { %v764_v27 = vpop.f32.mrf.mxu0 }
  0xc3   : > { %v765_v29 = vadd.f32 %v764_v27, %v6741_v3  ;;  %v933_v30 = vpop.f32.mrf.mxu1 }
  0xc4   : > { %v934_v32 = vadd.f32 %v933_v30, %v6743_v5  ;;  %v6242_v30 = vld [vmem:[%s6595_s27 + $0x60] sm:$0xff] }
  0xc5   : > { %v1092_v33 = vmul.f32 0.2, %v765_v29 }
  0xc6   : > { %v1093_v34 = vmul.f32 0.2, %v934_v32 }
  0xc7   : > { %v1220_v36 = vmax.f32 %v765_v29, %v1092_v33 }
  0xc8   : > { %v1221_v38 = vmax.f32 %v934_v32, %v1093_v34 }
  0xc9   : > { %v6760_v39 = vpack.c.bf16 %v1220_v36, %v1218_v35 }
  0xca   : > { %v767_v41 = vpop.f32.mrf.mxu0  ;;  %v6763_v42 = vpack.c.bf16 %v1221_v38, %v1219_v37 }
  0xcb   : > { %v936_v43 = vpop.f32.mrf.mxu1  ;;  %1617 = vmatmul.bf16.gmra.mxu2 %v6760_v39  ;;  %v768_v44 = vadd.f32 %v767_v41, %v6741_v3 }
  0xcc   : > { %1786 = vmatmul.bf16.gmra.mxu3 %v6763_v42  ;;  %v937_v45 = vadd.f32 %v936_v43, %v6743_v5 }
  0xcd   : > { %806 = vmatmul.bf16.gmra.mxu0 %v6240_v40  ;;  %v1094_v53 = vmul.f32 0.2, %v768_v44 }
  0xce   : > { %975 = vmatmul.bf16.gmra.mxu1 %v6240_v40  ;;  %v1095_v56 = vmul.f32 0.2, %v937_v45 }
  0xcf   : > { %v1222_v60 = vmax.f32 %v768_v44, %v1094_v53 }
  0xd0   : > { %v1223_v62 = vmax.f32 %v937_v45, %v1095_v56 }
  0xd2   : > { %v769_v51 = vpop.f32.mrf.mxu0 }
  0xd3   : > { %v770_v54 = vadd.f32 %v769_v51, %v6741_v3  ;;  %v938_v55 = vpop.f32.mrf.mxu1  ;;  %v6243_v51 = vld [vmem:[%s6595_s27 + $0x68] sm:$0xff] }
  0xd4   : > { %v939_v57 = vadd.f32 %v938_v55, %v6743_v5 }
  0xd5   : > { %v1096_v58 = vmul.f32 0.2, %v770_v54 }
  0xd6   : > { %v1097_v59 = vmul.f32 0.2, %v939_v57 }
  0xd7   : > { %v1224_v61 = vmax.f32 %v770_v54, %v1096_v58 }
  0xd8   : > { %v1225_v63 = vmax.f32 %v939_v57, %v1097_v59 }
  0xd9   : > { %v6783_v0 = vpack.c.bf16 %v1224_v61, %v1222_v60 }
  0xda   : > { %v772_v2 = vpop.f32.mrf.mxu0  ;;  %v6786_v4 = vpack.c.bf16 %v1225_v63, %v1223_v62 }
  0xdb   : > { %v941_v6 = vpop.f32.mrf.mxu1  ;;  %1622 = vmatmul.bf16.gmra.mxu2 %v6783_v0  ;;  %v773_v7 = vadd.f32 %v772_v2, %v6741_v3 }
  0xdc   : > { %1791 = vmatmul.bf16.gmra.mxu3 %v6786_v4  ;;  %v942_v8 = vadd.f32 %v941_v6, %v6743_v5 }
  0xdd   : > { %811 = vmatmul.bf16.gmra.mxu0 %v6241_v1  ;;  %v1098_v16 = vmul.f32 0.2, %v773_v7 }
  0xde   : > { %980 = vmatmul.bf16.gmra.mxu1 %v6241_v1  ;;  %v1099_v19 = vmul.f32 0.2, %v942_v8 }
  0xdf   : > { %v1226_v25 = vmax.f32 %v773_v7, %v1098_v16  ;;  %v6284_v16 = vld [vmem:[%s8868_s3 + $0x34] sm:$0xf] }
  0xe0   : > { %v1227_v27 = vmax.f32 %v942_v8, %v1099_v19 }
  0xe2   : > { %v774_v14 = vpop.f32.mrf.mxu0 }
  0xe3   : > { %v775_v17 = vadd.f32 %v774_v14, %v6741_v3  ;;  %v943_v18 = vpop.f32.mrf.mxu1 }
  0xe4   : > { %v944_v21 = vadd.f32 %v943_v18, %v6743_v5  ;;  %v6300_v18 = vld [vmem:[%s8868_s3 + $0xb4] sm:$0xf] }
  0xe5   : > { %v1100_v22 = vmul.f32 0.2, %v775_v17 }
  0xe6   : > { %v1101_v24 = vmul.f32 0.2, %v944_v21 }
  0xe7   : > { %v1228_v26 = vmax.f32 %v775_v17, %v1100_v22  ;;  %v5808_v17 = vld [vmem:[%s8868_s3 + $0x38] sm:$0xf0] }
  0xe8   : > { %v1229_v28 = vmax.f32 %v944_v21, %v1101_v24  ;;  %v5811_v19 = vor.u32 %v6284_v16, %v5808_v17  ;;  %v5872_v21 = vld [vmem:[%s8868_s3 + $0xb8] sm:$0xf0] }
  0xe9   : > { %v6806_v29 = vpack.c.bf16 %v1228_v26, %v1226_v25  ;;  %v5875_v24 = vor.u32 %v6300_v18, %v5872_v21 }
  0xea   : > { %v777_v31 = vpop.f32.mrf.mxu0  ;;  %v6809_v32 = vpack.c.bf16 %v1229_v28, %v1227_v27  ;;  %1946 = vmatpush.bf16.msrb.mxu0 %v5811_v19 }
  0xeb   : > { %v946_v33 = vpop.f32.mrf.mxu1  ;;  %1627 = vmatmul.bf16.gmra.mxu2 %v6806_v29  ;;  %v778_v34 = vadd.f32 %v777_v31, %v6741_v3  ;;  %2115 = vmatpush.bf16.msrb.mxu1 %v5875_v24 }
  0xec   : > { %1796 = vmatmul.bf16.gmra.mxu3 %v6809_v32  ;;  %v947_v35 = vadd.f32 %v946_v33, %v6743_v5 }
  0xed   : > { %816 = vmatmul.bf16.gmra.mxu0 %v6242_v30  ;;  %v1102_v37 = vmul.f32 0.2, %v778_v34 }
  0xee   : > { %985 = vmatmul.bf16.gmra.mxu1 %v6242_v30  ;;  %v1103_v41 = vmul.f32 0.2, %v947_v35 }
  0xef   : > { %v1230_v46 = vmax.f32 %v778_v34, %v1102_v37 }
  0xf0   : > { %v1231_v48 = vmax.f32 %v947_v35, %v1103_v41 }
  0xf2   : > { %v779_v36 = vpop.f32.mrf.mxu0 }
  0xf3   : > { %v780_v38 = vadd.f32 %v779_v36, %v6741_v3  ;;  %v948_v40 = vpop.f32.mrf.mxu1 }
  0xf4   : > { %v949_v43 = vadd.f32 %v948_v40, %v6743_v5  ;;  %v6245_v40 = vld [vmem:[%s6595_s27 + $0x78] sm:$0xff] }
  0xf5   : > { %v1104_v44 = vmul.f32 0.2, %v780_v38 }
  0xf6   : > { %v1105_v45 = vmul.f32 0.2, %v949_v43 }
  0xf7   : > { %v1232_v47 = vmax.f32 %v780_v38, %v1104_v44 }
  0xf8   : > { %v1233_v49 = vmax.f32 %v949_v43, %v1105_v45 }
  0xf9   : > { %v6817_v50 = vpack.c.bf16 %v1232_v47, %v1230_v46  ;;  %v5950_v47 = vld [vmem:[%s8870_s5 + $0x50] sm:$0xf] }
  0xfa   : > { %v782_v52 = vpop.f32.mrf.mxu0  ;;  %v6820_v53 = vpack.c.bf16 %v1233_v49, %v1231_v48  ;;  %v6321_v48 = vld [vmem:[%s8870_s5 + $0x54] sm:$0xf0]  ;;  %v6014_v49 = vld [vmem:[%s8870_s5 + $0xd0] sm:$0xf] }
  0xfb   : > { %v951_v54 = vpop.f32.mrf.mxu1  ;;  %1632 = vmatmul.bf16.gmra.mxu2 %v6817_v50  ;;  %v783_v55 = vadd.f32 %v782_v52, %v6741_v3  ;;  %v6337_v52 = vld [vmem:[%s8870_s5 + $0xd4] sm:$0xf0] }
  0xfc   : > { %1801 = vmatmul.bf16.gmra.mxu3 %v6820_v53  ;;  %v952_v56 = vadd.f32 %v951_v54, %v6743_v5 }
  0xfd   : > { %821 = vmatmul.bf16.gmra.mxu0 %v6243_v51  ;;  %v1106_v58 = vmul.f32 0.2, %v783_v55 }
  0xfe   : > { %990 = vmatmul.bf16.gmra.mxu1 %v6243_v51  ;;  %v1107_v61 = vmul.f32 0.2, %v952_v56  ;;  %v5951_v51 = vor.u32 %v6321_v48, %v5950_v47 }
  0xff   : > { %v1234_v2 = vmax.f32 %v783_v55, %v1106_v58  ;;  %v6015_v55 = vor.u32 %v6337_v52, %v6014_v49 }
 0x100   : > { %v1235_v7 = vmax.f32 %v952_v56, %v1107_v61  ;;  %2800 = vmatpush.bf16.msrb.mxu2 %v5951_v51 }
 0x101   : > { %2969 = vmatpush.bf16.msrb.mxu3 %v6015_v55 }
 0x102   : > { %v784_v57 = vpop.f32.mrf.mxu0 }
 0x103   : > { %v785_v59 = vadd.f32 %v784_v57, %v6741_v3  ;;  %v953_v60 = vpop.f32.mrf.mxu1 }
 0x104   : > { %v954_v62 = vadd.f32 %v953_v60, %v6743_v5 }
 0x105   : > { %v1108_v63 = vmul.f32 0.2, %v785_v59 }
 0x106   : > { %v1109_v1 = vmul.f32 0.2, %v954_v62 }
 0x107   : > { %v1236_v6 = vmax.f32 %v785_v59, %v1108_v63 }
 0x108   : > { %v1237_v8 = vmax.f32 %v954_v62, %v1109_v1 }
 0x109   : > { %v6828_v9 = vpack.c.bf16 %v1236_v6, %v1234_v2 }
 0x10a   : > { %v787_v11 = vpop.f32.mrf.mxu0  ;;  %v6831_v12 = vpack.c.bf16 %v1237_v8, %v1235_v7  ;;  %v6246_v8 = vld [vmem:[%s6595_s27 + $0x80] sm:$0xff] }
 0x10b   : > { %v956_v13 = vpop.f32.mrf.mxu1  ;;  %1637 = vmatmul.bf16.gmra.mxu2 %v6828_v9  ;;  %v788_v14 = vadd.f32 %v787_v11, %v6741_v3 }
 0x10c   : > { %1806 = vmatmul.bf16.gmra.mxu3 %v6831_v12  ;;  %v957_v15 = vadd.f32 %v956_v13, %v6743_v5 }
 0x10d   : > { %826 = vmatmul.bf16.gmra.mxu0 %v6244_v10  ;;  %v1110_v25 = vmul.f32 0.2, %v788_v14 }
 0x10e   : > { %995 = vmatmul.bf16.gmra.mxu1 %v6244_v10  ;;  %v1111_v28 = vmul.f32 0.2, %v957_v15 }
 0x10f   : > { %v1238_v34 = vmax.f32 %v788_v14, %v1110_v25 }
 0x110   : > { %v1239_v36 = vmax.f32 %v957_v15, %v1111_v28 }
 0x112   : > { %v789_v22 = vpop.f32.mrf.mxu0 }
 0x113   : > { %v790_v26 = vadd.f32 %v789_v22, %v6741_v3  ;;  %v958_v27 = vpop.f32.mrf.mxu1 }
 0x114   : > { %v959_v30 = vadd.f32 %v958_v27, %v6743_v5 }
 0x115   : > { %v1112_v31 = vmul.f32 0.2, %v790_v26 }
 0x116   : > { %v1113_v33 = vmul.f32 0.2, %v959_v30 }
 0x117   : > { %v1240_v35 = vmax.f32 %v790_v26, %v1112_v31  ;;  %v1438_v31 = vld [vmem:[%s8869_s4] sm:$0x3] }
 0x118   : > { %v1241_v37 = vmax.f32 %v959_v30, %v1113_v33 }
 0x119   : > { %v6851_v38 = vpack.c.bf16 %v1240_v35, %v1238_v34  ;;  %v6247_v34 = vld [vmem:[%s6595_s27 + $0x88] sm:$0xff] }
 0x11a   : > { %v792_v41 = vpop.f32.mrf.mxu0  ;;  %v6854_v43 = vpack.c.bf16 %v1241_v37, %v1239_v36 }
 0x11b   : > { %v961_v44 = vpop.f32.mrf.mxu1  ;;  %1642 = vmatmul.bf16.gmra.mxu2 %v6851_v38  ;;  %v793_v45 = vadd.f32 %v792_v41, %v6741_v3 }
 0x11c   : > { %1811 = vmatmul.bf16.gmra.mxu3 %v6854_v43  ;;  %v962_v46 = vadd.f32 %v961_v44, %v6743_v5 }
 0x11d   : > { %831 = vmatmul.bf16.gmra.mxu0 %v6245_v40  ;;  %v1114_v56 = vmul.f32 0.2, %v793_v45 }
 0x11e   : > { %1000 = vmatmul.bf16.gmra.mxu1 %v6245_v40  ;;  %v1115_v59 = vmul.f32 0.2, %v962_v46  ;;  %v6894_v40 = vperm.slane %v1438_v31, 0 }
 0x11f   : > { %v1242_v63 = vmax.f32 %v793_v45, %v1114_v56 }
 0x120   : > { %v1243_v2 = vmax.f32 %v962_v46, %v1115_v59 }
 0x122   : > { %v794_v54 = vpop.f32.mrf.mxu0 }
 0x123   : > { %v795_v57 = vadd.f32 %v794_v54, %v6741_v3  ;;  %v963_v58 = vpop.f32.mrf.mxu1 }
 0x124   : > { %v964_v60 = vadd.f32 %v963_v58, %v6743_v5 }
 0x125   : > { %v1116_v61 = vmul.f32 0.2, %v795_v57 }
 0x126   : > { %v1117_v62 = vmul.f32 0.2, %v964_v60 }
 0x127   : > { %v1244_v1 = vmax.f32 %v795_v57, %v1116_v61 }
 0x128   : > { %v1245_v6 = vmax.f32 %v964_v60, %v1117_v62 }
 0x129   : > { %v6874_v7 = vpack.c.bf16 %v1244_v1, %v1242_v63 }
 0x12a   : > { %v797_v10 = vpop.f32.mrf.mxu0  ;;  %v6877_v11 = vpack.c.bf16 %v1245_v6, %v1243_v2 }
 0x12b   : > { %v966_v13 = vpop.f32.mrf.mxu1  ;;  %1647 = vmatmul.bf16.gmra.mxu2 %v6874_v7  ;;  %v798_v14 = vadd.f32 %v797_v10, %v6741_v3 }
 0x12c   : > { %1816 = vmatmul.bf16.gmra.mxu3 %v6877_v11  ;;  %v967_v15 = vadd.f32 %v966_v13, %v6743_v5  ;;  %v6248_v13 = vld [vmem:[%s6595_s27 + $0x90] sm:$0xff] }
 0x12d   : > { %836 = vmatmul.bf16.gmra.mxu0 %v6246_v8  ;;  %v1118_v17 = vmul.f32 0.2, %v798_v14 }
 0x12e   : > { %1005 = vmatmul.bf16.gmra.mxu1 %v6246_v8  ;;  %v1119_v21 = vmul.f32 0.2, %v967_v15 }
 0x12f   : > { %v1246_v26 = vmax.f32 %v798_v14, %v1118_v17 }
 0x130   : > { %v1247_v28 = vmax.f32 %v967_v15, %v1119_v21 }
 0x132   : > { %v799_v16 = vpop.f32.mrf.mxu0 }
 0x133   : > { %v800_v18 = vadd.f32 %v799_v16, %v6741_v3  ;;  %v968_v19 = vpop.f32.mrf.mxu1 }
 0x134   : > { %v969_v22 = vadd.f32 %v968_v19, %v6743_v5 }
 0x135   : > { %v1120_v24 = vmul.f32 0.2, %v800_v18 }
 0x136   : > { %v1121_v25 = vmul.f32 0.2, %v969_v22 }
 0x137   : > { %v1248_v27 = vmax.f32 %v800_v18, %v1120_v24 }
 0x138   : > { %v1249_v30 = vmax.f32 %v969_v22, %v1121_v25 }
 0x139   : > { %v6888_v33 = vpack.c.bf16 %v1248_v27, %v1246_v26 }
 0x13a   : > { %v802_v35 = vpop.f32.mrf.mxu0  ;;  %v6891_v36 = vpack.c.bf16 %v1249_v30, %v1247_v28  ;;  %v6282_v28 = vld [vmem:[%s8868_s3 + $0x24] sm:$0xf]  ;;  %v5800_v30 = vld [vmem:[%s8868_s3 + $0x28] sm:$0xf0] }
 0x13b   : > { %v971_v37 = vpop.f32.mrf.mxu1  ;;  %1652 = vmatmul.bf16.gmra.mxu2 %v6888_v33  ;;  %v803_v44 = vadd.f32 %v802_v35, %v6741_v3 }
 0x13c   : > { %1821 = vmatmul.bf16.gmra.mxu3 %v6891_v36  ;;  %v972_v47 = vadd.f32 %v971_v37, %v6743_v5 }
 0x13d   : > { %841 = vmatmul.bf16.gmra.mxu0 %v6247_v34  ;;  %v1122_v51 = vmul.f32 0.2, %v803_v44 }
 0x13e   : > { %1010 = vmatmul.bf16.gmra.mxu1 %v6247_v34  ;;  %v1613_v41 = vpop.f32.mrf.mxu2  ;;  %v1123_v55 = vmul.f32 0.2, %v972_v47  ;;  %v5803_v34 = vor.u32 %v6282_v28, %v5800_v30  ;;  %v6006_v28 = vld [vmem:[%s8870_s5 + $0xc0] sm:$0xf] }
 0x13f   : > { %v1614_v45 = vadd.f32 %v1613_v41, %v6894_v40  ;;  %v1782_v46 = vpop.f32.mrf.mxu3  ;;  %v1250_v60 = vmax.f32 %v803_v44, %v1122_v51 }
 0x140   : > { %v1251_v1 = vmax.f32 %v972_v47, %v1123_v55  ;;  %1947 = vmatpush.bf16.msrb.mxu0 %v5803_v34  ;;  %v6335_v34 = vld [vmem:[%s8870_s5 + $0xc4] sm:$0xf0] }
 0x141   : > { %v1783_v48 = vadd.f32 %v1782_v46, %v1614_v45 }
 0x142   : > { %v804_v49 = vpop.f32.mrf.mxu0 }
 0x143   : > { %v805_v52 = vadd.f32 %v804_v49, %v6741_v3  ;;  %v973_v54 = vpop.f32.mrf.mxu1  ;;  %v2280_v6 = vmul.f32 0.2, %v1783_v48  ;;  %v5864_v49 = vld [vmem:[%s8868_s3 + $0xa8] sm:$0xf0] }
 0x144   : > { %v974_v56 = vadd.f32 %v973_v54, %v6743_v5 }
 0x145   : > { %v1124_v57 = vmul.f32 0.2, %v805_v52  ;;  %v2408_v18 = vmax.f32 %v1783_v48, %v2280_v6  ;;  %v6298_v48 = vld [vmem:[%s8868_s3 + $0xa4] sm:$0xf] }
 0x146   : > { %v1125_v58 = vmul.f32 0.2, %v974_v56  ;;  %v1615_v59 = vpop.f32.mrf.mxu2  ;;  %v5867_v54 = vor.u32 %v6298_v48, %v5864_v49 }
 0x147   : > { %v1616_v61 = vadd.f32 %v1615_v59, %v6894_v40  ;;  %v1784_v62 = vpop.f32.mrf.mxu3  ;;  %v1252_v63 = vmax.f32 %v805_v52, %v1124_v57 }
 0x148   : > { %v1253_v2 = vmax.f32 %v974_v56, %v1125_v58  ;;  %2116 = vmatpush.bf16.msrb.mxu1 %v5867_v54 }
 0x149   : > { %v1785_v8 = vadd.f32 %v1784_v62, %v1616_v61  ;;  %v6903_v10 = vpack.c.bf16 %v1252_v63, %v1250_v60 }
 0x14a   : > { %v807_v14 = vpop.f32.mrf.mxu0  ;;  %v6906_v15 = vpack.c.bf16 %v1253_v2, %v1251_v1  ;;  %v6249_v1 = vld [vmem:[%s6595_s27 + $0x98] sm:$0xff] }
 0x14b   : > { %v2282_v16 = vmul.f32 0.2, %v1785_v8  ;;  %v976_v17 = vpop.f32.mrf.mxu1  ;;  %1657 = vmatmul.bf16.gmra.mxu2 %v6903_v10  ;;  %v808_v24 = vadd.f32 %v807_v14, %v6741_v3 }
 0x14c   : > { %1826 = vmatmul.bf16.gmra.mxu3 %v6906_v15  ;;  %v977_v27 = vadd.f32 %v976_v17, %v6743_v5 }
 0x14d   : > { %v2410_v19 = vmax.f32 %v1785_v8, %v2282_v16  ;;  %846 = vmatmul.bf16.gmra.mxu0 %v6248_v13  ;;  %v1126_v37 = vmul.f32 0.2, %v808_v24 }
 0x14e   : > { %1015 = vmatmul.bf16.gmra.mxu1 %v6248_v13  ;;  %v1618_v21 = vpop.f32.mrf.mxu2  ;;  %v1127_v45 = vmul.f32 0.2, %v977_v27 }
 0x14f   : > { %v6910_v22 = vpack.c.bf16 %v2410_v19, %v2408_v18  ;;  %v1619_v25 = vadd.f32 %v1618_v21, %v6894_v40  ;;  %v1787_v26 = vpop.f32.mrf.mxu3  ;;  %v1254_v55 = vmax.f32 %v808_v24, %v1126_v37  ;;  %v6007_v37 = vor.u32 %v6335_v34, %v6006_v28 }
 0x150   : > { %v1255_v59 = vmax.f32 %v977_v27, %v1127_v45  ;;  %v6319_v27 = vld [vmem:[%s8870_s5 + $0x44] sm:$0xf0] }
 0x151   : > { %v1788_v31 = vadd.f32 %v1787_v26, %v1619_v25  ;;  %v5942_v26 = vld [vmem:[%s8870_s5 + $0x40] sm:$0xf]  ;;  %2970 = vmatpush.bf16.msrb.mxu3 %v6007_v37 }
 0x152   : > { %v809_v35 = vpop.f32.mrf.mxu0 }
 0x153   : > { %v810_v41 = vadd.f32 %v809_v35, %v6741_v3  ;;  %v978_v44 = vpop.f32.mrf.mxu1  ;;  %v2284_v61 = vmul.f32 0.2, %v1788_v31 }
 0x154   : > { %v979_v46 = vadd.f32 %v978_v44, %v6743_v5 }
 0x155   : > { %v1128_v47 = vmul.f32 0.2, %v810_v41  ;;  %v2412_v14 = vmax.f32 %v1788_v31, %v2284_v61  ;;  %v5943_v31 = vor.u32 %v6319_v27, %v5942_v26 }
 0x156   : > { %v1129_v51 = vmul.f32 0.2, %v979_v46  ;;  %v1620_v52 = vpop.f32.mrf.mxu2 }
 0x157   : > { %v1621_v56 = vadd.f32 %v1620_v52, %v6894_v40  ;;  %v1789_v57 = vpop.f32.mrf.mxu3  ;;  %v1256_v58 = vmax.f32 %v810_v41, %v1128_v47  ;;  %2801 = vmatpush.bf16.msrb.mxu2 %v5943_v31 }
 0x158   : > { %v1257_v60 = vmax.f32 %v979_v46, %v1129_v51 }
 0x159   : > { %v1790_v62 = vadd.f32 %v1789_v57, %v1621_v56  ;;  %v6930_v63 = vpack.c.bf16 %v1256_v58, %v1254_v55 }
 0x15a   : > { %v812_v2 = vpop.f32.mrf.mxu0  ;;  %v6933_v6 = vpack.c.bf16 %v1257_v60, %v1255_v59 }
 0x15b   : > { %v2286_v8 = vmul.f32 0.2, %v1790_v62  ;;  %v981_v13 = vpop.f32.mrf.mxu1  ;;  %1662 = vmatmul.bf16.gmra.mxu2 %v6930_v63  ;;  %v813_v18 = vadd.f32 %v812_v2, %v6741_v3 }
 0x15c   : > { %1831 = vmatmul.bf16.gmra.mxu3 %v6933_v6  ;;  %v982_v25 = vadd.f32 %v981_v13, %v6743_v5 }
 0x15d   : > { %v2414_v16 = vmax.f32 %v1790_v62, %v2286_v8  ;;  %851 = vmatmul.bf16.gmra.mxu0 %v6249_v1  ;;  %v1130_v41 = vmul.f32 0.2, %v813_v18  ;;  %v6250_v62 = vld [vmem:[%s6595_s27 + $0xa0] sm:$0xff] }
 0x15e   : > { %1020 = vmatmul.bf16.gmra.mxu1 %v6249_v1  ;;  %v1623_v17 = vpop.f32.mrf.mxu2  ;;  %v1131_v46 = vmul.f32 0.2, %v982_v25 }
 0x15f   : > { %v1624_v19 = vadd.f32 %v1623_v17, %v6894_v40  ;;  %v1792_v21 = vpop.f32.mrf.mxu3  ;;  %v6939_v24 = vpack.c.bf16 %v2414_v16, %v2412_v14  ;;  %v1258_v52 = vmax.f32 %v813_v18, %v1130_v41 }
 0x160   : > { %v1259_v57 = vmax.f32 %v982_v25, %v1131_v46 }
 0x161   : > { %v1793_v30 = vadd.f32 %v1792_v21, %v1624_v19 }
 0x162   : > { %v814_v35 = vpop.f32.mrf.mxu0 }
 0x163   : > { %v815_v44 = vadd.f32 %v814_v35, %v6741_v3  ;;  %v983_v45 = vpop.f32.mrf.mxu1  ;;  %v2288_v59 = vmul.f32 0.2, %v1793_v30 }
 0x164   : > { %v984_v47 = vadd.f32 %v983_v45, %v6743_v5 }
 0x165   : > { %v1132_v48 = vmul.f32 0.2, %v815_v44  ;;  %v2416_v14 = vmax.f32 %v1793_v30, %v2288_v59 }
 0x166   : > { %v1133_v49 = vmul.f32 0.2, %v984_v47  ;;  %v1625_v51 = vpop.f32.mrf.mxu2 }
 0x167   : > { %v1626_v54 = vadd.f32 %v1625_v51, %v6894_v40  ;;  %v1794_v55 = vpop.f32.mrf.mxu3  ;;  %v1260_v56 = vmax.f32 %v815_v44, %v1132_v48 }
 0x168   : > { %v1261_v58 = vmax.f32 %v984_v47, %v1133_v49 }
 0x169   : > { %v1795_v60 = vadd.f32 %v1794_v55, %v1626_v54  ;;  %v6957_v61 = vpack.c.bf16 %v1260_v56, %v1258_v52 }
 0x16a   : > { %v817_v1 = vpop.f32.mrf.mxu0  ;;  %v6960_v2 = vpack.c.bf16 %v1261_v58, %v1259_v57  ;;  %v6251_v57 = vld [vmem:[%s6595_s27 + $0xa8] sm:$0xff] }
 0x16b   : > { %v2290_v8 = vmul.f32 0.2, %v1795_v60  ;;  %v986_v13 = vpop.f32.mrf.mxu1  ;;  %1667 = vmatmul.bf16.gmra.mxu2 %v6957_v61  ;;  %v818_v18 = vadd.f32 %v817_v1, %v6741_v3 }
 0x16c   : > { %1836 = vmatmul.bf16.gmra.mxu3 %v6960_v2  ;;  %v987_v26 = vadd.f32 %v986_v13, %v6743_v5 }
 0x16d   : > { %v2418_v16 = vmax.f32 %v1795_v60, %v2290_v8  ;;  %856 = vmatmul.bf16.gmra.mxu0 %v6250_v62  ;;  %v1134_v31 = vmul.f32 0.2, %v818_v18 }
 0x16e   : > { %1025 = vmatmul.bf16.gmra.mxu1 %v6250_v62  ;;  %v1628_v17 = vpop.f32.mrf.mxu2  ;;  %v1135_v35 = vmul.f32 0.2, %v987_v26 }
 0x16f   : > { %v1629_v19 = vadd.f32 %v1628_v17, %v6894_v40  ;;  %v1797_v21 = vpop.f32.mrf.mxu3  ;;  %v6966_v25 = vpack.c.bf16 %v2418_v16, %v2416_v14  ;;  %v1262_v46 = vmax.f32 %v818_v18, %v1134_v31 }
 0x170   : > { %v1263_v51 = vmax.f32 %v987_v26, %v1135_v35 }
 0x171   : > { %v1798_v27 = vadd.f32 %v1797_v21, %v1629_v19 }
 0x172   : > { %v819_v28 = vpop.f32.mrf.mxu0 }
 0x173   : > { %v820_v34 = vadd.f32 %v819_v28, %v6741_v3  ;;  %v988_v30 = vpop.f32.mrf.mxu1  ;;  %v2292_v54 = vmul.f32 0.2, %v1798_v27 }
 0x174   : > { %v989_v37 = vadd.f32 %v988_v30, %v6743_v5 }
 0x175   : > { %v1136_v41 = vmul.f32 0.2, %v820_v34  ;;  %v2420_v1 = vmax.f32 %v1798_v27, %v2292_v54 }
 0x176   : > { %v1137_v44 = vmul.f32 0.2, %v989_v37  ;;  %v1630_v45 = vpop.f32.mrf.mxu2 }
 0x177   : > { %v1264_v47 = vmax.f32 %v820_v34, %v1136_v41  ;;  %v1631_v48 = vadd.f32 %v1630_v45, %v6894_v40  ;;  %v1799_v49 = vpop.f32.mrf.mxu3 }
 0x178   : > { %v1265_v52 = vmax.f32 %v989_v37, %v1137_v44 }
 0x179   : > { %v1800_v55 = vadd.f32 %v1799_v49, %v1631_v48  ;;  %v6972_v56 = vpack.c.bf16 %v1264_v47, %v1262_v46 }
 0x17a   : > { %v822_v58 = vpop.f32.mrf.mxu0  ;;  %v6975_v59 = vpack.c.bf16 %v1265_v52, %v1263_v51 }
 0x17b   : > { %v2294_v60 = vmul.f32 0.2, %v1800_v55  ;;  %v991_v62 = vpop.f32.mrf.mxu1  ;;  %1672 = vmatmul.bf16.gmra.mxu2 %v6972_v56  ;;  %v823_v14 = vadd.f32 %v822_v58, %v6741_v3 }
 0x17c   : > { %1841 = vmatmul.bf16.gmra.mxu3 %v6975_v59  ;;  %v992_v19 = vadd.f32 %v991_v62, %v6743_v5 }
 0x17d   : > { %v2422_v8 = vmax.f32 %v1800_v55, %v2294_v60  ;;  %861 = vmatmul.bf16.gmra.mxu0 %v6251_v57  ;;  %v1138_v28 = vmul.f32 0.2, %v823_v14  ;;  %v6252_v55 = vld [vmem:[%s6595_s27 + $0xb0] sm:$0xff] }
 0x17e   : > { %1030 = vmatmul.bf16.gmra.mxu1 %v6251_v57  ;;  %v1633_v13 = vpop.f32.mrf.mxu2  ;;  %v1139_v34 = vmul.f32 0.2, %v992_v19 }
 0x17f   : > { %v1634_v16 = vadd.f32 %v1633_v13, %v6894_v40  ;;  %v1802_v17 = vpop.f32.mrf.mxu3  ;;  %v6981_v18 = vpack.c.bf16 %v2422_v8, %v2420_v1  ;;  %v1266_v44 = vmax.f32 %v823_v14, %v1138_v28  ;;  %v6280_v28 = vld [vmem:[%s8868_s3 + $0x14] sm:$0xf] }
 0x180   : > { %v1267_v48 = vmax.f32 %v992_v19, %v1139_v34 }
 0x181   : > { %v1803_v21 = vadd.f32 %v1802_v17, %v1634_v16 }
 0x182   : > { %v824_v26 = vpop.f32.mrf.mxu0 }
 0x183   : > { %v825_v31 = vadd.f32 %v824_v26, %v6741_v3  ;;  %v993_v27 = vpop.f32.mrf.mxu1  ;;  %v2296_v51 = vmul.f32 0.2, %v1803_v21 }
 0x184   : > { %v994_v30 = vadd.f32 %v993_v27, %v6743_v5 }
 0x185   : > { %v1140_v35 = vmul.f32 0.2, %v825_v31  ;;  %v2424_v1 = vmax.f32 %v1803_v21, %v2296_v51  ;;  %v5792_v21 = vld [vmem:[%s8868_s3 + $0x18] sm:$0xf0] }
 0x186   : > { %v1141_v37 = vmul.f32 0.2, %v994_v30  ;;  %v1635_v41 = vpop.f32.mrf.mxu2  ;;  %v5795_v27 = vor.u32 %v6280_v28, %v5792_v21 }
 0x187   : > { %v1268_v45 = vmax.f32 %v825_v31, %v1140_v35  ;;  %v1636_v46 = vadd.f32 %v1635_v41, %v6894_v40  ;;  %v1804_v47 = vpop.f32.mrf.mxu3 }
 0x188   : > { %v1269_v49 = vmax.f32 %v994_v30, %v1141_v37  ;;  %1948 = vmatpush.bf16.msrb.mxu0 %v5795_v27 }
 0x189   : > { %v1805_v52 = vadd.f32 %v1804_v47, %v1636_v46  ;;  %v6987_v54 = vpack.c.bf16 %v1268_v45, %v1266_v44  ;;  %v6296_v46 = vld [vmem:[%s8868_s3 + $0x94] sm:$0xf]  ;;  %v5856_v47 = vld [vmem:[%s8868_s3 + $0x98] sm:$0xf0] }
 0x18a   : > { %v827_v57 = vpop.f32.mrf.mxu0  ;;  %v6990_v58 = vpack.c.bf16 %v1269_v49, %v1267_v48  ;;  %v5859_v51 = vor.u32 %v6296_v46, %v5856_v47  ;;  %v5934_v46 = vld [vmem:[%s8870_s5 + $0x30] sm:$0xf] }
 0x18b   : > { %v2298_v60 = vmul.f32 0.2, %v1805_v52  ;;  %v996_v62 = vpop.f32.mrf.mxu1  ;;  %1677 = vmatmul.bf16.gmra.mxu2 %v6987_v54  ;;  %v828_v14 = vadd.f32 %v827_v57, %v6741_v3  ;;  %v5998_v47 = vld [vmem:[%s8870_s5 + $0xb0] sm:$0xf] }
 0x18c   : > { %1846 = vmatmul.bf16.gmra.mxu3 %v6990_v58  ;;  %v997_v26 = vadd.f32 %v996_v62, %v6743_v5  ;;  %2117 = vmatpush.bf16.msrb.mxu1 %v5859_v51  ;;  %v6333_v51 = vld [vmem:[%s8870_s5 + $0xb4] sm:$0xf0] }
 0x18d   : > { %v2426_v8 = vmax.f32 %v1805_v52, %v2298_v60  ;;  %866 = vmatmul.bf16.gmra.mxu0 %v6252_v55  ;;  %v1142_v30 = vmul.f32 0.2, %v828_v14 }
 0x18e   : > { %1035 = vmatmul.bf16.gmra.mxu1 %v6252_v55  ;;  %v1638_v13 = vpop.f32.mrf.mxu2  ;;  %v1143_v41 = vmul.f32 0.2, %v997_v26 }
 0x18f   : > { %v1639_v16 = vadd.f32 %v1638_v13, %v6894_v40  ;;  %v1807_v17 = vpop.f32.mrf.mxu3  ;;  %v6996_v19 = vpack.c.bf16 %v2426_v8, %v2424_v1  ;;  %v1270_v52 = vmax.f32 %v828_v14, %v1142_v30 }
 0x190   : > { %v1271_v62 = vmax.f32 %v997_v26, %v1143_v41 }
 0x191   : > { %v1808_v31 = vadd.f32 %v1807_v17, %v1639_v16  ;;  %v6253_v17 = vld [vmem:[%s6595_s27 + $0xb8] sm:$0xff] }
 0x192   : > { %v829_v34 = vpop.f32.mrf.mxu0 }
 0x193   : > { %v830_v35 = vadd.f32 %v829_v34, %v6741_v3  ;;  %v998_v37 = vpop.f32.mrf.mxu1  ;;  %v2300_v8 = vmul.f32 0.2, %v1808_v31 }
 0x194   : > { %v999_v44 = vadd.f32 %v998_v37, %v6743_v5 }
 0x195   : > { %v1144_v45 = vmul.f32 0.2, %v830_v35  ;;  %v2428_v14 = vmax.f32 %v1808_v31, %v2300_v8  ;;  %v6317_v31 = vld [vmem:[%s8870_s5 + $0x34] sm:$0xf0] }
 0x196   : > { %v1145_v48 = vmul.f32 0.2, %v999_v44  ;;  %v1640_v49 = vpop.f32.mrf.mxu2 }
 0x197   : > { %v1272_v55 = vmax.f32 %v830_v35, %v1144_v45  ;;  %v1641_v57 = vadd.f32 %v1640_v49, %v6894_v40  ;;  %v1809_v60 = vpop.f32.mrf.mxu3  ;;  %v5935_v49 = vor.u32 %v6317_v31, %v5934_v46 }
 0x198   : > { %v1273_v1 = vmax.f32 %v999_v44, %v1145_v48 }
 0x199   : > { %v1810_v13 = vadd.f32 %v1809_v60, %v1641_v57  ;;  %v7014_v16 = vpack.c.bf16 %v1272_v55, %v1270_v52  ;;  %v5999_v55 = vor.u32 %v6333_v51, %v5998_v47  ;;  %2802 = vmatpush.bf16.msrb.mxu2 %v5935_v49  ;;  %v6254_v47 = vld [vmem:[%s6595_s27 + $0xc0] sm:$0xff] }
 0x19a   : > { %v832_v28 = vpop.f32.mrf.mxu0  ;;  %v7017_v21 = vpack.c.bf16 %v1273_v1, %v1271_v62 }
 0x19b   : > { %8965 = vst [vmem:[#allocation2_spill] sm:$0xff] %v7014_v16  ;;  %v2302_v27 = vmul.f32 0.2, %v1810_v13  ;;  %v1001_v34 = vpop.f32.mrf.mxu1  ;;  %1682 = vmatmul.bf16.gmra.mxu2 %v7014_v16  ;;  %v833_v35 = vadd.f32 %v832_v28, %v6741_v3  ;;  %2971 = vmatpush.bf16.msrb.mxu3 %v5999_v55 }
 0x19c   : > { %8966 = vst [vmem:[#allocation3_spill] sm:$0xff] %v7017_v21  ;;  %1851 = vmatmul.bf16.gmra.mxu3 %v7017_v21  ;;  %v1002_v45 = vadd.f32 %v1001_v34, %v6743_v5 }
 0x19d   : > { %v2430_v30 = vmax.f32 %v1810_v13, %v2302_v27  ;;  %871 = vmatmul.bf16.gmra.mxu0 %v6253_v17  ;;  %v1146_v57 = vmul.f32 0.2, %v833_v35 }
 0x19e   : > { %1040 = vmatmul.bf16.gmra.mxu1 %v6253_v17  ;;  %v1643_v26 = vpop.f32.mrf.mxu2  ;;  %v1147_v1 = vmul.f32 0.2, %v1002_v45 }
 0x19f   : > { %v1644_v37 = vadd.f32 %v1643_v26, %v6894_v40  ;;  %v1812_v41 = vpop.f32.mrf.mxu3  ;;  %v7023_v44 = vpack.c.bf16 %v2430_v30, %v2428_v14  ;;  %v1274_v27 = vmax.f32 %v833_v35, %v1146_v57 }
 0x1a0   : > { %v1275_v26 = vmax.f32 %v1002_v45, %v1147_v1 }
 0x1a1   : > { %v1813_v48 = vadd.f32 %v1812_v41, %v1644_v37 }
 0x1a2   : > { %v834_v52 = vpop.f32.mrf.mxu0 }
 0x1a3   : > { %v835_v60 = vadd.f32 %v834_v52, %v6741_v3  ;;  %v1003_v62 = vpop.f32.mrf.mxu1  ;;  %v2304_v41 = vmul.f32 0.2, %v1813_v48 }
 0x1a4   : > { %v1004_v8 = vadd.f32 %v1003_v62, %v6743_v5 }
 0x1a5   : > { %v1148_v13 = vmul.f32 0.2, %v835_v60  ;;  %v2432_v35 = vmax.f32 %v1813_v48, %v2304_v41 }
 0x1a6   : > { %v1149_v17 = vmul.f32 0.2, %v1004_v8  ;;  %v1645_v28 = vpop.f32.mrf.mxu2 }
 0x1a7   : > { %v1276_v34 = vmax.f32 %v835_v60, %v1148_v13  ;;  %v1646_v14 = vadd.f32 %v1645_v28, %v6894_v40  ;;  %v1814_v30 = vpop.f32.mrf.mxu3 }
 0x1a8   : > { %v1277_v37 = vmax.f32 %v1004_v8, %v1149_v17 }
 0x1a9   : > { %v1815_v46 = vadd.f32 %v1814_v30, %v1646_v14  ;;  %v7041_v31 = vpack.c.bf16 %v1276_v34, %v1274_v27 }
 0x1aa   : > { %v837_v49 = vpop.f32.mrf.mxu0  ;;  %v7044_v51 = vpack.c.bf16 %v1277_v37, %v1275_v26 }
 0x1ab   : > { %8967 = vst [vmem:[#allocation4_spill] sm:$0xff] %v7041_v31  ;;  %v2306_v52 = vmul.f32 0.2, %v1815_v46  ;;  %v1006_v55 = vpop.f32.mrf.mxu1  ;;  %1687 = vmatmul.bf16.gmra.mxu2 %v7041_v31  ;;  %v838_v60 = vadd.f32 %v837_v49, %v6741_v3 }
 0x1ac   : > { %8968 = vst [vmem:[#allocation5_spill] sm:$0xff] %v7044_v51  ;;  %1856 = vmatmul.bf16.gmra.mxu3 %v7044_v51  ;;  %v1007_v13 = vadd.f32 %v1006_v55, %v6743_v5 }
 0x1ad   : > { %v2434_v57 = vmax.f32 %v1815_v46, %v2306_v52  ;;  %876 = vmatmul.bf16.gmra.mxu0 %v6254_v47  ;;  %v1150_v27 = vmul.f32 0.2, %v838_v60 }
 0x1ae   : > { %1045 = vmatmul.bf16.gmra.mxu1 %v6254_v47  ;;  %v1648_v45 = vpop.f32.mrf.mxu2  ;;  %v1151_v14 = vmul.f32 0.2, %v1007_v13 }
 0x1af   : > { %v1649_v62 = vadd.f32 %v1648_v45, %v6894_v40  ;;  %v1817_v1 = vpop.f32.mrf.mxu3  ;;  %v7050_v8 = vpack.c.bf16 %v2434_v57, %v2432_v35  ;;  %v1278_v46 = vmax.f32 %v838_v60, %v1150_v27 }
 0x1b0   : > { %v1279_v35 = vmax.f32 %v1007_v13, %v1151_v14 }
 0x1b1   : > { %8969 = vst [vmem:[#allocation6_spill] sm:$0xff] %v7050_v8  ;;  %v1818_v17 = vadd.f32 %v1817_v1, %v1649_v62  ;;  %v6255_v1 = vld [vmem:[%s6595_s27 + $0xc8] sm:$0xff] }
 0x1b2   : > { %v839_v28 = vpop.f32.mrf.mxu0 }
 0x1b3   : > { %v840_v34 = vadd.f32 %v839_v28, %v6741_v3  ;;  %v1008_v48 = vpop.f32.mrf.mxu1  ;;  %v2308_v57 = vmul.f32 0.2, %v1818_v17 }
 0x1b4   : > { %v1009_v30 = vadd.f32 %v1008_v48, %v6743_v5 }
 0x1b5   : > { %v1152_v26 = vmul.f32 0.2, %v840_v34  ;;  %v2436_v60 = vmax.f32 %v1818_v17, %v2308_v57 }
 0x1b6   : > { %v1153_v37 = vmul.f32 0.2, %v1009_v30  ;;  %v1650_v41 = vpop.f32.mrf.mxu2 }
 0x1b7   : > { %v1280_v47 = vmax.f32 %v840_v34, %v1152_v26  ;;  %v1651_v49 = vadd.f32 %v1650_v41, %v6894_v40  ;;  %v1819_v52 = vpop.f32.mrf.mxu3 }
 0x1b8   : > { %v1281_v55 = vmax.f32 %v1009_v30, %v1153_v37 }
 0x1b9   : > { %v1820_v45 = vadd.f32 %v1819_v52, %v1651_v49  ;;  %v7056_v62 = vpack.c.bf16 %v1280_v47, %v1278_v46 }
 0x1ba   : > { %v842_v28 = vpop.f32.mrf.mxu0  ;;  %v7059_v51 = vpack.c.bf16 %v1281_v55, %v1279_v35 }
 0x1bb   : > { %8970 = vst [vmem:[#allocation7_spill] sm:$0xff] %v7056_v62  ;;  %v2310_v31 = vmul.f32 0.2, %v1820_v45  ;;  %v1011_v48 = vpop.f32.mrf.mxu1  ;;  %1692 = vmatmul.bf16.gmra.mxu2 %v7056_v62  ;;  %v843_v34 = vadd.f32 %v842_v28, %v6741_v3 }
 0x1bc   : > { %8971 = vst [vmem:[#allocation8_spill] sm:$0xff] %v7059_v51  ;;  %1861 = vmatmul.bf16.gmra.mxu3 %v7059_v51  ;;  %v1012_v37 = vadd.f32 %v1011_v48, %v6743_v5 }
 0x1bd   : > { %v2438_v27 = vmax.f32 %v1820_v45, %v2310_v31  ;;  %881 = vmatmul.bf16.gmra.mxu0 %v6255_v1  ;;  %v1154_v47 = vmul.f32 0.2, %v843_v34 }
 0x1be   : > { %1050 = vmatmul.bf16.gmra.mxu1 %v6255_v1  ;;  %v1653_v13 = vpop.f32.mrf.mxu2  ;;  %v1155_v31 = vmul.f32 0.2, %v1012_v37 }
 0x1bf   : > { %v1654_v14 = vadd.f32 %v1653_v13, %v6894_v40  ;;  %v1822_v30 = vpop.f32.mrf.mxu3  ;;  %v7065_v26 = vpack.c.bf16 %v2438_v27, %v2436_v60  ;;  %v1282_v45 = vmax.f32 %v843_v34, %v1154_v47 }
 0x1c0   : > { %v1283_v27 = vmax.f32 %v1012_v37, %v1155_v31 }
 0x1c1   : > { %8972 = vst [vmem:[#allocation9_spill] sm:$0xff] %v7065_v26  ;;  %v1823_v41 = vadd.f32 %v1822_v30, %v1654_v14 }
 0x1c2   : > { %v844_v46 = vpop.f32.mrf.mxu0 }
 0x1c3   : > { %v845_v49 = vadd.f32 %v844_v46, %v6741_v3  ;;  %v1013_v17 = vpop.f32.mrf.mxu1  ;;  %v2312_v13 = vmul.f32 0.2, %v1823_v41  ;;  %v6256_v46 = vld [vmem:[%s6595_s27 + $0xd0] sm:$0xff] }
 0x1c4   : > { %v1014_v52 = vadd.f32 %v1013_v17, %v6743_v5 }
 0x1c5   : > { %v1156_v35 = vmul.f32 0.2, %v845_v49  ;;  %v2440_v34 = vmax.f32 %v1823_v41, %v2312_v13 }
 0x1c6   : > { %v1157_v55 = vmul.f32 0.2, %v1014_v52  ;;  %v1655_v57 = vpop.f32.mrf.mxu2 }
 0x1c7   : > { %v1284_v1 = vmax.f32 %v845_v49, %v1156_v35  ;;  %v1656_v28 = vadd.f32 %v1655_v57, %v6894_v40  ;;  %v1824_v60 = vpop.f32.mrf.mxu3  ;;  %v6278_v57 = vld [vmem:[%s8868_s3 + $0x4] sm:$0xf] }
 0x1c8   : > { %v1285_v48 = vmax.f32 %v1014_v52, %v1157_v55 }
 0x1c9   : > { %v1825_v14 = vadd.f32 %v1824_v60, %v1656_v28  ;;  %v7071_v30 = vpack.c.bf16 %v1284_v1, %v1282_v45 }
 0x1ca   : > { %v847_v51 = vpop.f32.mrf.mxu0  ;;  %v7074_v62 = vpack.c.bf16 %v1285_v48, %v1283_v27 }
 0x1cb   : > { %8973 = vst [vmem:[#allocation10_spill] sm:$0xff] %v7071_v30  ;;  %v2314_v26 = vmul.f32 0.2, %v1825_v14  ;;  %v1016_v17 = vpop.f32.mrf.mxu1  ;;  %1697 = vmatmul.bf16.gmra.mxu2 %v7071_v30  ;;  %v848_v49 = vadd.f32 %v847_v51, %v6741_v3  ;;  %v6257_v30 = vld [vmem:[%s6595_s27 + $0xd8] sm:$0xff] }
 0x1cc   : > { %8974 = vst [vmem:[#allocation11_spill] sm:$0xff] %v7074_v62  ;;  %1866 = vmatmul.bf16.gmra.mxu3 %v7074_v62  ;;  %v1017_v55 = vadd.f32 %v1016_v17, %v6743_v5 }
 0x1cd   : > { %v2442_v47 = vmax.f32 %v1825_v14, %v2314_v26  ;;  %886 = vmatmul.bf16.gmra.mxu0 %v6256_v46  ;;  %v5784_v26 = vld [vmem:[%s8868_s3 + $0x8] sm:$0xf0]  ;;  %v1158_v28 = vmul.f32 0.2, %v848_v49  ;;  %v6294_v14 = vld [vmem:[%s8868_s3 + $0x84] sm:$0xf] }
 0x1ce   : > { %1055 = vmatmul.bf16.gmra.mxu1 %v6256_v46  ;;  %v1658_v37 = vpop.f32.mrf.mxu2  ;;  %v5787_v45 = vor.u32 %v6278_v57, %v5784_v26  ;;  %v1159_v27 = vmul.f32 0.2, %v1017_v55  ;;  %v5848_v46 = vld [vmem:[%s8868_s3 + $0x88] sm:$0xf0] }
 0x1cf   : > { %v1659_v31 = vadd.f32 %v1658_v37, %v6894_v40  ;;  %v1827_v52 = vpop.f32.mrf.mxu3  ;;  %v7080_v35 = vpack.c.bf16 %v2442_v47, %v2440_v34  ;;  %v5851_v47 = vor.u32 %v6294_v14, %v5848_v46  ;;  %v1286_v37 = vmax.f32 %v848_v49, %v1158_v28  ;;  %v5926_v46 = vld [vmem:[%s8870_s5 + $0x20] sm:$0xf] }
 0x1d0   : > { %1949 = vmatpush.bf16.msrb.mxu0 %v5787_v45  ;;  %v1287_v26 = vmax.f32 %v1017_v55, %v1159_v27 }
 0x1d1   : > { %8975 = vst [vmem:[#allocation12_spill] sm:$0xff] %v7080_v35  ;;  %v1828_v41 = vadd.f32 %v1827_v52, %v1659_v31  ;;  %2118 = vmatpush.bf16.msrb.mxu1 %v5851_v47 }
 0x1d2   : > { %v849_v1 = vpop.f32.mrf.mxu0 }
 0x1d3   : > { %v850_v51 = vadd.f32 %v849_v1, %v6741_v3  ;;  %v1018_v60 = vpop.f32.mrf.mxu1  ;;  %v2316_v1 = vmul.f32 0.2, %v1828_v41 }
 0x1d4   : > { %v1019_v48 = vadd.f32 %v1018_v60, %v6743_v5 }
 0x1d5   : > { %v1160_v13 = vmul.f32 0.2, %v850_v51  ;;  %v2444_v49 = vmax.f32 %v1828_v41, %v2316_v1 }
 0x1d6   : > { %v1161_v17 = vmul.f32 0.2, %v1019_v48  ;;  %v1660_v34 = vpop.f32.mrf.mxu2 }
 0x1d7   : > { %v1288_v31 = vmax.f32 %v850_v51, %v1160_v13  ;;  %v1661_v52 = vadd.f32 %v1660_v34, %v6894_v40  ;;  %v1829_v57 = vpop.f32.mrf.mxu3 }
 0x1d8   : > { %v1289_v45 = vmax.f32 %v1019_v48, %v1161_v17  ;;  %v6331_v17 = vld [vmem:[%s8870_s5 + $0xa4] sm:$0xf0] }
 0x1d9   : > { %v1830_v60 = vadd.f32 %v1829_v57, %v1661_v52  ;;  %v7098_v62 = vpack.c.bf16 %v1288_v31, %v1286_v37 }
 0x1da   : > { %v852_v35 = vpop.f32.mrf.mxu0  ;;  %v7101_v8 = vpack.c.bf16 %v1289_v45, %v1287_v26 }
 0x1db   : > { %8976 = vst [vmem:[#allocation13_spill] sm:$0xff] %v7098_v62  ;;  %v2318_v21 = vmul.f32 0.2, %v1830_v60  ;;  %v1021_v16 = vpop.f32.mrf.mxu1  ;;  %1702 = vmatmul.bf16.gmra.mxu2 %v7098_v62  ;;  %v853_v51 = vadd.f32 %v852_v35, %v6741_v3 }
 0x1dc   : > { %8977 = vst [vmem:[#allocation14_spill] sm:$0xff] %v7101_v8  ;;  %1871 = vmatmul.bf16.gmra.mxu3 %v7101_v8  ;;  %v1022_v14 = vadd.f32 %v1021_v16, %v6743_v5 }
 0x1dd   : > { %v2446_v28 = vmax.f32 %v1830_v60, %v2318_v21  ;;  %891 = vmatmul.bf16.gmra.mxu0 %v6257_v30  ;;  %v6315_v21 = vld [vmem:[%s8870_s5 + $0x24] sm:$0xf0]  ;;  %v1162_v47 = vmul.f32 0.2, %v853_v51 }
 0x1de   : > { %1060 = vmatmul.bf16.gmra.mxu1 %v6257_v30  ;;  %v1663_v55 = vpop.f32.mrf.mxu2  ;;  %v5990_v30 = vld [vmem:[%s8870_s5 + $0xa0] sm:$0xf]  ;;  %v5927_v41 = vor.u32 %v6315_v21, %v5926_v46  ;;  %v1163_v52 = vmul.f32 0.2, %v1022_v14 }
 0x1df   : > { %v1664_v27 = vadd.f32 %v1663_v55, %v6894_v40  ;;  %v1832_v48 = vpop.f32.mrf.mxu3  ;;  %v7107_v13 = vpack.c.bf16 %v2446_v28, %v2444_v49  ;;  %v5991_v16 = vor.u32 %v6331_v17, %v5990_v30  ;;  %v1290_v60 = vmax.f32 %v853_v51, %v1162_v47 }
 0x1e0   : > { %2803 = vmatpush.bf16.msrb.mxu2 %v5927_v41  ;;  %v6258_v41 = vld [vmem:[%s6595_s27 + $0xe0] sm:$0xff] }
 0x1e1   : > { %8978 = vst [vmem:[#allocation15_spill] sm:$0xff] %v7107_v13  ;;  %v1833_v35 = vadd.f32 %v1832_v48, %v1664_v27  ;;  %2972 = vmatpush.bf16.msrb.mxu3 %v5991_v16  ;;  %v1291_v27 = vmax.f32 %v1022_v14, %v1163_v52 }
 0x1e2   : > { %v854_v34 = vpop.f32.mrf.mxu0 }
 0x1e3   : > { %v855_v37 = vadd.f32 %v854_v34, %v6741_v3  ;;  %v1023_v31 = vpop.f32.mrf.mxu1  ;;  %v2320_v46 = vmul.f32 0.2, %v1833_v35 }
 0x1e4   : > { %v1024_v57 = vadd.f32 %v1023_v31, %v6743_v5 }
 0x1e5   : > { %v1164_v26 = vmul.f32 0.2, %v855_v37  ;;  %v2448_v51 = vmax.f32 %v1833_v35, %v2320_v46 }
 0x1e6   : > { %v1165_v45 = vmul.f32 0.2, %v1024_v57  ;;  %v1665_v1 = vpop.f32.mrf.mxu2 }
 0x1e7   : > { %v1292_v49 = vmax.f32 %v855_v37, %v1164_v26  ;;  %v1666_v28 = vadd.f32 %v1665_v1, %v6894_v40  ;;  %v1834_v55 = vpop.f32.mrf.mxu3 }
 0x1e8   : > { %v1293_v48 = vmax.f32 %v1024_v57, %v1165_v45 }
 0x1e9   : > { %v1835_v21 = vadd.f32 %v1834_v55, %v1666_v28  ;;  %v7125_v30 = vpack.c.bf16 %v1292_v49, %v1290_v60 }
 0x1ea   : > { %v857_v17 = vpop.f32.mrf.mxu0  ;;  %v7128_v34 = vpack.c.bf16 %v1293_v48, %v1291_v27 }
 0x1eb   : > { %8979 = vst [vmem:[#allocation16_spill] sm:$0xff] %v7125_v30  ;;  %v2322_v31 = vmul.f32 0.2, %v1835_v21  ;;  %v1026_v16 = vpop.f32.mrf.mxu1  ;;  %1707 = vmatmul.bf16.gmra.mxu2 %v7125_v30  ;;  %v858_v37 = vadd.f32 %v857_v17, %v6741_v3 }
 0x1ec   : > { %8980 = vst [vmem:[#allocation17_spill] sm:$0xff] %v7128_v34  ;;  %1876 = vmatmul.bf16.gmra.mxu3 %v7128_v34  ;;  %v1027_v45 = vadd.f32 %v1026_v16, %v6743_v5 }
 0x1ed   : > { %v2450_v47 = vmax.f32 %v1835_v21, %v2322_v31  ;;  %896 = vmatmul.bf16.gmra.mxu0 %v6258_v41  ;;  %v1166_v49 = vmul.f32 0.2, %v858_v37 }
 0x1ee   : > { %1065 = vmatmul.bf16.gmra.mxu1 %v6258_v41  ;;  %v1668_v14 = vpop.f32.mrf.mxu2  ;;  %v1167_v55 = vmul.f32 0.2, %v1027_v45 }
 0x1ef   : > { %v1669_v52 = vadd.f32 %v1668_v14, %v6894_v40  ;;  %v1837_v57 = vpop.f32.mrf.mxu3  ;;  %v7134_v26 = vpack.c.bf16 %v2450_v47, %v2448_v51  ;;  %v1294_v41 = vmax.f32 %v858_v37, %v1166_v49 }
 0x1f0   : > { %v1295_v47 = vmax.f32 %v1027_v45, %v1167_v55 }
 0x1f1   : > { %8981 = vst [vmem:[#allocation18_spill] sm:$0xff] %v7134_v26  ;;  %v1838_v1 = vadd.f32 %v1837_v57, %v1669_v52 }
 0x1f2   : > { %v859_v60 = vpop.f32.mrf.mxu0 }
 0x1f3   : > { %v860_v28 = vadd.f32 %v859_v60, %v6741_v3  ;;  %v1028_v35 = vpop.f32.mrf.mxu1  ;;  %v2324_v14 = vmul.f32 0.2, %v1838_v1  ;;  %v6259_v60 = vld [vmem:[%s6595_s27 + $0xe8] sm:$0xff] }
 0x1f4   : > { %v1029_v27 = vadd.f32 %v1028_v35, %v6743_v5 }
 0x1f5   : > { %v1168_v48 = vmul.f32 0.2, %v860_v28  ;;  %v2452_v37 = vmax.f32 %v1838_v1, %v2324_v14 }
 0x1f6   : > { %v1169_v46 = vmul.f32 0.2, %v1029_v27  ;;  %v1670_v21 = vpop.f32.mrf.mxu2 }
 0x1f7   : > { %v1296_v17 = vmax.f32 %v860_v28, %v1168_v48  ;;  %v1671_v31 = vadd.f32 %v1670_v21, %v6894_v40  ;;  %v1839_v51 = vpop.f32.mrf.mxu3 }
 0x1f8   : > { %v1297_v16 = vmax.f32 %v1029_v27, %v1169_v46 }
 0x1f9   : > { %v1840_v52 = vadd.f32 %v1839_v51, %v1671_v31  ;;  %v7140_v57 = vpack.c.bf16 %v1296_v17, %v1294_v41 }
 0x1fa   : > { %v862_v34 = vpop.f32.mrf.mxu0  ;;  %v7143_v30 = vpack.c.bf16 %v1297_v16, %v1295_v47 }
 0x1fb   : > { %8982 = vst [vmem:[#allocation19_spill] sm:$0xff] %v7140_v57  ;;  %v2326_v26 = vmul.f32 0.2, %v1840_v52  ;;  %v1031_v35 = vpop.f32.mrf.mxu1  ;;  %1712 = vmatmul.bf16.gmra.mxu2 %v7140_v57  ;;  %v863_v28 = vadd.f32 %v862_v34, %v6741_v3 }
 0x1fc   : > { %8983 = vst [vmem:[#allocation20_spill] sm:$0xff] %v7143_v30  ;;  %1881 = vmatmul.bf16.gmra.mxu3 %v7143_v30  ;;  %v1032_v46 = vadd.f32 %v1031_v35, %v6743_v5 }
 0x1fd   : > { %v2454_v49 = vmax.f32 %v1840_v52, %v2326_v26  ;;  %901 = vmatmul.bf16.gmra.mxu0 %v6259_v60  ;;  %v1170_v17 = vmul.f32 0.2, %v863_v28 }
 0x1fe   : > { %1070 = vmatmul.bf16.gmra.mxu1 %v6259_v60  ;;  %v1673_v45 = vpop.f32.mrf.mxu2  ;;  %v1171_v26 = vmul.f32 0.2, %v1032_v46 }
 0x1ff   : > { %v1674_v55 = vadd.f32 %v1673_v45, %v6894_v40  ;;  %v1842_v27 = vpop.f32.mrf.mxu3  ;;  %v7149_v48 = vpack.c.bf16 %v2454_v49, %v2452_v37  ;;  %v1298_v14 = vmax.f32 %v863_v28, %v1170_v17 }
 0x200   : > { %v1299_v49 = vmax.f32 %v1032_v46, %v1171_v26 }
 0x201   : > { %8984 = vst [vmem:[#allocation21_spill] sm:$0xff] %v7149_v48  ;;  %v1843_v21 = vadd.f32 %v1842_v27, %v1674_v55 }
 0x202   : > { %v864_v41 = vpop.f32.mrf.mxu0 }
 0x203   : > { %v865_v31 = vadd.f32 %v864_v41, %v6741_v3  ;;  %v1033_v1 = vpop.f32.mrf.mxu1  ;;  %v2328_v45 = vmul.f32 0.2, %v1843_v21  ;;  %v6260_v41 = vld [vmem:[%s6595_s27 + $0xf0] sm:$0xff] }
 0x204   : > { %v1034_v51 = vadd.f32 %v1033_v1, %v6743_v5 }
 0x205   : > { %v1172_v47 = vmul.f32 0.2, %v865_v31  ;;  %v2456_v28 = vmax.f32 %v1843_v21, %v2328_v45 }
 0x206   : > { %v1173_v16 = vmul.f32 0.2, %v1034_v51  ;;  %v1675_v34 = vpop.f32.mrf.mxu2 }
 0x207   : > { %v1300_v52 = vmax.f32 %v865_v31, %v1172_v47  ;;  %v1676_v60 = vadd.f32 %v1675_v34, %v6894_v40  ;;  %v1844_v37 = vpop.f32.mrf.mxu3  ;;  %v6324_v34 = vld [vmem:[%s8870_s5 + $0x74] sm:$0xf] }
 0x208   : > { %v1301_v35 = vmax.f32 %v1034_v51, %v1173_v16 }
 0x209   : > { %v1845_v55 = vadd.f32 %v1844_v37, %v1676_v60  ;;  %v7155_v27 = vpack.c.bf16 %v1300_v52, %v1298_v14 }
 0x20a   : > { %v867_v30 = vpop.f32.mrf.mxu0  ;;  %v7158_v57 = vpack.c.bf16 %v1301_v35, %v1299_v49 }
 0x20b   : > { %8985 = vst [vmem:[#allocation22_spill] sm:$0xff] %v7155_v27  ;;  %v2330_v48 = vmul.f32 0.2, %v1845_v55  ;;  %v1036_v1 = vpop.f32.mrf.mxu1  ;;  %1717 = vmatmul.bf16.gmra.mxu2 %v7155_v27  ;;  %v868_v31 = vadd.f32 %v867_v30, %v6741_v3  ;;  %v6261_v27 = vld [vmem:[%s6595_s27 + $0xf8] sm:$0xff] }
 0x20c   : > { %8986 = vst [vmem:[#allocation23_spill] sm:$0xff] %v7158_v57  ;;  %1886 = vmatmul.bf16.gmra.mxu3 %v7158_v57  ;;  %v1037_v16 = vadd.f32 %v1036_v1, %v6743_v5 }
 0x20d   : > { %v2458_v17 = vmax.f32 %v1845_v55, %v2330_v48  ;;  %906 = vmatmul.bf16.gmra.mxu0 %v6260_v41  ;;  %v5968_v48 = vld [vmem:[%s8870_s5 + $0x78] sm:$0xf0]  ;;  %v1174_v60 = vmul.f32 0.2, %v868_v31  ;;  %v6340_v55 = vld [vmem:[%s8870_s5 + $0xf4] sm:$0xf] }
 0x20e   : > { %1075 = vmatmul.bf16.gmra.mxu1 %v6260_v41  ;;  %v1678_v46 = vpop.f32.mrf.mxu2  ;;  %v5971_v14 = vor.u32 %v6324_v34, %v5968_v48  ;;  %v1175_v49 = vmul.f32 0.2, %v1037_v16  ;;  %v6032_v41 = vld [vmem:[%s8870_s5 + $0xf8] sm:$0xf0] }
 0x20f   : > { %v1679_v26 = vadd.f32 %v1678_v46, %v6894_v40  ;;  %v1847_v51 = vpop.f32.mrf.mxu3  ;;  %v7164_v47 = vpack.c.bf16 %v2458_v17, %v2456_v28  ;;  %v6035_v17 = vor.u32 %v6340_v55, %v6032_v41  ;;  %v1302_v46 = vmax.f32 %v868_v31, %v1174_v60  ;;  %v5918_v41 = vld [vmem:[%s8870_s5 + $0x10] sm:$0xf] }
 0x210   : > { %3136 = vmatpush.bf16.msra.mxu0 %v5971_v14  ;;  %v1303_v48 = vmax.f32 %v1037_v16, %v1175_v49 }
 0x211   : > { %8987 = vst [vmem:[#allocation24_spill] sm:$0xff] %v7164_v47  ;;  %v1848_v21 = vadd.f32 %v1847_v51, %v1679_v26  ;;  %3305 = vmatpush.bf16.msra.mxu1 %v6035_v17 }
 0x212   : > { %v869_v52 = vpop.f32.mrf.mxu0 }
 0x213   : > { %v870_v30 = vadd.f32 %v869_v52, %v6741_v3  ;;  %v1038_v37 = vpop.f32.mrf.mxu1  ;;  %v2332_v52 = vmul.f32 0.2, %v1848_v21 }
 0x214   : > { %v1039_v35 = vadd.f32 %v1038_v37, %v6743_v5 }
 0x215   : > { %v1176_v45 = vmul.f32 0.2, %v870_v30  ;;  %v2460_v31 = vmax.f32 %v1848_v21, %v2332_v52 }
 0x216   : > { %v1177_v1 = vmul.f32 0.2, %v1039_v35  ;;  %v1680_v28 = vpop.f32.mrf.mxu2 }
 0x217   : > { %v1304_v26 = vmax.f32 %v870_v30, %v1176_v45  ;;  %v1681_v51 = vadd.f32 %v1680_v28, %v6894_v40  ;;  %v1849_v34 = vpop.f32.mrf.mxu3 }
 0x218   : > { %v1305_v14 = vmax.f32 %v1039_v35, %v1177_v1  ;;  %v6329_v1 = vld [vmem:[%s8870_s5 + $0x94] sm:$0xf0] }
 0x219   : > { %v1850_v37 = vadd.f32 %v1849_v34, %v1681_v51  ;;  %v7182_v57 = vpack.c.bf16 %v1304_v26, %v1302_v46 }
 0x21a   : > { %v872_v47 = vpop.f32.mrf.mxu0  ;;  %v7185_v8 = vpack.c.bf16 %v1305_v14, %v1303_v48 }
 0x21b   : > { %v2334_v62 = vmul.f32 0.2, %v1850_v37  ;;  %v1041_v13 = vpop.f32.mrf.mxu1  ;;  %1722 = vmatmul.bf16.gmra.mxu2 %v7182_v57  ;;  %v873_v30 = vadd.f32 %v872_v47, %v6741_v3 }
 0x21c   : > { %1891 = vmatmul.bf16.gmra.mxu3 %v7185_v8  ;;  %v1042_v55 = vadd.f32 %v1041_v13, %v6743_v5 }
 0x21d   : > { %v2462_v60 = vmax.f32 %v1850_v37, %v2334_v62  ;;  %911 = vmatmul.bf16.gmra.mxu0 %v6261_v27  ;;  %v6313_v62 = vld [vmem:[%s8870_s5 + $0x14] sm:$0xf0]  ;;  %v1178_v17 = vmul.f32 0.2, %v873_v30 }
 0x21e   : > { %1080 = vmatmul.bf16.gmra.mxu1 %v6261_v27  ;;  %v1683_v16 = vpop.f32.mrf.mxu2  ;;  %v5982_v27 = vld [vmem:[%s8870_s5 + $0x90] sm:$0xf]  ;;  %v5919_v21 = vor.u32 %v6313_v62, %v5918_v41  ;;  %v1179_v51 = vmul.f32 0.2, %v1042_v55 }
 0x21f   : > { %v1684_v49 = vadd.f32 %v1683_v16, %v6894_v40  ;;  %v1852_v35 = vpop.f32.mrf.mxu3  ;;  %v7191_v45 = vpack.c.bf16 %v2462_v60, %v2460_v31  ;;  %v5983_v13 = vor.u32 %v6329_v1, %v5982_v27  ;;  %v1306_v37 = vmax.f32 %v873_v30, %v1178_v17 }
 0x220   : > { %2804 = vmatpush.bf16.msrb.mxu2 %v5919_v21 }
 0x221   : > { %v1853_v47 = vadd.f32 %v1852_v35, %v1684_v49  ;;  %2973 = vmatpush.bf16.msrb.mxu3 %v5983_v13  ;;  %v1307_v49 = vmax.f32 %v1042_v55, %v1179_v51 }
 0x222   : > { %v874_v28 = vpop.f32.mrf.mxu0 }
 0x223   : > { %v875_v46 = vadd.f32 %v874_v28, %v6741_v3  ;;  %v1043_v26 = vpop.f32.mrf.mxu1  ;;  %v2336_v41 = vmul.f32 0.2, %v1853_v47 }
 0x224   : > { %v1044_v34 = vadd.f32 %v1043_v26, %v6743_v5 }
 0x225   : > { %v1180_v48 = vmul.f32 0.2, %v875_v46  ;;  %v2464_v30 = vmax.f32 %v1853_v47, %v2336_v41 }
 0x226   : > { %v1181_v14 = vmul.f32 0.2, %v1044_v34  ;;  %v1685_v52 = vpop.f32.mrf.mxu2 }
 0x227   : > { %v1308_v31 = vmax.f32 %v875_v46, %v1180_v48  ;;  %v1686_v60 = vadd.f32 %v1685_v52, %v6894_v40  ;;  %v1854_v16 = vpop.f32.mrf.mxu3 }
 0x228   : > { %v1309_v35 = vmax.f32 %v1044_v34, %v1181_v14 }
 0x229   : > { %v1855_v62 = vadd.f32 %v1854_v16, %v1686_v60  ;;  %v7209_v27 = vpack.c.bf16 %v1308_v31, %v1306_v37 }
 0x22a   : > { %v877_v1 = vpop.f32.mrf.mxu0  ;;  %v7211_v21 = vpack.c.bf16 %v1309_v35, %v1307_v49 }
 0x22b   : > { %v2338_v28 = vmul.f32 0.2, %v1855_v62  ;;  %v1046_v26 = vpop.f32.mrf.mxu1  ;;  %1727 = vmatmul.bf16.gmra.mxu2 %v7209_v27  ;;  %v878_v17 = vadd.f32 %v877_v1, %v6741_v3 }
 0x22c   : > { %8988 = vst [vmem:[#allocation25_spill] sm:$0xff] %v7211_v21  ;;  %1896 = vmatmul.bf16.gmra.mxu3 %v7211_v21  ;;  %v1047_v48 = vadd.f32 %v1046_v26, %v6743_v5 }
 0x22d   : > { %v2466_v13 = vmax.f32 %v1855_v62, %v2338_v28  ;;  %1950 = vmatmul.bf16.vlgmr.msrb.gmra.mxu0 %v6749_v20  ;;  %v1182_v37 = vmul.f32 0.2, %v878_v17 }
 0x22e   : > { %2119 = vmatmul.bf16.vlgmr.msrb.gmra.mxu1 %v6752_v23  ;;  %v1688_v55 = vpop.f32.mrf.mxu2  ;;  %v1183_v60 = vmul.f32 0.2, %v1047_v48 }
 0x22f   : > { %v1689_v46 = vadd.f32 %v1688_v55, %v6894_v40  ;;  %v1857_v51 = vpop.f32.mrf.mxu3  ;;  %v7219_v34 = vpack.c.bf16 %v2466_v13, %v2464_v30  ;;  %v1310_v35 = vmax.f32 %v878_v17, %v1182_v37 }
 0x230   : > { %v1311_v28 = vmax.f32 %v1047_v48, %v1183_v60 }
 0x231   : > { %v1858_v14 = vadd.f32 %v1857_v51, %v1689_v46 }
 0x232   : > { %v879_v52 = vpop.f32.mrf.mxu0 }
 0x233   : > { %v880_v47 = vadd.f32 %v879_v52, %v6741_v3  ;;  %v1048_v31 = vpop.f32.mrf.mxu1  ;;  %v2340_v26 = vmul.f32 0.2, %v1858_v14 }
 0x234   : > { %v1049_v20 = vadd.f32 %v1048_v31, %v6743_v5 }
 0x235   : > { %v1184_v23 = vmul.f32 0.2, %v880_v47  ;;  %v2468_v17 = vmax.f32 %v1858_v14, %v2340_v26 }
 0x236   : > { %v1185_v16 = vmul.f32 0.2, %v1049_v20  ;;  %v1690_v49 = vpop.f32.mrf.mxu2 }
 0x237   : > { %v1312_v41 = vmax.f32 %v880_v47, %v1184_v23  ;;  %v1691_v62 = vadd.f32 %v1690_v49, %v6894_v40  ;;  %v1859_v1 = vpop.f32.mrf.mxu3 }
 0x238   : > { %v1313_v30 = vmax.f32 %v1049_v20, %v1185_v16 }
 0x239   : > { %v1860_v13 = vadd.f32 %v1859_v1, %v1691_v62  ;;  %v7225_v55 = vpack.c.bf16 %v1312_v41, %v1310_v35 }
 0x23a   : > { %v882_v46 = vpop.f32.mrf.mxu0  ;;  %v7227_v51 = vpack.c.bf16 %v1313_v30, %v1311_v28 }
 0x23b   : > { %v2342_v52 = vmul.f32 0.2, %v1860_v13  ;;  %v1051_v21 = vpop.f32.mrf.mxu1  ;;  %1732 = vmatmul.bf16.gmra.mxu2 %v7225_v55  ;;  %v883_v47 = vadd.f32 %v882_v46, %v6741_v3 }
 0x23c   : > { %8989 = vst [vmem:[#allocation26_spill] sm:$0xff] %v7227_v51  ;;  %1901 = vmatmul.bf16.gmra.mxu3 %v7227_v51  ;;  %v1052_v23 = vadd.f32 %v1051_v21, %v6743_v5 }
 0x23d   : > { %v2470_v37 = vmax.f32 %v1860_v13, %v2342_v52  ;;  %1955 = vmatmul.bf16.gmra.mxu0 %v6760_v39  ;;  %v1186_v35 = vmul.f32 0.2, %v883_v47 }
 0x23e   : > { %2124 = vmatmul.bf16.gmra.mxu1 %v6763_v42  ;;  %v1693_v48 = vpop.f32.mrf.mxu2  ;;  %v1187_v62 = vmul.f32 0.2, %v1052_v23 }
 0x23f   : > { %v1694_v31 = vadd.f32 %v1693_v48, %v6894_v40  ;;  %v1862_v60 = vpop.f32.mrf.mxu3  ;;  %v7235_v20 = vpack.c.bf16 %v2470_v37, %v2468_v17  ;;  %v1314_v30 = vmax.f32 %v883_v47, %v1186_v35 }
 0x240   : > { %v1315_v52 = vmax.f32 %v1052_v23, %v1187_v62 }
 0x241   : > { %v1863_v16 = vadd.f32 %v1862_v60, %v1694_v31 }
 0x242   : > { %v884_v49 = vpop.f32.mrf.mxu0 }
 0x243   : > { %v885_v14 = vadd.f32 %v884_v49, %v6741_v3  ;;  %v1053_v41 = vpop.f32.mrf.mxu1  ;;  %v2344_v21 = vmul.f32 0.2, %v1863_v16 }
 0x244   : > { %v1054_v39 = vadd.f32 %v1053_v41, %v6743_v5 }
 0x245   : > { %v1188_v42 = vmul.f32 0.2, %v885_v14  ;;  %v2472_v47 = vmax.f32 %v1863_v16, %v2344_v21  ;;  %v6024_v21 = vld [vmem:[%s8870_s5 + $0xe8] sm:$0xf0] }
 0x246   : > { %v1189_v1 = vmul.f32 0.2, %v1054_v39  ;;  %v1695_v28 = vpop.f32.mrf.mxu2 }
 0x247   : > { %v1316_v26 = vmax.f32 %v885_v14, %v1188_v42  ;;  %v1696_v13 = vadd.f32 %v1695_v28, %v6894_v40  ;;  %v1864_v46 = vpop.f32.mrf.mxu3 }
 0x248   : > { %v1317_v17 = vmax.f32 %v1054_v39, %v1189_v1  ;;  %v6322_v1 = vld [vmem:[%s8870_s5 + $0x64] sm:$0xf] }
 0x249   : > { %v1865_v37 = vadd.f32 %v1864_v46, %v1696_v13  ;;  %v7241_v48 = vpack.c.bf16 %v1316_v26, %v1314_v30 }
 0x24a   : > { %v887_v31 = vpop.f32.mrf.mxu0  ;;  %v7243_v60 = vpack.c.bf16 %v1317_v17, %v1315_v52  ;;  %v6338_v17 = vld [vmem:[%s8870_s5 + $0xe4] sm:$0xf] }
 0x24b   : > { %8990 = vst [vmem:[#allocation27_spill] sm:$0xff] %v7241_v48  ;;  %v2346_v49 = vmul.f32 0.2, %v1865_v37  ;;  %v1056_v51 = vpop.f32.mrf.mxu1  ;;  %1737 = vmatmul.bf16.gmra.mxu2 %v7241_v48  ;;  %v888_v14 = vadd.f32 %v887_v31, %v6741_v3 }
 0x24c   : > { %8991 = vst [vmem:[#allocation28_spill] sm:$0xff] %v7243_v60  ;;  %1906 = vmatmul.bf16.gmra.mxu3 %v7243_v60  ;;  %v1057_v42 = vadd.f32 %v1056_v51, %v6743_v5 }
 0x24d   : > { %v2474_v35 = vmax.f32 %v1865_v37, %v2346_v49  ;;  %1960 = vmatmul.bf16.gmra.mxu0 %v6783_v0  ;;  %v5960_v0 = vld [vmem:[%s8870_s5 + $0x68] sm:$0xf0]  ;;  %v1190_v30 = vmul.f32 0.2, %v888_v14  ;;  %v6027_v49 = vor.u32 %v6338_v17, %v6024_v21  ;;  %v5910_v21 = vld [vmem:[%s8870_s5] sm:$0xf] }
 0x24e   : > { %2129 = vmatmul.bf16.gmra.mxu1 %v6786_v4  ;;  %v1698_v23 = vpop.f32.mrf.mxu2  ;;  %v5963_v4 = vor.u32 %v6322_v1, %v5960_v0  ;;  %v1191_v46 = vmul.f32 0.2, %v1057_v42 }
 0x24f   : > { %v1699_v41 = vadd.f32 %v1698_v23, %v6894_v40  ;;  %v1867_v62 = vpop.f32.mrf.mxu3  ;;  %v7251_v39 = vpack.c.bf16 %v2474_v35, %v2472_v47  ;;  %v1318_v47 = vmax.f32 %v888_v14, %v1190_v30  ;;  %3306 = vmatpush.bf16.msra.mxu1 %v6027_v49 }
 0x250   : > { %3137 = vmatpush.bf16.msra.mxu0 %v5963_v4 }
 0x251   : > { %8992 = vst [vmem:[#allocation29_spill] sm:$0xff] %v7251_v39  ;;  %v1868_v16 = vadd.f32 %v1867_v62, %v1699_v41  ;;  %v1319_v62 = vmax.f32 %v1057_v42, %v1191_v46 }
 0x252   : > { %v889_v28 = vpop.f32.mrf.mxu0 }
 0x253   : > { %v890_v26 = vadd.f32 %v889_v28, %v6741_v3  ;;  %v1058_v13 = vpop.f32.mrf.mxu1  ;;  %v2348_v0 = vmul.f32 0.2, %v1868_v16 }
 0x254   : > { %v1059_v52 = vadd.f32 %v1058_v13, %v6743_v5 }
 0x255   : > { %v1192_v51 = vmul.f32 0.2, %v890_v26  ;;  %v2476_v14 = vmax.f32 %v1868_v16, %v2348_v0 }
 0x256   : > { %v1193_v37 = vmul.f32 0.2, %v1059_v52  ;;  %v1700_v31 = vpop.f32.mrf.mxu2 }
 0x257   : > { %v1320_v35 = vmax.f32 %v890_v26, %v1192_v51  ;;  %v1701_v23 = vadd.f32 %v1700_v31, %v6894_v40  ;;  %v1869_v41 = vpop.f32.mrf.mxu3 }
 0x258   : > { %v1321_v1 = vmax.f32 %v1059_v52, %v1193_v37  ;;  %v6327_v37 = vld [vmem:[%s8870_s5 + $0x84] sm:$0xf0] }
 0x259   : > { %v1870_v4 = vadd.f32 %v1869_v41, %v1701_v23  ;;  %v7269_v28 = vpack.c.bf16 %v1320_v35, %v1318_v47 }
 0x25a   : > { %v892_v13 = vpop.f32.mrf.mxu0  ;;  %v7271_v60 = vpack.c.bf16 %v1321_v1, %v1319_v62 }
 0x25b   : > { %v2350_v48 = vmul.f32 0.2, %v1870_v4  ;;  %v1061_v39 = vpop.f32.mrf.mxu1  ;;  %1742 = vmatmul.bf16.gmra.mxu2 %v7269_v28  ;;  %v893_v26 = vadd.f32 %v892_v13, %v6741_v3 }
 0x25c   : > { %1911 = vmatmul.bf16.gmra.mxu3 %v7271_v60  ;;  %v1062_v17 = vadd.f32 %v1061_v39, %v6743_v5 }
 0x25d   : > { %v2478_v30 = vmax.f32 %v1870_v4, %v2350_v48  ;;  %1965 = vmatmul.bf16.gmra.mxu0 %v6806_v29  ;;  %v6311_v29 = vld [vmem:[%s8870_s5 + $0x4] sm:$0xf0]  ;;  %v1194_v49 = vmul.f32 0.2, %v893_v26 }
 0x25e   : > { %2134 = vmatmul.bf16.gmra.mxu1 %v6809_v32  ;;  %v1703_v42 = vpop.f32.mrf.mxu2  ;;  %v5974_v32 = vld [vmem:[%s8870_s5 + $0x80] sm:$0xf]  ;;  %v5911_v16 = vor.u32 %v6311_v29, %v5910_v21  ;;  %v1195_v23 = vmul.f32 0.2, %v1062_v17 }
 0x25f   : > { %v1704_v46 = vadd.f32 %v1703_v42, %v6894_v40  ;;  %v1872_v52 = vpop.f32.mrf.mxu3  ;;  %v7279_v51 = vpack.c.bf16 %v2478_v30, %v2476_v14  ;;  %v5975_v39 = vor.u32 %v6327_v37, %v5974_v32  ;;  %v1322_v4 = vmax.f32 %v893_v26, %v1194_v49 }
 0x260   : > { %2805 = vmatpush.bf16.msrb.mxu2 %v5911_v16  ;;  %v1323_v42 = vmax.f32 %v1062_v17, %v1195_v23 }
 0x261   : > { %v1873_v48 = vadd.f32 %v1872_v52, %v1704_v46  ;;  %2974 = vmatpush.bf16.msrb.mxu3 %v5975_v39 }
 0x262   : > { %v894_v31 = vpop.f32.mrf.mxu0 }
 0x263   : > { %v895_v47 = vadd.f32 %v894_v31, %v6741_v3  ;;  %v1063_v35 = vpop.f32.mrf.mxu1  ;;  %v2352_v52 = vmul.f32 0.2, %v1873_v48 }
 0x264   : > { %v1064_v41 = vadd.f32 %v1063_v35, %v6743_v5 }
 0x265   : > { %v1196_v62 = vmul.f32 0.2, %v895_v47  ;;  %v2480_v26 = vmax.f32 %v1873_v48, %v2352_v52 }
 0x266   : > { %v1197_v1 = vmul.f32 0.2, %v1064_v41  ;;  %v1705_v0 = vpop.f32.mrf.mxu2 }
 0x267   : > { %v1324_v13 = vmax.f32 %v895_v47, %v1196_v62  ;;  %v1706_v14 = vadd.f32 %v1705_v0, %v6894_v40  ;;  %v1874_v30 = vpop.f32.mrf.mxu3 }
 0x268   : > { %v1325_v46 = vmax.f32 %v1064_v41, %v1197_v1 }
 0x269   : > { %v1875_v21 = vadd.f32 %v1874_v30, %v1706_v14  ;;  %v7297_v29 = vpack.c.bf16 %v1324_v13, %v1322_v4 }
 0x26a   : > { %v897_v32 = vpop.f32.mrf.mxu0  ;;  %v7299_v16 = vpack.c.bf16 %v1325_v46, %v1323_v42 }
 0x26b   : > { %v2354_v37 = vmul.f32 0.2, %v1875_v21  ;;  %v1066_v31 = vpop.f32.mrf.mxu1  ;;  %1747 = vmatmul.bf16.gmra.mxu2 %v7297_v29  ;;  %v898_v49 = vadd.f32 %v897_v32, %v6741_v3 }
 0x26c   : > { %1916 = vmatmul.bf16.gmra.mxu3 %v7299_v16  ;;  %v1067_v41 = vadd.f32 %v1066_v31, %v6743_v5 }
 0x26d   : > { %v2482_v39 = vmax.f32 %v1875_v21, %v2354_v37  ;;  %1970 = vmatmul.bf16.gmra.mxu0 %v6817_v50  ;;  %v1198_v0 = vmul.f32 0.2, %v898_v49 }
 0x26e   : > { %2139 = vmatmul.bf16.gmra.mxu1 %v6820_v53  ;;  %v1708_v17 = vpop.f32.mrf.mxu2  ;;  %v1199_v13 = vmul.f32 0.2, %v1067_v41 }
 0x26f   : > { %v1709_v47 = vadd.f32 %v1708_v17, %v6894_v40  ;;  %v1877_v35 = vpop.f32.mrf.mxu3  ;;  %v7307_v23 = vpack.c.bf16 %v2482_v39, %v2480_v26  ;;  %v1326_v42 = vmax.f32 %v898_v49, %v1198_v0 }
 0x270   : > { %v1327_v32 = vmax.f32 %v1067_v41, %v1199_v13 }
 0x271   : > { %v1878_v62 = vadd.f32 %v1877_v35, %v1709_v47 }
 0x272   : > { %v899_v1 = vpop.f32.mrf.mxu0 }
 0x273   : > { %v900_v48 = vadd.f32 %v899_v1, %v6741_v3  ;;  %v1068_v4 = vpop.f32.mrf.mxu1  ;;  %v2356_v31 = vmul.f32 0.2, %v1878_v62 }
 0x274   : > { %v1069_v50 = vadd.f32 %v1068_v4, %v6743_v5 }
 0x275   : > { %v1200_v53 = vmul.f32 0.2, %v900_v48  ;;  %v2484_v49 = vmax.f32 %v1878_v62, %v2356_v31 }
 0x276   : > { %v1201_v14 = vmul.f32 0.2, %v1069_v50  ;;  %v1710_v30 = vpop.f32.mrf.mxu2 }
 0x277   : > { %v1328_v46 = vmax.f32 %v900_v48, %v1200_v53  ;;  %v1711_v52 = vadd.f32 %v1710_v30, %v6894_v40  ;;  %v1879_v21 = vpop.f32.mrf.mxu3 }
 0x278   : > { %v1329_v37 = vmax.f32 %v1069_v50, %v1201_v14 }
 0x279   : > { %v1880_v26 = vadd.f32 %v1879_v21, %v1711_v52  ;;  %v7313_v39 = vpack.c.bf16 %v1328_v46, %v1326_v42 }
 0x27a   : > { %v902_v17 = vpop.f32.mrf.mxu0  ;;  %v7315_v47 = vpack.c.bf16 %v1329_v37, %v1327_v32 }
 0x27b   : > { %v2358_v35 = vmul.f32 0.2, %v1880_v26  ;;  %v1071_v1 = vpop.f32.mrf.mxu1  ;;  %1752 = vmatmul.bf16.gmra.mxu2 %v7313_v39  ;;  %v903_v48 = vadd.f32 %v902_v17, %v6741_v3 }
 0x27c   : > { %8993 = vst [vmem:[#allocation30_spill] sm:$0xff] %v7315_v47  ;;  %1921 = vmatmul.bf16.gmra.mxu3 %v7315_v47  ;;  %v1072_v53 = vadd.f32 %v1071_v1, %v6743_v5 }
 0x27d   : > { %v2486_v0 = vmax.f32 %v1880_v26, %v2358_v35  ;;  %1975 = vmatmul.bf16.gmra.mxu0 %v6828_v9  ;;  %v1202_v42 = vmul.f32 0.2, %v903_v48 }
 0x27e   : > { %2144 = vmatmul.bf16.gmra.mxu1 %v6831_v12  ;;  %v1713_v41 = vpop.f32.mrf.mxu2  ;;  %v1203_v52 = vmul.f32 0.2, %v1072_v53 }
 0x27f   : > { %v1714_v4 = vadd.f32 %v1713_v41, %v6894_v40  ;;  %v1882_v13 = vpop.f32.mrf.mxu3  ;;  %v7323_v50 = vpack.c.bf16 %v2486_v0, %v2484_v49  ;;  %v1330_v37 = vmax.f32 %v903_v48, %v1202_v42 }
 0x280   : > { %v1331_v35 = vmax.f32 %v1072_v53, %v1203_v52 }
 0x281   : > { %v1883_v14 = vadd.f32 %v1882_v13, %v1714_v4 }
 0x282   : > { %v904_v30 = vpop.f32.mrf.mxu0 }
 0x283   : > { %v905_v62 = vadd.f32 %v904_v30, %v6741_v3  ;;  %v1073_v46 = vpop.f32.mrf.mxu1  ;;  %v2360_v1 = vmul.f32 0.2, %v1883_v14 }
 0x284   : > { %v1074_v9 = vadd.f32 %v1073_v46, %v6743_v5 }
 0x285   : > { %v1204_v12 = vmul.f32 0.2, %v905_v62  ;;  %v2488_v48 = vmax.f32 %v1883_v14, %v2360_v1  ;;  %v6320_v14 = vld [vmem:[%s8870_s5 + $0x54] sm:$0xf]  ;;  %v6016_v1 = vld [vmem:[%s8870_s5 + $0xd8] sm:$0xf0] }
 0x286   : > { %v1205_v21 = vmul.f32 0.2, %v1074_v9  ;;  %v1715_v32 = vpop.f32.mrf.mxu2 }
 0x287   : > { %v1332_v31 = vmax.f32 %v905_v62, %v1204_v12  ;;  %v1716_v26 = vadd.f32 %v1715_v32, %v6894_v40  ;;  %v1884_v17 = vpop.f32.mrf.mxu3 }
 0x288   : > { %v1333_v49 = vmax.f32 %v1074_v9, %v1205_v21 }
 0x289   : > { %v1885_v0 = vadd.f32 %v1884_v17, %v1716_v26  ;;  %v7329_v41 = vpack.c.bf16 %v1332_v31, %v1330_v37 }
 0x28a   : > { %v907_v4 = vpop.f32.mrf.mxu0  ;;  %v7331_v13 = vpack.c.bf16 %v1333_v49, %v1331_v35  ;;  %v6336_v49 = vld [vmem:[%s8870_s5 + $0xd4] sm:$0xf] }
 0x28b   : > { %8994 = vst [vmem:[#allocation31_spill] sm:$0xff] %v7329_v41  ;;  %v2362_v30 = vmul.f32 0.2, %v1885_v0  ;;  %v1076_v47 = vpop.f32.mrf.mxu1  ;;  %1757 = vmatmul.bf16.gmra.mxu2 %v7329_v41  ;;  %v908_v62 = vadd.f32 %v907_v4, %v6741_v3 }
 0x28c   : > { %8995 = vst [vmem:[#allocation32_spill] sm:$0xff] %v7331_v13  ;;  %1926 = vmatmul.bf16.gmra.mxu3 %v7331_v13  ;;  %v1077_v12 = vadd.f32 %v1076_v47, %v6743_v5 }
 0x28d   : > { %v2490_v42 = vmax.f32 %v1885_v0, %v2362_v30  ;;  %1980 = vmatmul.bf16.gmra.mxu0 %v6851_v38  ;;  %v5952_v38 = vld [vmem:[%s8870_s5 + $0x58] sm:$0xf0]  ;;  %v1206_v37 = vmul.f32 0.2, %v908_v62  ;;  %v6019_v30 = vor.u32 %v6336_v49, %v6016_v1 }
 0x28e   : > { %2149 = vmatmul.bf16.gmra.mxu1 %v6854_v43  ;;  %v1718_v53 = vpop.f32.mrf.mxu2  ;;  %v5955_v32 = vor.u32 %v6320_v14, %v5952_v38  ;;  %v1207_v17 = vmul.f32 0.2, %v1077_v12 }
 0x28f   : > { %v1719_v46 = vadd.f32 %v1718_v53, %v6894_v40  ;;  %v1887_v52 = vpop.f32.mrf.mxu3  ;;  %v7339_v9 = vpack.c.bf16 %v2490_v42, %v2488_v48  ;;  %v1334_v48 = vmax.f32 %v908_v62, %v1206_v37  ;;  %3307 = vmatpush.bf16.msra.mxu1 %v6019_v30 }
 0x290   : > { %3138 = vmatpush.bf16.msra.mxu0 %v5955_v32 }
 0x291   : > { %8996 = vst [vmem:[#allocation33_spill] sm:$0xff] %v7339_v9  ;;  %v1888_v21 = vadd.f32 %v1887_v52, %v1719_v46  ;;  %v1335_v52 = vmax.f32 %v1077_v12, %v1207_v17 }
 0x292   : > { %v909_v43 = vpop.f32.mrf.mxu0 }
 0x293   : > { %v910_v31 = vadd.f32 %v909_v43, %v6741_v3  ;;  %v1078_v26 = vpop.f32.mrf.mxu1  ;;  %v2364_v38 = vmul.f32 0.2, %v1888_v21 }
 0x294   : > { %v1079_v35 = vadd.f32 %v1078_v26, %v6743_v5 }
 0x295   : > { %v1208_v47 = vmul.f32 0.2, %v910_v31  ;;  %v2492_v62 = vmax.f32 %v1888_v21, %v2364_v38  ;;  %v6094_v21 = vld [vmem:[%s8872_s7 + $0x70] sm:$0xf] }
 0x296   : > { %v1209_v0 = vmul.f32 0.2, %v1079_v35  ;;  %v1720_v4 = vpop.f32.mrf.mxu2 }
 0x297   : > { %v1336_v42 = vmax.f32 %v910_v31, %v1208_v47  ;;  %v1721_v53 = vadd.f32 %v1720_v4, %v6894_v40  ;;  %v1889_v46 = vpop.f32.mrf.mxu3  ;;  %v6373_v4 = vld [vmem:[%s8872_s7 + $0xf4] sm:$0xf0] }
 0x298   : > { %v1337_v14 = vmax.f32 %v1079_v35, %v1209_v0 }
 0x299   : > { %v1890_v43 = vadd.f32 %v1889_v46, %v1721_v53  ;;  %v7357_v32 = vpack.c.bf16 %v1336_v42, %v1334_v48 }
 0x29a   : > { %v912_v26 = vpop.f32.mrf.mxu0  ;;  %v7359_v13 = vpack.c.bf16 %v1337_v14, %v1335_v52 }
 0x29b   : > { %v2366_v41 = vmul.f32 0.2, %v1890_v43  ;;  %v1081_v9 = vpop.f32.mrf.mxu1  ;;  %1762 = vmatmul.bf16.gmra.mxu2 %v7357_v32  ;;  %v913_v31 = vadd.f32 %v912_v26, %v6741_v3 }
 0x29c   : > { %1931 = vmatmul.bf16.gmra.mxu3 %v7359_v13  ;;  %v1082_v49 = vadd.f32 %v1081_v9, %v6743_v5 }
 0x29d   : > { %v2494_v37 = vmax.f32 %v1890_v43, %v2366_v41  ;;  %1985 = vmatmul.bf16.gmra.mxu0 %v6874_v7  ;;  %v6357_v7 = vld [vmem:[%s8872_s7 + $0x74] sm:$0xf0]  ;;  %v1210_v9 = vmul.f32 0.2, %v913_v31 }
 0x29e   : > { %2154 = vmatmul.bf16.gmra.mxu1 %v6877_v11  ;;  %v1723_v12 = vpop.f32.mrf.mxu2  ;;  %v6158_v11 = vld [vmem:[%s8872_s7 + $0xf0] sm:$0xf]  ;;  %v6095_v0 = vor.u32 %v6357_v7, %v6094_v21  ;;  %v1211_v53 = vmul.f32 0.2, %v1082_v49 }
 0x29f   : > { %v1724_v17 = vadd.f32 %v1723_v12, %v6894_v40  ;;  %v1892_v35 = vpop.f32.mrf.mxu3  ;;  %v7367_v47 = vpack.c.bf16 %v2494_v37, %v2492_v62  ;;  %v6159_v42 = vor.u32 %v6373_v4, %v6158_v11  ;;  %v1338_v43 = vmax.f32 %v913_v31, %v1210_v9 }
 0x2a0   : > { %3992 = vmatpush.bf16.msra.mxu2 %v6095_v0  ;;  %v1339_v12 = vmax.f32 %v1082_v49, %v1211_v53 }
 0x2a1   : > { %v1893_v1 = vadd.f32 %v1892_v35, %v1724_v17  ;;  %4161 = vmatpush.bf16.msra.mxu3 %v6159_v42 }
 0x2a2   : > { %v914_v41 = vpop.f32.mrf.mxu0 }
 0x2a3   : > { %v915_v30 = vadd.f32 %v914_v41, %v6741_v3  ;;  %v1083_v48 = vpop.f32.mrf.mxu1  ;;  %v2368_v35 = vmul.f32 0.2, %v1893_v1  ;;  %v6399_v3 = vld [vmem:[%s8869_s4] sm:$0x3] }
 0x2a4   : > { %v1084_v46 = vadd.f32 %v1083_v48, %v6743_v5  ;;  %v7388_v7 = vperm.slane %v6399_v3, 1 }
 0x2a5   : > { %v1212_v52 = vmul.f32 0.2, %v915_v30  ;;  %v2496_v49 = vmax.f32 %v1893_v1, %v2368_v35 }
 0x2a6   : > { %v1213_v14 = vmul.f32 0.2, %v1084_v46  ;;  %v1725_v38 = vpop.f32.mrf.mxu2 }
 0x2a7   : > { %v1340_v26 = vmax.f32 %v915_v30, %v1212_v52  ;;  %v1726_v62 = vadd.f32 %v1725_v38, %v6894_v40  ;;  %v1894_v37 = vpop.f32.mrf.mxu3 }
 0x2a8   : > { %v1341_v17 = vmax.f32 %v1084_v46, %v1213_v14 }
 0x2a9   : > { %v1895_v21 = vadd.f32 %v1894_v37, %v1726_v62  ;;  %v7390_v5 = vpack.c.bf16 %v1340_v26, %v1338_v43 }
 0x2aa   : > { %v1951_v11 = vpop.f32.mrf.mxu0  ;;  %v7392_v41 = vpack.c.bf16 %v1341_v17, %v1339_v12 }
 0x2ab   : > { %v2370_v31 = vmul.f32 0.2, %v1895_v21  ;;  %v2120_v0 = vpop.f32.mrf.mxu1  ;;  %1767 = vmatmul.bf16.gmra.mxu2 %v7390_v5  ;;  %v1952_v9 = vadd.f32 %v1951_v11, %v7388_v7 }
 0x2ac   : > { %1936 = vmatmul.bf16.gmra.mxu3 %v7392_v41 }
 0x2ad   : > { %v2498_v4 = vmax.f32 %v1895_v21, %v2370_v31  ;;  %1990 = vmatmul.bf16.gmra.mxu0 %v6888_v33  ;;  %v2121_v46 = vadd.f32 %v2120_v0, %v1952_v9 }
 0x2ae   : > { %2159 = vmatmul.bf16.gmra.mxu1 %v6891_v36  ;;  %v1728_v30 = vpop.f32.mrf.mxu2 }
 0x2af   : > { %v1729_v48 = vadd.f32 %v1728_v30, %v6894_v40  ;;  %v1897_v42 = vpop.f32.mrf.mxu3  ;;  %v7400_v53 = vpack.c.bf16 %v2498_v4, %v2496_v49  ;;  %v2281_v1 = vmul.f32 0.2, %v2121_v46 }
 0x2b1   : > { %v1898_v52 = vadd.f32 %v1897_v42, %v1729_v48  ;;  %v2409_v36 = vmax.f32 %v2121_v46, %v2281_v1 }
 0x2b2   : > { %v1953_v14 = vpop.f32.mrf.mxu0 }
 0x2b3   : > { %v1954_v38 = vadd.f32 %v1953_v14, %v7388_v7  ;;  %v2122_v43 = vpop.f32.mrf.mxu1  ;;  %v2372_v17 = vmul.f32 0.2, %v1898_v52 }
 0x2b5   : > { %v2123_v26 = vadd.f32 %v2122_v43, %v1954_v38  ;;  %v2500_v49 = vmax.f32 %v1898_v52, %v2372_v17 }
 0x2b6   : > { %v1730_v62 = vpop.f32.mrf.mxu2 }
 0x2b7   : > { %v2283_v37 = vmul.f32 0.2, %v2123_v26  ;;  %v1731_v33 = vadd.f32 %v1730_v62, %v6894_v40  ;;  %v1899_v12 = vpop.f32.mrf.mxu3 }
 0x2b9   : > { %v2411_v35 = vmax.f32 %v2123_v26, %v2283_v37  ;;  %v1900_v21 = vadd.f32 %v1899_v12, %v1731_v33 }
 0x2ba   : > { %v1956_v3 = vpop.f32.mrf.mxu0 }
 0x2bb   : > { %v7404_v11 = vpack.c.bf16 %v2411_v35, %v2409_v36  ;;  %v2374_v31 = vmul.f32 0.2, %v1900_v21  ;;  %v2125_v0 = vpop.f32.mrf.mxu1  ;;  %2806 = vmatmul.bf16.vlgmr.msrb.gmra.mxu2 %v6910_v22  ;;  %v1957_v9 = vadd.f32 %v1956_v3, %v7388_v7 }
 0x2bd   : > { %v2502_v4 = vmax.f32 %v1900_v21, %v2374_v31  ;;  %1995 = vmatmul.bf16.gmra.mxu0 %v6903_v10  ;;  %2975 = vmatmul.bf16.vlgmr.msrb.gmra.mxu3 %v7404_v11  ;;  %v2126_v14 = vadd.f32 %v2125_v0, %v1957_v9 }
 0x2be   : > { %2164 = vmatmul.bf16.gmra.mxu1 %v6906_v15  ;;  %v1733_v30 = vpop.f32.mrf.mxu2 }
 0x2bf   : > { %v1734_v48 = vadd.f32 %v1733_v30, %v6894_v40  ;;  %v1902_v42 = vpop.f32.mrf.mxu3  ;;  %v7412_v46 = vpack.c.bf16 %v2502_v4, %v2500_v49  ;;  %v2285_v26 = vmul.f32 0.2, %v2126_v14 }
 0x2c1   : > { %v1903_v38 = vadd.f32 %v1902_v42, %v1734_v48  ;;  %v2413_v15 = vmax.f32 %v2126_v14, %v2285_v26 }
 0x2c2   : > { %v1958_v43 = vpop.f32.mrf.mxu0 }
 0x2c3   : > { %v1959_v52 = vadd.f32 %v1958_v43, %v7388_v7  ;;  %v2127_v1 = vpop.f32.mrf.mxu1  ;;  %v2376_v36 = vmul.f32 0.2, %v1903_v38 }
 0x2c5   : > { %v2128_v62 = vadd.f32 %v2127_v1, %v1959_v52  ;;  %v2504_v49 = vmax.f32 %v1903_v38, %v2376_v36  ;;  %v6318_v38 = vld [vmem:[%s8870_s5 + $0x44] sm:$0xf] }
 0x2c6   : > { %v1735_v37 = vpop.f32.mrf.mxu2 }
 0x2c7   : > { %v2287_v10 = vmul.f32 0.2, %v2128_v62  ;;  %v1736_v33 = vadd.f32 %v1735_v37, %v6894_v40  ;;  %v1904_v12 = vpop.f32.mrf.mxu3 }
 0x2c9   : > { %v2415_v17 = vmax.f32 %v2128_v62, %v2287_v10  ;;  %v1905_v35 = vadd.f32 %v1904_v12, %v1736_v33  ;;  %v6334_v33 = vld [vmem:[%s8870_s5 + $0xc4] sm:$0xf]  ;;  %v6008_v12 = vld [vmem:[%s8870_s5 + $0xc8] sm:$0xf0] }
 0x2ca   : > { %v1961_v21 = vpop.f32.mrf.mxu0  ;;  %v6011_v36 = vor.u32 %v6334_v33, %v6008_v12 }
 0x2cb   : > { %v2378_v3 = vmul.f32 0.2, %v1905_v35  ;;  %v2130_v31 = vpop.f32.mrf.mxu1  ;;  %2811 = vmatmul.bf16.gmra.mxu2 %v6939_v24  ;;  %v7417_v0 = vpack.c.bf16 %v2415_v17, %v2413_v15  ;;  %v1962_v9 = vadd.f32 %v1961_v21, %v7388_v7 }
 0x2cc   : > { %3308 = vmatpush.bf16.msra.mxu1 %v6011_v36 }
 0x2cd   : > { %v2506_v4 = vmax.f32 %v1905_v35, %v2378_v3  ;;  %2000 = vmatmul.bf16.gmra.mxu0 %v6930_v63  ;;  %2980 = vmatmul.bf16.gmra.mxu3 %v7417_v0  ;;  %v2131_v43 = vadd.f32 %v2130_v31, %v1962_v9  ;;  %v5944_v63 = vld [vmem:[%s8870_s5 + $0x48] sm:$0xf0] }
 0x2ce   : > { %2169 = vmatmul.bf16.gmra.mxu1 %v6933_v6  ;;  %v1738_v30 = vpop.f32.mrf.mxu2  ;;  %v5947_v26 = vor.u32 %v6318_v38, %v5944_v63 }
 0x2cf   : > { %v1739_v48 = vadd.f32 %v1738_v30, %v6894_v40  ;;  %v1907_v42 = vpop.f32.mrf.mxu3  ;;  %v7424_v14 = vpack.c.bf16 %v2506_v4, %v2504_v49  ;;  %v2289_v37 = vmul.f32 0.2, %v2131_v43 }
 0x2d0   : > { %3139 = vmatpush.bf16.msra.mxu0 %v5947_v26 }
 0x2d1   : > { %v1908_v52 = vadd.f32 %v1907_v42, %v1739_v48  ;;  %v2417_v3 = vmax.f32 %v2131_v43, %v2289_v37 }
 0x2d2   : > { %v1963_v1 = vpop.f32.mrf.mxu0 }
 0x2d3   : > { %v1964_v6 = vadd.f32 %v1963_v1, %v7388_v7  ;;  %v2132_v62 = vpop.f32.mrf.mxu1  ;;  %v2380_v31 = vmul.f32 0.2, %v1908_v52 }
 0x2d5   : > { %v2133_v10 = vadd.f32 %v2132_v62, %v1964_v6  ;;  %v2508_v38 = vmax.f32 %v1908_v52, %v2380_v31  ;;  %v6086_v52 = vld [vmem:[%s8872_s7 + $0x60] sm:$0xf] }
 0x2d6   : > { %v1740_v15 = vpop.f32.mrf.mxu2 }
 0x2d7   : > { %v2291_v17 = vmul.f32 0.2, %v2133_v10  ;;  %v1741_v35 = vadd.f32 %v1740_v15, %v6894_v40  ;;  %v1909_v21 = vpop.f32.mrf.mxu3  ;;  %v6371_v15 = vld [vmem:[%s8872_s7 + $0xe4] sm:$0xf0] }
 0x2d9   : > { %v2419_v49 = vmax.f32 %v2133_v10, %v2291_v17  ;;  %v1910_v4 = vadd.f32 %v1909_v21, %v1741_v35 }
 0x2da   : > { %v1966_v9 = vpop.f32.mrf.mxu0 }
 0x2db   : > { %v2382_v30 = vmul.f32 0.2, %v1910_v4  ;;  %v2135_v48 = vpop.f32.mrf.mxu1  ;;  %2816 = vmatmul.bf16.gmra.mxu2 %v6966_v25  ;;  %v7441_v42 = vpack.c.bf16 %v2419_v49, %v2417_v3  ;;  %v1967_v1 = vadd.f32 %v1966_v9, %v7388_v7 }
 0x2dd   : > { %v2510_v63 = vmax.f32 %v1910_v4, %v2382_v30  ;;  %2005 = vmatmul.bf16.gmra.mxu0 %v6957_v61  ;;  %2985 = vmatmul.bf16.gmra.mxu3 %v7441_v42  ;;  %v2136_v37 = vadd.f32 %v2135_v48, %v1967_v1  ;;  %v6355_v61 = vld [vmem:[%s8872_s7 + $0x64] sm:$0xf0] }
 0x2de   : > { %2174 = vmatmul.bf16.gmra.mxu1 %v6960_v2  ;;  %v1743_v43 = vpop.f32.mrf.mxu2  ;;  %v6150_v2 = vld [vmem:[%s8872_s7 + $0xe0] sm:$0xf]  ;;  %v6087_v12 = vor.u32 %v6355_v61, %v6086_v52 }
 0x2df   : > { %v1744_v26 = vadd.f32 %v1743_v43, %v6894_v40  ;;  %v1912_v6 = vpop.f32.mrf.mxu3  ;;  %v7448_v62 = vpack.c.bf16 %v2510_v63, %v2508_v38  ;;  %v6151_v35 = vor.u32 %v6371_v15, %v6150_v2  ;;  %v2293_v21 = vmul.f32 0.2, %v2136_v37 }
 0x2e0   : > { %3993 = vmatpush.bf16.msra.mxu2 %v6087_v12 }
 0x2e1   : > { %v1913_v10 = vadd.f32 %v1912_v6, %v1744_v26  ;;  %4162 = vmatpush.bf16.msra.mxu3 %v6151_v35  ;;  %v2421_v30 = vmax.f32 %v2136_v37, %v2293_v21 }
 0x2e2   : > { %v1968_v33 = vpop.f32.mrf.mxu0 }
 0x2e3   : > { %v1969_v36 = vadd.f32 %v1968_v33, %v7388_v7  ;;  %v2137_v17 = vpop.f32.mrf.mxu1  ;;  %v2384_v48 = vmul.f32 0.2, %v1913_v10 }
 0x2e5   : > { %v2138_v3 = vadd.f32 %v2137_v17, %v1969_v36  ;;  %v2512_v52 = vmax.f32 %v1913_v10, %v2384_v48 }
 0x2e6   : > { %v1745_v31 = vpop.f32.mrf.mxu2 }
 0x2e7   : > { %v2295_v49 = vmul.f32 0.2, %v2138_v3  ;;  %v1746_v4 = vadd.f32 %v1745_v31, %v6894_v40  ;;  %v1914_v9 = vpop.f32.mrf.mxu3 }
 0x2e9   : > { %v2423_v38 = vmax.f32 %v2138_v3, %v2295_v49  ;;  %v1915_v63 = vadd.f32 %v1914_v9, %v1746_v4 }
 0x2ea   : > { %v1971_v1 = vpop.f32.mrf.mxu0 }
 0x2eb   : > { %v2386_v43 = vmul.f32 0.2, %v1915_v63  ;;  %v2140_v26 = vpop.f32.mrf.mxu1  ;;  %2821 = vmatmul.bf16.gmra.mxu2 %v6981_v18  ;;  %v7465_v6 = vpack.c.bf16 %v2423_v38, %v2421_v30  ;;  %v1972_v2 = vadd.f32 %v1971_v1, %v7388_v7 }
 0x2ed   : > { %v2514_v61 = vmax.f32 %v1915_v63, %v2386_v43  ;;  %2010 = vmatmul.bf16.gmra.mxu0 %v6972_v56  ;;  %2990 = vmatmul.bf16.gmra.mxu3 %v7465_v6  ;;  %v2141_v36 = vadd.f32 %v2140_v26, %v1972_v2 }
 0x2ee   : > { %2179 = vmatmul.bf16.gmra.mxu1 %v6975_v59  ;;  %v1748_v37 = vpop.f32.mrf.mxu2 }
 0x2ef   : > { %v1749_v33 = vadd.f32 %v1748_v37, %v6894_v40  ;;  %v1917_v12 = vpop.f32.mrf.mxu3  ;;  %v7472_v15 = vpack.c.bf16 %v2514_v61, %v2512_v52  ;;  %v2297_v3 = vmul.f32 0.2, %v2141_v36 }
 0x2f1   : > { %v1918_v17 = vadd.f32 %v1917_v12, %v1749_v33  ;;  %v2425_v59 = vmax.f32 %v2141_v36, %v2297_v3 }
 0x2f2   : > { %v1973_v35 = vpop.f32.mrf.mxu0 }
 0x2f3   : > { %v1974_v10 = vadd.f32 %v1973_v35, %v7388_v7  ;;  %v2142_v21 = vpop.f32.mrf.mxu1  ;;  %v2388_v30 = vmul.f32 0.2, %v1918_v17 }
 0x2f5   : > { %v2143_v31 = vadd.f32 %v2142_v21, %v1974_v10  ;;  %v2516_v52 = vmax.f32 %v1918_v17, %v2388_v30 }
 0x2f6   : > { %v1750_v49 = vpop.f32.mrf.mxu2 }
 0x2f7   : > { %v2299_v56 = vmul.f32 0.2, %v2143_v31  ;;  %v1751_v4 = vadd.f32 %v1750_v49, %v6894_v40  ;;  %v1919_v9 = vpop.f32.mrf.mxu3 }
 0x2f9   : > { %v2427_v48 = vmax.f32 %v2143_v31, %v2299_v56  ;;  %v1920_v38 = vadd.f32 %v1919_v9, %v1751_v4 }
 0x2fa   : > { %v1976_v63 = vpop.f32.mrf.mxu0 }
 0x2fb   : > { %v2390_v1 = vmul.f32 0.2, %v1920_v38  ;;  %v2145_v43 = vpop.f32.mrf.mxu1  ;;  %2826 = vmatmul.bf16.gmra.mxu2 %v6996_v19  ;;  %v7477_v26 = vpack.c.bf16 %v2427_v48, %v2425_v59  ;;  %v1977_v2 = vadd.f32 %v1976_v63, %v7388_v7 }
 0x2fd   : > { %v2518_v61 = vmax.f32 %v1920_v38, %v2390_v1  ;;  %2015 = vmatmul.bf16.gmra.mxu0 %v6987_v54  ;;  %2995 = vmatmul.bf16.gmra.mxu3 %v7477_v26  ;;  %v2146_v35 = vadd.f32 %v2145_v43, %v1977_v2 }
 0x2fe   : > { %2184 = vmatmul.bf16.gmra.mxu1 %v6990_v58  ;;  %v1753_v37 = vpop.f32.mrf.mxu2 }
 0x2ff   : > { %v1754_v33 = vadd.f32 %v1753_v37, %v6894_v40  ;;  %v1922_v12 = vpop.f32.mrf.mxu3  ;;  %v7484_v36 = vpack.c.bf16 %v2518_v61, %v2516_v52  ;;  %v2301_v31 = vmul.f32 0.2, %v2146_v35  ;;  %v8997_v37 = vld [vmem:[#allocation2_spill] sm:$0xff] }
 0x301   : > { %v1923_v10 = vadd.f32 %v1922_v12, %v1754_v33  ;;  %v2429_v58 = vmax.f32 %v2146_v35, %v2301_v31  ;;  %v8998_v33 = vld [vmem:[#allocation3_spill] sm:$0xff] }
 0x302   : > { %v1978_v21 = vpop.f32.mrf.mxu0 }
 0x303   : > { %v1979_v17 = vadd.f32 %v1978_v21, %v7388_v7  ;;  %v2147_v3 = vpop.f32.mrf.mxu1  ;;  %v2392_v59 = vmul.f32 0.2, %v1923_v10 }
 0x305   : > { %v2148_v49 = vadd.f32 %v2147_v3, %v1979_v17  ;;  %v2520_v52 = vmax.f32 %v1923_v10, %v2392_v59  ;;  %v6316_v10 = vld [vmem:[%s8870_s5 + $0x34] sm:$0xf] }
 0x306   : > { %v1755_v56 = vpop.f32.mrf.mxu2 }
 0x307   : > { %v2303_v54 = vmul.f32 0.2, %v2148_v49  ;;  %v1756_v4 = vadd.f32 %v1755_v56, %v6894_v40  ;;  %v1924_v9 = vpop.f32.mrf.mxu3 }
 0x309   : > { %v2431_v30 = vmax.f32 %v2148_v49, %v2303_v54  ;;  %v1925_v48 = vadd.f32 %v1924_v9, %v1756_v4  ;;  %v5936_v49 = vld [vmem:[%s8870_s5 + $0x38] sm:$0xf0] }
 0x30a   : > { %v1981_v38 = vpop.f32.mrf.mxu0  ;;  %v5939_v54 = vor.u32 %v6316_v10, %v5936_v49  ;;  %v8999_v49 = vld [vmem:[#allocation6_spill] sm:$0xff] }
 0x30b   : > { %v2394_v63 = vmul.f32 0.2, %v1925_v48  ;;  %v2150_v1 = vpop.f32.mrf.mxu1  ;;  %2831 = vmatmul.bf16.gmra.mxu2 %v7023_v44  ;;  %v7489_v43 = vpack.c.bf16 %v2431_v30, %v2429_v58  ;;  %v1982_v2 = vadd.f32 %v1981_v38, %v7388_v7  ;;  %v6332_v30 = vld [vmem:[%s8870_s5 + $0xb4] sm:$0xf] }
 0x30c   : > { %3140 = vmatpush.bf16.msra.mxu0 %v5939_v54 }
 0x30d   : > { %v2522_v61 = vmax.f32 %v1925_v48, %v2394_v63  ;;  %2020 = vmatmul.bf16.gmra.mxu0 %v8997_v37  ;;  %3000 = vmatmul.bf16.gmra.mxu3 %v7489_v43  ;;  %v2151_v3 = vadd.f32 %v2150_v1, %v1982_v2  ;;  %v6000_v48 = vld [vmem:[%s8870_s5 + $0xb8] sm:$0xf0] }
 0x30e   : > { %2189 = vmatmul.bf16.gmra.mxu1 %v8998_v33  ;;  %v1758_v12 = vpop.f32.mrf.mxu2  ;;  %v6003_v63 = vor.u32 %v6332_v30, %v6000_v48  ;;  %v9001_v30 = vld [vmem:[#allocation4_spill] sm:$0xff]  ;;  %v9002_v48 = vld [vmem:[#allocation5_spill] sm:$0xff] }
 0x30f   : > { %v1759_v35 = vadd.f32 %v1758_v12, %v6894_v40  ;;  %v1927_v21 = vpop.f32.mrf.mxu3  ;;  %v7496_v17 = vpack.c.bf16 %v2522_v61, %v2520_v52  ;;  %v2305_v58 = vmul.f32 0.2, %v2151_v3 }
 0x310   : > { %3309 = vmatpush.bf16.msra.mxu1 %v6003_v63 }
 0x311   : > { %v1928_v31 = vadd.f32 %v1927_v21, %v1759_v35  ;;  %v2433_v2 = vmax.f32 %v2151_v3, %v2305_v58 }
 0x312   : > { %v1983_v56 = vpop.f32.mrf.mxu0 }
 0x313   : > { %v1984_v4 = vadd.f32 %v1983_v56, %v7388_v7  ;;  %v2152_v9 = vpop.f32.mrf.mxu1  ;;  %v2396_v37 = vmul.f32 0.2, %v1928_v31 }
 0x315   : > { %v2153_v59 = vadd.f32 %v2152_v9, %v1984_v4  ;;  %v2524_v54 = vmax.f32 %v1928_v31, %v2396_v37  ;;  %v6078_v31 = vld [vmem:[%s8872_s7 + $0x50] sm:$0xf] }
 0x316   : > { %v1760_v38 = vpop.f32.mrf.mxu2 }
 0x317   : > { %v2307_v1 = vmul.f32 0.2, %v2153_v59  ;;  %v1761_v52 = vadd.f32 %v1760_v38, %v6894_v40  ;;  %v1929_v61 = vpop.f32.mrf.mxu3 }
 0x319   : > { %v2435_v33 = vmax.f32 %v2153_v59, %v2307_v1  ;;  %v1930_v12 = vadd.f32 %v1929_v61, %v1761_v52  ;;  %v6353_v52 = vld [vmem:[%s8872_s7 + $0x54] sm:$0xf0]  ;;  %v6142_v61 = vld [vmem:[%s8872_s7 + $0xd0] sm:$0xf] }
 0x31a   : > { %v1986_v35 = vpop.f32.mrf.mxu0  ;;  %v6079_v37 = vor.u32 %v6353_v52, %v6078_v31 }
 0x31b   : > { %v2398_v21 = vmul.f32 0.2, %v1930_v12  ;;  %v2155_v10 = vpop.f32.mrf.mxu1  ;;  %2836 = vmatmul.bf16.gmra.mxu2 %v8999_v49  ;;  %v7513_v56 = vpack.c.bf16 %v2435_v33, %v2433_v2  ;;  %v1987_v9 = vadd.f32 %v1986_v35, %v7388_v7  ;;  %v6369_v33 = vld [vmem:[%s8872_s7 + $0xd4] sm:$0xf0] }
 0x31c   : > { %3994 = vmatpush.bf16.msra.mxu2 %v6079_v37 }
 0x31d   : > { %9000 = vst [vmem:[#allocation2_spill] sm:$0xff] %v7513_v56  ;;  %v2526_v4 = vmax.f32 %v1930_v12, %v2398_v21  ;;  %2025 = vmatmul.bf16.gmra.mxu0 %v9001_v30  ;;  %3005 = vmatmul.bf16.gmra.mxu3 %v7513_v56  ;;  %v2156_v63 = vadd.f32 %v2155_v10, %v1987_v9 }
 0x31e   : > { %2194 = vmatmul.bf16.gmra.mxu1 %v9002_v48  ;;  %v1763_v3 = vpop.f32.mrf.mxu2  ;;  %v6143_v21 = vor.u32 %v6369_v33, %v6142_v61 }
 0x31f   : > { %v1764_v58 = vadd.f32 %v1763_v3, %v6894_v40  ;;  %v1932_v59 = vpop.f32.mrf.mxu3  ;;  %v7520_v38 = vpack.c.bf16 %v2526_v4, %v2524_v54  ;;  %v2309_v10 = vmul.f32 0.2, %v2156_v63 }
 0x320   : > { %4163 = vmatpush.bf16.msra.mxu3 %v6143_v21 }
 0x321   : > { %9003 = vst [vmem:[#allocation3_spill] sm:$0xff] %v7520_v38  ;;  %v1933_v1 = vadd.f32 %v1932_v59, %v1764_v58  ;;  %v2437_v3 = vmax.f32 %v2156_v63, %v2309_v10  ;;  %v9004_v38 = vld [vmem:[#allocation9_spill] sm:$0xff] }
 0x322   : > { %v1988_v2 = vpop.f32.mrf.mxu0 }
 0x323   : > { %v1989_v12 = vadd.f32 %v1988_v2, %v7388_v7  ;;  %v2157_v35 = vpop.f32.mrf.mxu1  ;;  %v2400_v58 = vmul.f32 0.2, %v1933_v1 }
 0x325   : > { %v2158_v54 = vadd.f32 %v2157_v35, %v1989_v12  ;;  %v2528_v61 = vmax.f32 %v1933_v1, %v2400_v58  ;;  %v9006_v12 = vld [vmem:[#allocation7_spill] sm:$0xff]  ;;  %v9007_v35 = vld [vmem:[#allocation8_spill] sm:$0xff] }
 0x326   : > { %v1765_v4 = vpop.f32.mrf.mxu2 }
 0x327   : > { %v2311_v9 = vmul.f32 0.2, %v2158_v54  ;;  %v1766_v30 = vadd.f32 %v1765_v4, %v6894_v40  ;;  %v1934_v48 = vpop.f32.mrf.mxu3 }
 0x329   : > { %v2439_v59 = vmax.f32 %v2158_v54, %v2311_v9  ;;  %v1935_v31 = vadd.f32 %v1934_v48, %v1766_v30 }
 0x32a   : > { %v1991_v52 = vpop.f32.mrf.mxu0 }
 0x32b   : > { %v2402_v56 = vmul.f32 0.2, %v1935_v31  ;;  %v2160_v49 = vpop.f32.mrf.mxu1  ;;  %2841 = vmatmul.bf16.gmra.mxu2 %v9004_v38  ;;  %v7537_v2 = vpack.c.bf16 %v2439_v59, %v2437_v3  ;;  %v1992_v33 = vadd.f32 %v1991_v52, %v7388_v7 }
 0x32d   : > { %9005 = vst [vmem:[#allocation4_spill] sm:$0xff] %v7537_v2  ;;  %v2530_v37 = vmax.f32 %v1935_v31, %v2402_v56  ;;  %2030 = vmatmul.bf16.gmra.mxu0 %v9006_v12  ;;  %3010 = vmatmul.bf16.gmra.mxu3 %v7537_v2  ;;  %v2161_v4 = vadd.f32 %v2160_v49, %v1992_v33  ;;  %v2632_v12 = vld [vmem:[%s8871_s6] sm:$0x3] }
 0x32e   : > { %2199 = vmatmul.bf16.gmra.mxu1 %v9007_v35  ;;  %v1768_v63 = vpop.f32.mrf.mxu2  ;;  %v9011_v2 = vld [vmem:[#allocation10_spill] sm:$0xff] }
 0x32f   : > { %v1769_v21 = vadd.f32 %v1768_v63, %v6894_v40  ;;  %v1937_v10 = vpop.f32.mrf.mxu3  ;;  %v7544_v54 = vpack.c.bf16 %v2530_v37, %v2528_v61  ;;  %v2313_v48 = vmul.f32 0.2, %v2161_v4 }
 0x331   : > { %9008 = vst [vmem:[#allocation5_spill] sm:$0xff] %v7544_v54  ;;  %v1938_v9 = vadd.f32 %v1937_v10, %v1769_v21  ;;  %v2441_v35 = vmax.f32 %v2161_v4, %v2313_v48  ;;  %v9009_v10 = vld [vmem:[#allocation12_spill] sm:$0xff]  ;;  %v9012_v4 = vld [vmem:[#allocation11_spill] sm:$0xff]  ;;  %v9019_v54 = vld [vmem:[#allocation18_spill] sm:$0xff] }
 0x332   : > { %v1993_v30 = vpop.f32.mrf.mxu0 }
 0x333   : > { %v1994_v1 = vadd.f32 %v1993_v30, %v7388_v7  ;;  %v2162_v56 = vpop.f32.mrf.mxu1  ;;  %v2404_v61 = vmul.f32 0.2, %v1938_v9 }
 0x335   : > { %v2163_v3 = vadd.f32 %v2162_v56, %v1994_v1  ;;  %v7554_v1 = vperm.slane %v2632_v12, 0  ;;  %v2532_v56 = vmax.f32 %v1938_v9, %v2404_v61 }
 0x336   : > { %v1770_v58 = vpop.f32.mrf.mxu2 }
 0x337   : > { %v2315_v59 = vmul.f32 0.2, %v2163_v3  ;;  %v1771_v31 = vadd.f32 %v1770_v58, %v6894_v40  ;;  %v1939_v52 = vpop.f32.mrf.mxu3 }
 0x339   : > { %v2443_v37 = vmax.f32 %v2163_v3, %v2315_v59  ;;  %v1940_v49 = vadd.f32 %v1939_v52, %v1771_v31 }
 0x33a   : > { %v1996_v33 = vpop.f32.mrf.mxu0 }
 0x33b   : > { %v2406_v63 = vmul.f32 0.2, %v1940_v49  ;;  %v2165_v21 = vpop.f32.mrf.mxu1  ;;  %2846 = vmatmul.bf16.gmra.mxu2 %v9009_v10  ;;  %v7552_v30 = vpack.c.bf16 %v2443_v37, %v2441_v35  ;;  %v1997_v58 = vadd.f32 %v1996_v33, %v7388_v7 }
 0x33d   : > { %9010 = vst [vmem:[#allocation7_spill] sm:$0xff] %v7552_v30  ;;  %v2534_v40 = vmax.f32 %v1940_v49, %v2406_v63  ;;  %2035 = vmatmul.bf16.gmra.mxu0 %v9011_v2  ;;  %3015 = vmatmul.bf16.gmra.mxu3 %v7552_v30  ;;  %v2166_v52 = vadd.f32 %v2165_v21, %v1997_v58  ;;  %v9014_v21 = vld [vmem:[#allocation15_spill] sm:$0xff] }
 0x33e   : > { %2204 = vmatmul.bf16.gmra.mxu1 %v9012_v4  ;;  %v2807_v48 = vpop.f32.mrf.mxu2 }
 0x33f   : > { %v2808_v3 = vadd.f32 %v2807_v48, %v7554_v1  ;;  %v7561_v59 = vpack.c.bf16 %v2534_v40, %v2532_v56  ;;  %v2317_v37 = vmul.f32 0.2, %v2166_v52 }
 0x340   : > { %v2976_v31 = vpop.f32.mrf.mxu3 }
 0x341   : > { %9013 = vst [vmem:[#allocation8_spill] sm:$0xff] %v7561_v59  ;;  %v2977_v35 = vadd.f32 %v2976_v31, %v2808_v3  ;;  %v2445_v4 = vmax.f32 %v2166_v52, %v2317_v37 }
 0x342   : > { %v1998_v12 = vpop.f32.mrf.mxu0 }
 0x343   : > { %v1999_v9 = vadd.f32 %v1998_v12, %v7388_v7  ;;  %v2167_v61 = vpop.f32.mrf.mxu1  ;;  %v3474_v10 = vmul.f32 0.2, %v2977_v35 }
 0x345   : > { %v2168_v49 = vadd.f32 %v2167_v61, %v1999_v9  ;;  %v3602_v3 = vmax.f32 %v2977_v35, %v3474_v10  ;;  %v9016_v9 = vld [vmem:[#allocation13_spill] sm:$0xff]  ;;  %v9017_v61 = vld [vmem:[#allocation14_spill] sm:$0xff]  ;;  %v5928_v10 = vld [vmem:[%s8870_s5 + $0x28] sm:$0xf0] }
 0x346   : > { %v2809_v33 = vpop.f32.mrf.mxu2  ;;  %v6330_v35 = vld [vmem:[%s8870_s5 + $0xa4] sm:$0xf] }
 0x347   : > { %v2319_v2 = vmul.f32 0.2, %v2168_v49  ;;  %v2810_v63 = vadd.f32 %v2809_v33, %v7554_v1 }
 0x348   : > { %v2978_v30 = vpop.f32.mrf.mxu3 }
 0x349   : > { %v2447_v38 = vmax.f32 %v2168_v49, %v2319_v2  ;;  %v2979_v48 = vadd.f32 %v2978_v30, %v2810_v63 }
 0x34a   : > { %v2001_v56 = vpop.f32.mrf.mxu0 }
 0x34b   : > { %v3476_v40 = vmul.f32 0.2, %v2979_v48  ;;  %v2170_v59 = vpop.f32.mrf.mxu1  ;;  %2851 = vmatmul.bf16.gmra.mxu2 %v9014_v21  ;;  %v7566_v58 = vpack.c.bf16 %v2447_v38, %v2445_v4  ;;  %v2002_v12 = vadd.f32 %v2001_v56, %v7388_v7  ;;  %v6314_v38 = vld [vmem:[%s8870_s5 + $0x24] sm:$0xf] }
 0x34c   : > { %v5931_v4 = vor.u32 %v6314_v38, %v5928_v10 }
 0x34d   : > { %9015 = vst [vmem:[#allocation10_spill] sm:$0xff] %v7566_v58  ;;  %v3604_v31 = vmax.f32 %v2979_v48, %v3476_v40  ;;  %2040 = vmatmul.bf16.gmra.mxu0 %v9016_v9  ;;  %3020 = vmatmul.bf16.gmra.mxu3 %v7566_v58  ;;  %v2171_v33 = vadd.f32 %v2170_v59, %v2002_v12  ;;  %v5992_v48 = vld [vmem:[%s8870_s5 + $0xa8] sm:$0xf0] }
 0x34e   : > { %2209 = vmatmul.bf16.gmra.mxu1 %v9017_v61  ;;  %v2812_v52 = vpop.f32.mrf.mxu2  ;;  %v5995_v40 = vor.u32 %v6330_v35, %v5992_v48  ;;  %3141 = vmatpush.bf16.msra.mxu0 %v5931_v4 }
 0x34f   : > { %v7572_v37 = vpack.c.bf16 %v3604_v31, %v3602_v3  ;;  %v2813_v30 = vadd.f32 %v2812_v52, %v7554_v1  ;;  %v2321_v3 = vmul.f32 0.2, %v2171_v33 }
 0x350   : > { %v2981_v49 = vpop.f32.mrf.mxu3  ;;  %3310 = vmatpush.bf16.msra.mxu1 %v5995_v40 }
 0x351   : > { %9018 = vst [vmem:[#allocation11_spill] sm:$0xff] %v7572_v37  ;;  %v2982_v2 = vadd.f32 %v2981_v49, %v2813_v30  ;;  %v2449_v30 = vmax.f32 %v2171_v33, %v2321_v3 }
 0x352   : > { %v2003_v63 = vpop.f32.mrf.mxu0 }
 0x353   : > { %v2004_v59 = vadd.f32 %v2003_v63, %v7388_v7  ;;  %v2172_v56 = vpop.f32.mrf.mxu1  ;;  %v3478_v49 = vmul.f32 0.2, %v2982_v2 }
 0x355   : > { %v2173_v31 = vadd.f32 %v2172_v56, %v2004_v59  ;;  %v3606_v35 = vmax.f32 %v2982_v2, %v3478_v49  ;;  %v9021_v59 = vld [vmem:[#allocation16_spill] sm:$0xff]  ;;  %v9022_v56 = vld [vmem:[#allocation17_spill] sm:$0xff]  ;;  %v6134_v2 = vld [vmem:[%s8872_s7 + $0xc0] sm:$0xf] }
 0x356   : > { %v2814_v12 = vpop.f32.mrf.mxu2 }
 0x357   : > { %v2323_v9 = vmul.f32 0.2, %v2173_v31  ;;  %v2815_v61 = vadd.f32 %v2814_v12, %v7554_v1 }
 0x358   : > { %v2983_v52 = vpop.f32.mrf.mxu3 }
 0x359   : > { %v2451_v38 = vmax.f32 %v2173_v31, %v2323_v9  ;;  %v2984_v10 = vadd.f32 %v2983_v52, %v2815_v61 }
 0x35a   : > { %v2006_v58 = vpop.f32.mrf.mxu0 }
 0x35b   : > { %v3480_v21 = vmul.f32 0.2, %v2984_v10  ;;  %v2175_v37 = vpop.f32.mrf.mxu1  ;;  %2856 = vmatmul.bf16.gmra.mxu2 %v9019_v54  ;;  %v7590_v63 = vpack.c.bf16 %v2451_v38, %v2449_v30  ;;  %v2007_v48 = vadd.f32 %v2006_v58, %v7388_v7  ;;  %v6351_v58 = vld [vmem:[%s8872_s7 + $0x44] sm:$0xf0] }
 0x35c   : > { %v6367_v30 = vld [vmem:[%s8872_s7 + $0xc4] sm:$0xf0] }
 0x35d   : > { %9020 = vst [vmem:[#allocation13_spill] sm:$0xff] %v7590_v63  ;;  %v3608_v4 = vmax.f32 %v2984_v10, %v3480_v21  ;;  %2045 = vmatmul.bf16.gmra.mxu0 %v9021_v59  ;;  %3025 = vmatmul.bf16.gmra.mxu3 %v7590_v63  ;;  %v2176_v12 = vadd.f32 %v2175_v37, %v2007_v48  ;;  %v6070_v21 = vld [vmem:[%s8872_s7 + $0x40] sm:$0xf] }
 0x35e   : > { %2214 = vmatmul.bf16.gmra.mxu1 %v9022_v56  ;;  %v2817_v33 = vpop.f32.mrf.mxu2  ;;  %v6071_v52 = vor.u32 %v6351_v58, %v6070_v21  ;;  %v6135_v38 = vor.u32 %v6367_v30, %v6134_v2 }
 0x35f   : > { %v2818_v40 = vadd.f32 %v2817_v33, %v7554_v1  ;;  %v7597_v3 = vpack.c.bf16 %v3608_v4, %v3606_v35  ;;  %v2325_v10 = vmul.f32 0.2, %v2176_v12 }
 0x360   : > { %v2986_v31 = vpop.f32.mrf.mxu3  ;;  %3995 = vmatpush.bf16.msra.mxu2 %v6071_v52  ;;  %4164 = vmatpush.bf16.msra.mxu3 %v6135_v38 }
 0x361   : > { %9023 = vst [vmem:[#allocation14_spill] sm:$0xff] %v7597_v3  ;;  %v2987_v9 = vadd.f32 %v2986_v31, %v2818_v40  ;;  %v2453_v33 = vmax.f32 %v2176_v12, %v2325_v10  ;;  %v9024_v3 = vld [vmem:[#allocation21_spill] sm:$0xff] }
 0x362   : > { %v2008_v61 = vpop.f32.mrf.mxu0 }
 0x363   : > { %v2009_v37 = vadd.f32 %v2008_v61, %v7388_v7  ;;  %v2177_v49 = vpop.f32.mrf.mxu1  ;;  %v3482_v40 = vmul.f32 0.2, %v2987_v9 }
 0x365   : > { %v2178_v35 = vadd.f32 %v2177_v49, %v2009_v37  ;;  %v3610_v2 = vmax.f32 %v2987_v9, %v3482_v40  ;;  %v9026_v37 = vld [vmem:[#allocation19_spill] sm:$0xff]  ;;  %v9027_v49 = vld [vmem:[#allocation20_spill] sm:$0xff] }
 0x366   : > { %v2819_v4 = vpop.f32.mrf.mxu2 }
 0x367   : > { %v2327_v48 = vmul.f32 0.2, %v2178_v35  ;;  %v2820_v59 = vadd.f32 %v2819_v4, %v7554_v1 }
 0x368   : > { %v2988_v56 = vpop.f32.mrf.mxu3 }
 0x369   : > { %v2455_v31 = vmax.f32 %v2178_v35, %v2327_v48  ;;  %v2989_v21 = vadd.f32 %v2988_v56, %v2820_v59 }
 0x36a   : > { %v2011_v58 = vpop.f32.mrf.mxu0 }
 0x36b   : > { %v3484_v63 = vmul.f32 0.2, %v2989_v21  ;;  %v2180_v54 = vpop.f32.mrf.mxu1  ;;  %2861 = vmatmul.bf16.gmra.mxu2 %v9024_v3  ;;  %v7614_v61 = vpack.c.bf16 %v2455_v31, %v2453_v33  ;;  %v2012_v30 = vadd.f32 %v2011_v58, %v7388_v7 }
 0x36d   : > { %9025 = vst [vmem:[#allocation16_spill] sm:$0xff] %v7614_v61  ;;  %v3612_v52 = vmax.f32 %v2989_v21, %v3484_v63  ;;  %2050 = vmatmul.bf16.gmra.mxu0 %v9026_v37  ;;  %3030 = vmatmul.bf16.gmra.mxu3 %v7614_v61  ;;  %v2181_v4 = vadd.f32 %v2180_v54, %v2012_v30  ;;  %v9029_v54 = vld [vmem:[#allocation24_spill] sm:$0xff] }
 0x36e   : > { %2219 = vmatmul.bf16.gmra.mxu1 %v9027_v49  ;;  %v2822_v12 = vpop.f32.mrf.mxu2 }
 0x36f   : > { %v2823_v38 = vadd.f32 %v2822_v12, %v7554_v1  ;;  %v7621_v10 = vpack.c.bf16 %v3612_v52, %v3610_v2  ;;  %v2329_v56 = vmul.f32 0.2, %v2181_v4 }
 0x370   : > { %v2991_v35 = vpop.f32.mrf.mxu3 }
 0x371   : > { %9028 = vst [vmem:[#allocation17_spill] sm:$0xff] %v7621_v10  ;;  %v2992_v48 = vadd.f32 %v2991_v35, %v2823_v38  ;;  %v2457_v37 = vmax.f32 %v2181_v4, %v2329_v56 }
 0x372   : > { %v2013_v59 = vpop.f32.mrf.mxu0 }
 0x373   : > { %v2014_v9 = vadd.f32 %v2013_v59, %v7388_v7  ;;  %v2182_v63 = vpop.f32.mrf.mxu1  ;;  %v3486_v49 = vmul.f32 0.2, %v2992_v48 }
 0x375   : > { %v2183_v33 = vadd.f32 %v2182_v63, %v2014_v9  ;;  %v3614_v38 = vmax.f32 %v2992_v48, %v3486_v49  ;;  %v9031_v9 = vld [vmem:[#allocation22_spill] sm:$0xff]  ;;  %v9032_v63 = vld [vmem:[#allocation23_spill] sm:$0xff] }
 0x376   : > { %v2824_v40 = vpop.f32.mrf.mxu2 }
 0x377   : > { %v2331_v31 = vmul.f32 0.2, %v2183_v33  ;;  %v2825_v21 = vadd.f32 %v2824_v40, %v7554_v1 }
 0x378   : > { %v2993_v58 = vpop.f32.mrf.mxu3 }
 0x379   : > { %v2459_v61 = vmax.f32 %v2183_v33, %v2331_v31  ;;  %v2994_v12 = vadd.f32 %v2993_v58, %v2825_v21 }
 0x37a   : > { %v2016_v2 = vpop.f32.mrf.mxu0 }
 0x37b   : > { %v3488_v52 = vmul.f32 0.2, %v2994_v12  ;;  %v2185_v3 = vpop.f32.mrf.mxu1  ;;  %2866 = vmatmul.bf16.gmra.mxu2 %v9029_v54  ;;  %v7626_v30 = vpack.c.bf16 %v2459_v61, %v2457_v37  ;;  %v2017_v59 = vadd.f32 %v2016_v2, %v7388_v7 }
 0x37d   : > { %9030 = vst [vmem:[#allocation19_spill] sm:$0xff] %v7626_v30  ;;  %v3616_v35 = vmax.f32 %v2994_v12, %v3488_v52  ;;  %2055 = vmatmul.bf16.gmra.mxu0 %v9031_v9  ;;  %3035 = vmatmul.bf16.gmra.mxu3 %v7626_v30  ;;  %v2186_v31 = vadd.f32 %v2185_v3, %v2017_v59 }
 0x37e   : > { %2224 = vmatmul.bf16.gmra.mxu1 %v9032_v63  ;;  %v2827_v4 = vpop.f32.mrf.mxu2 }
 0x37f   : > { %v2828_v56 = vadd.f32 %v2827_v4, %v7554_v1  ;;  %v7633_v33 = vpack.c.bf16 %v3616_v35, %v3614_v38  ;;  %v2333_v37 = vmul.f32 0.2, %v2186_v31 }
 0x380   : > { %v2996_v40 = vpop.f32.mrf.mxu3 }
 0x381   : > { %9033 = vst [vmem:[#allocation20_spill] sm:$0xff] %v7633_v33  ;;  %v2997_v21 = vadd.f32 %v2996_v40, %v2828_v56  ;;  %v2461_v63 = vmax.f32 %v2186_v31, %v2333_v37 }
 0x382   : > { %v2018_v61 = vpop.f32.mrf.mxu0 }
 0x383   : > { %v2019_v48 = vadd.f32 %v2018_v61, %v7388_v7  ;;  %v2187_v58 = vpop.f32.mrf.mxu1  ;;  %v3490_v30 = vmul.f32 0.2, %v2997_v21 }
 0x385   : > { %v2188_v49 = vadd.f32 %v2187_v58, %v2019_v48  ;;  %v3618_v59 = vmax.f32 %v2997_v21, %v3490_v30 }
 0x386   : > { %v2829_v12 = vpop.f32.mrf.mxu2 }
 0x387   : > { %v2335_v2 = vmul.f32 0.2, %v2188_v49  ;;  %v2830_v52 = vadd.f32 %v2829_v12, %v7554_v1  ;;  %v5984_v12 = vld [vmem:[%s8870_s5 + $0x98] sm:$0xf0] }
 0x388   : > { %v2998_v9 = vpop.f32.mrf.mxu3 }
 0x389   : > { %v2463_v54 = vmax.f32 %v2188_v49, %v2335_v2  ;;  %v2999_v4 = vadd.f32 %v2998_v9, %v2830_v52 }
 0x38a   : > { %v2021_v38 = vpop.f32.mrf.mxu0 }
 0x38b   : > { %v3492_v35 = vmul.f32 0.2, %v2999_v4  ;;  %v2190_v33 = vpop.f32.mrf.mxu1  ;;  %2871 = vmatmul.bf16.gmra.mxu2 %v7191_v45  ;;  %v7638_v3 = vpack.c.bf16 %v2463_v54, %v2461_v63  ;;  %v2022_v40 = vadd.f32 %v2021_v38, %v7388_v7  ;;  %v6312_v54 = vld [vmem:[%s8870_s5 + $0x14] sm:$0xf] }
 0x38d   : > { %v3620_v56 = vmax.f32 %v2999_v4, %v3492_v35  ;;  %2060 = vmatmul.bf16.gmra.mxu0 %v7182_v57  ;;  %3040 = vmatmul.bf16.gmra.mxu3 %v7638_v3  ;;  %v2191_v37 = vadd.f32 %v2190_v33, %v2022_v40  ;;  %v5920_v57 = vld [vmem:[%s8870_s5 + $0x18] sm:$0xf0] }
 0x38e   : > { %2229 = vmatmul.bf16.gmra.mxu1 %v7185_v8  ;;  %v2832_v31 = vpop.f32.mrf.mxu2  ;;  %v6328_v8 = vld [vmem:[%s8870_s5 + $0x94] sm:$0xf]  ;;  %v5923_v21 = vor.u32 %v6312_v54, %v5920_v57 }
 0x38f   : > { %v2833_v61 = vadd.f32 %v2832_v31, %v7554_v1  ;;  %v7645_v48 = vpack.c.bf16 %v3620_v56, %v3618_v59  ;;  %v5987_v52 = vor.u32 %v6328_v8, %v5984_v12  ;;  %v2337_v9 = vmul.f32 0.2, %v2191_v37 }
 0x390   : > { %v3001_v58 = vpop.f32.mrf.mxu3  ;;  %3142 = vmatpush.bf16.msra.mxu0 %v5923_v21 }
 0x391   : > { %v3002_v49 = vadd.f32 %v3001_v58, %v2833_v61  ;;  %3311 = vmatpush.bf16.msra.mxu1 %v5987_v52  ;;  %v2465_v56 = vmax.f32 %v2191_v37, %v2337_v9 }
 0x392   : > { %v2023_v30 = vpop.f32.mrf.mxu0 }
 0x393   : > { %v2024_v33 = vadd.f32 %v2023_v30, %v7388_v7  ;;  %v2192_v2 = vpop.f32.mrf.mxu1  ;;  %v3494_v40 = vmul.f32 0.2, %v3002_v49 }
 0x395   : > { %v2193_v63 = vadd.f32 %v2192_v2, %v2024_v33  ;;  %v3622_v8 = vmax.f32 %v3002_v49, %v3494_v40  ;;  %v9035_v33 = vld [vmem:[#allocation25_spill] sm:$0xff]  ;;  %v6062_v49 = vld [vmem:[%s8872_s7 + $0x30] sm:$0xf] }
 0x396   : > { %v2834_v4 = vpop.f32.mrf.mxu2 }
 0x397   : > { %v2339_v38 = vmul.f32 0.2, %v2193_v63  ;;  %v2835_v35 = vadd.f32 %v2834_v4, %v7554_v1 }
 0x398   : > { %v3003_v59 = vpop.f32.mrf.mxu3 }
 0x399   : > { %v2467_v31 = vmax.f32 %v2193_v63, %v2339_v38  ;;  %v3004_v61 = vadd.f32 %v3003_v59, %v2835_v35  ;;  %v6126_v38 = vld [vmem:[%s8872_s7 + $0xb0] sm:$0xf] }
 0x39a   : > { %v2026_v58 = vpop.f32.mrf.mxu0 }
 0x39b   : > { %v3496_v54 = vmul.f32 0.2, %v3004_v61  ;;  %v2195_v57 = vpop.f32.mrf.mxu1  ;;  %2876 = vmatmul.bf16.gmra.mxu2 %v7219_v34  ;;  %v7662_v30 = vpack.c.bf16 %v2467_v31, %v2465_v56  ;;  %v2027_v12 = vadd.f32 %v2026_v58, %v7388_v7  ;;  %v6365_v56 = vld [vmem:[%s8872_s7 + $0xb4] sm:$0xf0] }
 0x39d   : > { %9034 = vst [vmem:[#allocation22_spill] sm:$0xff] %v7662_v30  ;;  %v3624_v21 = vmax.f32 %v3004_v61, %v3496_v54  ;;  %2065 = vmatmul.bf16.gmra.mxu0 %v7209_v27  ;;  %3045 = vmatmul.bf16.gmra.mxu3 %v7662_v30  ;;  %v2196_v63 = vadd.f32 %v2195_v57, %v2027_v12  ;;  %v6349_v27 = vld [vmem:[%s8872_s7 + $0x34] sm:$0xf0] }
 0x39e   : > { %2234 = vmatmul.bf16.gmra.mxu1 %v9035_v33  ;;  %v2837_v37 = vpop.f32.mrf.mxu2  ;;  %v6063_v59 = vor.u32 %v6349_v27, %v6062_v49  ;;  %v6127_v61 = vor.u32 %v6365_v56, %v6126_v38 }
 0x39f   : > { %v2838_v2 = vadd.f32 %v2837_v37, %v7554_v1  ;;  %v7669_v52 = vpack.c.bf16 %v3624_v21, %v3622_v8  ;;  %v2341_v58 = vmul.f32 0.2, %v2196_v63 }
 0x3a0   : > { %v3006_v9 = vpop.f32.mrf.mxu3  ;;  %3996 = vmatpush.bf16.msra.mxu2 %v6063_v59  ;;  %4165 = vmatpush.bf16.msra.mxu3 %v6127_v61 }
 0x3a1   : > { %v3007_v4 = vadd.f32 %v3006_v9, %v2838_v2  ;;  %v2469_v33 = vmax.f32 %v2196_v63, %v2341_v58 }
 0x3a2   : > { %v2028_v35 = vpop.f32.mrf.mxu0 }
 0x3a3   : > { %v2029_v40 = vadd.f32 %v2028_v35, %v7388_v7  ;;  %v2197_v31 = vpop.f32.mrf.mxu1  ;;  %v3498_v37 = vmul.f32 0.2, %v3007_v4 }
 0x3a5   : > { %v2198_v54 = vadd.f32 %v2197_v31, %v2029_v40  ;;  %v3626_v38 = vmax.f32 %v3007_v4, %v3498_v37  ;;  %v9037_v40 = vld [vmem:[#allocation26_spill] sm:$0xff] }
 0x3a6   : > { %v2839_v57 = vpop.f32.mrf.mxu2 }
 0x3a7   : > { %v2343_v8 = vmul.f32 0.2, %v2198_v54  ;;  %v2840_v21 = vadd.f32 %v2839_v57, %v7554_v1 }
 0x3a8   : > { %v3008_v12 = vpop.f32.mrf.mxu3 }
 0x3a9   : > { %v2471_v2 = vmax.f32 %v2198_v54, %v2343_v8  ;;  %v3009_v9 = vadd.f32 %v3008_v12, %v2840_v21 }
 0x3aa   : > { %v2031_v49 = vpop.f32.mrf.mxu0 }
 0x3ab   : > { %v3500_v27 = vmul.f32 0.2, %v3009_v9  ;;  %v2200_v30 = vpop.f32.mrf.mxu1  ;;  %2881 = vmatmul.bf16.gmra.mxu2 %v7235_v20  ;;  %v7686_v35 = vpack.c.bf16 %v2471_v2, %v2469_v33  ;;  %v2032_v56 = vadd.f32 %v2031_v49, %v7388_v7 }
 0x3ad   : > { %9036 = vst [vmem:[#allocation23_spill] sm:$0xff] %v7686_v35  ;;  %v3628_v59 = vmax.f32 %v3009_v9, %v3500_v27  ;;  %2070 = vmatmul.bf16.gmra.mxu0 %v7225_v55  ;;  %3050 = vmatmul.bf16.gmra.mxu3 %v7686_v35  ;;  %v2201_v54 = vadd.f32 %v2200_v30, %v2032_v56  ;;  %v9038_v30 = vld [vmem:[#allocation29_spill] sm:$0xff] }
 0x3ae   : > { %2239 = vmatmul.bf16.gmra.mxu1 %v9037_v40  ;;  %v2842_v63 = vpop.f32.mrf.mxu2 }
 0x3af   : > { %v2843_v31 = vadd.f32 %v2842_v63, %v7554_v1  ;;  %v7693_v61 = vpack.c.bf16 %v3628_v59, %v3626_v38  ;;  %v2345_v12 = vmul.f32 0.2, %v2201_v54 }
 0x3b0   : > { %v3011_v58 = vpop.f32.mrf.mxu3 }
 0x3b1   : > { %v3012_v57 = vadd.f32 %v3011_v58, %v2843_v31  ;;  %v2473_v49 = vmax.f32 %v2201_v54, %v2345_v12 }
 0x3b2   : > { %v2033_v8 = vpop.f32.mrf.mxu0 }
 0x3b3   : > { %v2034_v4 = vadd.f32 %v2033_v8, %v7388_v7  ;;  %v2202_v21 = vpop.f32.mrf.mxu1  ;;  %v3502_v27 = vmul.f32 0.2, %v3012_v57 }
 0x3b5   : > { %v2203_v33 = vadd.f32 %v2202_v21, %v2034_v4  ;;  %v3630_v31 = vmax.f32 %v3012_v57, %v3502_v27  ;;  %v9040_v4 = vld [vmem:[#allocation27_spill] sm:$0xff]  ;;  %v9041_v21 = vld [vmem:[#allocation28_spill] sm:$0xff] }
 0x3b6   : > { %v2844_v37 = vpop.f32.mrf.mxu2 }
 0x3b7   : > { %v2347_v55 = vmul.f32 0.2, %v2203_v33  ;;  %v2845_v2 = vadd.f32 %v2844_v37, %v7554_v1 }
 0x3b8   : > { %v3013_v9 = vpop.f32.mrf.mxu3 }
 0x3b9   : > { %v2475_v40 = vmax.f32 %v2203_v33, %v2347_v55  ;;  %v3014_v63 = vadd.f32 %v3013_v9, %v2845_v2 }
 0x3ba   : > { %v2036_v38 = vpop.f32.mrf.mxu0 }
 0x3bb   : > { %v3504_v59 = vmul.f32 0.2, %v3014_v63  ;;  %v2205_v35 = vpop.f32.mrf.mxu1  ;;  %2886 = vmatmul.bf16.gmra.mxu2 %v9038_v30  ;;  %v7698_v56 = vpack.c.bf16 %v2475_v40, %v2473_v49  ;;  %v2037_v8 = vadd.f32 %v2036_v38, %v7388_v7 }
 0x3bd   : > { %9039 = vst [vmem:[#allocation25_spill] sm:$0xff] %v7698_v56  ;;  %v3632_v58 = vmax.f32 %v3014_v63, %v3504_v59  ;;  %2075 = vmatmul.bf16.gmra.mxu0 %v9040_v4  ;;  %3055 = vmatmul.bf16.gmra.mxu3 %v7698_v56  ;;  %v2206_v55 = vadd.f32 %v2205_v35, %v2037_v8 }
 0x3be   : > { %2244 = vmatmul.bf16.gmra.mxu1 %v9041_v21  ;;  %v2847_v54 = vpop.f32.mrf.mxu2 }
 0x3bf   : > { %v2848_v12 = vadd.f32 %v2847_v54, %v7554_v1  ;;  %v7705_v33 = vpack.c.bf16 %v3632_v58, %v3630_v31  ;;  %v2349_v27 = vmul.f32 0.2, %v2206_v55 }
 0x3c0   : > { %v3016_v37 = vpop.f32.mrf.mxu3 }
 0x3c1   : > { %9042 = vst [vmem:[#allocation26_spill] sm:$0xff] %v7705_v33  ;;  %v3017_v2 = vadd.f32 %v3016_v37, %v2848_v12  ;;  %v2477_v21 = vmax.f32 %v2206_v55, %v2349_v27 }
 0x3c2   : > { %v2038_v9 = vpop.f32.mrf.mxu0 }
 0x3c3   : > { %v2039_v57 = vadd.f32 %v2038_v9, %v7388_v7  ;;  %v2207_v49 = vpop.f32.mrf.mxu1  ;;  %v3506_v56 = vmul.f32 0.2, %v3017_v2 }
 0x3c5   : > { %v2208_v40 = vadd.f32 %v2207_v49, %v2039_v57  ;;  %v3634_v8 = vmax.f32 %v3017_v2, %v3506_v56 }
 0x3c6   : > { %v2849_v63 = vpop.f32.mrf.mxu2 }
 0x3c7   : > { %v2351_v38 = vmul.f32 0.2, %v2208_v40  ;;  %v2850_v59 = vadd.f32 %v2849_v63, %v7554_v1  ;;  %v5976_v63 = vld [vmem:[%s8870_s5 + $0x88] sm:$0xf0] }
 0x3c8   : > { %v3018_v4 = vpop.f32.mrf.mxu3 }
 0x3c9   : > { %v2479_v30 = vmax.f32 %v2208_v40, %v2351_v38  ;;  %v3019_v54 = vadd.f32 %v3018_v4, %v2850_v59 }
 0x3ca   : > { %v2041_v31 = vpop.f32.mrf.mxu0 }
 0x3cb   : > { %v3508_v58 = vmul.f32 0.2, %v3019_v54  ;;  %v2210_v33 = vpop.f32.mrf.mxu1  ;;  %2891 = vmatmul.bf16.gmra.mxu2 %v7279_v51  ;;  %v7710_v35 = vpack.c.bf16 %v2479_v30, %v2477_v21  ;;  %v2042_v37 = vadd.f32 %v2041_v31, %v7388_v7  ;;  %v6310_v30 = vld [vmem:[%s8870_s5 + $0x4] sm:$0xf] }
 0x3cd   : > { %v3636_v12 = vmax.f32 %v3019_v54, %v3508_v58  ;;  %2080 = vmatmul.bf16.gmra.mxu0 %v7269_v28  ;;  %3060 = vmatmul.bf16.gmra.mxu3 %v7710_v35  ;;  %v2211_v27 = vadd.f32 %v2210_v33, %v2042_v37  ;;  %v5912_v28 = vld [vmem:[%s8870_s5 + $0x8] sm:$0xf0] }
 0x3ce   : > { %2249 = vmatmul.bf16.gmra.mxu1 %v7271_v60  ;;  %v2852_v55 = vpop.f32.mrf.mxu2  ;;  %v6326_v60 = vld [vmem:[%s8870_s5 + $0x84] sm:$0xf]  ;;  %v5915_v2 = vor.u32 %v6310_v30, %v5912_v28 }
 0x3cf   : > { %v2853_v9 = vadd.f32 %v2852_v55, %v7554_v1  ;;  %v7717_v57 = vpack.c.bf16 %v3636_v12, %v3634_v8  ;;  %v5979_v59 = vor.u32 %v6326_v60, %v5976_v63  ;;  %v2353_v4 = vmul.f32 0.2, %v2211_v27 }
 0x3d0   : > { %v3021_v49 = vpop.f32.mrf.mxu3  ;;  %3143 = vmatpush.bf16.msra.mxu0 %v5915_v2 }
 0x3d1   : > { %9043 = vst [vmem:[#allocation27_spill] sm:$0xff] %v7717_v57  ;;  %v3022_v40 = vadd.f32 %v3021_v49, %v2853_v9  ;;  %3312 = vmatpush.bf16.msra.mxu1 %v5979_v59  ;;  %v2481_v12 = vmax.f32 %v2211_v27, %v2353_v4 }
 0x3d2   : > { %v2043_v56 = vpop.f32.mrf.mxu0 }
 0x3d3   : > { %v2044_v33 = vadd.f32 %v2043_v56, %v7388_v7  ;;  %v2212_v38 = vpop.f32.mrf.mxu1  ;;  %v3510_v37 = vmul.f32 0.2, %v3022_v40 }
 0x3d5   : > { %v2213_v21 = vadd.f32 %v2212_v38, %v2044_v33  ;;  %v3638_v60 = vmax.f32 %v3022_v40, %v3510_v37  ;;  %v6054_v40 = vld [vmem:[%s8872_s7 + $0x20] sm:$0xf] }
 0x3d6   : > { %v2854_v54 = vpop.f32.mrf.mxu2 }
 0x3d7   : > { %v2355_v31 = vmul.f32 0.2, %v2213_v21  ;;  %v2855_v58 = vadd.f32 %v2854_v54, %v7554_v1 }
 0x3d8   : > { %v3023_v8 = vpop.f32.mrf.mxu3 }
 0x3d9   : > { %v2483_v55 = vmax.f32 %v2213_v21, %v2355_v31  ;;  %v3024_v9 = vadd.f32 %v3023_v8, %v2855_v58  ;;  %v6363_v58 = vld [vmem:[%s8872_s7 + $0xa4] sm:$0xf0] }
 0x3da   : > { %v2046_v49 = vpop.f32.mrf.mxu0 }
 0x3db   : > { %v3512_v30 = vmul.f32 0.2, %v3024_v9  ;;  %v2215_v28 = vpop.f32.mrf.mxu1  ;;  %2896 = vmatmul.bf16.gmra.mxu2 %v7307_v23  ;;  %v7734_v56 = vpack.c.bf16 %v2483_v55, %v2481_v12  ;;  %v2047_v63 = vadd.f32 %v2046_v49, %v7388_v7 }
 0x3dd   : > { %v3640_v2 = vmax.f32 %v3024_v9, %v3512_v30  ;;  %2085 = vmatmul.bf16.gmra.mxu0 %v7297_v29  ;;  %3065 = vmatmul.bf16.gmra.mxu3 %v7734_v56  ;;  %v2216_v4 = vadd.f32 %v2215_v28, %v2047_v63  ;;  %v6347_v29 = vld [vmem:[%s8872_s7 + $0x24] sm:$0xf0] }
 0x3de   : > { %2254 = vmatmul.bf16.gmra.mxu1 %v7299_v16  ;;  %v2857_v27 = vpop.f32.mrf.mxu2  ;;  %v6118_v16 = vld [vmem:[%s8872_s7 + $0xa0] sm:$0xf]  ;;  %v6055_v31 = vor.u32 %v6347_v29, %v6054_v40 }
 0x3df   : > { %v2858_v33 = vadd.f32 %v2857_v27, %v7554_v1  ;;  %v7741_v38 = vpack.c.bf16 %v3640_v2, %v3638_v60  ;;  %v6119_v37 = vor.u32 %v6363_v58, %v6118_v16  ;;  %v2357_v55 = vmul.f32 0.2, %v2216_v4 }
 0x3e0   : > { %v3026_v59 = vpop.f32.mrf.mxu3  ;;  %3997 = vmatpush.bf16.msra.mxu2 %v6055_v31 }
 0x3e1   : > { %v3027_v21 = vadd.f32 %v3026_v59, %v2858_v33  ;;  %4166 = vmatpush.bf16.msra.mxu3 %v6119_v37  ;;  %v2485_v2 = vmax.f32 %v2216_v4, %v2357_v55 }
 0x3e2   : > { %v2048_v54 = vpop.f32.mrf.mxu0 }
 0x3e3   : > { %v2049_v8 = vadd.f32 %v2048_v54, %v7388_v7  ;;  %v2217_v12 = vpop.f32.mrf.mxu1  ;;  %v3514_v63 = vmul.f32 0.2, %v3027_v21 }
 0x3e5   : > { %v2218_v9 = vadd.f32 %v2217_v12, %v2049_v8  ;;  %v3642_v16 = vmax.f32 %v3027_v21, %v3514_v63  ;;  %v9045_v8 = vld [vmem:[#allocation30_spill] sm:$0xff] }
 0x3e6   : > { %v2859_v49 = vpop.f32.mrf.mxu2 }
 0x3e7   : > { %v2359_v30 = vmul.f32 0.2, %v2218_v9  ;;  %v2860_v28 = vadd.f32 %v2859_v49, %v7554_v1 }
 0x3e8   : > { %v3028_v60 = vpop.f32.mrf.mxu3 }
 0x3e9   : > { %v2487_v27 = vmax.f32 %v2218_v9, %v2359_v30  ;;  %v3029_v33 = vadd.f32 %v3028_v60, %v2860_v28 }
 0x3ea   : > { %v2051_v59 = vpop.f32.mrf.mxu0 }
 0x3eb   : > { %v3516_v40 = vmul.f32 0.2, %v3029_v33  ;;  %v2220_v29 = vpop.f32.mrf.mxu1  ;;  %2901 = vmatmul.bf16.gmra.mxu2 %v7323_v50  ;;  %v7758_v54 = vpack.c.bf16 %v2487_v27, %v2485_v2  ;;  %v2052_v58 = vadd.f32 %v2051_v59, %v7388_v7 }
 0x3ed   : > { %9044 = vst [vmem:[#allocation28_spill] sm:$0xff] %v7758_v54  ;;  %v3644_v31 = vmax.f32 %v3029_v33, %v3516_v40  ;;  %2090 = vmatmul.bf16.gmra.mxu0 %v7313_v39  ;;  %3070 = vmatmul.bf16.gmra.mxu3 %v7758_v54  ;;  %v2221_v9 = vadd.f32 %v2220_v29, %v2052_v58  ;;  %v9046_v29 = vld [vmem:[#allocation33_spill] sm:$0xff] }
 0x3ee   : > { %2259 = vmatmul.bf16.gmra.mxu1 %v9045_v8  ;;  %v2862_v4 = vpop.f32.mrf.mxu2 }
 0x3ef   : > { %v2863_v12 = vadd.f32 %v2862_v4, %v7554_v1  ;;  %v7765_v37 = vpack.c.bf16 %v3644_v31, %v3642_v16  ;;  %v2361_v60 = vmul.f32 0.2, %v2221_v9 }
 0x3f0   : > { %v3031_v55 = vpop.f32.mrf.mxu3 }
 0x3f1   : > { %v3032_v49 = vadd.f32 %v3031_v55, %v2863_v12  ;;  %v2489_v59 = vmax.f32 %v2221_v9, %v2361_v60 }
 0x3f2   : > { %v2053_v30 = vpop.f32.mrf.mxu0 }
 0x3f3   : > { %v2054_v21 = vadd.f32 %v2053_v30, %v7388_v7  ;;  %v2222_v28 = vpop.f32.mrf.mxu1  ;;  %v3518_v40 = vmul.f32 0.2, %v3032_v49 }
 0x3f5   : > { %v2223_v2 = vadd.f32 %v2222_v28, %v2054_v21  ;;  %v3646_v12 = vmax.f32 %v3032_v49, %v3518_v40  ;;  %v9048_v21 = vld [vmem:[#allocation31_spill] sm:$0xff]  ;;  %v9049_v28 = vld [vmem:[#allocation32_spill] sm:$0xff] }
 0x3f6   : > { %v2864_v63 = vpop.f32.mrf.mxu2 }
 0x3f7   : > { %v2363_v39 = vmul.f32 0.2, %v2223_v2  ;;  %v2865_v27 = vadd.f32 %v2864_v63, %v7554_v1 }
 0x3f8   : > { %v3033_v33 = vpop.f32.mrf.mxu3 }
 0x3f9   : > { %v2491_v8 = vmax.f32 %v2223_v2, %v2363_v39  ;;  %v3034_v4 = vadd.f32 %v3033_v33, %v2865_v27 }
 0x3fa   : > { %v2056_v16 = vpop.f32.mrf.mxu0 }
 0x3fb   : > { %v3520_v31 = vmul.f32 0.2, %v3034_v4  ;;  %v2225_v54 = vpop.f32.mrf.mxu1  ;;  %2906 = vmatmul.bf16.gmra.mxu2 %v9046_v29  ;;  %v7770_v58 = vpack.c.bf16 %v2491_v8, %v2489_v59  ;;  %v2057_v30 = vadd.f32 %v2056_v16, %v7388_v7 }
 0x3fd   : > { %9047 = vst [vmem:[#allocation30_spill] sm:$0xff] %v7770_v58  ;;  %v3648_v55 = vmax.f32 %v3034_v4, %v3520_v31  ;;  %2095 = vmatmul.bf16.gmra.mxu0 %v9048_v21  ;;  %3075 = vmatmul.bf16.gmra.mxu3 %v7770_v58  ;;  %v2226_v39 = vadd.f32 %v2225_v54, %v2057_v30 }
 0x3fe   : > { %2264 = vmatmul.bf16.gmra.mxu1 %v9049_v28  ;;  %v2867_v9 = vpop.f32.mrf.mxu2 }
 0x3ff   : > { %v2868_v60 = vadd.f32 %v2867_v9, %v7554_v1  ;;  %v7777_v2 = vpack.c.bf16 %v3648_v55, %v3646_v12  ;;  %v2365_v40 = vmul.f32 0.2, %v2226_v39 }
 0x400   : > { %v3036_v63 = vpop.f32.mrf.mxu3 }
 0x401   : > { %9050 = vst [vmem:[#allocation31_spill] sm:$0xff] %v7777_v2  ;;  %v3037_v27 = vadd.f32 %v3036_v63, %v2868_v60  ;;  %v2493_v28 = vmax.f32 %v2226_v39, %v2365_v40 }
 0x402   : > { %v2058_v33 = vpop.f32.mrf.mxu0 }
 0x403   : > { %v2059_v49 = vadd.f32 %v2058_v33, %v7388_v7  ;;  %v2227_v59 = vpop.f32.mrf.mxu1  ;;  %v3522_v58 = vmul.f32 0.2, %v3037_v27 }
 0x405   : > { %v2228_v8 = vadd.f32 %v2227_v59, %v2059_v49  ;;  %v3650_v30 = vmax.f32 %v3037_v27, %v3522_v58 }
 0x406   : > { %v2869_v4 = vpop.f32.mrf.mxu2 }
 0x407   : > { %v2367_v16 = vmul.f32 0.2, %v2228_v8  ;;  %v2870_v31 = vadd.f32 %v2869_v4, %v7554_v1  ;;  %v6160_v4 = vld [vmem:[%s8872_s7 + $0xf8] sm:$0xf0] }
 0x408   : > { %v3038_v21 = vpop.f32.mrf.mxu3 }
 0x409   : > { %v2495_v29 = vmax.f32 %v2228_v8, %v2367_v16  ;;  %v3039_v9 = vadd.f32 %v3038_v21, %v2870_v31 }
 0x40a   : > { %v2061_v12 = vpop.f32.mrf.mxu0 }
 0x40b   : > { %v3524_v55 = vmul.f32 0.2, %v3039_v9  ;;  %v2230_v2 = vpop.f32.mrf.mxu1  ;;  %2911 = vmatmul.bf16.gmra.mxu2 %v7367_v47  ;;  %v7782_v54 = vpack.c.bf16 %v2495_v29, %v2493_v28  ;;  %v2062_v63 = vadd.f32 %v2061_v12, %v7388_v7  ;;  %v6356_v29 = vld [vmem:[%s8872_s7 + $0x74] sm:$0xf] }
 0x40d   : > { %v3652_v60 = vmax.f32 %v3039_v9, %v3524_v55  ;;  %2100 = vmatmul.bf16.gmra.mxu0 %v7357_v32  ;;  %3080 = vmatmul.bf16.gmra.mxu3 %v7782_v54  ;;  %v2231_v40 = vadd.f32 %v2230_v2, %v2062_v63  ;;  %v6096_v32 = vld [vmem:[%s8872_s7 + $0x78] sm:$0xf0] }
 0x40e   : > { %2269 = vmatmul.bf16.gmra.mxu1 %v7359_v13  ;;  %v2872_v39 = vpop.f32.mrf.mxu2  ;;  %v6372_v13 = vld [vmem:[%s8872_s7 + $0xf4] sm:$0xf]  ;;  %v6099_v27 = vor.u32 %v6356_v29, %v6096_v32 }
 0x40f   : > { %v2873_v33 = vadd.f32 %v2872_v39, %v7554_v1  ;;  %v7789_v49 = vpack.c.bf16 %v3652_v60, %v3650_v30  ;;  %v6163_v31 = vor.u32 %v6372_v13, %v6160_v4  ;;  %v2369_v21 = vmul.f32 0.2, %v2231_v40 }
 0x410   : > { %v3041_v59 = vpop.f32.mrf.mxu3  ;;  %4330 = vmatpush.bf16.msrb.mxu0 %v6099_v27 }
 0x411   : > { %v3042_v8 = vadd.f32 %v3041_v59, %v2873_v33  ;;  %4499 = vmatpush.bf16.msrb.mxu1 %v6163_v31  ;;  %v2497_v60 = vmax.f32 %v2231_v40, %v2369_v21 }
 0x412   : > { %v2063_v58 = vpop.f32.mrf.mxu0 }
 0x413   : > { %v2064_v2 = vadd.f32 %v2063_v58, %v7388_v7  ;;  %v2232_v16 = vpop.f32.mrf.mxu1  ;;  %v3526_v63 = vmul.f32 0.2, %v3042_v8 }
 0x415   : > { %v2233_v28 = vadd.f32 %v2232_v16, %v2064_v2  ;;  %v3654_v13 = vmax.f32 %v3042_v8, %v3526_v63  ;;  %v6046_v8 = vld [vmem:[%s8872_s7 + $0x10] sm:$0xf] }
 0x416   : > { %v2874_v9 = vpop.f32.mrf.mxu2 }
 0x417   : > { %v2371_v12 = vmul.f32 0.2, %v2233_v28  ;;  %v2875_v55 = vadd.f32 %v2874_v9, %v7554_v1 }
 0x418   : > { %v3043_v30 = vpop.f32.mrf.mxu3 }
 0x419   : > { %v2499_v39 = vmax.f32 %v2233_v28, %v2371_v12  ;;  %v3044_v33 = vadd.f32 %v3043_v30, %v2875_v55  ;;  %v6361_v55 = vld [vmem:[%s8872_s7 + $0x94] sm:$0xf0] }
 0x41a   : > { %v2066_v59 = vpop.f32.mrf.mxu0 }
 0x41b   : > { %v3528_v29 = vmul.f32 0.2, %v3044_v33  ;;  %v2235_v32 = vpop.f32.mrf.mxu1  ;;  %2916 = vmatmul.bf16.gmra.mxu2 %v7400_v53  ;;  %v7806_v58 = vpack.c.bf16 %v2499_v39, %v2497_v60  ;;  %v2067_v4 = vadd.f32 %v2066_v59, %v7388_v7 }
 0x41d   : > { %v3656_v27 = vmax.f32 %v3044_v33, %v3528_v29  ;;  %2105 = vmatmul.bf16.gmra.mxu0 %v7390_v5  ;;  %3085 = vmatmul.bf16.gmra.mxu3 %v7806_v58  ;;  %v2236_v21 = vadd.f32 %v2235_v32, %v2067_v4  ;;  %v6345_v5 = vld [vmem:[%s8872_s7 + $0x14] sm:$0xf0] }
 0x41e   : > { %2274 = vmatmul.bf16.gmra.mxu1 %v7392_v41  ;;  %v2877_v40 = vpop.f32.mrf.mxu2  ;;  %v6110_v41 = vld [vmem:[%s8872_s7 + $0x90] sm:$0xf]  ;;  %v6047_v12 = vor.u32 %v6345_v5, %v6046_v8 }
 0x41f   : > { %v2878_v2 = vadd.f32 %v2877_v40, %v7554_v1  ;;  %v7813_v16 = vpack.c.bf16 %v3656_v27, %v3654_v13  ;;  %v6111_v63 = vor.u32 %v6361_v55, %v6110_v41  ;;  %v2373_v39 = vmul.f32 0.2, %v2236_v21 }
 0x420   : > { %v3046_v31 = vpop.f32.mrf.mxu3  ;;  %3998 = vmatpush.bf16.msra.mxu2 %v6047_v12 }
 0x421   : > { %v3047_v28 = vadd.f32 %v3046_v31, %v2878_v2  ;;  %4167 = vmatpush.bf16.msra.mxu3 %v6111_v63  ;;  %v2501_v27 = vmax.f32 %v2236_v21, %v2373_v39 }
 0x422   : > { %v2068_v9 = vpop.f32.mrf.mxu0 }
 0x423   : > { %v2069_v30 = vadd.f32 %v2068_v9, %v7388_v7  ;;  %v2237_v60 = vpop.f32.mrf.mxu1  ;;  %v3530_v4 = vmul.f32 0.2, %v3047_v28 }
 0x425   : > { %v2238_v33 = vadd.f32 %v2237_v60, %v2069_v30  ;;  %v3658_v41 = vmax.f32 %v3047_v28, %v3530_v4 }
 0x426   : > { %v2879_v59 = vpop.f32.mrf.mxu2 }
 0x427   : > { %v2375_v29 = vmul.f32 0.2, %v2238_v33  ;;  %v2880_v32 = vadd.f32 %v2879_v59, %v7554_v1 }
 0x428   : > { %v3048_v13 = vpop.f32.mrf.mxu3 }
 0x429   : > { %v2503_v40 = vmax.f32 %v2238_v33, %v2375_v29  ;;  %v3049_v2 = vadd.f32 %v3048_v13, %v2880_v32 }
 0x42a   : > { %v2071_v31 = vpop.f32.mrf.mxu0 }
 0x42b   : > { %v3532_v8 = vmul.f32 0.2, %v3049_v2  ;;  %v2240_v5 = vpop.f32.mrf.mxu1  ;;  %2921 = vmatmul.bf16.gmra.mxu2 %v7412_v46  ;;  %v7830_v9 = vpack.c.bf16 %v2503_v40, %v2501_v27  ;;  %v2072_v55 = vadd.f32 %v2071_v31, %v7388_v7 }
 0x42d   : > { %v3660_v12 = vmax.f32 %v3049_v2, %v3532_v8  ;;  %3090 = vmatmul.bf16.gmra.mxu3 %v7830_v9  ;;  %3144 = vmatmul.bf16.vlgmr.msra.gmra.mxu0 %v6910_v22  ;;  %v2241_v39 = vadd.f32 %v2240_v5, %v2072_v55 }
 0x42e   : > { %3313 = vmatmul.bf16.vlgmr.msra.gmra.mxu1 %v7404_v11  ;;  %v2882_v21 = vpop.f32.mrf.mxu2 }
 0x42f   : > { %v2883_v30 = vadd.f32 %v2882_v21, %v7554_v1  ;;  %v7837_v60 = vpack.c.bf16 %v3660_v12, %v3658_v41  ;;  %v2377_v32 = vmul.f32 0.2, %v2241_v39 }
 0x430   : > { %v3051_v63 = vpop.f32.mrf.mxu3 }
 0x431   : > { %v3052_v33 = vadd.f32 %v3051_v63, %v2883_v30  ;;  %v2505_v11 = vmax.f32 %v2241_v39, %v2377_v32 }
 0x432   : > { %v2073_v59 = vpop.f32.mrf.mxu0 }
 0x433   : > { %v2074_v28 = vadd.f32 %v2073_v59, %v7388_v7  ;;  %v2242_v29 = vpop.f32.mrf.mxu1  ;;  %v3534_v2 = vmul.f32 0.2, %v3052_v33 }
 0x435   : > { %v2243_v13 = vadd.f32 %v2242_v29, %v2074_v28  ;;  %v3662_v55 = vmax.f32 %v3052_v33, %v3534_v2 }
 0x436   : > { %v2884_v27 = vpop.f32.mrf.mxu2 }
 0x437   : > { %v2379_v4 = vmul.f32 0.2, %v2243_v13  ;;  %v2885_v22 = vadd.f32 %v2884_v27, %v7554_v1 }
 0x438   : > { %v3053_v40 = vpop.f32.mrf.mxu3 }
 0x439   : > { %v2507_v31 = vmax.f32 %v2243_v13, %v2379_v4  ;;  %v3054_v8 = vadd.f32 %v3053_v40, %v2885_v22 }
 0x43a   : > { %v2076_v41 = vpop.f32.mrf.mxu0 }
 0x43b   : > { %v3536_v12 = vmul.f32 0.2, %v3054_v8  ;;  %v2245_v21 = vpop.f32.mrf.mxu1  ;;  %2926 = vmatmul.bf16.gmra.mxu2 %v7424_v14  ;;  %v7842_v5 = vpack.c.bf16 %v2507_v31, %v2505_v11  ;;  %v2077_v63 = vadd.f32 %v2076_v41, %v7388_v7 }
 0x43d   : > { %v3664_v30 = vmax.f32 %v3054_v8, %v3536_v12  ;;  %3095 = vmatmul.bf16.gmra.mxu3 %v7842_v5  ;;  %3149 = vmatmul.bf16.gmra.mxu0 %v6939_v24  ;;  %v2246_v32 = vadd.f32 %v2245_v21, %v2077_v63 }
 0x43e   : > { %3318 = vmatmul.bf16.gmra.mxu1 %v7417_v0  ;;  %v2887_v39 = vpop.f32.mrf.mxu2 }
 0x43f   : > { %v2888_v59 = vadd.f32 %v2887_v39, %v7554_v1  ;;  %v7849_v28 = vpack.c.bf16 %v3664_v30, %v3662_v55  ;;  %v2381_v22 = vmul.f32 0.2, %v2246_v32 }
 0x440   : > { %v3056_v29 = vpop.f32.mrf.mxu3 }
 0x441   : > { %v3057_v13 = vadd.f32 %v3056_v29, %v2888_v59  ;;  %v2509_v0 = vmax.f32 %v2246_v32, %v2381_v22 }
 0x442   : > { %v2078_v27 = vpop.f32.mrf.mxu0 }
 0x443   : > { %v2079_v33 = vadd.f32 %v2078_v27, %v7388_v7  ;;  %v2247_v4 = vpop.f32.mrf.mxu1  ;;  %v3538_v8 = vmul.f32 0.2, %v3057_v13 }
 0x445   : > { %v2248_v40 = vadd.f32 %v2247_v4, %v2079_v33  ;;  %v3666_v63 = vmax.f32 %v3057_v13, %v3538_v8  ;;  %v6354_v13 = vld [vmem:[%s8872_s7 + $0x64] sm:$0xf] }
 0x446   : > { %v2889_v11 = vpop.f32.mrf.mxu2 }
 0x447   : > { %v2383_v2 = vmul.f32 0.2, %v2248_v40  ;;  %v2890_v24 = vadd.f32 %v2889_v11, %v7554_v1  ;;  %v6088_v11 = vld [vmem:[%s8872_s7 + $0x68] sm:$0xf0] }
 0x448   : > { %v3058_v31 = vpop.f32.mrf.mxu3 }
 0x449   : > { %v2511_v41 = vmax.f32 %v2248_v40, %v2383_v2  ;;  %v3059_v12 = vadd.f32 %v3058_v31, %v2890_v24  ;;  %v6091_v2 = vor.u32 %v6354_v13, %v6088_v11  ;;  %v6152_v24 = vld [vmem:[%s8872_s7 + $0xe8] sm:$0xf0] }
 0x44a   : > { %v2081_v55 = vpop.f32.mrf.mxu0 }
 0x44b   : > { %v3540_v30 = vmul.f32 0.2, %v3059_v12  ;;  %v2250_v39 = vpop.f32.mrf.mxu1  ;;  %2931 = vmatmul.bf16.gmra.mxu2 %v7448_v62  ;;  %v7854_v21 = vpack.c.bf16 %v2511_v41, %v2509_v0  ;;  %v2082_v29 = vadd.f32 %v2081_v55, %v7388_v7  ;;  %4331 = vmatpush.bf16.msrb.mxu0 %v6091_v2 }
 0x44d   : > { %v3668_v59 = vmax.f32 %v3059_v12, %v3540_v30  ;;  %3100 = vmatmul.bf16.gmra.mxu3 %v7854_v21  ;;  %3154 = vmatmul.bf16.gmra.mxu0 %v6966_v25  ;;  %v2251_v22 = vadd.f32 %v2250_v39, %v2082_v29  ;;  %v6370_v25 = vld [vmem:[%s8872_s7 + $0xe4] sm:$0xf] }
 0x44e   : > { %3323 = vmatmul.bf16.gmra.mxu1 %v7441_v42  ;;  %v2892_v32 = vpop.f32.mrf.mxu2  ;;  %v6155_v8 = vor.u32 %v6370_v25, %v6152_v24 }
 0x44f   : > { %v2893_v27 = vadd.f32 %v2892_v32, %v7554_v1  ;;  %v7861_v33 = vpack.c.bf16 %v3668_v59, %v3666_v63  ;;  %v2385_v41 = vmul.f32 0.2, %v2251_v22 }
 0x450   : > { %v3061_v4 = vpop.f32.mrf.mxu3  ;;  %4500 = vmatpush.bf16.msrb.mxu1 %v6155_v8 }
 0x451   : > { %v3062_v40 = vadd.f32 %v3061_v4, %v2893_v27  ;;  %v2513_v59 = vmax.f32 %v2251_v22, %v2385_v41 }
 0x452   : > { %v2083_v42 = vpop.f32.mrf.mxu0 }
 0x453   : > { %v2084_v31 = vadd.f32 %v2083_v42, %v7388_v7  ;;  %v2252_v0 = vpop.f32.mrf.mxu1  ;;  %v3542_v29 = vmul.f32 0.2, %v3062_v40 }
 0x455   : > { %v2253_v12 = vadd.f32 %v2252_v0, %v2084_v31  ;;  %v3670_v25 = vmax.f32 %v3062_v40, %v3542_v29  ;;  %v6038_v40 = vld [vmem:[%s8872_s7] sm:$0xf] }
 0x456   : > { %v2894_v55 = vpop.f32.mrf.mxu2 }
 0x457   : > { %v2387_v30 = vmul.f32 0.2, %v2253_v12  ;;  %v2895_v39 = vadd.f32 %v2894_v55, %v7554_v1  ;;  %v6343_v55 = vld [vmem:[%s8872_s7 + $0x4] sm:$0xf0] }
 0x458   : > { %v3063_v63 = vpop.f32.mrf.mxu3 }
 0x459   : > { %v2515_v32 = vmax.f32 %v2253_v12, %v2387_v30  ;;  %v3064_v27 = vadd.f32 %v3063_v63, %v2895_v39  ;;  %v6039_v30 = vor.u32 %v6343_v55, %v6038_v40  ;;  %v6359_v39 = vld [vmem:[%s8872_s7 + $0x84] sm:$0xf0] }
 0x45a   : > { %v2086_v4 = vpop.f32.mrf.mxu0 }
 0x45b   : > { %v3544_v13 = vmul.f32 0.2, %v3064_v27  ;;  %v2255_v11 = vpop.f32.mrf.mxu1  ;;  %2936 = vmatmul.bf16.gmra.mxu2 %v7472_v15  ;;  %v7878_v42 = vpack.c.bf16 %v2515_v32, %v2513_v59  ;;  %v2087_v24 = vadd.f32 %v2086_v4, %v7388_v7 }
 0x45c   : > { %3999 = vmatpush.bf16.msra.mxu2 %v6039_v30 }
 0x45d   : > { %v3672_v2 = vmax.f32 %v3064_v27, %v3544_v13  ;;  %3105 = vmatmul.bf16.gmra.mxu3 %v7878_v42  ;;  %3159 = vmatmul.bf16.gmra.mxu0 %v6981_v18  ;;  %v2256_v41 = vadd.f32 %v2255_v11, %v2087_v24  ;;  %v6102_v18 = vld [vmem:[%s8872_s7 + $0x80] sm:$0xf] }
 0x45e   : > { %3328 = vmatmul.bf16.gmra.mxu1 %v7465_v6  ;;  %v2897_v22 = vpop.f32.mrf.mxu2  ;;  %v6103_v29 = vor.u32 %v6359_v39, %v6102_v18 }
 0x45f   : > { %v2898_v31 = vadd.f32 %v2897_v22, %v7554_v1  ;;  %v7885_v0 = vpack.c.bf16 %v3672_v2, %v3670_v25  ;;  %v2389_v32 = vmul.f32 0.2, %v2256_v41 }
 0x460   : > { %v3066_v8 = vpop.f32.mrf.mxu3  ;;  %4168 = vmatpush.bf16.msra.mxu3 %v6103_v29 }
 0x461   : > { %v3067_v12 = vadd.f32 %v3066_v8, %v2898_v31  ;;  %v2517_v2 = vmax.f32 %v2256_v41, %v2389_v32 }
 0x462   : > { %v2088_v6 = vpop.f32.mrf.mxu0 }
 0x463   : > { %v2089_v63 = vadd.f32 %v2088_v6, %v7388_v7  ;;  %v2257_v59 = vpop.f32.mrf.mxu1  ;;  %v3546_v24 = vmul.f32 0.2, %v3067_v12 }
 0x465   : > { %v2258_v27 = vadd.f32 %v2257_v59, %v2089_v63  ;;  %v3674_v18 = vmax.f32 %v3067_v12, %v3546_v24 }
 0x466   : > { %v2899_v4 = vpop.f32.mrf.mxu2 }
 0x467   : > { %v2391_v13 = vmul.f32 0.2, %v2258_v27  ;;  %v2900_v11 = vadd.f32 %v2899_v4, %v7554_v1 }
 0x468   : > { %v3068_v25 = vpop.f32.mrf.mxu3 }
 0x469   : > { %v2519_v22 = vmax.f32 %v2258_v27, %v2391_v13  ;;  %v3069_v31 = vadd.f32 %v3068_v25, %v2900_v11 }
 0x46a   : > { %v2091_v8 = vpop.f32.mrf.mxu0 }
 0x46b   : > { %v3548_v40 = vmul.f32 0.2, %v3069_v31  ;;  %v2260_v55 = vpop.f32.mrf.mxu1  ;;  %2941 = vmatmul.bf16.gmra.mxu2 %v7484_v36  ;;  %v7902_v6 = vpack.c.bf16 %v2519_v22, %v2517_v2  ;;  %v2092_v39 = vadd.f32 %v2091_v8, %v7388_v7 }
 0x46d   : > { %v3676_v30 = vmax.f32 %v3069_v31, %v3548_v40  ;;  %3110 = vmatmul.bf16.gmra.mxu3 %v7902_v6  ;;  %3164 = vmatmul.bf16.gmra.mxu0 %v6996_v19  ;;  %v2261_v32 = vadd.f32 %v2260_v55, %v2092_v39 }
 0x46e   : > { %3333 = vmatmul.bf16.gmra.mxu1 %v7477_v26  ;;  %v2902_v41 = vpop.f32.mrf.mxu2 }
 0x46f   : > { %v2903_v63 = vadd.f32 %v2902_v41, %v7554_v1  ;;  %v7909_v59 = vpack.c.bf16 %v3676_v30, %v3674_v18  ;;  %v2393_v11 = vmul.f32 0.2, %v2261_v32 }
 0x470   : > { %v3071_v29 = vpop.f32.mrf.mxu3 }
 0x471   : > { %v3072_v27 = vadd.f32 %v3071_v29, %v2903_v63  ;;  %v2521_v26 = vmax.f32 %v2261_v32, %v2393_v11 }
 0x472   : > { %v2093_v4 = vpop.f32.mrf.mxu0 }
 0x473   : > { %v2094_v12 = vadd.f32 %v2093_v4, %v7388_v7  ;;  %v2262_v13 = vpop.f32.mrf.mxu1  ;;  %v3550_v31 = vmul.f32 0.2, %v3072_v27 }
 0x475   : > { %v2263_v25 = vadd.f32 %v2262_v13, %v2094_v12  ;;  %v3678_v39 = vmax.f32 %v3072_v27, %v3550_v31 }
 0x476   : > { %v2904_v2 = vpop.f32.mrf.mxu2 }
 0x477   : > { %v2395_v24 = vmul.f32 0.2, %v2263_v25  ;;  %v2905_v19 = vadd.f32 %v2904_v2, %v7554_v1 }
 0x478   : > { %v3073_v22 = vpop.f32.mrf.mxu3 }
 0x479   : > { %v2523_v8 = vmax.f32 %v2263_v25, %v2395_v24  ;;  %v3074_v40 = vadd.f32 %v3073_v22, %v2905_v19 }
 0x47a   : > { %v2096_v18 = vpop.f32.mrf.mxu0 }
 0x47b   : > { %v3552_v30 = vmul.f32 0.2, %v3074_v40  ;;  %v2265_v41 = vpop.f32.mrf.mxu1  ;;  %2946 = vmatmul.bf16.gmra.mxu2 %v7496_v17  ;;  %v7914_v55 = vpack.c.bf16 %v2523_v8, %v2521_v26  ;;  %v2097_v29 = vadd.f32 %v2096_v18, %v7388_v7 }
 0x47d   : > { %9051 = vst [vmem:[#allocation32_spill] sm:$0xff] %v7914_v55  ;;  %v3680_v63 = vmax.f32 %v3074_v40, %v3552_v30  ;;  %3115 = vmatmul.bf16.gmra.mxu3 %v7914_v55  ;;  %3169 = vmatmul.bf16.gmra.mxu0 %v7023_v44  ;;  %v2266_v11 = vadd.f32 %v2265_v41, %v2097_v29  ;;  %v9052_v41 = vld [vmem:[#allocation3_spill] sm:$0xff]  ;;  %v9057_v55 = vld [vmem:[#allocation5_spill] sm:$0xff] }
 0x47e   : > { %3338 = vmatmul.bf16.gmra.mxu1 %v7489_v43  ;;  %v2907_v32 = vpop.f32.mrf.mxu2 }
 0x47f   : > { %v2908_v4 = vadd.f32 %v2907_v32, %v7554_v1  ;;  %v7921_v12 = vpack.c.bf16 %v3680_v63, %v3678_v39  ;;  %v2397_v19 = vmul.f32 0.2, %v2266_v11 }
 0x480   : > { %v3076_v13 = vpop.f32.mrf.mxu3 }
 0x481   : > { %v3077_v25 = vadd.f32 %v3076_v13, %v2908_v4  ;;  %v2525_v43 = vmax.f32 %v2266_v11, %v2397_v19 }
 0x482   : > { %v2098_v2 = vpop.f32.mrf.mxu0 }
 0x483   : > { %v2099_v27 = vadd.f32 %v2098_v2, %v7388_v7  ;;  %v2267_v24 = vpop.f32.mrf.mxu1  ;;  %v3554_v40 = vmul.f32 0.2, %v3077_v25 }
 0x485   : > { %v2268_v22 = vadd.f32 %v2267_v24, %v2099_v27  ;;  %v3682_v4 = vmax.f32 %v3077_v25, %v3554_v40  ;;  %v9054_v27 = vld [vmem:[#allocation6_spill] sm:$0xff]  ;;  %v6352_v25 = vld [vmem:[%s8872_s7 + $0x54] sm:$0xf] }
 0x486   : > { %v2909_v26 = vpop.f32.mrf.mxu2  ;;  %v9055_v24 = vld [vmem:[#allocation2_spill] sm:$0xff] }
 0x487   : > { %v2399_v31 = vmul.f32 0.2, %v2268_v22  ;;  %v2910_v44 = vadd.f32 %v2909_v26, %v7554_v1 }
 0x488   : > { %v3078_v8 = vpop.f32.mrf.mxu3 }
 0x489   : > { %v2527_v18 = vmax.f32 %v2268_v22, %v2399_v31  ;;  %v3079_v30 = vadd.f32 %v3078_v8, %v2910_v44  ;;  %v6080_v8 = vld [vmem:[%s8872_s7 + $0x58] sm:$0xf0] }
 0x48a   : > { %v2101_v39 = vpop.f32.mrf.mxu0 }
 0x48b   : > { %v3556_v63 = vmul.f32 0.2, %v3079_v30  ;;  %v2270_v32 = vpop.f32.mrf.mxu1  ;;  %2951 = vmatmul.bf16.gmra.mxu2 %v9052_v41  ;;  %v7926_v29 = vpack.c.bf16 %v2527_v18, %v2525_v43  ;;  %v2102_v2 = vadd.f32 %v2101_v39, %v7388_v7  ;;  %v6368_v43 = vld [vmem:[%s8872_s7 + $0xd4] sm:$0xf]  ;;  %v6083_v18 = vor.u32 %v6352_v25, %v6080_v8 }
 0x48d   : > { %9053 = vst [vmem:[#allocation34_spill] sm:$0xff] %v7926_v29  ;;  %v3684_v13 = vmax.f32 %v3079_v30, %v3556_v63  ;;  %3120 = vmatmul.bf16.gmra.mxu3 %v7926_v29  ;;  %3174 = vmatmul.bf16.gmra.mxu0 %v9054_v27  ;;  %v2271_v31 = vadd.f32 %v2270_v32, %v2102_v2  ;;  %v6144_v30 = vld [vmem:[%s8872_s7 + $0xd8] sm:$0xf0] }
 0x48e   : > { %3343 = vmatmul.bf16.gmra.mxu1 %v9055_v24  ;;  %v2912_v11 = vpop.f32.mrf.mxu2  ;;  %v6147_v32 = vor.u32 %v6368_v43, %v6144_v30  ;;  %4332 = vmatpush.bf16.msrb.mxu0 %v6083_v18 }
 0x48f   : > { %v2913_v19 = vadd.f32 %v2912_v11, %v7554_v1  ;;  %v7933_v22 = vpack.c.bf16 %v3684_v13, %v3682_v4  ;;  %v2401_v4 = vmul.f32 0.2, %v2271_v31 }
 0x490   : > { %v3081_v26 = vpop.f32.mrf.mxu3  ;;  %4501 = vmatpush.bf16.msrb.mxu1 %v6147_v32 }
 0x491   : > { %9056 = vst [vmem:[#allocation6_spill] sm:$0xff] %v7933_v22  ;;  %v3082_v44 = vadd.f32 %v3081_v26, %v2913_v19  ;;  %v2529_v19 = vmax.f32 %v2271_v31, %v2401_v4 }
 0x492   : > { %v2103_v40 = vpop.f32.mrf.mxu0 }
 0x493   : > { %v2104_v39 = vadd.f32 %v2103_v40, %v7388_v7  ;;  %v2272_v63 = vpop.f32.mrf.mxu1  ;;  %v3558_v26 = vmul.f32 0.2, %v3082_v44 }
 0x495   : > { %v2273_v13 = vadd.f32 %v2272_v63, %v2104_v39  ;;  %v3686_v43 = vmax.f32 %v3082_v44, %v3558_v26  ;;  %v9059_v39 = vld [vmem:[#allocation9_spill] sm:$0xff]  ;;  %v9060_v63 = vld [vmem:[#allocation4_spill] sm:$0xff] }
 0x496   : > { %v2914_v2 = vpop.f32.mrf.mxu2 }
 0x497   : > { %v2403_v27 = vmul.f32 0.2, %v2273_v13  ;;  %v2915_v24 = vadd.f32 %v2914_v2, %v7554_v1 }
 0x498   : > { %v3083_v11 = vpop.f32.mrf.mxu3 }
 0x499   : > { %v2531_v25 = vmax.f32 %v2273_v13, %v2403_v27  ;;  %v3084_v8 = vadd.f32 %v3083_v11, %v2915_v24 }
 0x49a   : > { %v2106_v29 = vpop.f32.mrf.mxu0 }
 0x49b   : > { %v3560_v41 = vmul.f32 0.2, %v3084_v8  ;;  %v2275_v22 = vpop.f32.mrf.mxu1  ;;  %2956 = vmatmul.bf16.gmra.mxu2 %v9057_v55  ;;  %v7950_v40 = vpack.c.bf16 %v2531_v25, %v2529_v19  ;;  %v2107_v30 = vadd.f32 %v2106_v29, %v7388_v7  ;;  %v6389_v29 = vld [vmem:[%s8874_s9 + $0x78] sm:$0xff] }
 0x49c   : > { %5289 = vmatpush.bf16.msrb.mxu3 %v6389_v29  ;;  %v9062_v29 = vld [vmem:[#allocation8_spill] sm:$0xff] }
 0x49d   : > { %9058 = vst [vmem:[#allocation2_spill] sm:$0xff] %v7950_v40  ;;  %v3688_v18 = vmax.f32 %v3084_v8, %v3560_v41  ;;  %3125 = vmatmul.bf16.gmra.mxu3 %v7950_v40  ;;  %3179 = vmatmul.bf16.gmra.mxu0 %v9059_v39  ;;  %v2276_v2 = vadd.f32 %v2275_v22, %v2107_v30  ;;  %v6381_v41 = vld [vmem:[%s8874_s9 + $0x38] sm:$0xff]  ;;  %v9064_v40 = vld [vmem:[#allocation12_spill] sm:$0xff] }
 0x49e   : > { %3348 = vmatmul.bf16.gmra.mxu1 %v9060_v63  ;;  %v2917_v31 = vpop.f32.mrf.mxu2  ;;  %5120 = vmatpush.bf16.msrb.mxu2 %v6381_v41 }
 0x49f   : > { %v2918_v32 = vadd.f32 %v2917_v31, %v7554_v1  ;;  %v7957_v4 = vpack.c.bf16 %v3688_v18, %v3686_v43  ;;  %v2405_v19 = vmul.f32 0.2, %v2276_v2  ;;  %v6400_v18 = vld [vmem:[%s8871_s6] sm:$0x3] }
 0x4a0   : > { %v3086_v13 = vpop.f32.mrf.mxu3  ;;  %v7970_v30 = vperm.slane %v6400_v18, 1  ;;  %v9065_v18 = vld [vmem:[#allocation7_spill] sm:$0xff] }
 0x4a1   : > { %9061 = vst [vmem:[#allocation9_spill] sm:$0xff] %v7957_v4  ;;  %v3087_v27 = vadd.f32 %v3086_v13, %v2918_v32  ;;  %v2533_v39 = vmax.f32 %v2276_v2, %v2405_v19 }
 0x4a2   : > { %v2108_v44 = vpop.f32.mrf.mxu0 }
 0x4a3   : > { %v2109_v24 = vadd.f32 %v2108_v44, %v7388_v7  ;;  %v2277_v11 = vpop.f32.mrf.mxu1  ;;  %v3562_v63 = vmul.f32 0.2, %v3087_v27 }
 0x4a5   : > { %v2278_v26 = vadd.f32 %v2277_v11, %v2109_v24  ;;  %v3690_v24 = vmax.f32 %v3087_v27, %v3562_v63 }
 0x4a6   : > { %v2919_v25 = vpop.f32.mrf.mxu2 }
 0x4a7   : > { %v2407_v8 = vmul.f32 0.2, %v2278_v26  ;;  %v2920_v22 = vadd.f32 %v2919_v25, %v7554_v1 }
 0x4a8   : > { %v3088_v43 = vpop.f32.mrf.mxu3 }
 0x4a9   : > { %v2535_v31 = vmax.f32 %v2278_v26, %v2407_v8  ;;  %v3089_v7 = vadd.f32 %v3088_v43, %v2920_v22 }
 0x4aa   : > { %v3145_v32 = vpop.f32.mrf.mxu0 }
 0x4ab   : > { %v3564_v13 = vmul.f32 0.2, %v3089_v7  ;;  %v3314_v41 = vpop.f32.mrf.mxu1  ;;  %2961 = vmatmul.bf16.gmra.mxu2 %v9062_v29  ;;  %v7973_v44 = vpack.c.bf16 %v2535_v31, %v2533_v39  ;;  %v3146_v25 = vadd.f32 %v3145_v32, %v7970_v30 }
 0x4ad   : > { %9063 = vst [vmem:[#allocation4_spill] sm:$0xff] %v7973_v44  ;;  %v3692_v11 = vmax.f32 %v3089_v7, %v3564_v13  ;;  %3130 = vmatmul.bf16.gmra.mxu3 %v7973_v44  ;;  %3184 = vmatmul.bf16.gmra.mxu0 %v9064_v40  ;;  %v3315_v22 = vadd.f32 %v3314_v41, %v3146_v25 }
 0x4ae   : > { %3353 = vmatmul.bf16.gmra.mxu1 %v9065_v18  ;;  %v2922_v2 = vpop.f32.mrf.mxu2 }
 0x4af   : > { %v2923_v19 = vadd.f32 %v2922_v2, %v7554_v1  ;;  %v7980_v26 = vpack.c.bf16 %v3692_v11, %v3690_v24  ;;  %v3475_v31 = vmul.f32 0.2, %v3315_v22 }
 0x4b0   : > { %v3091_v8 = vpop.f32.mrf.mxu3 }
 0x4b1   : > { %9066 = vst [vmem:[#allocation12_spill] sm:$0xff] %v7980_v26  ;;  %v3092_v43 = vadd.f32 %v3091_v8, %v2923_v19  ;;  %v3603_v18 = vmax.f32 %v3315_v22, %v3475_v31  ;;  %v9068_v19 = vld [vmem:[#allocation11_spill] sm:$0xff] }
 0x4b2   : > { %v3147_v39 = vpop.f32.mrf.mxu0 }
 0x4b3   : > { %v3148_v27 = vadd.f32 %v3147_v39, %v7970_v30  ;;  %v3316_v63 = vpop.f32.mrf.mxu1  ;;  %v3566_v29 = vmul.f32 0.2, %v3092_v43 }
 0x4b5   : > { %v3317_v7 = vadd.f32 %v3316_v63, %v3148_v27  ;;  %v3694_v8 = vmax.f32 %v3092_v43, %v3566_v29  ;;  %v9069_v63 = vld [vmem:[#allocation15_spill] sm:$0xff] }
 0x4b6   : > { %v2924_v32 = vpop.f32.mrf.mxu2 }
 0x4b7   : > { %v3477_v13 = vmul.f32 0.2, %v3317_v7  ;;  %v2925_v40 = vadd.f32 %v2924_v32, %v7554_v1  ;;  %v9070_v32 = vld [vmem:[#allocation10_spill] sm:$0xff] }
 0x4b8   : > { %v3093_v44 = vpop.f32.mrf.mxu3 }
 0x4b9   : > { %v3605_v55 = vmax.f32 %v3317_v7, %v3477_v13  ;;  %v3094_v2 = vadd.f32 %v3093_v44, %v2925_v40 }
 0x4ba   : > { %v3150_v24 = vpop.f32.mrf.mxu0 }
 0x4bb   : > { %v7984_v11 = vpack.c.bf16 %v3605_v55, %v3603_v18  ;;  %v3568_v41 = vmul.f32 0.2, %v3094_v2  ;;  %v3319_v25 = vpop.f32.mrf.mxu1  ;;  %4000 = vmatmul.bf16.vlgmr.msra.gmra.mxu2 %v9068_v19  ;;  %v3151_v27 = vadd.f32 %v3150_v24, %v7970_v30 }
 0x4bd   : > { %9067 = vst [vmem:[#allocation7_spill] sm:$0xff] %v7984_v11  ;;  %v3696_v39 = vmax.f32 %v3094_v2, %v3568_v41  ;;  %3189 = vmatmul.bf16.gmra.mxu0 %v9069_v63  ;;  %4169 = vmatmul.bf16.vlgmr.msra.gmra.mxu3 %v7984_v11  ;;  %v3320_v7 = vadd.f32 %v3319_v25, %v3151_v27  ;;  %v9072_v25 = vld [vmem:[#allocation14_spill] sm:$0xff] }
 0x4be   : > { %3358 = vmatmul.bf16.gmra.mxu1 %v9070_v32  ;;  %v2927_v22 = vpop.f32.mrf.mxu2 }
 0x4bf   : > { %v2928_v44 = vadd.f32 %v2927_v22, %v7554_v1  ;;  %v7992_v31 = vpack.c.bf16 %v3696_v39, %v3694_v8  ;;  %v3479_v18 = vmul.f32 0.2, %v3320_v7 }
 0x4c0   : > { %v3096_v55 = vpop.f32.mrf.mxu3 }
 0x4c1   : > { %9071 = vst [vmem:[#allocation15_spill] sm:$0xff] %v7992_v31  ;;  %v3097_v13 = vadd.f32 %v3096_v55, %v2928_v44  ;;  %v3607_v32 = vmax.f32 %v3320_v7, %v3479_v18 }
 0x4c2   : > { %v3152_v40 = vpop.f32.mrf.mxu0 }
 0x4c3   : > { %v3153_v29 = vadd.f32 %v3152_v40, %v7970_v30  ;;  %v3321_v43 = vpop.f32.mrf.mxu1  ;;  %v3570_v19 = vmul.f32 0.2, %v3097_v13 }
 0x4c5   : > { %v3322_v2 = vadd.f32 %v3321_v43, %v3153_v29  ;;  %v3698_v44 = vmax.f32 %v3097_v13, %v3570_v19  ;;  %v9074_v29 = vld [vmem:[#allocation18_spill] sm:$0xff]  ;;  %v9075_v43 = vld [vmem:[#allocation13_spill] sm:$0xff]  ;;  %v6072_v19 = vld [vmem:[%s8872_s7 + $0x48] sm:$0xf0] }
 0x4c6   : > { %v2929_v24 = vpop.f32.mrf.mxu2  ;;  %v6366_v13 = vld [vmem:[%s8872_s7 + $0xc4] sm:$0xf] }
 0x4c7   : > { %v3481_v41 = vmul.f32 0.2, %v3322_v2  ;;  %v2930_v63 = vadd.f32 %v2929_v24, %v7554_v1 }
 0x4c8   : > { %v3098_v11 = vpop.f32.mrf.mxu3 }
 0x4c9   : > { %v3609_v26 = vmax.f32 %v3322_v2, %v3481_v41  ;;  %v3099_v22 = vadd.f32 %v3098_v11, %v2930_v63 }
 0x4ca   : > { %v3155_v8 = vpop.f32.mrf.mxu0 }
 0x4cb   : > { %v3572_v39 = vmul.f32 0.2, %v3099_v22  ;;  %v3324_v31 = vpop.f32.mrf.mxu1  ;;  %4005 = vmatmul.bf16.gmra.mxu2 %v9072_v25  ;;  %v7997_v27 = vpack.c.bf16 %v3609_v26, %v3607_v32  ;;  %v3156_v40 = vadd.f32 %v3155_v8, %v7970_v30  ;;  %v6350_v26 = vld [vmem:[%s8872_s7 + $0x44] sm:$0xf] }
 0x4cc   : > { %v6075_v32 = vor.u32 %v6350_v26, %v6072_v19 }
 0x4cd   : > { %9073 = vst [vmem:[#allocation10_spill] sm:$0xff] %v7997_v27  ;;  %v3700_v55 = vmax.f32 %v3099_v22, %v3572_v39  ;;  %3194 = vmatmul.bf16.gmra.mxu0 %v9074_v29  ;;  %4174 = vmatmul.bf16.gmra.mxu3 %v7997_v27  ;;  %v3325_v24 = vadd.f32 %v3324_v31, %v3156_v40  ;;  %v6136_v22 = vld [vmem:[%s8872_s7 + $0xc8] sm:$0xf0] }
 0x4ce   : > { %3363 = vmatmul.bf16.gmra.mxu1 %v9075_v43  ;;  %v2932_v7 = vpop.f32.mrf.mxu2  ;;  %v6139_v39 = vor.u32 %v6366_v13, %v6136_v22  ;;  %4333 = vmatpush.bf16.msrb.mxu0 %v6075_v32 }
 0x4cf   : > { %v2933_v11 = vadd.f32 %v2932_v7, %v7554_v1  ;;  %v8004_v18 = vpack.c.bf16 %v3700_v55, %v3698_v44  ;;  %v3483_v44 = vmul.f32 0.2, %v3325_v24 }
 0x4d0   : > { %v3101_v2 = vpop.f32.mrf.mxu3  ;;  %4502 = vmatpush.bf16.msrb.mxu1 %v6139_v39 }
 0x4d1   : > { %9076 = vst [vmem:[#allocation18_spill] sm:$0xff] %v8004_v18  ;;  %v3102_v41 = vadd.f32 %v3101_v2, %v2933_v11  ;;  %v3611_v11 = vmax.f32 %v3325_v24, %v3483_v44 }
 0x4d2   : > { %v3157_v63 = vpop.f32.mrf.mxu0 }
 0x4d3   : > { %v3158_v31 = vadd.f32 %v3157_v63, %v7970_v30  ;;  %v3326_v8 = vpop.f32.mrf.mxu1  ;;  %v3574_v2 = vmul.f32 0.2, %v3102_v41 }
 0x4d5   : > { %v3327_v55 = vadd.f32 %v3326_v8, %v3158_v31  ;;  %v3702_v13 = vmax.f32 %v3102_v41, %v3574_v2  ;;  %v9078_v31 = vld [vmem:[#allocation21_spill] sm:$0xff]  ;;  %v9079_v8 = vld [vmem:[#allocation16_spill] sm:$0xff] }
 0x4d6   : > { %v2934_v40 = vpop.f32.mrf.mxu2 }
 0x4d7   : > { %v3485_v29 = vmul.f32 0.2, %v3327_v55  ;;  %v2935_v43 = vadd.f32 %v2934_v40, %v7554_v1 }
 0x4d8   : > { %v3103_v7 = vpop.f32.mrf.mxu3 }
 0x4d9   : > { %v3613_v26 = vmax.f32 %v3327_v55, %v3485_v29  ;;  %v3104_v19 = vadd.f32 %v3103_v7, %v2935_v43 }
 0x4da   : > { %v3160_v27 = vpop.f32.mrf.mxu0 }
 0x4db   : > { %v3576_v25 = vmul.f32 0.2, %v3104_v19  ;;  %v3329_v18 = vpop.f32.mrf.mxu1  ;;  %4010 = vmatmul.bf16.gmra.mxu2 %v7621_v10  ;;  %v8021_v63 = vpack.c.bf16 %v3613_v26, %v3611_v11  ;;  %v3161_v22 = vadd.f32 %v3160_v27, %v7970_v30  ;;  %v6388_v27 = vld [vmem:[%s8874_s9 + $0x70] sm:$0xff] }
 0x4dc   : > { %5290 = vmatpush.bf16.msrb.mxu3 %v6388_v27 }
 0x4dd   : > { %9077 = vst [vmem:[#allocation13_spill] sm:$0xff] %v8021_v63  ;;  %v3704_v32 = vmax.f32 %v3104_v19, %v3576_v25  ;;  %3199 = vmatmul.bf16.gmra.mxu0 %v9078_v31  ;;  %4179 = vmatmul.bf16.gmra.mxu3 %v8021_v63  ;;  %v3330_v40 = vadd.f32 %v3329_v18, %v3161_v22  ;;  %v6380_v25 = vld [vmem:[%s8874_s9 + $0x30] sm:$0xff] }
 0x4de   : > { %3368 = vmatmul.bf16.gmra.mxu1 %v9079_v8  ;;  %v2937_v24 = vpop.f32.mrf.mxu2  ;;  %5121 = vmatpush.bf16.msrb.mxu2 %v6380_v25  ;;  %v9081_v63 = vld [vmem:[#allocation20_spill] sm:$0xff] }
 0x4df   : > { %v2938_v39 = vadd.f32 %v2937_v24, %v7554_v1  ;;  %v8028_v44 = vpack.c.bf16 %v3704_v32, %v3702_v13  ;;  %v3487_v11 = vmul.f32 0.2, %v3330_v40 }
 0x4e0   : > { %v3106_v55 = vpop.f32.mrf.mxu3 }
 0x4e1   : > { %9080 = vst [vmem:[#allocation21_spill] sm:$0xff] %v8028_v44  ;;  %v3107_v29 = vadd.f32 %v3106_v55, %v2938_v39  ;;  %v3615_v32 = vmax.f32 %v3330_v40, %v3487_v11 }
 0x4e2   : > { %v3162_v41 = vpop.f32.mrf.mxu0 }
 0x4e3   : > { %v3163_v43 = vadd.f32 %v3162_v41, %v7970_v30  ;;  %v3331_v7 = vpop.f32.mrf.mxu1  ;;  %v3578_v22 = vmul.f32 0.2, %v3107_v29 }
 0x4e5   : > { %v3332_v2 = vadd.f32 %v3331_v7, %v3163_v43  ;;  %v3706_v25 = vmax.f32 %v3107_v29, %v3578_v22  ;;  %v9083_v7 = vld [vmem:[#allocation24_spill] sm:$0xff] }
 0x4e6   : > { %v2939_v26 = vpop.f32.mrf.mxu2 }
 0x4e7   : > { %v3489_v19 = vmul.f32 0.2, %v3332_v2  ;;  %v2940_v18 = vadd.f32 %v2939_v26, %v7554_v1  ;;  %v9084_v26 = vld [vmem:[#allocation19_spill] sm:$0xff] }
 0x4e8   : > { %v3108_v13 = vpop.f32.mrf.mxu3 }
 0x4e9   : > { %v3617_v31 = vmax.f32 %v3332_v2, %v3489_v19  ;;  %v3109_v8 = vadd.f32 %v3108_v13, %v2940_v18 }
 0x4ea   : > { %v3165_v24 = vpop.f32.mrf.mxu0 }
 0x4eb   : > { %v3580_v39 = vmul.f32 0.2, %v3109_v8  ;;  %v3334_v55 = vpop.f32.mrf.mxu1  ;;  %4015 = vmatmul.bf16.gmra.mxu2 %v9081_v63  ;;  %v8039_v41 = vpack.c.bf16 %v3617_v31, %v3615_v32  ;;  %v3166_v43 = vadd.f32 %v3165_v24, %v7970_v30 }
 0x4ed   : > { %9082 = vst [vmem:[#allocation16_spill] sm:$0xff] %v8039_v41  ;;  %v3708_v27 = vmax.f32 %v3109_v8, %v3580_v39  ;;  %3204 = vmatmul.bf16.gmra.mxu0 %v9083_v7  ;;  %4184 = vmatmul.bf16.gmra.mxu3 %v8039_v41  ;;  %v3335_v18 = vadd.f32 %v3334_v55, %v3166_v43 }
 0x4ee   : > { %3373 = vmatmul.bf16.gmra.mxu1 %v9084_v26  ;;  %v2942_v40 = vpop.f32.mrf.mxu2 }
 0x4ef   : > { %v2943_v11 = vadd.f32 %v2942_v40, %v7554_v1  ;;  %v8046_v2 = vpack.c.bf16 %v3708_v27, %v3706_v25  ;;  %v3491_v31 = vmul.f32 0.2, %v3335_v18 }
 0x4f0   : > { %v3111_v19 = vpop.f32.mrf.mxu3 }
 0x4f1   : > { %9085 = vst [vmem:[#allocation24_spill] sm:$0xff] %v8046_v2  ;;  %v3112_v13 = vadd.f32 %v3111_v19, %v2943_v11  ;;  %v3619_v26 = vmax.f32 %v3335_v18, %v3491_v31 }
 0x4f2   : > { %v3167_v32 = vpop.f32.mrf.mxu0 }
 0x4f3   : > { %v3168_v29 = vadd.f32 %v3167_v32, %v7970_v30  ;;  %v3336_v22 = vpop.f32.mrf.mxu1  ;;  %v3582_v63 = vmul.f32 0.2, %v3112_v13 }
 0x4f5   : > { %v3337_v8 = vadd.f32 %v3336_v22, %v3168_v29  ;;  %v3710_v43 = vmax.f32 %v3112_v13, %v3582_v63 }
 0x4f6   : > { %v2944_v24 = vpop.f32.mrf.mxu2 }
 0x4f7   : > { %v3493_v39 = vmul.f32 0.2, %v3337_v8  ;;  %v2945_v7 = vadd.f32 %v2944_v24, %v7554_v1 }
 0x4f8   : > { %v3113_v41 = vpop.f32.mrf.mxu3 }
 0x4f9   : > { %v3621_v10 = vmax.f32 %v3337_v8, %v3493_v39  ;;  %v3114_v40 = vadd.f32 %v3113_v41, %v2945_v7 }
 0x4fa   : > { %v3170_v25 = vpop.f32.mrf.mxu0 }
 0x4fb   : > { %v3584_v27 = vmul.f32 0.2, %v3114_v40  ;;  %v3339_v2 = vpop.f32.mrf.mxu1  ;;  %4020 = vmatmul.bf16.gmra.mxu2 %v7645_v48  ;;  %v8051_v55 = vpack.c.bf16 %v3621_v10, %v3619_v26  ;;  %v3171_v19 = vadd.f32 %v3170_v25, %v7970_v30 }
 0x4fd   : > { %v3712_v11 = vmax.f32 %v3114_v40, %v3584_v27  ;;  %3209 = vmatmul.bf16.gmra.mxu0 %v7191_v45  ;;  %4189 = vmatmul.bf16.gmra.mxu3 %v8051_v55  ;;  %v3340_v22 = vadd.f32 %v3339_v2, %v3171_v19 }
 0x4fe   : > { %3378 = vmatmul.bf16.gmra.mxu1 %v7638_v3  ;;  %v2947_v18 = vpop.f32.mrf.mxu2 }
 0x4ff   : > { %v2948_v41 = vadd.f32 %v2947_v18, %v7554_v1  ;;  %v8058_v32 = vpack.c.bf16 %v3712_v11, %v3710_v43  ;;  %v3495_v8 = vmul.f32 0.2, %v3340_v22 }
 0x500   : > { %v3116_v29 = vpop.f32.mrf.mxu3 }
 0x501   : > { %9086 = vst [vmem:[#allocation19_spill] sm:$0xff] %v8058_v32  ;;  %v3117_v31 = vadd.f32 %v3116_v29, %v2948_v41  ;;  %v3623_v3 = vmax.f32 %v3340_v22, %v3495_v8 }
 0x502   : > { %v3172_v10 = vpop.f32.mrf.mxu0 }
 0x503   : > { %v3173_v63 = vadd.f32 %v3172_v10, %v7970_v30  ;;  %v3341_v13 = vpop.f32.mrf.mxu1  ;;  %v3586_v40 = vmul.f32 0.2, %v3117_v31  ;;  %v9088_v10 = vld [vmem:[#allocation22_spill] sm:$0xff] }
 0x505   : > { %v3342_v24 = vadd.f32 %v3341_v13, %v3173_v63  ;;  %v3714_v19 = vmax.f32 %v3117_v31, %v3586_v40  ;;  %v6348_v31 = vld [vmem:[%s8872_s7 + $0x34] sm:$0xf] }
 0x506   : > { %v2949_v39 = vpop.f32.mrf.mxu2 }
 0x507   : > { %v3497_v45 = vmul.f32 0.2, %v3342_v24  ;;  %v2950_v7 = vadd.f32 %v2949_v39, %v7554_v1 }
 0x508   : > { %v3118_v26 = vpop.f32.mrf.mxu3 }
 0x509   : > { %v3625_v25 = vmax.f32 %v3342_v24, %v3497_v45  ;;  %v3119_v27 = vadd.f32 %v3118_v26, %v2950_v7  ;;  %v6364_v45 = vld [vmem:[%s8872_s7 + $0xb4] sm:$0xf] }
 0x50a   : > { %v3175_v43 = vpop.f32.mrf.mxu0 }
 0x50b   : > { %v3588_v11 = vmul.f32 0.2, %v3119_v27  ;;  %v3344_v18 = vpop.f32.mrf.mxu1  ;;  %4025 = vmatmul.bf16.gmra.mxu2 %v7669_v52  ;;  %v8063_v2 = vpack.c.bf16 %v3625_v25, %v3623_v3  ;;  %v3176_v29 = vadd.f32 %v3175_v43, %v7970_v30  ;;  %v6128_v3 = vld [vmem:[%s8872_s7 + $0xb8] sm:$0xf0] }
 0x50d   : > { %9087 = vst [vmem:[#allocation35_spill] sm:$0xff] %v8063_v2  ;;  %v3716_v41 = vmax.f32 %v3119_v27, %v3588_v11  ;;  %3214 = vmatmul.bf16.gmra.mxu0 %v7219_v34  ;;  %4194 = vmatmul.bf16.gmra.mxu3 %v8063_v2  ;;  %v3345_v24 = vadd.f32 %v3344_v18, %v3176_v29  ;;  %v6064_v34 = vld [vmem:[%s8872_s7 + $0x38] sm:$0xf0] }
 0x50e   : > { %3383 = vmatmul.bf16.gmra.mxu1 %v9088_v10  ;;  %v2952_v22 = vpop.f32.mrf.mxu2  ;;  %v6067_v26 = vor.u32 %v6348_v31, %v6064_v34  ;;  %v6131_v27 = vor.u32 %v6364_v45, %v6128_v3 }
 0x50f   : > { %v2953_v63 = vadd.f32 %v2952_v22, %v7554_v1  ;;  %v8070_v13 = vpack.c.bf16 %v3716_v41, %v3714_v19  ;;  %v3499_v43 = vmul.f32 0.2, %v3345_v24 }
 0x510   : > { %v3121_v8 = vpop.f32.mrf.mxu3  ;;  %4334 = vmatpush.bf16.msrb.mxu0 %v6067_v26  ;;  %4503 = vmatpush.bf16.msrb.mxu1 %v6131_v27 }
 0x511   : > { %v3122_v39 = vadd.f32 %v3121_v8, %v2953_v63  ;;  %v3627_v10 = vmax.f32 %v3345_v24, %v3499_v43 }
 0x512   : > { %v3177_v7 = vpop.f32.mrf.mxu0 }
 0x513   : > { %v3178_v40 = vadd.f32 %v3177_v7, %v7970_v30  ;;  %v3346_v25 = vpop.f32.mrf.mxu1  ;;  %v3590_v22 = vmul.f32 0.2, %v3122_v39 }
 0x515   : > { %v3347_v11 = vadd.f32 %v3346_v25, %v3178_v40  ;;  %v3718_v45 = vmax.f32 %v3122_v39, %v3590_v22  ;;  %v9089_v40 = vld [vmem:[#allocation23_spill] sm:$0xff] }
 0x516   : > { %v2954_v18 = vpop.f32.mrf.mxu2  ;;  %v6379_v39 = vld [vmem:[%s8874_s9 + $0x28] sm:$0xff] }
 0x517   : > { %v3501_v19 = vmul.f32 0.2, %v3347_v11  ;;  %v2955_v41 = vadd.f32 %v2954_v18, %v7554_v1  ;;  %5122 = vmatpush.bf16.msrb.mxu2 %v6379_v39 }
 0x518   : > { %v3123_v29 = vpop.f32.mrf.mxu3 }
 0x519   : > { %v3629_v63 = vmax.f32 %v3347_v11, %v3501_v19  ;;  %v3124_v8 = vadd.f32 %v3123_v29, %v2955_v41 }
 0x51a   : > { %v3180_v31 = vpop.f32.mrf.mxu0 }
 0x51b   : > { %v3592_v34 = vmul.f32 0.2, %v3124_v8  ;;  %v3349_v2 = vpop.f32.mrf.mxu1  ;;  %4030 = vmatmul.bf16.gmra.mxu2 %v7693_v61  ;;  %v8087_v7 = vpack.c.bf16 %v3629_v63, %v3627_v10  ;;  %v3181_v3 = vadd.f32 %v3180_v31, %v7970_v30 }
 0x51d   : > { %v3720_v26 = vmax.f32 %v3124_v8, %v3592_v34  ;;  %3219 = vmatmul.bf16.gmra.mxu0 %v7235_v20  ;;  %4199 = vmatmul.bf16.gmra.mxu3 %v8087_v7  ;;  %v3350_v11 = vadd.f32 %v3349_v2, %v3181_v3  ;;  %v6387_v20 = vld [vmem:[%s8874_s9 + $0x68] sm:$0xff] }
 0x51e   : > { %3388 = vmatmul.bf16.gmra.mxu1 %v9089_v40  ;;  %v2957_v24 = vpop.f32.mrf.mxu2  ;;  %5291 = vmatpush.bf16.msrb.mxu3 %v6387_v20 }
 0x51f   : > { %v2958_v25 = vadd.f32 %v2957_v24, %v7554_v1  ;;  %v8094_v27 = vpack.c.bf16 %v3720_v26, %v3718_v45  ;;  %v3503_v10 = vmul.f32 0.2, %v3350_v11 }
 0x520   : > { %v3126_v43 = vpop.f32.mrf.mxu3 }
 0x521   : > { %v3127_v18 = vadd.f32 %v3126_v43, %v2958_v25  ;;  %v3631_v34 = vmax.f32 %v3350_v11, %v3503_v10  ;;  %v9090_v43 = vld [vmem:[#allocation26_spill] sm:$0xff] }
 0x522   : > { %v3182_v19 = vpop.f32.mrf.mxu0 }
 0x523   : > { %v3183_v41 = vadd.f32 %v3182_v19, %v7970_v30  ;;  %v3351_v29 = vpop.f32.mrf.mxu1  ;;  %v3594_v45 = vmul.f32 0.2, %v3127_v18 }
 0x525   : > { %v3352_v22 = vadd.f32 %v3351_v29, %v3183_v41  ;;  %v3722_v39 = vmax.f32 %v3127_v18, %v3594_v45  ;;  %v9092_v29 = vld [vmem:[#allocation29_spill] sm:$0xff] }
 0x526   : > { %v2959_v63 = vpop.f32.mrf.mxu2 }
 0x527   : > { %v3505_v8 = vmul.f32 0.2, %v3352_v22  ;;  %v2960_v2 = vadd.f32 %v2959_v63, %v7554_v1  ;;  %v9093_v63 = vld [vmem:[#allocation25_spill] sm:$0xff] }
 0x528   : > { %v3128_v31 = vpop.f32.mrf.mxu3 }
 0x529   : > { %v3633_v26 = vmax.f32 %v3352_v22, %v3505_v8  ;;  %v3129_v3 = vadd.f32 %v3128_v31, %v2960_v2 }
 0x52a   : > { %v3185_v40 = vpop.f32.mrf.mxu0 }
 0x52b   : > { %v3596_v24 = vmul.f32 0.2, %v3129_v3  ;;  %v3354_v25 = vpop.f32.mrf.mxu1  ;;  %4035 = vmatmul.bf16.gmra.mxu2 %v9090_v43  ;;  %v8105_v19 = vpack.c.bf16 %v3633_v26, %v3631_v34  ;;  %v3186_v41 = vadd.f32 %v3185_v40, %v7970_v30 }
 0x52d   : > { %9091 = vst [vmem:[#allocation22_spill] sm:$0xff] %v8105_v19  ;;  %v3724_v20 = vmax.f32 %v3129_v3, %v3596_v24  ;;  %3224 = vmatmul.bf16.gmra.mxu0 %v9092_v29  ;;  %4204 = vmatmul.bf16.gmra.mxu3 %v8105_v19  ;;  %v3355_v2 = vadd.f32 %v3354_v25, %v3186_v41 }
 0x52e   : > { %3393 = vmatmul.bf16.gmra.mxu1 %v9093_v63  ;;  %v2962_v11 = vpop.f32.mrf.mxu2  ;;  %v3826_v63 = vld [vmem:[%s8873_s8] sm:$0x3] }
 0x52f   : > { %v2963_v10 = vadd.f32 %v2962_v11, %v7554_v1  ;;  %v8112_v22 = vpack.c.bf16 %v3724_v20, %v3722_v39  ;;  %v3507_v26 = vmul.f32 0.2, %v3355_v2 }
 0x530   : > { %v3131_v8 = vpop.f32.mrf.mxu3 }
 0x531   : > { %v3132_v31 = vadd.f32 %v3131_v8, %v2963_v10  ;;  %v3635_v39 = vmax.f32 %v3355_v2, %v3507_v26 }
 0x532   : > { %v3187_v34 = vpop.f32.mrf.mxu0 }
 0x533   : > { %v3188_v18 = vadd.f32 %v3187_v34, %v7970_v30  ;;  %v3356_v45 = vpop.f32.mrf.mxu1  ;;  %v3598_v20 = vmul.f32 0.2, %v3132_v31 }
 0x535   : > { %v3357_v3 = vadd.f32 %v3356_v45, %v3188_v18  ;;  %v8122_v18 = vperm.slane %v3826_v63, 0  ;;  %v3726_v45 = vmax.f32 %v3132_v31, %v3598_v20 }
 0x536   : > { %v2964_v40 = vpop.f32.mrf.mxu2 }
 0x537   : > { %v3509_v24 = vmul.f32 0.2, %v3357_v3  ;;  %v2965_v29 = vadd.f32 %v2964_v40, %v7554_v1 }
 0x538   : > { %v3133_v19 = vpop.f32.mrf.mxu3 }
 0x539   : > { %v3637_v11 = vmax.f32 %v3357_v3, %v3509_v24  ;;  %v3134_v25 = vadd.f32 %v3133_v19, %v2965_v29 }
 0x53a   : > { %v3190_v41 = vpop.f32.mrf.mxu0 }
 0x53b   : > { %v3600_v10 = vmul.f32 0.2, %v3134_v25  ;;  %v3359_v8 = vpop.f32.mrf.mxu1  ;;  %4040 = vmatmul.bf16.gmra.mxu2 %v7717_v57  ;;  %v8120_v34 = vpack.c.bf16 %v3637_v11, %v3635_v39  ;;  %v3191_v40 = vadd.f32 %v3190_v41, %v7970_v30 }
 0x53d   : > { %9094 = vst [vmem:[#allocation23_spill] sm:$0xff] %v8120_v34  ;;  %v3728_v1 = vmax.f32 %v3134_v25, %v3600_v10  ;;  %3229 = vmatmul.bf16.gmra.mxu0 %v7279_v51  ;;  %4209 = vmatmul.bf16.gmra.mxu3 %v8120_v34  ;;  %v3360_v24 = vadd.f32 %v3359_v8, %v3191_v40 }
 0x53e   : > { %3398 = vmatmul.bf16.gmra.mxu1 %v7710_v35  ;;  %v4001_v19 = vpop.f32.mrf.mxu2 }
 0x53f   : > { %v4002_v2 = vadd.f32 %v4001_v19, %v8122_v18  ;;  %v8129_v26 = vpack.c.bf16 %v3728_v1, %v3726_v45  ;;  %v3511_v20 = vmul.f32 0.2, %v3360_v24 }
 0x540   : > { %v4170_v3 = vpop.f32.mrf.mxu3 }
 0x541   : > { %9095 = vst [vmem:[#allocation26_spill] sm:$0xff] %v8129_v26  ;;  %v4171_v29 = vadd.f32 %v4170_v3, %v4002_v2  ;;  %v3639_v35 = vmax.f32 %v3360_v24, %v3511_v20 }
 0x542   : > { %v3192_v63 = vpop.f32.mrf.mxu0 }
 0x543   : > { %v3193_v31 = vadd.f32 %v3192_v63, %v7970_v30  ;;  %v3361_v39 = vpop.f32.mrf.mxu1  ;;  %v4668_v34 = vmul.f32 0.2, %v4171_v29 }
 0x545   : > { %v3362_v11 = vadd.f32 %v3361_v39, %v3193_v31  ;;  %v4796_v40 = vmax.f32 %v4171_v29, %v4668_v34 }
 0x546   : > { %v4003_v25 = vpop.f32.mrf.mxu2 }
 0x547   : > { %v3513_v51 = vmul.f32 0.2, %v3362_v11  ;;  %v4004_v41 = vadd.f32 %v4003_v25, %v8122_v18  ;;  %v6120_v25 = vld [vmem:[%s8872_s7 + $0xa8] sm:$0xf0] }
 0x548   : > { %v4172_v10 = vpop.f32.mrf.mxu3 }
 0x549   : > { %v3641_v57 = vmax.f32 %v3362_v11, %v3513_v51  ;;  %v4173_v19 = vadd.f32 %v4172_v10, %v4004_v41 }
 0x54a   : > { %v3195_v45 = vpop.f32.mrf.mxu0 }
 0x54b   : > { %v4670_v1 = vmul.f32 0.2, %v4173_v19  ;;  %v3364_v26 = vpop.f32.mrf.mxu1  ;;  %4045 = vmatmul.bf16.gmra.mxu2 %v7741_v38  ;;  %v8134_v8 = vpack.c.bf16 %v3641_v57, %v3639_v35  ;;  %v3196_v3 = vadd.f32 %v3195_v45, %v7970_v30  ;;  %v6346_v57 = vld [vmem:[%s8872_s7 + $0x24] sm:$0xf] }
 0x54d   : > { %v4798_v2 = vmax.f32 %v4173_v19, %v4670_v1  ;;  %3234 = vmatmul.bf16.gmra.mxu0 %v7307_v23  ;;  %4214 = vmatmul.bf16.gmra.mxu3 %v8134_v8  ;;  %v3365_v20 = vadd.f32 %v3364_v26, %v3196_v3  ;;  %v6056_v23 = vld [vmem:[%s8872_s7 + $0x28] sm:$0xf0] }
 0x54e   : > { %3403 = vmatmul.bf16.gmra.mxu1 %v7734_v56  ;;  %v4006_v24 = vpop.f32.mrf.mxu2  ;;  %v6362_v56 = vld [vmem:[%s8872_s7 + $0xa4] sm:$0xf]  ;;  %v6059_v29 = vor.u32 %v6346_v57, %v6056_v23 }
 0x54f   : > { %v8140_v63 = vpack.c.bf16 %v4798_v2, %v4796_v40  ;;  %v4007_v31 = vadd.f32 %v4006_v24, %v8122_v18  ;;  %v6123_v41 = vor.u32 %v6362_v56, %v6120_v25  ;;  %v3515_v10 = vmul.f32 0.2, %v3365_v20 }
 0x550   : > { %v4175_v39 = vpop.f32.mrf.mxu3  ;;  %4335 = vmatpush.bf16.msrb.mxu0 %v6059_v29 }
 0x551   : > { %v4176_v11 = vadd.f32 %v4175_v39, %v4007_v31  ;;  %4504 = vmatpush.bf16.msrb.mxu1 %v6123_v41  ;;  %v3643_v2 = vmax.f32 %v3365_v20, %v3515_v10 }
 0x552   : > { %v3197_v34 = vpop.f32.mrf.mxu0 }
 0x553   : > { %v3198_v26 = vadd.f32 %v3197_v34, %v7970_v30  ;;  %v3366_v51 = vpop.f32.mrf.mxu1  ;;  %v4672_v3 = vmul.f32 0.2, %v4176_v11 }
 0x555   : > { %v3367_v35 = vadd.f32 %v3366_v51, %v3198_v26  ;;  %v4800_v56 = vmax.f32 %v4176_v11, %v4672_v3  ;;  %v9097_v26 = vld [vmem:[#allocation28_spill] sm:$0xff]  ;;  %v6378_v11 = vld [vmem:[%s8874_s9 + $0x20] sm:$0xff] }
 0x556   : > { %v4008_v19 = vpop.f32.mrf.mxu2  ;;  %5123 = vmatpush.bf16.msrb.mxu2 %v6378_v11 }
 0x557   : > { %v3517_v45 = vmul.f32 0.2, %v3367_v35  ;;  %v4009_v1 = vadd.f32 %v4008_v19, %v8122_v18 }
 0x558   : > { %v4177_v40 = vpop.f32.mrf.mxu3 }
 0x559   : > { %v3645_v24 = vmax.f32 %v3367_v35, %v3517_v45  ;;  %v4178_v31 = vadd.f32 %v4177_v40, %v4009_v1 }
 0x55a   : > { %v3200_v39 = vpop.f32.mrf.mxu0 }
 0x55b   : > { %v4674_v57 = vmul.f32 0.2, %v4178_v31  ;;  %v3369_v23 = vpop.f32.mrf.mxu1  ;;  %4050 = vmatmul.bf16.gmra.mxu2 %v7765_v37  ;;  %v8158_v34 = vpack.c.bf16 %v3645_v24, %v3643_v2  ;;  %v3201_v25 = vadd.f32 %v3200_v39, %v7970_v30 }
 0x55d   : > { %9096 = vst [vmem:[#allocation29_spill] sm:$0xff] %v8158_v34  ;;  %v4802_v29 = vmax.f32 %v4178_v31, %v4674_v57  ;;  %3239 = vmatmul.bf16.gmra.mxu0 %v7323_v50  ;;  %4219 = vmatmul.bf16.gmra.mxu3 %v8158_v34  ;;  %v3370_v35 = vadd.f32 %v3369_v23, %v3201_v25  ;;  %v6386_v50 = vld [vmem:[%s8874_s9 + $0x60] sm:$0xff] }
 0x55e   : > { %3408 = vmatmul.bf16.gmra.mxu1 %v9097_v26  ;;  %v4011_v20 = vpop.f32.mrf.mxu2  ;;  %5292 = vmatpush.bf16.msrb.mxu3 %v6386_v50 }
 0x55f   : > { %v4012_v51 = vadd.f32 %v4011_v20, %v8122_v18  ;;  %v8165_v41 = vpack.c.bf16 %v4802_v29, %v4800_v56  ;;  %v3519_v2 = vmul.f32 0.2, %v3370_v35 }
 0x560   : > { %v4180_v10 = vpop.f32.mrf.mxu3 }
 0x561   : > { %v4181_v19 = vadd.f32 %v4180_v10, %v4012_v51  ;;  %v3647_v23 = vmax.f32 %v3370_v35, %v3519_v2  ;;  %v9098_v10 = vld [vmem:[#allocation31_spill] sm:$0xff] }
 0x562   : > { %v3202_v45 = vpop.f32.mrf.mxu0 }
 0x563   : > { %v3203_v1 = vadd.f32 %v3202_v45, %v7970_v30  ;;  %v3371_v40 = vpop.f32.mrf.mxu1  ;;  %v4676_v56 = vmul.f32 0.2, %v4181_v19 }
 0x565   : > { %v3372_v3 = vadd.f32 %v3371_v40, %v3203_v1  ;;  %v4804_v11 = vmax.f32 %v4181_v19, %v4676_v56  ;;  %v9100_v40 = vld [vmem:[#allocation33_spill] sm:$0xff] }
 0x566   : > { %v4013_v24 = vpop.f32.mrf.mxu2 }
 0x567   : > { %v3521_v31 = vmul.f32 0.2, %v3372_v3  ;;  %v4014_v39 = vadd.f32 %v4013_v24, %v8122_v18  ;;  %v9101_v24 = vld [vmem:[#allocation30_spill] sm:$0xff] }
 0x568   : > { %v4182_v57 = vpop.f32.mrf.mxu3 }
 0x569   : > { %v3649_v29 = vmax.f32 %v3372_v3, %v3521_v31  ;;  %v4183_v25 = vadd.f32 %v4182_v57, %v4014_v39 }
 0x56a   : > { %v3205_v26 = vpop.f32.mrf.mxu0 }
 0x56b   : > { %v4678_v20 = vmul.f32 0.2, %v4183_v25  ;;  %v3374_v51 = vpop.f32.mrf.mxu1  ;;  %4055 = vmatmul.bf16.gmra.mxu2 %v9098_v10  ;;  %v8176_v45 = vpack.c.bf16 %v3649_v29, %v3647_v23  ;;  %v3206_v1 = vadd.f32 %v3205_v26, %v7970_v30 }
 0x56d   : > { %9099 = vst [vmem:[#allocation25_spill] sm:$0xff] %v8176_v45  ;;  %v4806_v50 = vmax.f32 %v4183_v25, %v4678_v20  ;;  %3244 = vmatmul.bf16.gmra.mxu0 %v9100_v40  ;;  %4224 = vmatmul.bf16.gmra.mxu3 %v8176_v45  ;;  %v3375_v39 = vadd.f32 %v3374_v51, %v3206_v1 }
 0x56e   : > { %3413 = vmatmul.bf16.gmra.mxu1 %v9101_v24  ;;  %v4016_v35 = vpop.f32.mrf.mxu2 }
 0x56f   : > { %v4017_v2 = vadd.f32 %v4016_v35, %v8122_v18  ;;  %v8183_v3 = vpack.c.bf16 %v4806_v50, %v4804_v11  ;;  %v3523_v29 = vmul.f32 0.2, %v3375_v39 }
 0x570   : > { %v4185_v31 = vpop.f32.mrf.mxu3 }
 0x571   : > { %9102 = vst [vmem:[#allocation28_spill] sm:$0xff] %v8183_v3  ;;  %v4186_v57 = vadd.f32 %v4185_v31, %v4017_v2  ;;  %v3651_v24 = vmax.f32 %v3375_v39, %v3523_v29 }
 0x572   : > { %v3207_v23 = vpop.f32.mrf.mxu0 }
 0x573   : > { %v3208_v19 = vadd.f32 %v3207_v23, %v7970_v30  ;;  %v3376_v56 = vpop.f32.mrf.mxu1  ;;  %v4680_v10 = vmul.f32 0.2, %v4186_v57 }
 0x575   : > { %v3377_v25 = vadd.f32 %v3376_v56, %v3208_v19  ;;  %v4808_v1 = vmax.f32 %v4186_v57, %v4680_v10 }
 0x576   : > { %v4018_v26 = vpop.f32.mrf.mxu2 }
 0x577   : > { %v3525_v20 = vmul.f32 0.2, %v3377_v25  ;;  %v4019_v40 = vadd.f32 %v4018_v26, %v8122_v18 }
 0x578   : > { %v4187_v45 = vpop.f32.mrf.mxu3 }
 0x579   : > { %v3653_v34 = vmax.f32 %v3377_v25, %v3525_v20  ;;  %v4188_v35 = vadd.f32 %v4187_v45, %v4019_v40 }
 0x57a   : > { %v3210_v11 = vpop.f32.mrf.mxu0 }
 0x57b   : > { %v4682_v50 = vmul.f32 0.2, %v4188_v35  ;;  %v3379_v3 = vpop.f32.mrf.mxu1  ;;  %4060 = vmatmul.bf16.gmra.mxu2 %v7789_v49  ;;  %v8188_v51 = vpack.c.bf16 %v3653_v34, %v3651_v24  ;;  %v3211_v31 = vadd.f32 %v3210_v11, %v7970_v30 }
 0x57d   : > { %v4810_v2 = vmax.f32 %v4188_v35, %v4682_v50  ;;  %3249 = vmatmul.bf16.gmra.mxu0 %v7367_v47  ;;  %4229 = vmatmul.bf16.gmra.mxu3 %v8188_v51  ;;  %v3380_v56 = vadd.f32 %v3379_v3, %v3211_v31 }
 0x57e   : > { %3418 = vmatmul.bf16.gmra.mxu1 %v7782_v54  ;;  %v4021_v39 = vpop.f32.mrf.mxu2 }
 0x57f   : > { %v4022_v45 = vadd.f32 %v4021_v39, %v8122_v18  ;;  %v8195_v23 = vpack.c.bf16 %v4810_v2, %v4808_v1  ;;  %v3527_v25 = vmul.f32 0.2, %v3380_v56 }
 0x580   : > { %v4190_v19 = vpop.f32.mrf.mxu3 }
 0x581   : > { %v4191_v29 = vadd.f32 %v4190_v19, %v4022_v45  ;;  %v3655_v54 = vmax.f32 %v3380_v56, %v3527_v25 }
 0x582   : > { %v3212_v34 = vpop.f32.mrf.mxu0 }
 0x583   : > { %v3213_v10 = vadd.f32 %v3212_v34, %v7970_v30  ;;  %v3381_v57 = vpop.f32.mrf.mxu1  ;;  %v4684_v35 = vmul.f32 0.2, %v4191_v29 }
 0x585   : > { %v3382_v26 = vadd.f32 %v3381_v57, %v3213_v10  ;;  %v4812_v31 = vmax.f32 %v4191_v29, %v4684_v35  ;;  %v6344_v29 = vld [vmem:[%s8872_s7 + $0x14] sm:$0xf] }
 0x586   : > { %v4023_v20 = vpop.f32.mrf.mxu2 }
 0x587   : > { %v3529_v47 = vmul.f32 0.2, %v3382_v26  ;;  %v4024_v40 = vadd.f32 %v4023_v20, %v8122_v18 }
 0x588   : > { %v4192_v24 = vpop.f32.mrf.mxu3 }
 0x589   : > { %v3657_v11 = vmax.f32 %v3382_v26, %v3529_v47  ;;  %v4193_v50 = vadd.f32 %v4192_v24, %v4024_v40  ;;  %v6112_v40 = vld [vmem:[%s8872_s7 + $0x98] sm:$0xf0] }
 0x58a   : > { %v3215_v1 = vpop.f32.mrf.mxu0 }
 0x58b   : > { %v4686_v2 = vmul.f32 0.2, %v4193_v50  ;;  %v3384_v39 = vpop.f32.mrf.mxu1  ;;  %4065 = vmatmul.bf16.gmra.mxu2 %v7813_v16  ;;  %v8200_v3 = vpack.c.bf16 %v3657_v11, %v3655_v54  ;;  %v3216_v19 = vadd.f32 %v3215_v1, %v7970_v30 }
 0x58d   : > { %v4814_v45 = vmax.f32 %v4193_v50, %v4686_v2  ;;  %3254 = vmatmul.bf16.gmra.mxu0 %v7400_v53  ;;  %4234 = vmatmul.bf16.gmra.mxu3 %v8200_v3  ;;  %v3385_v25 = vadd.f32 %v3384_v39, %v3216_v19  ;;  %v6048_v53 = vld [vmem:[%s8872_s7 + $0x18] sm:$0xf0] }
 0x58e   : > { %3423 = vmatmul.bf16.gmra.mxu1 %v7806_v58  ;;  %v4026_v56 = vpop.f32.mrf.mxu2  ;;  %v6360_v58 = vld [vmem:[%s8872_s7 + $0x94] sm:$0xf]  ;;  %v6051_v47 = vor.u32 %v6344_v29, %v6048_v53 }
 0x58f   : > { %v4027_v34 = vadd.f32 %v4026_v56, %v8122_v18  ;;  %v8207_v10 = vpack.c.bf16 %v4814_v45, %v4812_v31  ;;  %v6115_v35 = vor.u32 %v6360_v58, %v6112_v40  ;;  %v3531_v11 = vmul.f32 0.2, %v3385_v25 }
 0x590   : > { %v4195_v57 = vpop.f32.mrf.mxu3  ;;  %4336 = vmatpush.bf16.msrb.mxu0 %v6051_v47 }
 0x591   : > { %v4196_v26 = vadd.f32 %v4195_v57, %v4027_v34  ;;  %4505 = vmatpush.bf16.msrb.mxu1 %v6115_v35  ;;  %v3659_v45 = vmax.f32 %v3385_v25, %v3531_v11 }
 0x592   : > { %v3217_v20 = vpop.f32.mrf.mxu0 }
 0x593   : > { %v3218_v24 = vadd.f32 %v3217_v20, %v7970_v30  ;;  %v3386_v54 = vpop.f32.mrf.mxu1  ;;  %v4688_v19 = vmul.f32 0.2, %v4196_v26 }
 0x595   : > { %v3387_v50 = vadd.f32 %v3386_v54, %v3218_v24  ;;  %v4816_v58 = vmax.f32 %v4196_v26, %v4688_v19  ;;  %v6377_v26 = vld [vmem:[%s8874_s9 + $0x18] sm:$0xff] }
 0x596   : > { %v4028_v1 = vpop.f32.mrf.mxu2  ;;  %5124 = vmatpush.bf16.msrb.mxu2 %v6377_v26 }
 0x597   : > { %v3533_v2 = vmul.f32 0.2, %v3387_v50  ;;  %v4029_v39 = vadd.f32 %v4028_v1, %v8122_v18 }
 0x598   : > { %v4197_v31 = vpop.f32.mrf.mxu3 }
 0x599   : > { %v3661_v56 = vmax.f32 %v3387_v50, %v3533_v2  ;;  %v4198_v34 = vadd.f32 %v4197_v31, %v4029_v39 }
 0x59a   : > { %v3220_v57 = vpop.f32.mrf.mxu0 }
 0x59b   : > { %v4690_v29 = vmul.f32 0.2, %v4198_v34  ;;  %v3389_v53 = vpop.f32.mrf.mxu1  ;;  %4070 = vmatmul.bf16.gmra.mxu2 %v7837_v60  ;;  %v8224_v20 = vpack.c.bf16 %v3661_v56, %v3659_v45  ;;  %v3221_v40 = vadd.f32 %v3220_v57, %v7970_v30 }
 0x59d   : > { %v4818_v47 = vmax.f32 %v4198_v34, %v4690_v29  ;;  %3259 = vmatmul.bf16.gmra.mxu0 %v7412_v46  ;;  %4239 = vmatmul.bf16.gmra.mxu3 %v8224_v20  ;;  %v3390_v11 = vadd.f32 %v3389_v53, %v3221_v40  ;;  %v6385_v46 = vld [vmem:[%s8874_s9 + $0x58] sm:$0xff] }
 0x59e   : > { %3428 = vmatmul.bf16.gmra.mxu1 %v7830_v9  ;;  %v4031_v25 = vpop.f32.mrf.mxu2  ;;  %5293 = vmatpush.bf16.msrb.mxu3 %v6385_v46 }
 0x59f   : > { %v4032_v24 = vadd.f32 %v4031_v25, %v8122_v18  ;;  %v8231_v54 = vpack.c.bf16 %v4818_v47, %v4816_v58  ;;  %v3535_v39 = vmul.f32 0.2, %v3390_v11 }
 0x5a0   : > { %v4200_v35 = vpop.f32.mrf.mxu3 }
 0x5a1   : > { %v4201_v50 = vadd.f32 %v4200_v35, %v4032_v24  ;;  %v3663_v57 = vmax.f32 %v3390_v11, %v3535_v39 }
 0x5a2   : > { %v3222_v1 = vpop.f32.mrf.mxu0 }
 0x5a3   : > { %v3223_v2 = vadd.f32 %v3222_v1, %v7970_v30  ;;  %v3391_v9 = vpop.f32.mrf.mxu1  ;;  %v4692_v29 = vmul.f32 0.2, %v4201_v50 }
 0x5a5   : > { %v3392_v31 = vadd.f32 %v3391_v9, %v3223_v2  ;;  %v4820_v35 = vmax.f32 %v4201_v50, %v4692_v29 }
 0x5a6   : > { %v4033_v45 = vpop.f32.mrf.mxu2 }
 0x5a7   : > { %v3537_v19 = vmul.f32 0.2, %v3392_v31  ;;  %v4034_v56 = vadd.f32 %v4033_v45, %v8122_v18 }
 0x5a8   : > { %v4202_v34 = vpop.f32.mrf.mxu3 }
 0x5a9   : > { %v3665_v53 = vmax.f32 %v3392_v31, %v3537_v19  ;;  %v4203_v58 = vadd.f32 %v4202_v34, %v4034_v56 }
 0x5aa   : > { %v3225_v47 = vpop.f32.mrf.mxu0 }
 0x5ab   : > { %v4694_v40 = vmul.f32 0.2, %v4203_v58  ;;  %v3394_v25 = vpop.f32.mrf.mxu1  ;;  %4075 = vmatmul.bf16.gmra.mxu2 %v7849_v28  ;;  %v8242_v24 = vpack.c.bf16 %v3665_v53, %v3663_v57  ;;  %v3226_v46 = vadd.f32 %v3225_v47, %v7970_v30 }
 0x5ad   : > { %v4822_v26 = vmax.f32 %v4203_v58, %v4694_v40  ;;  %3264 = vmatmul.bf16.gmra.mxu0 %v7424_v14  ;;  %4244 = vmatmul.bf16.gmra.mxu3 %v8242_v24  ;;  %v3395_v39 = vadd.f32 %v3394_v25, %v3226_v46 }
 0x5ae   : > { %3433 = vmatmul.bf16.gmra.mxu1 %v7842_v5  ;;  %v4036_v11 = vpop.f32.mrf.mxu2 }
 0x5af   : > { %v4037_v1 = vadd.f32 %v4036_v11, %v8122_v18  ;;  %v8249_v2 = vpack.c.bf16 %v4822_v26, %v4820_v35  ;;  %v3539_v56 = vmul.f32 0.2, %v3395_v39 }
 0x5b0   : > { %v4205_v9 = vpop.f32.mrf.mxu3 }
 0x5b1   : > { %v4206_v31 = vadd.f32 %v4205_v9, %v4037_v1  ;;  %v3667_v5 = vmax.f32 %v3395_v39, %v3539_v56 }
 0x5b2   : > { %v3227_v45 = vpop.f32.mrf.mxu0 }
 0x5b3   : > { %v3228_v50 = vadd.f32 %v3227_v45, %v7970_v30  ;;  %v3396_v19 = vpop.f32.mrf.mxu1  ;;  %v4696_v58 = vmul.f32 0.2, %v4206_v31 }
 0x5b5   : > { %v3397_v34 = vadd.f32 %v3396_v19, %v3228_v50  ;;  %v4824_v46 = vmax.f32 %v4206_v31, %v4696_v58 }
 0x5b6   : > { %v4038_v57 = vpop.f32.mrf.mxu2 }
 0x5b7   : > { %v3541_v14 = vmul.f32 0.2, %v3397_v34  ;;  %v4039_v29 = vadd.f32 %v4038_v57, %v8122_v18 }
 0x5b8   : > { %v4207_v53 = vpop.f32.mrf.mxu3 }
 0x5b9   : > { %v3669_v47 = vmax.f32 %v3397_v34, %v3541_v14  ;;  %v4208_v40 = vadd.f32 %v4207_v53, %v4039_v29 }
 0x5ba   : > { %v3230_v35 = vpop.f32.mrf.mxu0 }
 0x5bb   : > { %v4698_v26 = vmul.f32 0.2, %v4208_v40  ;;  %v3399_v11 = vpop.f32.mrf.mxu1  ;;  %4080 = vmatmul.bf16.gmra.mxu2 %v7861_v33  ;;  %v8254_v25 = vpack.c.bf16 %v3669_v47, %v3667_v5  ;;  %v3231_v9 = vadd.f32 %v3230_v35, %v7970_v30 }
 0x5bd   : > { %v4826_v1 = vmax.f32 %v4208_v40, %v4698_v26  ;;  %3269 = vmatmul.bf16.gmra.mxu0 %v7448_v62  ;;  %4249 = vmatmul.bf16.gmra.mxu3 %v8254_v25  ;;  %v3400_v56 = vadd.f32 %v3399_v11, %v3231_v9 }
 0x5be   : > { %3438 = vmatmul.bf16.gmra.mxu1 %v7854_v21  ;;  %v4041_v39 = vpop.f32.mrf.mxu2 }
 0x5bf   : > { %v4042_v45 = vadd.f32 %v4041_v39, %v8122_v18  ;;  %v8261_v50 = vpack.c.bf16 %v4826_v1, %v4824_v46  ;;  %v3543_v29 = vmul.f32 0.2, %v3400_v56 }
 0x5c0   : > { %v4210_v19 = vpop.f32.mrf.mxu3 }
 0x5c1   : > { %v4211_v34 = vadd.f32 %v4210_v19, %v4042_v45  ;;  %v3671_v21 = vmax.f32 %v3400_v56, %v3543_v29 }
 0x5c2   : > { %v3232_v57 = vpop.f32.mrf.mxu0 }
 0x5c3   : > { %v3233_v31 = vadd.f32 %v3232_v57, %v7970_v30  ;;  %v3401_v14 = vpop.f32.mrf.mxu1  ;;  %v4700_v40 = vmul.f32 0.2, %v4211_v34 }
 0x5c5   : > { %v3402_v53 = vadd.f32 %v3401_v14, %v3233_v31  ;;  %v4828_v9 = vmax.f32 %v4211_v34, %v4700_v40  ;;  %v6342_v34 = vld [vmem:[%s8872_s7 + $0x4] sm:$0xf] }
 0x5c6   : > { %v4043_v5 = vpop.f32.mrf.mxu2 }
 0x5c7   : > { %v3545_v62 = vmul.f32 0.2, %v3402_v53  ;;  %v4044_v58 = vadd.f32 %v4043_v5, %v8122_v18 }
 0x5c8   : > { %v4212_v47 = vpop.f32.mrf.mxu3 }
 0x5c9   : > { %v3673_v35 = vmax.f32 %v3402_v53, %v3545_v62  ;;  %v4213_v26 = vadd.f32 %v4212_v47, %v4044_v58  ;;  %v6104_v58 = vld [vmem:[%s8872_s7 + $0x88] sm:$0xf0] }
 0x5ca   : > { %v3235_v46 = vpop.f32.mrf.mxu0 }
 0x5cb   : > { %v4702_v1 = vmul.f32 0.2, %v4213_v26  ;;  %v3404_v39 = vpop.f32.mrf.mxu1  ;;  %4085 = vmatmul.bf16.gmra.mxu2 %v7885_v0  ;;  %v8266_v11 = vpack.c.bf16 %v3673_v35, %v3671_v21  ;;  %v3236_v19 = vadd.f32 %v3235_v46, %v7970_v30 }
 0x5cd   : > { %v4830_v45 = vmax.f32 %v4213_v26, %v4702_v1  ;;  %3274 = vmatmul.bf16.gmra.mxu0 %v7472_v15  ;;  %4254 = vmatmul.bf16.gmra.mxu3 %v8266_v11  ;;  %v3405_v29 = vadd.f32 %v3404_v39, %v3236_v19  ;;  %v6040_v15 = vld [vmem:[%s8872_s7 + $0x8] sm:$0xf0] }
 0x5ce   : > { %3443 = vmatmul.bf16.gmra.mxu1 %v7878_v42  ;;  %v4046_v56 = vpop.f32.mrf.mxu2  ;;  %v6358_v42 = vld [vmem:[%s8872_s7 + $0x84] sm:$0xf]  ;;  %v6043_v62 = vor.u32 %v6342_v34, %v6040_v15 }
 0x5cf   : > { %v4047_v57 = vadd.f32 %v4046_v56, %v8122_v18  ;;  %v8273_v31 = vpack.c.bf16 %v4830_v45, %v4828_v9  ;;  %v6107_v40 = vor.u32 %v6358_v42, %v6104_v58  ;;  %v3547_v35 = vmul.f32 0.2, %v3405_v29 }
 0x5d0   : > { %v4215_v14 = vpop.f32.mrf.mxu3  ;;  %4337 = vmatpush.bf16.msrb.mxu0 %v6043_v62 }
 0x5d1   : > { %v4216_v53 = vadd.f32 %v4215_v14, %v4047_v57  ;;  %4506 = vmatpush.bf16.msrb.mxu1 %v6107_v40  ;;  %v3675_v45 = vmax.f32 %v3405_v29, %v3547_v35 }
 0x5d2   : > { %v3237_v5 = vpop.f32.mrf.mxu0 }
 0x5d3   : > { %v3238_v47 = vadd.f32 %v3237_v5, %v7970_v30  ;;  %v3406_v21 = vpop.f32.mrf.mxu1  ;;  %v4704_v19 = vmul.f32 0.2, %v4216_v53 }
 0x5d5   : > { %v3407_v26 = vadd.f32 %v3406_v21, %v3238_v47  ;;  %v4832_v42 = vmax.f32 %v4216_v53, %v4704_v19  ;;  %v6376_v53 = vld [vmem:[%s8874_s9 + $0x10] sm:$0xff] }
 0x5d6   : > { %v4048_v46 = vpop.f32.mrf.mxu2  ;;  %5125 = vmatpush.bf16.msrb.mxu2 %v6376_v53 }
 0x5d7   : > { %v3549_v1 = vmul.f32 0.2, %v3407_v26  ;;  %v4049_v39 = vadd.f32 %v4048_v46, %v8122_v18 }
 0x5d8   : > { %v4217_v9 = vpop.f32.mrf.mxu3 }
 0x5d9   : > { %v3677_v56 = vmax.f32 %v3407_v26, %v3549_v1  ;;  %v4218_v57 = vadd.f32 %v4217_v9, %v4049_v39 }
 0x5da   : > { %v3240_v14 = vpop.f32.mrf.mxu0 }
 0x5db   : > { %v4706_v34 = vmul.f32 0.2, %v4218_v57  ;;  %v3409_v15 = vpop.f32.mrf.mxu1  ;;  %4090 = vmatmul.bf16.gmra.mxu2 %v7909_v59  ;;  %v8290_v5 = vpack.c.bf16 %v3677_v56, %v3675_v45  ;;  %v3241_v58 = vadd.f32 %v3240_v14, %v7970_v30 }
 0x5dd   : > { %v4834_v62 = vmax.f32 %v4218_v57, %v4706_v34  ;;  %3279 = vmatmul.bf16.gmra.mxu0 %v7484_v36  ;;  %4259 = vmatmul.bf16.gmra.mxu3 %v8290_v5  ;;  %v3410_v35 = vadd.f32 %v3409_v15, %v3241_v58  ;;  %v6384_v36 = vld [vmem:[%s8874_s9 + $0x50] sm:$0xff] }
 0x5de   : > { %3448 = vmatmul.bf16.gmra.mxu1 %v7902_v6  ;;  %v4051_v29 = vpop.f32.mrf.mxu2  ;;  %5294 = vmatpush.bf16.msrb.mxu3 %v6384_v36 }
 0x5df   : > { %v4052_v47 = vadd.f32 %v4051_v29, %v8122_v18  ;;  %v8297_v21 = vpack.c.bf16 %v4834_v62, %v4832_v42  ;;  %v3551_v39 = vmul.f32 0.2, %v3410_v35 }
 0x5e0   : > { %v4220_v40 = vpop.f32.mrf.mxu3 }
 0x5e1   : > { %v4221_v26 = vadd.f32 %v4220_v40, %v4052_v47  ;;  %v3679_v14 = vmax.f32 %v3410_v35, %v3551_v39 }
 0x5e2   : > { %v3242_v46 = vpop.f32.mrf.mxu0 }
 0x5e3   : > { %v3243_v1 = vadd.f32 %v3242_v46, %v7970_v30  ;;  %v3411_v6 = vpop.f32.mrf.mxu1  ;;  %v4708_v34 = vmul.f32 0.2, %v4221_v26  ;;  %v9104_v46 = vld [vmem:[#allocation32_spill] sm:$0xff] }
 0x5e5   : > { %v3412_v9 = vadd.f32 %v3411_v6, %v3243_v1  ;;  %v4836_v40 = vmax.f32 %v4221_v26, %v4708_v34 }
 0x5e6   : > { %v4053_v45 = vpop.f32.mrf.mxu2 }
 0x5e7   : > { %v3553_v19 = vmul.f32 0.2, %v3412_v9  ;;  %v4054_v56 = vadd.f32 %v4053_v45, %v8122_v18 }
 0x5e8   : > { %v4222_v57 = vpop.f32.mrf.mxu3 }
 0x5e9   : > { %v3681_v15 = vmax.f32 %v3412_v9, %v3553_v19  ;;  %v4223_v42 = vadd.f32 %v4222_v57, %v4054_v56 }
 0x5ea   : > { %v3245_v62 = vpop.f32.mrf.mxu0 }
 0x5eb   : > { %v4710_v58 = vmul.f32 0.2, %v4223_v42  ;;  %v3414_v29 = vpop.f32.mrf.mxu1  ;;  %4095 = vmatmul.bf16.gmra.mxu2 %v7921_v12  ;;  %v8308_v47 = vpack.c.bf16 %v3681_v15, %v3679_v14  ;;  %v3246_v36 = vadd.f32 %v3245_v62, %v7970_v30 }
 0x5ed   : > { %9103 = vst [vmem:[#allocation33_spill] sm:$0xff] %v8308_v47  ;;  %v4838_v53 = vmax.f32 %v4223_v42, %v4710_v58  ;;  %3284 = vmatmul.bf16.gmra.mxu0 %v7496_v17  ;;  %4264 = vmatmul.bf16.gmra.mxu3 %v8308_v47  ;;  %v3415_v9 = vadd.f32 %v3414_v29, %v3246_v36  ;;  %v9105_v29 = vld [vmem:[#allocation6_spill] sm:$0xff] }
 0x5ee   : > { %3453 = vmatmul.bf16.gmra.mxu1 %v9104_v46  ;;  %v4056_v35 = vpop.f32.mrf.mxu2 }
 0x5ef   : > { %v4057_v1 = vadd.f32 %v4056_v35, %v8122_v18  ;;  %v8315_v6 = vpack.c.bf16 %v4838_v53, %v4836_v40  ;;  %v3555_v57 = vmul.f32 0.2, %v3415_v9 }
 0x5f0   : > { %v4225_v39 = vpop.f32.mrf.mxu3 }
 0x5f1   : > { %v4226_v45 = vadd.f32 %v4225_v39, %v4057_v1  ;;  %v3683_v62 = vmax.f32 %v3415_v9, %v3555_v57 }
 0x5f2   : > { %v3247_v19 = vpop.f32.mrf.mxu0 }
 0x5f3   : > { %v3248_v26 = vadd.f32 %v3247_v19, %v7970_v30  ;;  %v3416_v56 = vpop.f32.mrf.mxu1  ;;  %v4712_v58 = vmul.f32 0.2, %v4226_v45 }
 0x5f5   : > { %v3417_v14 = vadd.f32 %v3416_v56, %v3248_v26  ;;  %v4840_v1 = vmax.f32 %v4226_v45, %v4712_v58  ;;  %v9107_v26 = vld [vmem:[#allocation3_spill] sm:$0xff]  ;;  %v9108_v56 = vld [vmem:[#allocation34_spill] sm:$0xff] }
 0x5f6   : > { %v4058_v34 = vpop.f32.mrf.mxu2 }
 0x5f7   : > { %v3557_v17 = vmul.f32 0.2, %v3417_v14  ;;  %v4059_v15 = vadd.f32 %v4058_v34, %v8122_v18 }
 0x5f8   : > { %v4227_v42 = vpop.f32.mrf.mxu3 }
 0x5f9   : > { %v3685_v46 = vmax.f32 %v3417_v14, %v3557_v17  ;;  %v4228_v35 = vadd.f32 %v4227_v42, %v4059_v15 }
 0x5fa   : > { %v3250_v40 = vpop.f32.mrf.mxu0 }
 0x5fb   : > { %v4714_v53 = vmul.f32 0.2, %v4228_v35  ;;  %v3419_v47 = vpop.f32.mrf.mxu1  ;;  %4100 = vmatmul.bf16.gmra.mxu2 %v9105_v29  ;;  %v8320_v36 = vpack.c.bf16 %v3685_v46, %v3683_v62  ;;  %v3251_v19 = vadd.f32 %v3250_v40, %v7970_v30 }
 0x5fd   : > { %9106 = vst [vmem:[#allocation30_spill] sm:$0xff] %v8320_v36  ;;  %v4842_v39 = vmax.f32 %v4228_v35, %v4714_v53  ;;  %3289 = vmatmul.bf16.gmra.mxu0 %v9107_v26  ;;  %4269 = vmatmul.bf16.gmra.mxu3 %v8320_v36  ;;  %v3420_v17 = vadd.f32 %v3419_v47, %v3251_v19 }
 0x5fe   : > { %3458 = vmatmul.bf16.gmra.mxu1 %v9108_v56  ;;  %v4061_v9 = vpop.f32.mrf.mxu2 }
 0x5ff   : > { %v4062_v57 = vadd.f32 %v4061_v9, %v8122_v18  ;;  %v8327_v14 = vpack.c.bf16 %v4842_v39, %v4840_v1  ;;  %v3559_v58 = vmul.f32 0.2, %v3420_v17 }
 0x600   : > { %v4230_v34 = vpop.f32.mrf.mxu3 }
 0x601   : > { %9109 = vst [vmem:[#allocation32_spill] sm:$0xff] %v8327_v14  ;;  %v4231_v15 = vadd.f32 %v4230_v34, %v4062_v57  ;;  %v3687_v56 = vmax.f32 %v3420_v17, %v3559_v58 }
 0x602   : > { %v3252_v42 = vpop.f32.mrf.mxu0 }
 0x603   : > { %v3253_v45 = vadd.f32 %v3252_v42, %v7970_v30  ;;  %v3421_v62 = vpop.f32.mrf.mxu1  ;;  %v4716_v36 = vmul.f32 0.2, %v4231_v15  ;;  %v9111_v42 = vld [vmem:[#allocation5_spill] sm:$0xff] }
 0x605   : > { %v3422_v46 = vadd.f32 %v3421_v62, %v3253_v45  ;;  %v4844_v19 = vmax.f32 %v4231_v15, %v4716_v36  ;;  %v9112_v45 = vld [vmem:[#allocation2_spill] sm:$0xff] }
 0x606   : > { %v4063_v35 = vpop.f32.mrf.mxu2 }
 0x607   : > { %v3561_v40 = vmul.f32 0.2, %v3422_v46  ;;  %v4064_v53 = vadd.f32 %v4063_v35, %v8122_v18 }
 0x608   : > { %v4232_v26 = vpop.f32.mrf.mxu3 }
 0x609   : > { %v3689_v29 = vmax.f32 %v3422_v46, %v3561_v40  ;;  %v4233_v9 = vadd.f32 %v4232_v26, %v4064_v53 }
 0x60a   : > { %v3255_v1 = vpop.f32.mrf.mxu0 }
 0x60b   : > { %v4718_v39 = vmul.f32 0.2, %v4233_v9  ;;  %v3424_v14 = vpop.f32.mrf.mxu1  ;;  %4105 = vmatmul.bf16.gmra.mxu2 %v7957_v4  ;;  %v8332_v47 = vpack.c.bf16 %v3689_v29, %v3687_v56  ;;  %v3256_v34 = vadd.f32 %v3255_v1, %v7970_v30 }
 0x60d   : > { %9110 = vst [vmem:[#allocation3_spill] sm:$0xff] %v8332_v47  ;;  %v4846_v57 = vmax.f32 %v4233_v9, %v4718_v39  ;;  %3294 = vmatmul.bf16.gmra.mxu0 %v9111_v42  ;;  %4274 = vmatmul.bf16.gmra.mxu3 %v8332_v47  ;;  %v3425_v35 = vadd.f32 %v3424_v14, %v3256_v34  ;;  %v9113_v14 = vld [vmem:[#allocation12_spill] sm:$0xff] }
 0x60e   : > { %3463 = vmatmul.bf16.gmra.mxu1 %v9112_v45  ;;  %v4066_v17 = vpop.f32.mrf.mxu2 }
 0x60f   : > { %v4067_v62 = vadd.f32 %v4066_v17, %v8122_v18  ;;  %v8339_v58 = vpack.c.bf16 %v4846_v57, %v4844_v19  ;;  %v3563_v53 = vmul.f32 0.2, %v3425_v35 }
 0x610   : > { %v4235_v46 = vpop.f32.mrf.mxu3 }
 0x611   : > { %v4236_v40 = vadd.f32 %v4235_v46, %v4067_v62  ;;  %v3691_v42 = vmax.f32 %v3425_v35, %v3563_v53 }
 0x612   : > { %v3257_v29 = vpop.f32.mrf.mxu0 }
 0x613   : > { %v3258_v36 = vadd.f32 %v3257_v29, %v7970_v30  ;;  %v3426_v15 = vpop.f32.mrf.mxu1  ;;  %v4720_v45 = vmul.f32 0.2, %v4236_v40 }
 0x615   : > { %v3427_v26 = vadd.f32 %v3426_v15, %v3258_v36  ;;  %v4848_v62 = vmax.f32 %v4236_v40, %v4720_v45  ;;  %v9115_v36 = vld [vmem:[#allocation8_spill] sm:$0xff]  ;;  %v6383_v40 = vld [vmem:[%s8874_s9 + $0x48] sm:$0xff] }
 0x616   : > { %v4068_v56 = vpop.f32.mrf.mxu2  ;;  %v9116_v15 = vld [vmem:[#allocation4_spill] sm:$0xff]  ;;  %5295 = vmatpush.bf16.msrb.mxu3 %v6383_v40 }
 0x617   : > { %v3565_v9 = vmul.f32 0.2, %v3427_v26  ;;  %v4069_v1 = vadd.f32 %v4068_v56, %v8122_v18 }
 0x618   : > { %v4237_v39 = vpop.f32.mrf.mxu3 }
 0x619   : > { %v3693_v47 = vmax.f32 %v3427_v26, %v3565_v9  ;;  %v4238_v17 = vadd.f32 %v4237_v39, %v4069_v1 }
 0x61a   : > { %v3260_v19 = vpop.f32.mrf.mxu0 }
 0x61b   : > { %v4722_v57 = vmul.f32 0.2, %v4238_v17  ;;  %v3429_v4 = vpop.f32.mrf.mxu1  ;;  %4110 = vmatmul.bf16.gmra.mxu2 %v9113_v14  ;;  %v8344_v34 = vpack.c.bf16 %v3693_v47, %v3691_v42  ;;  %v3261_v29 = vadd.f32 %v3260_v19, %v7970_v30  ;;  %v6375_v47 = vld [vmem:[%s8874_s9 + $0x8] sm:$0xff] }
 0x61c   : > { %5126 = vmatpush.bf16.msrb.mxu2 %v6375_v47  ;;  %v9118_v14 = vld [vmem:[#allocation15_spill] sm:$0xff] }
 0x61d   : > { %9114 = vst [vmem:[#allocation34_spill] sm:$0xff] %v8344_v34  ;;  %v4850_v46 = vmax.f32 %v4238_v17, %v4722_v57  ;;  %3299 = vmatmul.bf16.gmra.mxu0 %v9115_v36  ;;  %4279 = vmatmul.bf16.gmra.mxu3 %v8344_v34  ;;  %v3430_v9 = vadd.f32 %v3429_v4, %v3261_v29 }
 0x61e   : > { %3468 = vmatmul.bf16.gmra.mxu1 %v9116_v15  ;;  %v4071_v35 = vpop.f32.mrf.mxu2 }
 0x61f   : > { %v4072_v53 = vadd.f32 %v4071_v35, %v8122_v18  ;;  %v8351_v26 = vpack.c.bf16 %v4850_v46, %v4848_v62  ;;  %v3567_v17 = vmul.f32 0.2, %v3430_v9 }
 0x620   : > { %v4240_v56 = vpop.f32.mrf.mxu3 }
 0x621   : > { %9117 = vst [vmem:[#allocation5_spill] sm:$0xff] %v8351_v26  ;;  %v4241_v1 = vadd.f32 %v4240_v56, %v4072_v53  ;;  %v3695_v29 = vmax.f32 %v3430_v9, %v3567_v17 }
 0x622   : > { %v3262_v39 = vpop.f32.mrf.mxu0 }
 0x623   : > { %v3263_v42 = vadd.f32 %v3262_v39, %v7970_v30  ;;  %v3431_v45 = vpop.f32.mrf.mxu1  ;;  %v4724_v36 = vmul.f32 0.2, %v4241_v1 }
 0x625   : > { %v3432_v19 = vadd.f32 %v3431_v45, %v3263_v42  ;;  %v4852_v47 = vmax.f32 %v4241_v1, %v4724_v36  ;;  %v9120_v45 = vld [vmem:[#allocation11_spill] sm:$0xff] }
 0x626   : > { %v4073_v57 = vpop.f32.mrf.mxu2 }
 0x627   : > { %v3569_v62 = vmul.f32 0.2, %v3432_v19  ;;  %v4074_v4 = vadd.f32 %v4073_v57, %v8122_v18  ;;  %v9121_v57 = vld [vmem:[#allocation7_spill] sm:$0xff] }
 0x628   : > { %v4242_v46 = vpop.f32.mrf.mxu3 }
 0x629   : > { %v3697_v15 = vmax.f32 %v3432_v19, %v3569_v62  ;;  %v4243_v35 = vadd.f32 %v4242_v46, %v4074_v4 }
 0x62a   : > { %v3265_v53 = vpop.f32.mrf.mxu0 }
 0x62b   : > { %v4726_v56 = vmul.f32 0.2, %v4243_v35  ;;  %v3434_v34 = vpop.f32.mrf.mxu1  ;;  %4115 = vmatmul.bf16.gmra.mxu2 %v9118_v14  ;;  %v8362_v39 = vpack.c.bf16 %v3697_v15, %v3695_v29  ;;  %v3266_v42 = vadd.f32 %v3265_v53, %v7970_v30 }
 0x62d   : > { %9119 = vst [vmem:[#allocation2_spill] sm:$0xff] %v8362_v39  ;;  %v4854_v40 = vmax.f32 %v4243_v35, %v4726_v56  ;;  %4284 = vmatmul.bf16.gmra.mxu3 %v8362_v39  ;;  %4338 = vmatmul.bf16.vlgmr.msrb.gmra.mxu0 %v9120_v45  ;;  %v3435_v4 = vadd.f32 %v3434_v34, %v3266_v42  ;;  %v9123_v34 = vld [vmem:[#allocation18_spill] sm:$0xff] }
 0x62e   : > { %4507 = vmatmul.bf16.vlgmr.msrb.gmra.mxu1 %v9121_v57  ;;  %v4076_v9 = vpop.f32.mrf.mxu2 }
 0x62f   : > { %v4077_v17 = vadd.f32 %v4076_v9, %v8122_v18  ;;  %v8369_v19 = vpack.c.bf16 %v4854_v40, %v4852_v47  ;;  %v3571_v15 = vmul.f32 0.2, %v3435_v4 }
 0x630   : > { %v4245_v62 = vpop.f32.mrf.mxu3 }
 0x631   : > { %9122 = vst [vmem:[#allocation8_spill] sm:$0xff] %v8369_v19  ;;  %v4246_v46 = vadd.f32 %v4245_v62, %v4077_v17  ;;  %v3699_v57 = vmax.f32 %v3435_v4, %v3571_v15 }
 0x632   : > { %v3267_v29 = vpop.f32.mrf.mxu0 }
 0x633   : > { %v3268_v1 = vadd.f32 %v3267_v29, %v7970_v30  ;;  %v3436_v36 = vpop.f32.mrf.mxu1  ;;  %v4728_v14 = vmul.f32 0.2, %v4246_v46 }
 0x635   : > { %v3437_v35 = vadd.f32 %v3436_v36, %v3268_v1  ;;  %v4856_v17 = vmax.f32 %v4246_v46, %v4728_v14  ;;  %v9125_v1 = vld [vmem:[#allocation14_spill] sm:$0xff] }
 0x636   : > { %v4078_v53 = vpop.f32.mrf.mxu2  ;;  %v9126_v36 = vld [vmem:[#allocation10_spill] sm:$0xff] }
 0x637   : > { %v3573_v56 = vmul.f32 0.2, %v3437_v35  ;;  %v4079_v45 = vadd.f32 %v4078_v53, %v8122_v18 }
 0x638   : > { %v4247_v39 = vpop.f32.mrf.mxu3 }
 0x639   : > { %v3701_v26 = vmax.f32 %v3437_v35, %v3573_v56  ;;  %v4248_v9 = vadd.f32 %v4247_v39, %v4079_v45 }
 0x63a   : > { %v3270_v47 = vpop.f32.mrf.mxu0 }
 0x63b   : > { %v4730_v40 = vmul.f32 0.2, %v4248_v9  ;;  %v3439_v19 = vpop.f32.mrf.mxu1  ;;  %4120 = vmatmul.bf16.gmra.mxu2 %v9123_v34  ;;  %v8374_v42 = vpack.c.bf16 %v3701_v26, %v3699_v57  ;;  %v3271_v29 = vadd.f32 %v3270_v47, %v7970_v30 }
 0x63d   : > { %9124 = vst [vmem:[#allocation4_spill] sm:$0xff] %v8374_v42  ;;  %v4858_v62 = vmax.f32 %v4248_v9, %v4730_v40  ;;  %4289 = vmatmul.bf16.gmra.mxu3 %v8374_v42  ;;  %4343 = vmatmul.bf16.gmra.mxu0 %v9125_v1  ;;  %v3440_v53 = vadd.f32 %v3439_v19, %v3271_v29 }
 0x63e   : > { %4512 = vmatmul.bf16.gmra.mxu1 %v9126_v36  ;;  %v4081_v4 = vpop.f32.mrf.mxu2 }
 0x63f   : > { %v4082_v39 = vadd.f32 %v4081_v4, %v8122_v18  ;;  %v8381_v15 = vpack.c.bf16 %v4858_v62, %v4856_v17  ;;  %v3575_v45 = vmul.f32 0.2, %v3440_v53 }
 0x640   : > { %v4250_v35 = vpop.f32.mrf.mxu3 }
 0x641   : > { %9127 = vst [vmem:[#allocation11_spill] sm:$0xff] %v8381_v15  ;;  %v4251_v56 = vadd.f32 %v4250_v35, %v4082_v39  ;;  %v3703_v36 = vmax.f32 %v3440_v53, %v3575_v45 }
 0x642   : > { %v3272_v26 = vpop.f32.mrf.mxu0 }
 0x643   : > { %v3273_v14 = vadd.f32 %v3272_v26, %v7970_v30  ;;  %v3441_v46 = vpop.f32.mrf.mxu1  ;;  %v4732_v42 = vmul.f32 0.2, %v4251_v56  ;;  %v9129_v26 = vld [vmem:[#allocation17_spill] sm:$0xff] }
 0x645   : > { %v3442_v57 = vadd.f32 %v3441_v46, %v3273_v14  ;;  %v4860_v29 = vmax.f32 %v4251_v56, %v4732_v42  ;;  %v9130_v14 = vld [vmem:[#allocation13_spill] sm:$0xff] }
 0x646   : > { %v4083_v9 = vpop.f32.mrf.mxu2 }
 0x647   : > { %v3577_v47 = vmul.f32 0.2, %v3442_v57  ;;  %v4084_v40 = vadd.f32 %v4083_v9, %v8122_v18 }
 0x648   : > { %v4252_v1 = vpop.f32.mrf.mxu3 }
 0x649   : > { %v3705_v34 = vmax.f32 %v3442_v57, %v3577_v47  ;;  %v4253_v4 = vadd.f32 %v4252_v1, %v4084_v40 }
 0x64a   : > { %v3275_v17 = vpop.f32.mrf.mxu0 }
 0x64b   : > { %v4734_v62 = vmul.f32 0.2, %v4253_v4  ;;  %v3444_v15 = vpop.f32.mrf.mxu1  ;;  %4125 = vmatmul.bf16.gmra.mxu2 %v8028_v44  ;;  %v8386_v19 = vpack.c.bf16 %v3705_v34, %v3703_v36  ;;  %v3276_v35 = vadd.f32 %v3275_v17, %v7970_v30 }
 0x64d   : > { %9128 = vst [vmem:[#allocation7_spill] sm:$0xff] %v8386_v19  ;;  %v4862_v39 = vmax.f32 %v4253_v4, %v4734_v62  ;;  %4294 = vmatmul.bf16.gmra.mxu3 %v8386_v19  ;;  %4348 = vmatmul.bf16.gmra.mxu0 %v9129_v26  ;;  %v3445_v9 = vadd.f32 %v3444_v15, %v3276_v35  ;;  %v9131_v15 = vld [vmem:[#allocation24_spill] sm:$0xff] }
 0x64e   : > { %4517 = vmatmul.bf16.gmra.mxu1 %v9130_v14  ;;  %v4086_v53 = vpop.f32.mrf.mxu2 }
 0x64f   : > { %v4087_v46 = vadd.f32 %v4086_v53, %v8122_v18  ;;  %v8393_v45 = vpack.c.bf16 %v4862_v39, %v4860_v29  ;;  %v3579_v40 = vmul.f32 0.2, %v3445_v9 }
 0x650   : > { %v4255_v57 = vpop.f32.mrf.mxu3 }
 0x651   : > { %v4256_v47 = vadd.f32 %v4255_v57, %v4087_v46  ;;  %v3707_v26 = vmax.f32 %v3445_v9, %v3579_v40 }
 0x652   : > { %v3277_v34 = vpop.f32.mrf.mxu0 }
 0x653   : > { %v3278_v42 = vadd.f32 %v3277_v34, %v7970_v30  ;;  %v3446_v56 = vpop.f32.mrf.mxu1  ;;  %v4736_v14 = vmul.f32 0.2, %v4256_v47 }
 0x655   : > { %v3447_v1 = vadd.f32 %v3446_v56, %v3278_v42  ;;  %v4864_v46 = vmax.f32 %v4256_v47, %v4736_v14  ;;  %v9133_v42 = vld [vmem:[#allocation20_spill] sm:$0xff]  ;;  %v6382_v47 = vld [vmem:[%s8874_s9 + $0x40] sm:$0xff] }
 0x656   : > { %v4088_v36 = vpop.f32.mrf.mxu2  ;;  %v9134_v56 = vld [vmem:[#allocation16_spill] sm:$0xff]  ;;  %5296 = vmatpush.bf16.msrb.mxu3 %v6382_v47 }
 0x657   : > { %v3581_v4 = vmul.f32 0.2, %v3447_v1  ;;  %v4089_v17 = vadd.f32 %v4088_v36, %v8122_v18 }
 0x658   : > { %v4257_v62 = vpop.f32.mrf.mxu3 }
 0x659   : > { %v3709_v19 = vmax.f32 %v3447_v1, %v3581_v4  ;;  %v4258_v53 = vadd.f32 %v4257_v62, %v4089_v17 }
 0x65a   : > { %v3280_v29 = vpop.f32.mrf.mxu0 }
 0x65b   : > { %v4738_v39 = vmul.f32 0.2, %v4258_v53  ;;  %v3449_v44 = vpop.f32.mrf.mxu1  ;;  %4130 = vmatmul.bf16.gmra.mxu2 %v9131_v15  ;;  %v8398_v35 = vpack.c.bf16 %v3709_v19, %v3707_v26  ;;  %v3281_v34 = vadd.f32 %v3280_v29, %v7970_v30  ;;  %v6374_v19 = vld [vmem:[%s8874_s9] sm:$0xff] }
 0x65c   : > { %5127 = vmatpush.bf16.msrb.mxu2 %v6374_v19 }
 0x65d   : > { %9132 = vst [vmem:[#allocation14_spill] sm:$0xff] %v8398_v35  ;;  %v4866_v57 = vmax.f32 %v4258_v53, %v4738_v39  ;;  %4299 = vmatmul.bf16.gmra.mxu3 %v8398_v35  ;;  %4353 = vmatmul.bf16.gmra.mxu0 %v9133_v42  ;;  %v3450_v4 = vadd.f32 %v3449_v44, %v3281_v34 }
 0x65e   : > { %4522 = vmatmul.bf16.gmra.mxu1 %v9134_v56  ;;  %v4091_v9 = vpop.f32.mrf.mxu2 }
 0x65f   : > { %v4092_v40 = vadd.f32 %v4091_v9, %v8122_v18  ;;  %v8405_v1 = vpack.c.bf16 %v4866_v57, %v4864_v46  ;;  %v3583_v53 = vmul.f32 0.2, %v3450_v4 }
 0x660   : > { %v4260_v36 = vpop.f32.mrf.mxu3 }
 0x661   : > { %v4261_v17 = vadd.f32 %v4260_v36, %v4092_v40  ;;  %v3711_v34 = vmax.f32 %v3450_v4, %v3583_v53 }
 0x662   : > { %v3282_v62 = vpop.f32.mrf.mxu0 }
 0x663   : > { %v3283_v26 = vadd.f32 %v3282_v62, %v7970_v30  ;;  %v3451_v14 = vpop.f32.mrf.mxu1  ;;  %v4740_v42 = vmul.f32 0.2, %v4261_v17 }
 0x665   : > { %v3452_v29 = vadd.f32 %v3451_v14, %v3283_v26  ;;  %v4868_v19 = vmax.f32 %v4261_v17, %v4740_v42 }
 0x666   : > { %v4093_v39 = vpop.f32.mrf.mxu2 }
 0x667   : > { %v3585_v46 = vmul.f32 0.2, %v3452_v29  ;;  %v4094_v44 = vadd.f32 %v4093_v39, %v8122_v18 }
 0x668   : > { %v4262_v57 = vpop.f32.mrf.mxu3 }
 0x669   : > { %v3713_v56 = vmax.f32 %v3452_v29, %v3585_v46  ;;  %v4263_v9 = vadd.f32 %v4262_v57, %v4094_v44 }
 0x66a   : > { %v3285_v40 = vpop.f32.mrf.mxu0 }
 0x66b   : > { %v4742_v36 = vmul.f32 0.2, %v4263_v9  ;;  %v3454_v35 = vpop.f32.mrf.mxu1  ;;  %4135 = vmatmul.bf16.gmra.mxu2 %v8058_v32  ;;  %v8416_v62 = vpack.c.bf16 %v3713_v56, %v3711_v34  ;;  %v3286_v26 = vadd.f32 %v3285_v40, %v7970_v30 }
 0x66d   : > { %9135 = vst [vmem:[#allocation10_spill] sm:$0xff] %v8416_v62  ;;  %v4870_v47 = vmax.f32 %v4263_v9, %v4742_v36  ;;  %4304 = vmatmul.bf16.gmra.mxu3 %v8416_v62  ;;  %4358 = vmatmul.bf16.gmra.mxu0 %v7645_v48  ;;  %v3455_v39 = vadd.f32 %v3454_v35, %v3286_v26 }
 0x66e   : > { %4527 = vmatmul.bf16.gmra.mxu1 %v8051_v55  ;;  %v4096_v4 = vpop.f32.mrf.mxu2 }
 0x66f   : > { %v4097_v14 = vadd.f32 %v4096_v4, %v8122_v18  ;;  %v8423_v53 = vpack.c.bf16 %v4870_v47, %v4868_v19  ;;  %v3587_v34 = vmul.f32 0.2, %v3455_v39 }
 0x670   : > { %v4265_v29 = vpop.f32.mrf.mxu3 }
 0x671   : > { %v4266_v46 = vadd.f32 %v4265_v29, %v4097_v14  ;;  %v3715_v55 = vmax.f32 %v3455_v39, %v3587_v34 }
 0x672   : > { %v3287_v44 = vpop.f32.mrf.mxu0 }
 0x673   : > { %v3288_v17 = vadd.f32 %v3287_v44, %v7970_v30  ;;  %v3456_v57 = vpop.f32.mrf.mxu1  ;;  %v4744_v36 = vmul.f32 0.2, %v4266_v46  ;;  %v9137_v44 = vld [vmem:[#allocation35_spill] sm:$0xff] }
 0x675   : > { %v3457_v42 = vadd.f32 %v3456_v57, %v3288_v17  ;;  %v4872_v26 = vmax.f32 %v4266_v46, %v4744_v36 }
 0x676   : > { %v4098_v56 = vpop.f32.mrf.mxu2 }
 0x677   : > { %v3589_v9 = vmul.f32 0.2, %v3457_v42  ;;  %v4099_v48 = vadd.f32 %v4098_v56, %v8122_v18 }
 0x678   : > { %v4267_v40 = vpop.f32.mrf.mxu3 }
 0x679   : > { %v3717_v62 = vmax.f32 %v3457_v42, %v3589_v9  ;;  %v4268_v4 = vadd.f32 %v4267_v40, %v4099_v48 }
 0x67a   : > { %v3290_v19 = vpop.f32.mrf.mxu0 }
 0x67b   : > { %v4746_v47 = vmul.f32 0.2, %v4268_v4  ;;  %v3459_v32 = vpop.f32.mrf.mxu1  ;;  %4140 = vmatmul.bf16.gmra.mxu2 %v8070_v13  ;;  %v8428_v35 = vpack.c.bf16 %v3717_v62, %v3715_v55  ;;  %v3291_v29 = vadd.f32 %v3290_v19, %v7970_v30 }
 0x67d   : > { %9136 = vst [vmem:[#allocation17_spill] sm:$0xff] %v8428_v35  ;;  %v4874_v14 = vmax.f32 %v4268_v4, %v4746_v47  ;;  %4309 = vmatmul.bf16.gmra.mxu3 %v8428_v35  ;;  %4363 = vmatmul.bf16.gmra.mxu0 %v7669_v52  ;;  %v3460_v42 = vadd.f32 %v3459_v32, %v3291_v29 }
 0x67e   : > { %4532 = vmatmul.bf16.gmra.mxu1 %v9137_v44  ;;  %v4101_v39 = vpop.f32.mrf.mxu2 }
 0x67f   : > { %v4102_v17 = vadd.f32 %v4101_v39, %v8122_v18  ;;  %v8435_v57 = vpack.c.bf16 %v4874_v14, %v4872_v26  ;;  %v3591_v48 = vmul.f32 0.2, %v3460_v42 }
 0x680   : > { %v4270_v34 = vpop.f32.mrf.mxu3 }
 0x681   : > { %v4271_v56 = vadd.f32 %v4270_v34, %v4102_v17  ;;  %v3719_v19 = vmax.f32 %v3460_v42, %v3591_v48 }
 0x682   : > { %v3292_v62 = vpop.f32.mrf.mxu0 }
 0x683   : > { %v3293_v46 = vadd.f32 %v3292_v62, %v7970_v30  ;;  %v3461_v9 = vpop.f32.mrf.mxu1  ;;  %v4748_v47 = vmul.f32 0.2, %v4271_v56 }
 0x685   : > { %v3462_v40 = vadd.f32 %v3461_v9, %v3293_v46  ;;  %v4876_v29 = vmax.f32 %v4271_v56, %v4748_v47 }
 0x686   : > { %v4103_v55 = vpop.f32.mrf.mxu2 }
 0x687   : > { %v3593_v36 = vmul.f32 0.2, %v3462_v40  ;;  %v4104_v52 = vadd.f32 %v4103_v55, %v8122_v18 }
 0x688   : > { %v4272_v4 = vpop.f32.mrf.mxu3 }
 0x689   : > { %v3721_v44 = vmax.f32 %v3462_v40, %v3593_v36  ;;  %v4273_v39 = vadd.f32 %v4272_v4, %v4104_v52 }
 0x68a   : > { %v3295_v26 = vpop.f32.mrf.mxu0 }
 0x68b   : > { %v4750_v14 = vmul.f32 0.2, %v4273_v39  ;;  %v3464_v35 = vpop.f32.mrf.mxu1  ;;  %4145 = vmatmul.bf16.gmra.mxu2 %v8094_v27  ;;  %v8440_v32 = vpack.c.bf16 %v3721_v44, %v3719_v19  ;;  %v3296_v34 = vadd.f32 %v3295_v26, %v7970_v30 }
 0x68d   : > { %v4878_v17 = vmax.f32 %v4273_v39, %v4750_v14  ;;  %4314 = vmatmul.bf16.gmra.mxu3 %v8440_v32  ;;  %4368 = vmatmul.bf16.gmra.mxu0 %v7693_v61  ;;  %v3465_v48 = vadd.f32 %v3464_v35, %v3296_v34 }
 0x68e   : > { %4537 = vmatmul.bf16.gmra.mxu1 %v8087_v7  ;;  %v4106_v42 = vpop.f32.mrf.mxu2 }
 0x68f   : > { %v4107_v62 = vadd.f32 %v4106_v42, %v8122_v18  ;;  %v8447_v46 = vpack.c.bf16 %v4878_v17, %v4876_v29  ;;  %v3595_v52 = vmul.f32 0.2, %v3465_v48 }
 0x690   : > { %v4275_v9 = vpop.f32.mrf.mxu3 }
 0x691   : > { %v4276_v40 = vadd.f32 %v4275_v9, %v4107_v62  ;;  %v3723_v7 = vmax.f32 %v3465_v48, %v3595_v52 }
 0x692   : > { %v3297_v55 = vpop.f32.mrf.mxu0 }
 0x693   : > { %v3298_v56 = vadd.f32 %v3297_v55, %v7970_v30  ;;  %v3466_v36 = vpop.f32.mrf.mxu1  ;;  %v4752_v39 = vmul.f32 0.2, %v4276_v40  ;;  %v9139_v55 = vld [vmem:[#allocation22_spill] sm:$0xff] }
 0x695   : > { %v3467_v4 = vadd.f32 %v3466_v36, %v3298_v56  ;;  %v4880_v34 = vmax.f32 %v4276_v40, %v4752_v39 }
 0x696   : > { %v4108_v19 = vpop.f32.mrf.mxu2 }
 0x697   : > { %v3597_v47 = vmul.f32 0.2, %v3467_v4  ;;  %v4109_v61 = vadd.f32 %v4108_v19, %v8122_v18 }
 0x698   : > { %v4277_v44 = vpop.f32.mrf.mxu3 }
 0x699   : > { %v3725_v26 = vmax.f32 %v3467_v4, %v3597_v47  ;;  %v4278_v14 = vadd.f32 %v4277_v44, %v4109_v61 }
 0x69a   : > { %v3300_v29 = vpop.f32.mrf.mxu0 }
 0x69b   : > { %v4754_v17 = vmul.f32 0.2, %v4278_v14  ;;  %v3469_v42 = vpop.f32.mrf.mxu1  ;;  %4150 = vmatmul.bf16.gmra.mxu2 %v8112_v22  ;;  %v8452_v35 = vpack.c.bf16 %v3725_v26, %v3723_v7  ;;  %v3301_v9 = vadd.f32 %v3300_v29, %v7970_v30  ;;  %v6401_v29 = vld [vmem:[%s8873_s8] sm:$0x3] }
 0x69d   : > { %9138 = vst [vmem:[#allocation13_spill] sm:$0xff] %v8452_v35  ;;  %v4882_v62 = vmax.f32 %v4278_v14, %v4754_v17  ;;  %4319 = vmatmul.bf16.gmra.mxu3 %v8452_v35  ;;  %4373 = vmatmul.bf16.gmra.mxu0 %v9090_v43  ;;  %v3470_v4 = vadd.f32 %v3469_v42, %v3301_v9  ;;  %v8466_v17 = vperm.slane %v6401_v29, 1  ;;  %v9143_v29 = vld [vmem:[#allocation23_spill] sm:$0xff] }
 0x69e   : > { %4542 = vmatmul.bf16.gmra.mxu1 %v9139_v55  ;;  %v4111_v48 = vpop.f32.mrf.mxu2 }
 0x69f   : > { %v4112_v56 = vadd.f32 %v4111_v48, %v8122_v18  ;;  %v8459_v36 = vpack.c.bf16 %v4882_v62, %v4880_v34  ;;  %v3599_v44 = vmul.f32 0.2, %v3470_v4 }
 0x6a0   : > { %v4280_v52 = vpop.f32.mrf.mxu3 }
 0x6a1   : > { %v4281_v19 = vadd.f32 %v4280_v52, %v4112_v56  ;;  %v3727_v34 = vmax.f32 %v3470_v4, %v3599_v44  ;;  %v9140_v56 = vld [vmem:[#allocation26_spill] sm:$0xff] }
 0x6a2   : > { %v3302_v47 = vpop.f32.mrf.mxu0 }
 0x6a3   : > { %v3303_v40 = vadd.f32 %v3302_v47, %v7970_v30  ;;  %v3471_v61 = vpop.f32.mrf.mxu1  ;;  %v4756_v42 = vmul.f32 0.2, %v4281_v19 }
 0x6a5   : > { %v3472_v7 = vadd.f32 %v3471_v61, %v3303_v40  ;;  %v4884_v47 = vmax.f32 %v4281_v19, %v4756_v42 }
 0x6a6   : > { %v4113_v39 = vpop.f32.mrf.mxu2 }
 0x6a7   : > { %v3601_v26 = vmul.f32 0.2, %v3472_v7  ;;  %v4114_v43 = vadd.f32 %v4113_v39, %v8122_v18  ;;  %v9142_v39 = vld [vmem:[#allocation27_spill] sm:$0xff] }
 0x6a8   : > { %v4282_v14 = vpop.f32.mrf.mxu3 }
 0x6a9   : > { %v3729_v62 = vmax.f32 %v3472_v7, %v3601_v26  ;;  %v4283_v9 = vadd.f32 %v4282_v14, %v4114_v43 }
 0x6aa   : > { %v4339_v55 = vpop.f32.mrf.mxu0 }
 0x6ab   : > { %v4758_v30 = vmul.f32 0.2, %v4283_v9  ;;  %v4508_v48 = vpop.f32.mrf.mxu1  ;;  %4155 = vmatmul.bf16.gmra.mxu2 %v9140_v56  ;;  %v8469_v52 = vpack.c.bf16 %v3729_v62, %v3727_v34  ;;  %v4340_v61 = vadd.f32 %v4339_v55, %v8466_v17 }
 0x6ad   : > { %9141 = vst [vmem:[#allocation24_spill] sm:$0xff] %v8469_v52  ;;  %v4886_v40 = vmax.f32 %v4283_v9, %v4758_v30  ;;  %4324 = vmatmul.bf16.gmra.mxu3 %v8469_v52  ;;  %4378 = vmatmul.bf16.gmra.mxu0 %v9142_v39  ;;  %v4509_v43 = vadd.f32 %v4508_v48, %v4340_v61 }
 0x6ae   : > { %4547 = vmatmul.bf16.gmra.mxu1 %v9143_v29  ;;  %v4116_v4 = vpop.f32.mrf.mxu2 }
 0x6af   : > { %v4117_v44 = vadd.f32 %v4116_v4, %v8122_v18  ;;  %v8476_v7 = vpack.c.bf16 %v4886_v40, %v4884_v47  ;;  %v4669_v62 = vmul.f32 0.2, %v4509_v43 }
 0x6b0   : > { %v4285_v26 = vpop.f32.mrf.mxu3 }
 0x6b1   : > { %9144 = vst [vmem:[#allocation20_spill] sm:$0xff] %v8476_v7  ;;  %v4286_v14 = vadd.f32 %v4285_v26, %v4117_v44  ;;  %v4797_v29 = vmax.f32 %v4509_v43, %v4669_v62 }
 0x6b2   : > { %v4341_v34 = vpop.f32.mrf.mxu0 }
 0x6b3   : > { %v4342_v19 = vadd.f32 %v4341_v34, %v8466_v17  ;;  %v4510_v42 = vpop.f32.mrf.mxu1  ;;  %v4760_v56 = vmul.f32 0.2, %v4286_v14 }
 0x6b5   : > { %v4511_v9 = vadd.f32 %v4510_v42, %v4342_v19  ;;  %v4888_v61 = vmax.f32 %v4286_v14, %v4760_v56 }
 0x6b6   : > { %v4118_v55 = vpop.f32.mrf.mxu2 }
 0x6b7   : > { %v4671_v30 = vmul.f32 0.2, %v4511_v9  ;;  %v4119_v39 = vadd.f32 %v4118_v55, %v8122_v18 }
 0x6b8   : > { %v4287_v52 = vpop.f32.mrf.mxu3 }
 0x6b9   : > { %v4799_v35 = vmax.f32 %v4511_v9, %v4671_v30  ;;  %v4288_v4 = vadd.f32 %v4287_v52, %v4119_v39 }
 0x6ba   : > { %v4344_v47 = vpop.f32.mrf.mxu0 }
 0x6bb   : > { %v4925_v40 = vpack.c.bf16 %v4799_v35, %v4797_v29  ;;  %v4762_v7 = vmul.f32 0.2, %v4288_v4  ;;  %v4513_v48 = vpop.f32.mrf.mxu1  ;;  %5128 = vmatmul.bf16.vlgmr.msrb.gmra.mxu2 %v8140_v63  ;;  %v4345_v26 = vadd.f32 %v4344_v47, %v8466_v17 }
 0x6bd   : > { %v4890_v44 = vmax.f32 %v4288_v4, %v4762_v7  ;;  %4383 = vmatmul.bf16.gmra.mxu0 %v7741_v38  ;;  %5297 = vmatmul.bf16.vlgmr.msrb.gmra.mxu3 %v4925_v40  ;;  %v4514_v35 = vadd.f32 %v4513_v48, %v4345_v26 }
 0x6be   : > { %4552 = vmatmul.bf16.gmra.mxu1 %v8134_v8  ;;  %v4121_v34 = vpop.f32.mrf.mxu2 }
 0x6bf   : > { %v4122_v43 = vadd.f32 %v4121_v34, %v8122_v18  ;;  %v8485_v19 = vpack.c.bf16 %v4890_v44, %v4888_v61  ;;  %v4673_v7 = vmul.f32 0.2, %v4514_v35 }
 0x6c0   : > { %v4290_v52 = vpop.f32.mrf.mxu3 }
 0x6c1   : > { %v4291_v42 = vadd.f32 %v4290_v52, %v4122_v43  ;;  %v4801_v8 = vmax.f32 %v4514_v35, %v4673_v7  ;;  %v9145_v43 = vld [vmem:[#allocation29_spill] sm:$0xff] }
 0x6c2   : > { %v4346_v62 = vpop.f32.mrf.mxu0 }
 0x6c3   : > { %v4347_v63 = vadd.f32 %v4346_v62, %v8466_v17  ;;  %v4515_v56 = vpop.f32.mrf.mxu1  ;;  %v4764_v39 = vmul.f32 0.2, %v4291_v42 }
 0x6c5   : > { %v4516_v14 = vadd.f32 %v4515_v56, %v4347_v63  ;;  %v4892_v44 = vmax.f32 %v4291_v42, %v4764_v39 }
 0x6c6   : > { %v4123_v9 = vpop.f32.mrf.mxu2 }
 0x6c7   : > { %v4675_v55 = vmul.f32 0.2, %v4516_v14  ;;  %v4124_v38 = vadd.f32 %v4123_v9, %v8122_v18 }
 0x6c8   : > { %v4292_v30 = vpop.f32.mrf.mxu3 }
 0x6c9   : > { %v4803_v29 = vmax.f32 %v4516_v14, %v4675_v55  ;;  %v4293_v4 = vadd.f32 %v4292_v30, %v4124_v38 }
 0x6ca   : > { %v4349_v47 = vpop.f32.mrf.mxu0 }
 0x6cb   : > { %v4766_v40 = vmul.f32 0.2, %v4293_v4  ;;  %v4518_v61 = vpop.f32.mrf.mxu1  ;;  %5133 = vmatmul.bf16.gmra.mxu2 %v8165_v41  ;;  %v4927_v48 = vpack.c.bf16 %v4803_v29, %v4801_v8  ;;  %v4350_v34 = vadd.f32 %v4349_v47, %v8466_v17 }
 0x6cd   : > { %v4894_v26 = vmax.f32 %v4293_v4, %v4766_v40  ;;  %4388 = vmatmul.bf16.gmra.mxu0 %v7765_v37  ;;  %5302 = vmatmul.bf16.gmra.mxu3 %v4927_v48  ;;  %v4519_v56 = vadd.f32 %v4518_v61, %v4350_v34  ;;  %v9146_v61 = vld [vmem:[#allocation28_spill] sm:$0xff] }
 0x6ce   : > { %4557 = vmatmul.bf16.gmra.mxu1 %v9145_v43  ;;  %v4126_v52 = vpop.f32.mrf.mxu2 }
 0x6cf   : > { %v4127_v35 = vadd.f32 %v4126_v52, %v8122_v18  ;;  %v8494_v62 = vpack.c.bf16 %v4894_v26, %v4892_v44  ;;  %v4677_v9 = vmul.f32 0.2, %v4519_v56 }
 0x6d0   : > { %v4295_v63 = vpop.f32.mrf.mxu3 }
 0x6d1   : > { %v4296_v7 = vadd.f32 %v4295_v63, %v4127_v35  ;;  %v4805_v39 = vmax.f32 %v4519_v56, %v4677_v9  ;;  %v9147_v35 = vld [vmem:[#allocation31_spill] sm:$0xff]  ;;  %v9148_v63 = vld [vmem:[#allocation25_spill] sm:$0xff] }
 0x6d2   : > { %v4351_v14 = vpop.f32.mrf.mxu0 }
 0x6d3   : > { %v4352_v41 = vadd.f32 %v4351_v14, %v8466_v17  ;;  %v4520_v42 = vpop.f32.mrf.mxu1  ;;  %v4768_v29 = vmul.f32 0.2, %v4296_v7 }
 0x6d5   : > { %v4521_v55 = vadd.f32 %v4520_v42, %v4352_v41  ;;  %v4896_v34 = vmax.f32 %v4296_v7, %v4768_v29 }
 0x6d6   : > { %v4128_v38 = vpop.f32.mrf.mxu2 }
 0x6d7   : > { %v4679_v30 = vmul.f32 0.2, %v4521_v55  ;;  %v4129_v37 = vadd.f32 %v4128_v38, %v8122_v18 }
 0x6d8   : > { %v4297_v8 = vpop.f32.mrf.mxu3 }
 0x6d9   : > { %v4807_v4 = vmax.f32 %v4521_v55, %v4679_v30  ;;  %v4298_v47 = vadd.f32 %v4297_v8, %v4129_v37 }
 0x6da   : > { %v4354_v40 = vpop.f32.mrf.mxu0 }
 0x6db   : > { %v4770_v48 = vmul.f32 0.2, %v4298_v47  ;;  %v4523_v44 = vpop.f32.mrf.mxu1  ;;  %5138 = vmatmul.bf16.gmra.mxu2 %v9146_v61  ;;  %v4929_v26 = vpack.c.bf16 %v4807_v4, %v4805_v39  ;;  %v4355_v52 = vadd.f32 %v4354_v40, %v8466_v17 }
 0x6dd   : > { %v4898_v43 = vmax.f32 %v4298_v47, %v4770_v48  ;;  %4393 = vmatmul.bf16.gmra.mxu0 %v9147_v35  ;;  %5307 = vmatmul.bf16.gmra.mxu3 %v4929_v26  ;;  %v4524_v9 = vadd.f32 %v4523_v44, %v4355_v52 }
 0x6de   : > { %4562 = vmatmul.bf16.gmra.mxu1 %v9148_v63  ;;  %v4131_v14 = vpop.f32.mrf.mxu2 }
 0x6df   : > { %v4132_v56 = vadd.f32 %v4131_v14, %v8122_v18  ;;  %v8503_v41 = vpack.c.bf16 %v4898_v43, %v4896_v34  ;;  %v4681_v37 = vmul.f32 0.2, %v4524_v9 }
 0x6e0   : > { %v4300_v42 = vpop.f32.mrf.mxu3 }
 0x6e1   : > { %v4301_v55 = vadd.f32 %v4300_v42, %v4132_v56  ;;  %v4809_v40 = vmax.f32 %v4524_v9, %v4681_v37 }
 0x6e2   : > { %v4356_v38 = vpop.f32.mrf.mxu0 }
 0x6e3   : > { %v4357_v30 = vadd.f32 %v4356_v38, %v8466_v17  ;;  %v4525_v7 = vpop.f32.mrf.mxu1  ;;  %v4772_v48 = vmul.f32 0.2, %v4301_v55 }
 0x6e5   : > { %v4526_v8 = vadd.f32 %v4525_v7, %v4357_v30  ;;  %v4900_v52 = vmax.f32 %v4301_v55, %v4772_v48 }
 0x6e6   : > { %v4133_v39 = vpop.f32.mrf.mxu2 }
 0x6e7   : > { %v4683_v29 = vmul.f32 0.2, %v4526_v8  ;;  %v4134_v4 = vadd.f32 %v4133_v39, %v8122_v18 }
 0x6e8   : > { %v4302_v47 = vpop.f32.mrf.mxu3 }
 0x6e9   : > { %v4811_v61 = vmax.f32 %v4526_v8, %v4683_v29  ;;  %v4303_v26 = vadd.f32 %v4302_v47, %v4134_v4 }
 0x6ea   : > { %v4359_v34 = vpop.f32.mrf.mxu0 }
 0x6eb   : > { %v4774_v43 = vmul.f32 0.2, %v4303_v26  ;;  %v4528_v35 = vpop.f32.mrf.mxu1  ;;  %5143 = vmatmul.bf16.gmra.mxu2 %v8195_v23  ;;  %v4931_v44 = vpack.c.bf16 %v4811_v61, %v4809_v40  ;;  %v4360_v14 = vadd.f32 %v4359_v34, %v8466_v17 }
 0x6ed   : > { %v4902_v63 = vmax.f32 %v4303_v26, %v4774_v43  ;;  %4398 = vmatmul.bf16.gmra.mxu0 %v7789_v49  ;;  %5312 = vmatmul.bf16.gmra.mxu3 %v4931_v44  ;;  %v4529_v30 = vadd.f32 %v4528_v35, %v4360_v14 }
 0x6ee   : > { %4567 = vmatmul.bf16.gmra.mxu1 %v8188_v51  ;;  %v4136_v56 = vpop.f32.mrf.mxu2 }
 0x6ef   : > { %v4137_v42 = vadd.f32 %v4136_v56, %v8122_v18  ;;  %v8512_v9 = vpack.c.bf16 %v4902_v63, %v4900_v52  ;;  %v4685_v8 = vmul.f32 0.2, %v4529_v30 }
 0x6f0   : > { %v4305_v38 = vpop.f32.mrf.mxu3 }
 0x6f1   : > { %v4306_v7 = vadd.f32 %v4305_v38, %v4137_v42  ;;  %v4813_v51 = vmax.f32 %v4529_v30, %v4685_v8 }
 0x6f2   : > { %v4361_v37 = vpop.f32.mrf.mxu0 }
 0x6f3   : > { %v4362_v23 = vadd.f32 %v4361_v37, %v8466_v17  ;;  %v4530_v55 = vpop.f32.mrf.mxu1  ;;  %v4776_v40 = vmul.f32 0.2, %v4306_v7 }
 0x6f5   : > { %v4531_v39 = vadd.f32 %v4530_v55, %v4362_v23  ;;  %v4904_v44 = vmax.f32 %v4306_v7, %v4776_v40 }
 0x6f6   : > { %v4138_v29 = vpop.f32.mrf.mxu2 }
 0x6f7   : > { %v4687_v4 = vmul.f32 0.2, %v4531_v39  ;;  %v4139_v49 = vadd.f32 %v4138_v29, %v8122_v18 }
 0x6f8   : > { %v4307_v47 = vpop.f32.mrf.mxu3 }
 0x6f9   : > { %v4815_v48 = vmax.f32 %v4531_v39, %v4687_v4  ;;  %v4308_v61 = vadd.f32 %v4307_v47, %v4139_v49 }
 0x6fa   : > { %v4364_v26 = vpop.f32.mrf.mxu0 }
 0x6fb   : > { %v4778_v34 = vmul.f32 0.2, %v4308_v61  ;;  %v4533_v43 = vpop.f32.mrf.mxu1  ;;  %5148 = vmatmul.bf16.gmra.mxu2 %v8207_v10  ;;  %v4933_v35 = vpack.c.bf16 %v4815_v48, %v4813_v51  ;;  %v4365_v63 = vadd.f32 %v4364_v26, %v8466_v17 }
 0x6fd   : > { %v4906_v52 = vmax.f32 %v4308_v61, %v4778_v34  ;;  %4403 = vmatmul.bf16.gmra.mxu0 %v7813_v16  ;;  %5317 = vmatmul.bf16.gmra.mxu3 %v4933_v35  ;;  %v4534_v30 = vadd.f32 %v4533_v43, %v4365_v63 }
 0x6fe   : > { %4572 = vmatmul.bf16.gmra.mxu1 %v8200_v3  ;;  %v4141_v14 = vpop.f32.mrf.mxu2 }
 0x6ff   : > { %v4142_v56 = vadd.f32 %v4141_v14, %v8122_v18  ;;  %v8521_v42 = vpack.c.bf16 %v4906_v52, %v4904_v44  ;;  %v4689_v55 = vmul.f32 0.2, %v4534_v30 }
 0x700   : > { %v4310_v38 = vpop.f32.mrf.mxu3 }
 0x701   : > { %v4311_v37 = vadd.f32 %v4310_v38, %v4142_v56  ;;  %v4817_v3 = vmax.f32 %v4534_v30, %v4689_v55 }
 0x702   : > { %v4366_v23 = vpop.f32.mrf.mxu0 }
 0x703   : > { %v4367_v10 = vadd.f32 %v4366_v23, %v8466_v17  ;;  %v4535_v7 = vpop.f32.mrf.mxu1  ;;  %v4780_v49 = vmul.f32 0.2, %v4311_v37 }
 0x705   : > { %v4536_v8 = vadd.f32 %v4535_v7, %v4367_v10  ;;  %v4908_v34 = vmax.f32 %v4311_v37, %v4780_v49 }
 0x706   : > { %v4143_v39 = vpop.f32.mrf.mxu2 }
 0x707   : > { %v4691_v29 = vmul.f32 0.2, %v4536_v8  ;;  %v4144_v16 = vadd.f32 %v4143_v39, %v8122_v18 }
 0x708   : > { %v4312_v4 = vpop.f32.mrf.mxu3 }
 0x709   : > { %v4819_v47 = vmax.f32 %v4536_v8, %v4691_v29  ;;  %v4313_v51 = vadd.f32 %v4312_v4, %v4144_v16 }
 0x70a   : > { %v4369_v40 = vpop.f32.mrf.mxu0 }
 0x70b   : > { %v4782_v48 = vmul.f32 0.2, %v4313_v51  ;;  %v4538_v61 = vpop.f32.mrf.mxu1  ;;  %5153 = vmatmul.bf16.gmra.mxu2 %v8231_v54  ;;  %v4935_v26 = vpack.c.bf16 %v4819_v47, %v4817_v3  ;;  %v4370_v35 = vadd.f32 %v4369_v40, %v8466_v17 }
 0x70d   : > { %v4910_v43 = vmax.f32 %v4313_v51, %v4782_v48  ;;  %4408 = vmatmul.bf16.gmra.mxu0 %v7837_v60  ;;  %5322 = vmatmul.bf16.gmra.mxu3 %v4935_v26  ;;  %v4539_v56 = vadd.f32 %v4538_v61, %v4370_v35 }
 0x70e   : > { %4577 = vmatmul.bf16.gmra.mxu1 %v8224_v20  ;;  %v4146_v44 = vpop.f32.mrf.mxu2 }
 0x70f   : > { %v4147_v52 = vadd.f32 %v4146_v44, %v8122_v18  ;;  %v8530_v63 = vpack.c.bf16 %v4910_v43, %v4908_v34  ;;  %v4693_v23 = vmul.f32 0.2, %v4539_v56 }
 0x710   : > { %v4315_v14 = vpop.f32.mrf.mxu3 }
 0x711   : > { %v4316_v38 = vadd.f32 %v4315_v14, %v4147_v52  ;;  %v4821_v20 = vmax.f32 %v4539_v56, %v4693_v23 }
 0x712   : > { %v4371_v30 = vpop.f32.mrf.mxu0 }
 0x713   : > { %v4372_v54 = vadd.f32 %v4371_v30, %v8466_v17  ;;  %v4540_v37 = vpop.f32.mrf.mxu1  ;;  %v4784_v39 = vmul.f32 0.2, %v4316_v38 }
 0x715   : > { %v4541_v10 = vadd.f32 %v4540_v37, %v4372_v54  ;;  %v4912_v51 = vmax.f32 %v4316_v38, %v4784_v39 }
 0x716   : > { %v4148_v7 = vpop.f32.mrf.mxu2 }
 0x717   : > { %v4695_v55 = vmul.f32 0.2, %v4541_v10  ;;  %v4149_v60 = vadd.f32 %v4148_v7, %v8122_v18 }
 0x718   : > { %v4317_v8 = vpop.f32.mrf.mxu3 }
 0x719   : > { %v4823_v29 = vmax.f32 %v4541_v10, %v4695_v55  ;;  %v4318_v16 = vadd.f32 %v4317_v8, %v4149_v60 }
 0x71a   : > { %v4374_v4 = vpop.f32.mrf.mxu0 }
 0x71b   : > { %v4786_v3 = vmul.f32 0.2, %v4318_v16  ;;  %v4543_v49 = vpop.f32.mrf.mxu1  ;;  %5158 = vmatmul.bf16.gmra.mxu2 %v8249_v2  ;;  %v4937_v47 = vpack.c.bf16 %v4823_v29, %v4821_v20  ;;  %v4375_v48 = vadd.f32 %v4374_v4, %v8466_v17 }
 0x71d   : > { %v4914_v40 = vmax.f32 %v4318_v16, %v4786_v3  ;;  %4413 = vmatmul.bf16.gmra.mxu0 %v7849_v28  ;;  %5327 = vmatmul.bf16.gmra.mxu3 %v4937_v47  ;;  %v4544_v35 = vadd.f32 %v4543_v49, %v4375_v48 }
 0x71e   : > { %4582 = vmatmul.bf16.gmra.mxu1 %v8242_v24  ;;  %v4151_v61 = vpop.f32.mrf.mxu2 }
 0x71f   : > { %v4152_v26 = vadd.f32 %v4151_v61, %v8122_v18  ;;  %v8539_v34 = vpack.c.bf16 %v4914_v40, %v4912_v51  ;;  %v4697_v56 = vmul.f32 0.2, %v4544_v35 }
 0x720   : > { %v4320_v43 = vpop.f32.mrf.mxu3 }
 0x721   : > { %v4321_v44 = vadd.f32 %v4320_v43, %v4152_v26  ;;  %v4825_v24 = vmax.f32 %v4544_v35, %v4697_v56 }
 0x722   : > { %v4376_v52 = vpop.f32.mrf.mxu0 }
 0x723   : > { %v4377_v2 = vadd.f32 %v4376_v52, %v8466_v17  ;;  %v4545_v14 = vpop.f32.mrf.mxu1  ;;  %v4788_v23 = vmul.f32 0.2, %v4321_v44 }
 0x725   : > { %v4546_v38 = vadd.f32 %v4545_v14, %v4377_v2  ;;  %v4916_v39 = vmax.f32 %v4321_v44, %v4788_v23 }
 0x726   : > { %v4153_v30 = vpop.f32.mrf.mxu2 }
 0x727   : > { %v4699_v54 = vmul.f32 0.2, %v4546_v38  ;;  %v4154_v28 = vadd.f32 %v4153_v30, %v8122_v18 }
 0x728   : > { %v4322_v37 = vpop.f32.mrf.mxu3 }
 0x729   : > { %v4827_v10 = vmax.f32 %v4546_v38, %v4699_v54  ;;  %v4323_v7 = vadd.f32 %v4322_v37, %v4154_v28  ;;  %v8556_v37 = vld [vmem:[%s8875_s10] ss:$0 sm:$0xff] }
 0x72a   : > { %v4379_v55 = vpop.f32.mrf.mxu0 }
 0x72b   : > { %v4790_v60 = vmul.f32 0.2, %v4323_v7  ;;  %v4548_v8 = vpop.f32.mrf.mxu1  ;;  %5163 = vmatmul.bf16.gmra.mxu2 %v8261_v50  ;;  %v4939_v20 = vpack.c.bf16 %v4827_v10, %v4825_v24  ;;  %v4380_v16 = vadd.f32 %v4379_v55, %v8466_v17 }
 0x72d   : > { %v4918_v29 = vmax.f32 %v4323_v7, %v4790_v60  ;;  %4418 = vmatmul.bf16.gmra.mxu0 %v7861_v33  ;;  %5332 = vmatmul.bf16.gmra.mxu3 %v4939_v20  ;;  %v4549_v51 = vadd.f32 %v4548_v8, %v4380_v16 }
 0x72e   : > { %4587 = vmatmul.bf16.gmra.mxu1 %v8254_v25  ;;  %v4156_v4 = vpop.f32.mrf.mxu2 }
 0x72f   : > { %v4157_v3 = vadd.f32 %v4156_v4, %v8122_v18  ;;  %v8548_v49 = vpack.c.bf16 %v4918_v29, %v4916_v39  ;;  %v4701_v26 = vmul.f32 0.2, %v4549_v51 }
 0x730   : > { %v4325_v47 = vpop.f32.mrf.mxu3 }
 0x731   : > { %v4326_v40 = vadd.f32 %v4325_v47, %v4157_v3  ;;  %v4829_v25 = vmax.f32 %v4549_v51, %v4701_v26 }
 0x732   : > { %v4381_v48 = vpop.f32.mrf.mxu0 }
 0x733   : > { %v4382_v50 = vadd.f32 %v4381_v48, %v8466_v17  ;;  %v4550_v61 = vpop.f32.mrf.mxu1  ;;  %v4792_v2 = vmul.f32 0.2, %v4326_v40 }
 0x735   : > { %v4551_v43 = vadd.f32 %v4550_v61, %v4382_v50  ;;  %v4920_v24 = vmax.f32 %v4326_v40, %v4792_v2 }
 0x736   : > { %v4158_v35 = vpop.f32.mrf.mxu2 }
 0x737   : > { %v4703_v44 = vmul.f32 0.2, %v4551_v43  ;;  %v4159_v33 = vadd.f32 %v4158_v35, %v8122_v18 }
 0x738   : > { %v4327_v52 = vpop.f32.mrf.mxu3 }
 0x739   : > { %v4831_v14 = vmax.f32 %v4551_v43, %v4703_v44  ;;  %v4328_v56 = vadd.f32 %v4327_v52, %v4159_v33 }
 0x73a   : > { %v4384_v38 = vpop.f32.mrf.mxu0 }
 0x73b   : > { %v4794_v30 = vmul.f32 0.2, %v4328_v56  ;;  %v4553_v54 = vpop.f32.mrf.mxu1  ;;  %5168 = vmatmul.bf16.gmra.mxu2 %v8273_v31  ;;  %v4941_v28 = vpack.c.bf16 %v4831_v14, %v4829_v25  ;;  %v4385_v18 = vadd.f32 %v4384_v38, %v8466_v17 }
 0x73d   : > { %v4922_v23 = vmax.f32 %v4328_v56, %v4794_v30  ;;  %4423 = vmatmul.bf16.gmra.mxu0 %v7885_v0  ;;  %5337 = vmatmul.bf16.gmra.mxu3 %v4941_v28  ;;  %v4554_v60 = vadd.f32 %v4553_v54, %v4385_v18 }
 0x73e   : > { %4592 = vmatmul.bf16.gmra.mxu1 %v8266_v11  ;;  %v5129_v10 = vpop.f32.mrf.mxu2 }
 0x73f   : > { %v5130_v7 = vadd.f32 %v8556_v37, %v5129_v10  ;;  %v8563_v31 = vpack.c.bf16 %v4922_v23, %v4920_v24  ;;  %v4705_v39 = vmul.f32 0.2, %v4554_v60 }
 0x740   : > { %v5298_v55 = vpop.f32.mrf.mxu3 }
 0x741   : > { %v5299_v0 = vadd.f32 %v5298_v55, %v5130_v7  ;;  %v4833_v51 = vmax.f32 %v4554_v60, %v4705_v39  ;;  %v9149_v60 = vld [vmem:[#allocation33_spill] sm:$0xff] }
 0x742   : > { %v4386_v8 = vpop.f32.mrf.mxu0 }
 0x743   : > { %5459 = vst.msk [vmem:[%s8568_s22] sm:$0xff] %vm5458_vm0, %v5299_v0  ;;  %v4387_v11 = vadd.f32 %v4386_v8, %v8466_v17  ;;  %v4555_v20 = vpop.f32.mrf.mxu1 }
 0x745   : > { %v4556_v29 = vadd.f32 %v4555_v20, %v4387_v11 }
 0x746   : > { %v5131_v16 = vpop.f32.mrf.mxu2 }
 0x747   : > { %v4707_v4 = vmul.f32 0.2, %v4556_v29  ;;  %v5132_v3 = vadd.f32 %v8556_v37, %v5131_v16 }
 0x748   : > { %v5300_v47 = vpop.f32.mrf.mxu3 }
 0x749   : > { %v4835_v40 = vmax.f32 %v4556_v29, %v4707_v4  ;;  %v5301_v48 = vadd.f32 %v5300_v47, %v5132_v3 }
 0x74a   : > { %v4389_v50 = vpop.f32.mrf.mxu0 }
 0x74b   : > { %5460 = vst.msk [vmem:[%s8568_s22 + $0x8] sm:$0xff] %vm5458_vm0, %v5301_v48  ;;  %v4558_v61 = vpop.f32.mrf.mxu1  ;;  %5173 = vmatmul.bf16.gmra.mxu2 %v8297_v21  ;;  %v4943_v26 = vpack.c.bf16 %v4835_v40, %v4833_v51  ;;  %v4390_v43 = vadd.f32 %v4389_v50, %v8466_v17 }
 0x74d   : > { %4428 = vmatmul.bf16.gmra.mxu0 %v7909_v59  ;;  %5342 = vmatmul.bf16.gmra.mxu3 %v4943_v26  ;;  %v4559_v52 = vadd.f32 %v4558_v61, %v4390_v43 }
 0x74e   : > { %4597 = vmatmul.bf16.gmra.mxu1 %v8290_v5  ;;  %v5134_v35 = vpop.f32.mrf.mxu2 }
 0x74f   : > { %v5135_v44 = vadd.f32 %v8556_v37, %v5134_v35  ;;  %v4709_v56 = vmul.f32 0.2, %v4559_v52  ;;  %v9150_v35 = vld [vmem:[#allocation32_spill] sm:$0xff] }
 0x750   : > { %v5303_v33 = vpop.f32.mrf.mxu3 }
 0x751   : > { %v5304_v25 = vadd.f32 %v5303_v33, %v5135_v44  ;;  %v4837_v28 = vmax.f32 %v4559_v52, %v4709_v56  ;;  %v9151_v52 = vld [vmem:[#allocation6_spill] sm:$0xff] }
 0x752   : > { %v4391_v2 = vpop.f32.mrf.mxu0 }
 0x753   : > { %5461 = vst.msk [vmem:[%s8568_s22 + $0x10] sm:$0xff] %vm5458_vm0, %v5304_v25  ;;  %v4392_v21 = vadd.f32 %v4391_v2, %v8466_v17  ;;  %v4560_v14 = vpop.f32.mrf.mxu1  ;;  %v9152_v25 = vld [vmem:[#allocation30_spill] sm:$0xff] }
 0x755   : > { %v4561_v38 = vadd.f32 %v4560_v14, %v4392_v21 }
 0x756   : > { %v5136_v30 = vpop.f32.mrf.mxu2 }
 0x757   : > { %v4711_v59 = vmul.f32 0.2, %v4561_v38  ;;  %v5137_v54 = vadd.f32 %v8556_v37, %v5136_v30 }
 0x758   : > { %v5305_v5 = vpop.f32.mrf.mxu3 }
 0x759   : > { %v4839_v24 = vmax.f32 %v4561_v38, %v4711_v59  ;;  %v5306_v23 = vadd.f32 %v5305_v5, %v5137_v54 }
 0x75a   : > { %v4394_v18 = vpop.f32.mrf.mxu0 }
 0x75b   : > { %5462 = vst.msk [vmem:[%s8568_s22 + $0x18] sm:$0xff] %vm5458_vm0, %v5306_v23  ;;  %v4563_v10 = vpop.f32.mrf.mxu1  ;;  %5178 = vmatmul.bf16.gmra.mxu2 %v8315_v6  ;;  %v4945_v7 = vpack.c.bf16 %v4839_v24, %v4837_v28  ;;  %v4395_v55 = vadd.f32 %v4394_v18, %v8466_v17 }
 0x75d   : > { %4433 = vmatmul.bf16.gmra.mxu0 %v7921_v12  ;;  %5347 = vmatmul.bf16.gmra.mxu3 %v4945_v7  ;;  %v4564_v20 = vadd.f32 %v4563_v10, %v4395_v55 }
 0x75e   : > { %4602 = vmatmul.bf16.gmra.mxu1 %v9149_v60  ;;  %v5139_v0 = vpop.f32.mrf.mxu2 }
 0x75f   : > { %v5140_v8 = vadd.f32 %v8556_v37, %v5139_v0  ;;  %v4713_v4 = vmul.f32 0.2, %v4564_v20 }
 0x760   : > { %v5308_v11 = vpop.f32.mrf.mxu3 }
 0x761   : > { %v5309_v39 = vadd.f32 %v5308_v11, %v5140_v8  ;;  %v4841_v48 = vmax.f32 %v4564_v20, %v4713_v4 }
 0x762   : > { %v4396_v29 = vpop.f32.mrf.mxu0 }
 0x763   : > { %5463 = vst.msk [vmem:[%s8568_s22 + $0x20] sm:$0xff] %vm5458_vm0, %v5309_v39  ;;  %v4397_v6 = vadd.f32 %v4396_v29, %v8466_v17  ;;  %v4565_v16 = vpop.f32.mrf.mxu1  ;;  %v9153_v39 = vld [vmem:[#allocation9_spill] sm:$0xff]  ;;  %v9154_v29 = vld [vmem:[#allocation3_spill] sm:$0xff] }
 0x765   : > { %v4566_v3 = vadd.f32 %v4565_v16, %v4397_v6 }
 0x766   : > { %v5141_v47 = vpop.f32.mrf.mxu2 }
 0x767   : > { %v4715_v12 = vmul.f32 0.2, %v4566_v3  ;;  %v5142_v51 = vadd.f32 %v8556_v37, %v5141_v47 }
 0x768   : > { %v5310_v40 = vpop.f32.mrf.mxu3 }
 0x769   : > { %v4843_v50 = vmax.f32 %v4566_v3, %v4715_v12  ;;  %v5311_v61 = vadd.f32 %v5310_v40, %v5142_v51 }
 0x76a   : > { %v4399_v26 = vpop.f32.mrf.mxu0 }
 0x76b   : > { %5464 = vst.msk [vmem:[%s8568_s22 + $0x28] sm:$0xff] %vm5458_vm0, %v5311_v61  ;;  %v4568_v43 = vpop.f32.mrf.mxu1  ;;  %5183 = vmatmul.bf16.gmra.mxu2 %v9150_v35  ;;  %v4947_v44 = vpack.c.bf16 %v4843_v50, %v4841_v48  ;;  %v4400_v33 = vadd.f32 %v4399_v26, %v8466_v17 }
 0x76d   : > { %4438 = vmatmul.bf16.gmra.mxu0 %v9151_v52  ;;  %5352 = vmatmul.bf16.gmra.mxu3 %v4947_v44  ;;  %v4569_v56 = vadd.f32 %v4568_v43, %v4400_v33 }
 0x76e   : > { %4607 = vmatmul.bf16.gmra.mxu1 %v9152_v25  ;;  %v5144_v2 = vpop.f32.mrf.mxu2 }
 0x76f   : > { %v5145_v21 = vadd.f32 %v8556_v37, %v5144_v2  ;;  %v4717_v5 = vmul.f32 0.2, %v4569_v56  ;;  %v9155_v2 = vld [vmem:[#allocation5_spill] sm:$0xff] }
 0x770   : > { %v5313_v14 = vpop.f32.mrf.mxu3 }
 0x771   : > { %v5314_v38 = vadd.f32 %v5313_v14, %v5145_v21  ;;  %v4845_v7 = vmax.f32 %v4569_v56, %v4717_v5  ;;  %v9156_v56 = vld [vmem:[#allocation12_spill] sm:$0xff] }
 0x772   : > { %v4401_v30 = vpop.f32.mrf.mxu0 }
 0x773   : > { %5465 = vst.msk [vmem:[%s8568_s22 + $0x30] sm:$0xff] %vm5458_vm0, %v5314_v38  ;;  %v4402_v59 = vadd.f32 %v4401_v30, %v8466_v17  ;;  %v4570_v54 = vpop.f32.mrf.mxu1  ;;  %v9157_v38 = vld [vmem:[#allocation34_spill] sm:$0xff] }
 0x775   : > { %v4571_v28 = vadd.f32 %v4570_v54, %v4402_v59 }
 0x776   : > { %v5146_v24 = vpop.f32.mrf.mxu2 }
 0x777   : > { %v4719_v23 = vmul.f32 0.2, %v4571_v28  ;;  %v5147_v18 = vadd.f32 %v8556_v37, %v5146_v24 }
 0x778   : > { %v5315_v10 = vpop.f32.mrf.mxu3 }
 0x779   : > { %v4847_v55 = vmax.f32 %v4571_v28, %v4719_v23  ;;  %v5316_v60 = vadd.f32 %v5315_v10, %v5147_v18 }
 0x77a   : > { %v4404_v0 = vpop.f32.mrf.mxu0 }
 0x77b   : > { %5466 = vst.msk [vmem:[%s8568_s22 + $0x38] sm:$0xff] %vm5458_vm0, %v5316_v60  ;;  %v4573_v8 = vpop.f32.mrf.mxu1  ;;  %5188 = vmatmul.bf16.gmra.mxu2 %v8339_v58  ;;  %v4949_v11 = vpack.c.bf16 %v4847_v55, %v4845_v7  ;;  %v4405_v20 = vadd.f32 %v4404_v0, %v8466_v17 }
 0x77d   : > { %4443 = vmatmul.bf16.gmra.mxu0 %v9153_v39  ;;  %5357 = vmatmul.bf16.gmra.mxu3 %v4949_v11  ;;  %v4574_v3 = vadd.f32 %v4573_v8, %v4405_v20 }
 0x77e   : > { %4612 = vmatmul.bf16.gmra.mxu1 %v9154_v29  ;;  %v5149_v6 = vpop.f32.mrf.mxu2 }
 0x77f   : > { %v5150_v16 = vadd.f32 %v8556_v37, %v5149_v6  ;;  %v4721_v40 = vmul.f32 0.2, %v4574_v3 }
 0x780   : > { %v5318_v4 = vpop.f32.mrf.mxu3 }
 0x781   : > { %v5319_v47 = vadd.f32 %v5318_v4, %v5150_v16  ;;  %v4849_v35 = vmax.f32 %v4574_v3, %v4721_v40  ;;  %v9158_v16 = vld [vmem:[#allocation8_spill] sm:$0xff] }
 0x782   : > { %v4406_v12 = vpop.f32.mrf.mxu0 }
 0x783   : > { %5467 = vst.msk [vmem:[%s8568_s22 + $0x40] sm:$0xff] %vm5458_vm0, %v5319_v47  ;;  %v4407_v58 = vadd.f32 %v4406_v12, %v8466_v17  ;;  %v4575_v51 = vpop.f32.mrf.mxu1  ;;  %v9159_v47 = vld [vmem:[#allocation15_spill] sm:$0xff]  ;;  %v9160_v12 = vld [vmem:[#allocation2_spill] sm:$0xff] }
 0x785   : > { %v4576_v48 = vadd.f32 %v4575_v51, %v4407_v58 }
 0x786   : > { %v5151_v50 = vpop.f32.mrf.mxu2 }
 0x787   : > { %v4723_v61 = vmul.f32 0.2, %v4576_v48  ;;  %v5152_v26 = vadd.f32 %v8556_v37, %v5151_v50 }
 0x788   : > { %v5320_v43 = vpop.f32.mrf.mxu3 }
 0x789   : > { %v4851_v44 = vmax.f32 %v4576_v48, %v4723_v61  ;;  %v5321_v33 = vadd.f32 %v5320_v43, %v5152_v26 }
 0x78a   : > { %v4409_v52 = vpop.f32.mrf.mxu0 }
 0x78b   : > { %5468 = vst.msk [vmem:[%s8568_s22 + $0x48] sm:$0xff] %vm5458_vm0, %v5321_v33  ;;  %v4578_v25 = vpop.f32.mrf.mxu1  ;;  %5193 = vmatmul.bf16.gmra.mxu2 %v9155_v2  ;;  %v4951_v21 = vpack.c.bf16 %v4851_v44, %v4849_v35  ;;  %v4410_v14 = vadd.f32 %v4409_v52, %v8466_v17 }
 0x78d   : > { %4448 = vmatmul.bf16.gmra.mxu0 %v9156_v56  ;;  %5362 = vmatmul.bf16.gmra.mxu3 %v4951_v21  ;;  %v4579_v5 = vadd.f32 %v4578_v25, %v4410_v14 }
 0x78e   : > { %4617 = vmatmul.bf16.gmra.mxu1 %v9157_v38  ;;  %v5154_v30 = vpop.f32.mrf.mxu2 }
 0x78f   : > { %v5155_v59 = vadd.f32 %v8556_v37, %v5154_v30  ;;  %v4725_v10 = vmul.f32 0.2, %v4579_v5 }
 0x790   : > { %v5323_v54 = vpop.f32.mrf.mxu3 }
 0x791   : > { %v5324_v28 = vadd.f32 %v5323_v54, %v5155_v59  ;;  %v4853_v11 = vmax.f32 %v4579_v5, %v4725_v10  ;;  %v9161_v59 = vld [vmem:[#allocation11_spill] sm:$0xff] }
 0x792   : > { %v4411_v24 = vpop.f32.mrf.mxu0 }
 0x793   : > { %5469 = vst.msk [vmem:[%s8568_s22 + $0x50] sm:$0xff] %vm5458_vm0, %v5324_v28  ;;  %v4412_v23 = vadd.f32 %v4411_v24, %v8466_v17  ;;  %v4580_v18 = vpop.f32.mrf.mxu1  ;;  %v9162_v28 = vld [vmem:[#allocation18_spill] sm:$0xff]  ;;  %v9163_v24 = vld [vmem:[#allocation4_spill] sm:$0xff] }
 0x795   : > { %v4581_v7 = vadd.f32 %v4580_v18, %v4412_v23 }
 0x796   : > { %v5156_v55 = vpop.f32.mrf.mxu2 }
 0x797   : > { %v4727_v60 = vmul.f32 0.2, %v4581_v7  ;;  %v5157_v0 = vadd.f32 %v8556_v37, %v5156_v55 }
 0x798   : > { %v5325_v8 = vpop.f32.mrf.mxu3 }
 0x799   : > { %v4855_v20 = vmax.f32 %v4581_v7, %v4727_v60  ;;  %v5326_v39 = vadd.f32 %v5325_v8, %v5157_v0 }
 0x79a   : > { %v4414_v29 = vpop.f32.mrf.mxu0 }
 0x79b   : > { %5470 = vst.msk [vmem:[%s8568_s22 + $0x58] sm:$0xff] %vm5458_vm0, %v5326_v39  ;;  %v4583_v6 = vpop.f32.mrf.mxu1  ;;  %5198 = vmatmul.bf16.gmra.mxu2 %v9158_v16  ;;  %v4953_v4 = vpack.c.bf16 %v4855_v20, %v4853_v11  ;;  %v4415_v3 = vadd.f32 %v4414_v29, %v8466_v17 }
 0x79d   : > { %4453 = vmatmul.bf16.gmra.mxu0 %v9159_v47  ;;  %5367 = vmatmul.bf16.gmra.mxu3 %v4953_v4  ;;  %v4584_v48 = vadd.f32 %v4583_v6, %v4415_v3 }
 0x79e   : > { %4622 = vmatmul.bf16.gmra.mxu1 %v9160_v12  ;;  %v5159_v58 = vpop.f32.mrf.mxu2 }
 0x79f   : > { %v5160_v51 = vadd.f32 %v8556_v37, %v5159_v58  ;;  %v4729_v35 = vmul.f32 0.2, %v4584_v48 }
 0x7a0   : > { %v5328_v40 = vpop.f32.mrf.mxu3 }
 0x7a1   : > { %v5329_v50 = vadd.f32 %v5328_v40, %v5160_v51  ;;  %v4857_v21 = vmax.f32 %v4584_v48, %v4729_v35  ;;  %v9164_v48 = vld [vmem:[#allocation21_spill] sm:$0xff] }
 0x7a2   : > { %v4416_v61 = vpop.f32.mrf.mxu0 }
 0x7a3   : > { %5471 = vst.msk [vmem:[%s8568_s22 + $0x60] sm:$0xff] %vm5458_vm0, %v5329_v50  ;;  %v4417_v26 = vadd.f32 %v4416_v61, %v8466_v17  ;;  %v4585_v43 = vpop.f32.mrf.mxu1  ;;  %v9165_v50 = vld [vmem:[#allocation7_spill] sm:$0xff] }
 0x7a5   : > { %v4586_v44 = vadd.f32 %v4585_v43, %v4417_v26 }
 0x7a6   : > { %v5161_v33 = vpop.f32.mrf.mxu2 }
 0x7a7   : > { %v4731_v52 = vmul.f32 0.2, %v4586_v44  ;;  %v5162_v25 = vadd.f32 %v8556_v37, %v5161_v33 }
 0x7a8   : > { %v5330_v2 = vpop.f32.mrf.mxu3 }
 0x7a9   : > { %v4859_v14 = vmax.f32 %v4586_v44, %v4731_v52  ;;  %v5331_v56 = vadd.f32 %v5330_v2, %v5162_v25 }
 0x7aa   : > { %v4419_v38 = vpop.f32.mrf.mxu0 }
 0x7ab   : > { %5472 = vst.msk [vmem:[%s8568_s22 + $0x68] sm:$0xff] %vm5458_vm0, %v5331_v56  ;;  %v4588_v30 = vpop.f32.mrf.mxu1  ;;  %5203 = vmatmul.bf16.gmra.mxu2 %v9161_v59  ;;  %v4955_v54 = vpack.c.bf16 %v4859_v14, %v4857_v21  ;;  %v4420_v5 = vadd.f32 %v4419_v38, %v8466_v17 }
 0x7ad   : > { %4458 = vmatmul.bf16.gmra.mxu0 %v9162_v28  ;;  %5372 = vmatmul.bf16.gmra.mxu3 %v4955_v54  ;;  %v4589_v7 = vadd.f32 %v4588_v30, %v4420_v5 }
 0x7ae   : > { %4627 = vmatmul.bf16.gmra.mxu1 %v9163_v24  ;;  %v5164_v23 = vpop.f32.mrf.mxu2 }
 0x7af   : > { %v5165_v18 = vadd.f32 %v8556_v37, %v5164_v23  ;;  %v4733_v11 = vmul.f32 0.2, %v4589_v7 }
 0x7b0   : > { %v5333_v10 = vpop.f32.mrf.mxu3 }
 0x7b1   : > { %v5334_v55 = vadd.f32 %v5333_v10, %v5165_v18  ;;  %v4861_v4 = vmax.f32 %v4589_v7, %v4733_v11  ;;  %v9166_v18 = vld [vmem:[#allocation14_spill] sm:$0xff] }
 0x7b2   : > { %v4421_v60 = vpop.f32.mrf.mxu0 }
 0x7b3   : > { %5473 = vst.msk [vmem:[%s8568_s22 + $0x70] sm:$0xff] %vm5458_vm0, %v5334_v55  ;;  %v4422_v0 = vadd.f32 %v4421_v60, %v8466_v17  ;;  %v4590_v8 = vpop.f32.mrf.mxu1 }
 0x7b5   : > { %v4591_v20 = vadd.f32 %v4590_v8, %v4422_v0 }
 0x7b6   : > { %v5166_v39 = vpop.f32.mrf.mxu2 }
 0x7b7   : > { %v4735_v29 = vmul.f32 0.2, %v4591_v20  ;;  %v5167_v6 = vadd.f32 %v8556_v37, %v5166_v39 }
 0x7b8   : > { %v5335_v16 = vpop.f32.mrf.mxu3 }
 0x7b9   : > { %v4863_v3 = vmax.f32 %v4591_v20, %v4735_v29  ;;  %v5336_v47 = vadd.f32 %v5335_v16, %v5167_v6 }
 0x7ba   : > { %v4424_v12 = vpop.f32.mrf.mxu0 }
 0x7bb   : > { %5474 = vst.msk [vmem:[%s8568_s22 + $0x78] sm:$0xff] %vm5458_vm0, %v5336_v47  ;;  %v4593_v58 = vpop.f32.mrf.mxu1  ;;  %5208 = vmatmul.bf16.gmra.mxu2 %v8393_v45  ;;  %v4957_v51 = vpack.c.bf16 %v4863_v3, %v4861_v4  ;;  %v4425_v40 = vadd.f32 %v4424_v12, %v8466_v17 }
 0x7bd   : > { %4463 = vmatmul.bf16.gmra.mxu0 %v9164_v48  ;;  %5377 = vmatmul.bf16.gmra.mxu3 %v4957_v51  ;;  %v4594_v35 = vadd.f32 %v4593_v58, %v4425_v40  ;;  %v9167_v48 = vld [vmem:[#allocation19_spill] sm:$0xff] }
 0x7be   : > { %4632 = vmatmul.bf16.gmra.mxu1 %v9165_v50  ;;  %v5169_v61 = vpop.f32.mrf.mxu2  ;;  %v9168_v50 = vld [vmem:[#allocation10_spill] sm:$0xff] }
 0x7bf   : > { %v5170_v26 = vadd.f32 %v8556_v37, %v5169_v61  ;;  %v4737_v25 = vmul.f32 0.2, %v4594_v35 }
 0x7c0   : > { %v5338_v43 = vpop.f32.mrf.mxu3 }
 0x7c1   : > { %v5339_v44 = vadd.f32 %v5338_v43, %v5170_v26  ;;  %v4865_v30 = vmax.f32 %v4594_v35, %v4737_v25 }
 0x7c2   : > { %v4426_v33 = vpop.f32.mrf.mxu0 }
 0x7c3   : > { %5475 = vst.msk [vmem:[%s8568_s22 + $0x80] sm:$0xff] %vm5458_vm0, %v5339_v44  ;;  %v4427_v45 = vadd.f32 %v4426_v33, %v8466_v17  ;;  %v4595_v52 = vpop.f32.mrf.mxu1 }
 0x7c5   : > { %v4596_v2 = vadd.f32 %v4595_v52, %v4427_v45 }
 0x7c6   : > { %v5171_v21 = vpop.f32.mrf.mxu2 }
 0x7c7   : > { %v4739_v14 = vmul.f32 0.2, %v4596_v2  ;;  %v5172_v56 = vadd.f32 %v8556_v37, %v5171_v21 }
 0x7c8   : > { %v5340_v38 = vpop.f32.mrf.mxu3 }
 0x7c9   : > { %v4867_v59 = vmax.f32 %v4596_v2, %v4739_v14  ;;  %v5341_v54 = vadd.f32 %v5340_v38, %v5172_v56 }
 0x7ca   : > { %v4429_v5 = vpop.f32.mrf.mxu0 }
 0x7cb   : > { %5476 = vst.msk [vmem:[%s8568_s22 + $0x88] sm:$0xff] %vm5458_vm0, %v5341_v54  ;;  %v4598_v28 = vpop.f32.mrf.mxu1  ;;  %5213 = vmatmul.bf16.gmra.mxu2 %v8405_v1  ;;  %v4959_v24 = vpack.c.bf16 %v4867_v59, %v4865_v30  ;;  %v4430_v23 = vadd.f32 %v4429_v5, %v8466_v17 }
 0x7cd   : > { %4468 = vmatmul.bf16.gmra.mxu0 %v9131_v15  ;;  %5382 = vmatmul.bf16.gmra.mxu3 %v4959_v24  ;;  %v4599_v60 = vadd.f32 %v4598_v28, %v4430_v23  ;;  %v9169_v23 = vld [vmem:[#allocation17_spill] sm:$0xff] }
 0x7ce   : > { %4637 = vmatmul.bf16.gmra.mxu1 %v9166_v18  ;;  %v5174_v10 = vpop.f32.mrf.mxu2 }
 0x7cf   : > { %v5175_v7 = vadd.f32 %v8556_v37, %v5174_v10  ;;  %v4741_v20 = vmul.f32 0.2, %v4599_v60 }
 0x7d0   : > { %v5343_v55 = vpop.f32.mrf.mxu3 }
 0x7d1   : > { %v5344_v0 = vadd.f32 %v5343_v55, %v5175_v7  ;;  %v4869_v4 = vmax.f32 %v4599_v60, %v4741_v20 }
 0x7d2   : > { %v4431_v8 = vpop.f32.mrf.mxu0 }
 0x7d3   : > { %5477 = vst.msk [vmem:[%s8568_s22 + $0x90] sm:$0xff] %vm5458_vm0, %v5344_v0  ;;  %v4432_v1 = vadd.f32 %v4431_v8, %v8466_v17  ;;  %v4600_v11 = vpop.f32.mrf.mxu1 }
 0x7d5   : > { %v4601_v39 = vadd.f32 %v4600_v11, %v4432_v1 }
 0x7d6   : > { %v5176_v29 = vpop.f32.mrf.mxu2 }
 0x7d7   : > { %v4743_v15 = vmul.f32 0.2, %v4601_v39  ;;  %v5177_v6 = vadd.f32 %v8556_v37, %v5176_v29 }
 0x7d8   : > { %v5345_v16 = vpop.f32.mrf.mxu3 }
 0x7d9   : > { %v4871_v3 = vmax.f32 %v4601_v39, %v4743_v15  ;;  %v5346_v47 = vadd.f32 %v5345_v16, %v5177_v6 }
 0x7da   : > { %v4434_v12 = vpop.f32.mrf.mxu0 }
 0x7db   : > { %5478 = vst.msk [vmem:[%s8568_s22 + $0x98] sm:$0xff] %vm5458_vm0, %v5346_v47  ;;  %v4603_v58 = vpop.f32.mrf.mxu1  ;;  %5218 = vmatmul.bf16.gmra.mxu2 %v8423_v53  ;;  %v4961_v51 = vpack.c.bf16 %v4871_v3, %v4869_v4  ;;  %v4435_v40 = vadd.f32 %v4434_v12, %v8466_v17 }
 0x7dd   : > { %4473 = vmatmul.bf16.gmra.mxu0 %v9167_v48  ;;  %5387 = vmatmul.bf16.gmra.mxu3 %v4961_v51  ;;  %v4604_v35 = vadd.f32 %v4603_v58, %v4435_v40 }
 0x7de   : > { %4642 = vmatmul.bf16.gmra.mxu1 %v9168_v50  ;;  %v5179_v61 = vpop.f32.mrf.mxu2 }
 0x7df   : > { %v5180_v26 = vadd.f32 %v8556_v37, %v5179_v61  ;;  %v4745_v52 = vmul.f32 0.2, %v4604_v35 }
 0x7e0   : > { %v5348_v43 = vpop.f32.mrf.mxu3 }
 0x7e1   : > { %v5349_v44 = vadd.f32 %v5348_v43, %v5180_v26  ;;  %v4873_v38 = vmax.f32 %v4604_v35, %v4745_v52 }
 0x7e2   : > { %v4436_v33 = vpop.f32.mrf.mxu0 }
 0x7e3   : > { %5479 = vst.msk [vmem:[%s8568_s22 + $0xa0] sm:$0xff] %vm5458_vm0, %v5349_v44  ;;  %v4437_v53 = vadd.f32 %v4436_v33, %v8466_v17  ;;  %v4605_v45 = vpop.f32.mrf.mxu1 }
 0x7e5   : > { %v4606_v25 = vadd.f32 %v4605_v45, %v4437_v53 }
 0x7e6   : > { %v5181_v2 = vpop.f32.mrf.mxu2 }
 0x7e7   : > { %v4747_v21 = vmul.f32 0.2, %v4606_v25  ;;  %v5182_v14 = vadd.f32 %v8556_v37, %v5181_v2 }
 0x7e8   : > { %v5350_v56 = vpop.f32.mrf.mxu3 }
 0x7e9   : > { %v4875_v30 = vmax.f32 %v4606_v25, %v4747_v21  ;;  %v5351_v59 = vadd.f32 %v5350_v56, %v5182_v14  ;;  %v9170_v56 = vld [vmem:[#allocation13_spill] sm:$0xff] }
 0x7ea   : > { %v4439_v54 = vpop.f32.mrf.mxu0 }
 0x7eb   : > { %5480 = vst.msk [vmem:[%s8568_s22 + $0xa8] sm:$0xff] %vm5458_vm0, %v5351_v59  ;;  %v4608_v5 = vpop.f32.mrf.mxu1  ;;  %5223 = vmatmul.bf16.gmra.mxu2 %v8435_v57  ;;  %v4963_v28 = vpack.c.bf16 %v4875_v30, %v4873_v38  ;;  %v4440_v24 = vadd.f32 %v4439_v54, %v8466_v17 }
 0x7ed   : > { %4478 = vmatmul.bf16.gmra.mxu0 %v8070_v13  ;;  %5392 = vmatmul.bf16.gmra.mxu3 %v4963_v28  ;;  %v4609_v55 = vadd.f32 %v4608_v5, %v4440_v24 }
 0x7ee   : > { %4647 = vmatmul.bf16.gmra.mxu1 %v9169_v23  ;;  %v5184_v18 = vpop.f32.mrf.mxu2 }
 0x7ef   : > { %v5185_v10 = vadd.f32 %v8556_v37, %v5184_v18  ;;  %v4749_v1 = vmul.f32 0.2, %v4609_v55 }
 0x7f0   : > { %v5353_v7 = vpop.f32.mrf.mxu3 }
 0x7f1   : > { %v5354_v60 = vadd.f32 %v5353_v7, %v5185_v10  ;;  %v4877_v15 = vmax.f32 %v4609_v55, %v4749_v1 }
 0x7f2   : > { %v4441_v0 = vpop.f32.mrf.mxu0 }
 0x7f3   : > { %5481 = vst.msk [vmem:[%s8568_s22 + $0xb0] sm:$0xff] %vm5458_vm0, %v5354_v60  ;;  %v4442_v57 = vadd.f32 %v4441_v0, %v8466_v17  ;;  %v4610_v8 = vpop.f32.mrf.mxu1 }
 0x7f5   : > { %v4611_v11 = vadd.f32 %v4610_v8, %v4442_v57 }
 0x7f6   : > { %v5186_v20 = vpop.f32.mrf.mxu2 }
 0x7f7   : > { %v4751_v13 = vmul.f32 0.2, %v4611_v11  ;;  %v5187_v39 = vadd.f32 %v8556_v37, %v5186_v20 }
 0x7f8   : > { %v5355_v29 = vpop.f32.mrf.mxu3 }
 0x7f9   : > { %v4879_v6 = vmax.f32 %v4611_v11, %v4751_v13  ;;  %v5356_v16 = vadd.f32 %v5355_v29, %v5187_v39  ;;  %v9171_v11 = vld [vmem:[#allocation20_spill] sm:$0xff]  ;;  %v9172_v39 = vld [vmem:[#allocation26_spill] sm:$0xff] }
 0x7fa   : > { %v4444_v4 = vpop.f32.mrf.mxu0  ;;  %v9173_v29 = vld [vmem:[#allocation24_spill] sm:$0xff] }
 0x7fb   : > { %5482 = vst.msk [vmem:[%s8568_s22 + $0xb8] sm:$0xff] %vm5458_vm0, %v5356_v16  ;;  %v4613_v3 = vpop.f32.mrf.mxu1  ;;  %5228 = vmatmul.bf16.gmra.mxu2 %v8447_v46  ;;  %v4965_v47 = vpack.c.bf16 %v4879_v6, %v4877_v15  ;;  %v4445_v12 = vadd.f32 %v4444_v4, %v8466_v17 }
 0x7fd   : > { %4483 = vmatmul.bf16.gmra.mxu0 %v8094_v27  ;;  %5397 = vmatmul.bf16.gmra.mxu3 %v4965_v47  ;;  %v4614_v48 = vadd.f32 %v4613_v3, %v4445_v12 }
 0x7fe   : > { %4652 = vmatmul.bf16.gmra.mxu1 %v8440_v32  ;;  %v5189_v58 = vpop.f32.mrf.mxu2 }
 0x7ff   : > { %v5190_v51 = vadd.f32 %v8556_v37, %v5189_v58  ;;  %v4753_v43 = vmul.f32 0.2, %v4614_v48 }
 0x800   : > { %v5358_v40 = vpop.f32.mrf.mxu3 }
 0x801   : > { %v5359_v50 = vadd.f32 %v5358_v40, %v5190_v51  ;;  %v4881_v53 = vmax.f32 %v4614_v48, %v4753_v43 }
 0x802   : > { %v4446_v61 = vpop.f32.mrf.mxu0 }
 0x803   : > { %5483 = vst.msk [vmem:[%s8568_s22 + $0xc0] sm:$0xff] %vm5458_vm0, %v5359_v50  ;;  %v4447_v46 = vadd.f32 %v4446_v61, %v8466_v17  ;;  %v4615_v26 = vpop.f32.mrf.mxu1 }
 0x805   : > { %v4616_v35 = vadd.f32 %v4615_v26, %v4447_v46 }
 0x806   : > { %v5191_v44 = vpop.f32.mrf.mxu2 }
 0x807   : > { %v4755_v27 = vmul.f32 0.2, %v4616_v35  ;;  %v5192_v33 = vadd.f32 %v8556_v37, %v5191_v44 }
 0x808   : > { %v5360_v32 = vpop.f32.mrf.mxu3 }
 0x809   : > { %v4883_v45 = vmax.f32 %v4616_v35, %v4755_v27  ;;  %v5361_v52 = vadd.f32 %v5360_v32, %v5192_v33 }
 0x80a   : > { %v4449_v25 = vpop.f32.mrf.mxu0 }
 0x80b   : > { %5484 = vst.msk [vmem:[%s8568_s22 + $0xc8] sm:$0xff] %vm5458_vm0, %v5361_v52  ;;  %v4618_v2 = vpop.f32.mrf.mxu1  ;;  %5233 = vmatmul.bf16.gmra.mxu2 %v8459_v36  ;;  %v4967_v21 = vpack.c.bf16 %v4883_v45, %v4881_v53  ;;  %v4450_v14 = vadd.f32 %v4449_v25, %v8466_v17 }
 0x80d   : > { %4488 = vmatmul.bf16.gmra.mxu0 %v8112_v22  ;;  %5402 = vmatmul.bf16.gmra.mxu3 %v4967_v21  ;;  %v4619_v54 = vadd.f32 %v4618_v2, %v4450_v14 }
 0x80e   : > { %4657 = vmatmul.bf16.gmra.mxu1 %v9170_v56  ;;  %v5194_v38 = vpop.f32.mrf.mxu2 }
 0x80f   : > { %v5195_v30 = vadd.f32 %v8556_v37, %v5194_v38  ;;  %v4757_v23 = vmul.f32 0.2, %v4619_v54 }
 0x810   : > { %v5363_v59 = vpop.f32.mrf.mxu3 }
 0x811   : > { %v5364_v5 = vadd.f32 %v5363_v59, %v5195_v30  ;;  %v4885_v60 = vmax.f32 %v4619_v54, %v4757_v23 }
 0x812   : > { %v4451_v28 = vpop.f32.mrf.mxu0 }
 0x813   : > { %5485 = vst.msk [vmem:[%s8568_s22 + $0xd0] sm:$0xff] %vm5458_vm0, %v5364_v5  ;;  %v4452_v36 = vadd.f32 %v4451_v28, %v8466_v17  ;;  %v4620_v24 = vpop.f32.mrf.mxu1 }
 0x815   : > { %v4621_v18 = vadd.f32 %v4620_v24, %v4452_v36 }
 0x816   : > { %v5196_v10 = vpop.f32.mrf.mxu2 }
 0x817   : > { %v4759_v22 = vmul.f32 0.2, %v4621_v18  ;;  %v5197_v7 = vadd.f32 %v8556_v37, %v5196_v10 }
 0x818   : > { %v5365_v55 = vpop.f32.mrf.mxu3 }
 0x819   : > { %v4887_v0 = vmax.f32 %v4621_v18, %v4759_v22  ;;  %v5366_v57 = vadd.f32 %v5365_v55, %v5197_v7 }
 0x81a   : > { %v4454_v8 = vpop.f32.mrf.mxu0 }
 0x81b   : > { %5486 = vst.msk [vmem:[%s8568_s22 + $0xd8] sm:$0xff] %vm5458_vm0, %v5366_v57  ;;  %v4623_v1 = vpop.f32.mrf.mxu1  ;;  %5238 = vmatmul.bf16.gmra.mxu2 %v9171_v11  ;;  %v4969_v20 = vpack.c.bf16 %v4887_v0, %v4885_v60  ;;  %v4455_v13 = vadd.f32 %v4454_v8, %v8466_v17 }
 0x81d   : > { %4493 = vmatmul.bf16.gmra.mxu0 %v9172_v39  ;;  %5407 = vmatmul.bf16.gmra.mxu3 %v4969_v20  ;;  %v4624_v4 = vadd.f32 %v4623_v1, %v4455_v13 }
 0x81e   : > { %4662 = vmatmul.bf16.gmra.mxu1 %v9173_v29  ;;  %v5199_v15 = vpop.f32.mrf.mxu2 }
 0x81f   : > { %v5200_v6 = vadd.f32 %v8556_v37, %v5199_v15  ;;  %v4761_v51 = vmul.f32 0.2, %v4624_v4 }
 0x820   : > { %v5368_v16 = vpop.f32.mrf.mxu3 }
 0x821   : > { %v5369_v3 = vadd.f32 %v5368_v16, %v5200_v6  ;;  %v4889_v26 = vmax.f32 %v4624_v4, %v4761_v51 }
 0x822   : > { %v4456_v47 = vpop.f32.mrf.mxu0 }
 0x823   : > { %5487 = vst.msk [vmem:[%s8568_s22 + $0xe0] sm:$0xff] %vm5458_vm0, %v5369_v3  ;;  %v4457_v12 = vadd.f32 %v4456_v47, %v8466_v17  ;;  %v4625_v58 = vpop.f32.mrf.mxu1 }
 0x825   : > { %v4626_v40 = vadd.f32 %v4625_v58, %v4457_v12 }
 0x826   : > { %v5201_v48 = vpop.f32.mrf.mxu2 }
 0x827   : > { %v4763_v50 = vmul.f32 0.2, %v4626_v40  ;;  %v5202_v61 = vadd.f32 %v8556_v37, %v5201_v48 }
 0x828   : > { %v5370_v46 = vpop.f32.mrf.mxu3 }
 0x829   : > { %v4891_v43 = vmax.f32 %v4626_v40, %v4763_v50  ;;  %v5371_v35 = vadd.f32 %v5370_v46, %v5202_v61 }
 0x82a   : > { %v4459_v44 = vpop.f32.mrf.mxu0 }
 0x82b   : > { %5488 = vst.msk [vmem:[%s8568_s22 + $0xe8] sm:$0xff] %vm5458_vm0, %v5371_v35  ;;  %v4628_v27 = vpop.f32.mrf.mxu1  ;;  %5243 = vmatmul.bf16.gmra.mxu2 %v8485_v19  ;;  %v4971_v33 = vpack.c.bf16 %v4891_v43, %v4889_v26  ;;  %v4460_v32 = vadd.f32 %v4459_v44, %v8466_v17 }
 0x82d   : > { %5412 = vmatmul.bf16.gmra.mxu3 %v4971_v33  ;;  %v4629_v25 = vadd.f32 %v4628_v27, %v4460_v32 }
 0x82e   : > { %v5204_v53 = vpop.f32.mrf.mxu2 }
 0x82f   : > { %v5205_v45 = vadd.f32 %v8556_v37, %v5204_v53  ;;  %v4765_v38 = vmul.f32 0.2, %v4629_v25 }
 0x830   : > { %v5373_v52 = vpop.f32.mrf.mxu3 }
 0x831   : > { %v5374_v2 = vadd.f32 %v5373_v52, %v5205_v45  ;;  %v4893_v28 = vmax.f32 %v4629_v25, %v4765_v38 }
 0x832   : > { %v4461_v21 = vpop.f32.mrf.mxu0 }
 0x833   : > { %5489 = vst.msk [vmem:[%s8568_s22 + $0xf0] sm:$0xff] %vm5458_vm0, %v5374_v2  ;;  %v4462_v14 = vadd.f32 %v4461_v21, %v8466_v17  ;;  %v4630_v56 = vpop.f32.mrf.mxu1 }
 0x835   : > { %v4631_v30 = vadd.f32 %v4630_v56, %v4462_v14 }
 0x836   : > { %v5206_v19 = vpop.f32.mrf.mxu2 }
 0x837   : > { %v4767_v59 = vmul.f32 0.2, %v4631_v30  ;;  %v5207_v54 = vadd.f32 %v8556_v37, %v5206_v19 }
 0x838   : > { %v5375_v5 = vpop.f32.mrf.mxu3 }
 0x839   : > { %v4895_v36 = vmax.f32 %v4631_v30, %v4767_v59  ;;  %v5376_v24 = vadd.f32 %v5375_v5, %v5207_v54 }
 0x83a   : > { %v4464_v23 = vpop.f32.mrf.mxu0 }
 0x83b   : > { %5490 = vst.msk [vmem:[%s8568_s22 + $0xf8] sm:$0xff] %vm5458_vm0, %v5376_v24  ;;  %v4633_v18 = vpop.f32.mrf.mxu1  ;;  %5248 = vmatmul.bf16.gmra.mxu2 %v8494_v62  ;;  %v4973_v10 = vpack.c.bf16 %v4895_v36, %v4893_v28  ;;  %v4465_v22 = vadd.f32 %v4464_v23, %v8466_v17 }
 0x83d   : > { %5417 = vmatmul.bf16.gmra.mxu3 %v4973_v10  ;;  %v4634_v0 = vadd.f32 %v4633_v18, %v4465_v22 }
 0x83e   : > { %v5209_v7 = vpop.f32.mrf.mxu2 }
 0x83f   : > { %v5210_v55 = vadd.f32 %v8556_v37, %v5209_v7  ;;  %v4769_v20 = vmul.f32 0.2, %v4634_v0 }
 0x840   : > { %v5378_v60 = vpop.f32.mrf.mxu3 }
 0x841   : > { %v5379_v57 = vadd.f32 %v5378_v60, %v5210_v55  ;;  %v4897_v6 = vmax.f32 %v4634_v0, %v4769_v20 }
 0x842   : > { %v4466_v8 = vpop.f32.mrf.mxu0 }
 0x843   : > { %5491 = vst.msk [vmem:[%s8568_s22 + $0x100] sm:$0xff] %vm5458_vm0, %v5379_v57  ;;  %v4467_v1 = vadd.f32 %v4466_v8, %v8466_v17  ;;  %v4635_v11 = vpop.f32.mrf.mxu1 }
 0x845   : > { %v4636_v13 = vadd.f32 %v4635_v11, %v4467_v1 }
 0x846   : > { %v5211_v62 = vpop.f32.mrf.mxu2 }
 0x847   : > { %v4771_v39 = vmul.f32 0.2, %v4636_v13  ;;  %v5212_v29 = vadd.f32 %v8556_v37, %v5211_v62 }
 0x848   : > { %v5380_v15 = vpop.f32.mrf.mxu3 }
 0x849   : > { %v4899_v16 = vmax.f32 %v4636_v13, %v4771_v39  ;;  %v5381_v4 = vadd.f32 %v5380_v15, %v5212_v29 }
 0x84a   : > { %v4469_v3 = vpop.f32.mrf.mxu0 }
 0x84b   : > { %5492 = vst.msk [vmem:[%s8568_s22 + $0x108] sm:$0xff] %vm5458_vm0, %v5381_v4  ;;  %v4638_v47 = vpop.f32.mrf.mxu1  ;;  %5253 = vmatmul.bf16.gmra.mxu2 %v8503_v41  ;;  %v4975_v12 = vpack.c.bf16 %v4899_v16, %v4897_v6  ;;  %v4470_v58 = vadd.f32 %v4469_v3, %v8466_v17 }
 0x84d   : > { %5422 = vmatmul.bf16.gmra.mxu3 %v4975_v12  ;;  %v4639_v50 = vadd.f32 %v4638_v47, %v4470_v58 }
 0x84e   : > { %v5214_v51 = vpop.f32.mrf.mxu2 }
 0x84f   : > { %v5215_v40 = vadd.f32 %v8556_v37, %v5214_v51  ;;  %v4773_v35 = vmul.f32 0.2, %v4639_v50 }
 0x850   : > { %v5383_v48 = vpop.f32.mrf.mxu3 }
 0x851   : > { %v5384_v61 = vadd.f32 %v5383_v48, %v5215_v40  ;;  %v4901_v53 = vmax.f32 %v4639_v50, %v4773_v35 }
 0x852   : > { %v4471_v46 = vpop.f32.mrf.mxu0 }
 0x853   : > { %5493 = vst.msk [vmem:[%s8568_s22 + $0x110] sm:$0xff] %vm5458_vm0, %v5384_v61  ;;  %v4472_v26 = vadd.f32 %v4471_v46, %v8466_v17  ;;  %v4640_v43 = vpop.f32.mrf.mxu1 }
 0x855   : > { %v4641_v44 = vadd.f32 %v4640_v43, %v4472_v26 }
 0x856   : > { %v5216_v41 = vpop.f32.mrf.mxu2 }
 0x857   : > { %v4775_v27 = vmul.f32 0.2, %v4641_v44  ;;  %v5217_v33 = vadd.f32 %v8556_v37, %v5216_v41 }
 0x858   : > { %v5385_v32 = vpop.f32.mrf.mxu3 }
 0x859   : > { %v4903_v45 = vmax.f32 %v4641_v44, %v4775_v27  ;;  %v5386_v52 = vadd.f32 %v5385_v32, %v5217_v33 }
 0x85a   : > { %v4474_v25 = vpop.f32.mrf.mxu0 }
 0x85b   : > { %5494 = vst.msk [vmem:[%s8568_s22 + $0x118] sm:$0xff] %vm5458_vm0, %v5386_v52  ;;  %v4643_v2 = vpop.f32.mrf.mxu1  ;;  %5258 = vmatmul.bf16.gmra.mxu2 %v8512_v9  ;;  %v4977_v21 = vpack.c.bf16 %v4903_v45, %v4901_v53  ;;  %v4475_v14 = vadd.f32 %v4474_v25, %v8466_v17 }
 0x85d   : > { %5427 = vmatmul.bf16.gmra.mxu3 %v4977_v21  ;;  %v4644_v19 = vadd.f32 %v4643_v2, %v4475_v14 }
 0x85e   : > { %v5219_v56 = vpop.f32.mrf.mxu2 }
 0x85f   : > { %v5220_v38 = vadd.f32 %v8556_v37, %v5219_v56  ;;  %v4777_v36 = vmul.f32 0.2, %v4644_v19 }
 0x860   : > { %v5388_v30 = vpop.f32.mrf.mxu3 }
 0x861   : > { %v5389_v59 = vadd.f32 %v5388_v30, %v5220_v38  ;;  %v4905_v22 = vmax.f32 %v4644_v19, %v4777_v36 }
 0x862   : > { %v4476_v54 = vpop.f32.mrf.mxu0 }
 0x863   : > { %5495 = vst.msk [vmem:[%s8568_s22 + $0x120] sm:$0xff] %vm5458_vm0, %v5389_v59  ;;  %v4477_v5 = vadd.f32 %v4476_v54, %v8466_v17  ;;  %v4645_v28 = vpop.f32.mrf.mxu1 }
 0x865   : > { %v4646_v24 = vadd.f32 %v4645_v28, %v4477_v5 }
 0x866   : > { %v5221_v9 = vpop.f32.mrf.mxu2 }
 0x867   : > { %v4779_v23 = vmul.f32 0.2, %v4646_v24  ;;  %v5222_v18 = vadd.f32 %v8556_v37, %v5221_v9  ;;  %v8771_v37 = vld [vmem:[%s8875_s10] ss:$0 sm:$0xff] }
 0x868   : > { %v5390_v10 = vpop.f32.mrf.mxu3 }
 0x869   : > { %v4907_v7 = vmax.f32 %v4646_v24, %v4779_v23  ;;  %v5391_v55 = vadd.f32 %v5390_v10, %v5222_v18 }
 0x86a   : > { %v4479_v60 = vpop.f32.mrf.mxu0 }
 0x86b   : > { %5496 = vst.msk [vmem:[%s8568_s22 + $0x128] sm:$0xff] %vm5458_vm0, %v5391_v55  ;;  %v4648_v0 = vpop.f32.mrf.mxu1  ;;  %5263 = vmatmul.bf16.gmra.mxu2 %v8521_v42  ;;  %v4979_v57 = vpack.c.bf16 %v4907_v7, %v4905_v22  ;;  %v4480_v8 = vadd.f32 %v4479_v60, %v8466_v17 }
 0x86d   : > { %5432 = vmatmul.bf16.gmra.mxu3 %v4979_v57  ;;  %v4649_v13 = vadd.f32 %v4648_v0, %v4480_v8 }
 0x86e   : > { %v5224_v1 = vpop.f32.mrf.mxu2 }
 0x86f   : > { %v5225_v11 = vadd.f32 %v8771_v37, %v5224_v1  ;;  %v4781_v15 = vmul.f32 0.2, %v4649_v13 }
 0x870   : > { %v5393_v20 = vpop.f32.mrf.mxu3 }
 0x871   : > { %v5394_v62 = vadd.f32 %v5393_v20, %v5225_v11  ;;  %v4909_v12 = vmax.f32 %v4649_v13, %v4781_v15 }
 0x872   : > { %v4481_v39 = vpop.f32.mrf.mxu0 }
 0x873   : > { %5497 = vst.msk [vmem:[%s8568_s22 + $0x130] sm:$0xff] %vm5458_vm0, %v5394_v62  ;;  %v4482_v42 = vadd.f32 %v4481_v39, %v8466_v17  ;;  %v4650_v29 = vpop.f32.mrf.mxu1 }
 0x875   : > { %v4651_v6 = vadd.f32 %v4650_v29, %v4482_v42 }
 0x876   : > { %v5226_v16 = vpop.f32.mrf.mxu2 }
 0x877   : > { %v4783_v4 = vmul.f32 0.2, %v4651_v6  ;;  %v5227_v3 = vadd.f32 %v8771_v37, %v5226_v16 }
 0x878   : > { %v5395_v47 = vpop.f32.mrf.mxu3 }
 0x879   : > { %v4911_v58 = vmax.f32 %v4651_v6, %v4783_v4  ;;  %v5396_v51 = vadd.f32 %v5395_v47, %v5227_v3 }
 0x87a   : > { %v4484_v40 = vpop.f32.mrf.mxu0 }
 0x87b   : > { %5498 = vst.msk [vmem:[%s8568_s22 + $0x138] sm:$0xff] %vm5458_vm0, %v5396_v51  ;;  %v4653_v48 = vpop.f32.mrf.mxu1  ;;  %5268 = vmatmul.bf16.gmra.mxu2 %v8530_v63  ;;  %v4981_v50 = vpack.c.bf16 %v4911_v58, %v4909_v12  ;;  %v4485_v61 = vadd.f32 %v4484_v40, %v8466_v17 }
 0x87d   : > { %5437 = vmatmul.bf16.gmra.mxu3 %v4981_v50  ;;  %v4654_v35 = vadd.f32 %v4653_v48, %v4485_v61 }
 0x87e   : > { %v5229_v46 = vpop.f32.mrf.mxu2 }
 0x87f   : > { %v5230_v26 = vadd.f32 %v8771_v37, %v5229_v46  ;;  %v4785_v32 = vmul.f32 0.2, %v4654_v35 }
 0x880   : > { %v5398_v43 = vpop.f32.mrf.mxu3 }
 0x881   : > { %v5399_v44 = vadd.f32 %v5398_v43, %v5230_v26  ;;  %v4913_v2 = vmax.f32 %v4654_v35, %v4785_v32 }
 0x882   : > { %v4486_v41 = vpop.f32.mrf.mxu0 }
 0x883   : > { %5499 = vst.msk [vmem:[%s8568_s22 + $0x140] sm:$0xff] %vm5458_vm0, %v5399_v44  ;;  %v4487_v27 = vadd.f32 %v4486_v41, %v8466_v17  ;;  %v4655_v33 = vpop.f32.mrf.mxu1 }
 0x885   : > { %v4656_v53 = vadd.f32 %v4655_v33, %v4487_v27 }
 0x886   : > { %v5231_v63 = vpop.f32.mrf.mxu2 }
 0x887   : > { %v4787_v45 = vmul.f32 0.2, %v4656_v53  ;;  %v5232_v52 = vadd.f32 %v8771_v37, %v5231_v63 }
 0x888   : > { %v5400_v25 = vpop.f32.mrf.mxu3 }
 0x889   : > { %v4915_v21 = vmax.f32 %v4656_v53, %v4787_v45  ;;  %v5401_v14 = vadd.f32 %v5400_v25, %v5232_v52 }
 0x88a   : > { %v4489_v56 = vpop.f32.mrf.mxu0 }
 0x88b   : > { %5500 = vst.msk [vmem:[%s8568_s22 + $0x148] sm:$0xff] %vm5458_vm0, %v5401_v14  ;;  %v4658_v38 = vpop.f32.mrf.mxu1  ;;  %5273 = vmatmul.bf16.gmra.mxu2 %v8539_v34  ;;  %v4983_v30 = vpack.c.bf16 %v4915_v21, %v4913_v2  ;;  %v4490_v19 = vadd.f32 %v4489_v56, %v8466_v17 }
 0x88d   : > { %5442 = vmatmul.bf16.gmra.mxu3 %v4983_v30  ;;  %v4659_v28 = vadd.f32 %v4658_v38, %v4490_v19 }
 0x88e   : > { %v5234_v59 = vpop.f32.mrf.mxu2 }
 0x88f   : > { %v5235_v54 = vadd.f32 %v8771_v37, %v5234_v59  ;;  %v4789_v18 = vmul.f32 0.2, %v4659_v28 }
 0x890   : > { %v5403_v5 = vpop.f32.mrf.mxu3 }
 0x891   : > { %v5404_v36 = vadd.f32 %v5403_v5, %v5235_v54  ;;  %v4917_v60 = vmax.f32 %v4659_v28, %v4789_v18 }
 0x892   : > { %v4491_v24 = vpop.f32.mrf.mxu0 }
 0x893   : > { %5501 = vst.msk [vmem:[%s8568_s22 + $0x150] sm:$0xff] %vm5458_vm0, %v5404_v36  ;;  %v4492_v9 = vadd.f32 %v4491_v24, %v8466_v17  ;;  %v4660_v23 = vpop.f32.mrf.mxu1 }
 0x895   : > { %v4661_v10 = vadd.f32 %v4660_v23, %v4492_v9 }
 0x896   : > { %v5236_v34 = vpop.f32.mrf.mxu2 }
 0x897   : > { %v4791_v22 = vmul.f32 0.2, %v4661_v10  ;;  %v5237_v7 = vadd.f32 %v8771_v37, %v5236_v34 }
 0x898   : > { %v5405_v55 = vpop.f32.mrf.mxu3 }
 0x899   : > { %v4919_v0 = vmax.f32 %v4661_v10, %v4791_v22  ;;  %v5406_v57 = vadd.f32 %v5405_v55, %v5237_v7 }
 0x89a   : > { %v4494_v8 = vpop.f32.mrf.mxu0 }
 0x89b   : > { %5502 = vst.msk [vmem:[%s8568_s22 + $0x158] sm:$0xff] %vm5458_vm0, %v5406_v57  ;;  %v4663_v1 = vpop.f32.mrf.mxu1  ;;  %5278 = vmatmul.bf16.gmra.mxu2 %v8548_v49  ;;  %v4985_v11 = vpack.c.bf16 %v4919_v0, %v4917_v60  ;;  %v4495_v20 = vadd.f32 %v4494_v8, %v8466_v17 }
 0x89d   : > { %5447 = vmatmul.bf16.gmra.mxu3 %v4985_v11  ;;  %v4664_v42 = vadd.f32 %v4663_v1, %v4495_v20 }
 0x89e   : > { %v5239_v13 = vpop.f32.mrf.mxu2 }
 0x89f   : > { %v5240_v62 = vadd.f32 %v8771_v37, %v5239_v13  ;;  %v4793_v4 = vmul.f32 0.2, %v4664_v42 }
 0x8a0   : > { %v5408_v39 = vpop.f32.mrf.mxu3 }
 0x8a1   : > { %v5409_v29 = vadd.f32 %v5408_v39, %v5240_v62  ;;  %v4921_v51 = vmax.f32 %v4664_v42, %v4793_v4 }
 0x8a2   : > { %v4496_v15 = vpop.f32.mrf.mxu0 }
 0x8a3   : > { %5503 = vst.msk [vmem:[%s8568_s22 + $0x160] sm:$0xff] %vm5458_vm0, %v5409_v29  ;;  %v4497_v6 = vadd.f32 %v4496_v15, %v8466_v17  ;;  %v4665_v16 = vpop.f32.mrf.mxu1 }
 0x8a5   : > { %v4666_v3 = vadd.f32 %v4665_v16, %v4497_v6 }
 0x8a6   : > { %v5241_v49 = vpop.f32.mrf.mxu2 }
 0x8a7   : > { %v4795_v47 = vmul.f32 0.2, %v4666_v3  ;;  %v5242_v12 = vadd.f32 %v8771_v37, %v5241_v49 }
 0x8a8   : > { %v5410_v58 = vpop.f32.mrf.mxu3 }
 0x8a9   : > { %v4923_v40 = vmax.f32 %v4666_v3, %v4795_v47  ;;  %v5411_v48 = vadd.f32 %v5410_v58, %v5242_v12 }
 0x8ab   : > { %5504 = vst.msk [vmem:[%s8568_s22 + $0x168] sm:$0xff] %vm5458_vm0, %v5411_v48  ;;  %5283 = vmatmul.bf16.gmra.mxu2 %v8563_v31  ;;  %v4987_v50 = vpack.c.bf16 %v4923_v40, %v4921_v51 }
 0x8ad   : > { %5452 = vmatmul.bf16.gmra.mxu3 %v4987_v50 }
 0x8ae   : > { %v5244_v17 = vpop.f32.mrf.mxu2 }
 0x8af   : > { %v5245_v61 = vadd.f32 %v8771_v37, %v5244_v17 }
 0x8b0   : > { %v5413_v46 = vpop.f32.mrf.mxu3 }
 0x8b1   : > { %v5414_v26 = vadd.f32 %v5413_v46, %v5245_v61 }
 0x8b3   : > { %5505 = vst.msk [vmem:[%s8568_s22 + $0x170] sm:$0xff] %vm5458_vm0, %v5414_v26 }
 0x8b6   : > { %v5246_v43 = vpop.f32.mrf.mxu2 }
 0x8b7   : > { %v5247_v35 = vadd.f32 %v8771_v37, %v5246_v43 }
 0x8b8   : > { %v5415_v44 = vpop.f32.mrf.mxu3 }
 0x8b9   : > { %v5416_v41 = vadd.f32 %v5415_v44, %v5247_v35 }
 0x8bb   : > { %5506 = vst.msk [vmem:[%s8568_s22 + $0x178] sm:$0xff] %vm5458_vm0, %v5416_v41 }
 0x8be   : > { %v5249_v31 = vpop.f32.mrf.mxu2 }
 0x8bf   : > { %v5250_v27 = vadd.f32 %v8771_v37, %v5249_v31 }
 0x8c0   : > { %v5418_v33 = vpop.f32.mrf.mxu3 }
 0x8c1   : > { %v5419_v32 = vadd.f32 %v5418_v33, %v5250_v27 }
 0x8c3   : > { %5507 = vst.msk [vmem:[%s8568_s22 + $0x180] sm:$0xff] %vm5458_vm0, %v5419_v32 }
 0x8c6   : > { %v5251_v53 = vpop.f32.mrf.mxu2 }
 0x8c7   : > { %v5252_v63 = vadd.f32 %v8771_v37, %v5251_v53 }
 0x8c8   : > { %v5420_v45 = vpop.f32.mrf.mxu3 }
 0x8c9   : > { %v5421_v52 = vadd.f32 %v5420_v45, %v5252_v63 }
 0x8cb   : > { %5508 = vst.msk [vmem:[%s8568_s22 + $0x188] sm:$0xff] %vm5458_vm0, %v5421_v52 }
 0x8ce   : > { %v5254_v25 = vpop.f32.mrf.mxu2 }
 0x8cf   : > { %v5255_v2 = vadd.f32 %v8771_v37, %v5254_v25 }
 0x8d0   : > { %v5423_v21 = vpop.f32.mrf.mxu3 }
 0x8d1   : > { %v5424_v14 = vadd.f32 %v5423_v21, %v5255_v2 }
 0x8d3   : > { %5509 = vst.msk [vmem:[%s8568_s22 + $0x190] sm:$0xff] %vm5458_vm0, %v5424_v14 }
 0x8d6   : > { %v5256_v56 = vpop.f32.mrf.mxu2 }
 0x8d7   : > { %v5257_v38 = vadd.f32 %v8771_v37, %v5256_v56 }
 0x8d8   : > { %v5425_v30 = vpop.f32.mrf.mxu3 }
 0x8d9   : > { %v5426_v19 = vadd.f32 %v5425_v30, %v5257_v38 }
 0x8db   : > { %5510 = vst.msk [vmem:[%s8568_s22 + $0x198] sm:$0xff] %vm5458_vm0, %v5426_v19 }
 0x8de   : > { %v5259_v59 = vpop.f32.mrf.mxu2 }
 0x8df   : > { %v5260_v54 = vadd.f32 %v8771_v37, %v5259_v59 }
 0x8e0   : > { %v5428_v5 = vpop.f32.mrf.mxu3 }
 0x8e1   : > { %v5429_v28 = vadd.f32 %v5428_v5, %v5260_v54 }
 0x8e3   : > { %5511 = vst.msk [vmem:[%s8568_s22 + $0x1a0] sm:$0xff] %vm5458_vm0, %v5429_v28 }
 0x8e6   : > { %v5261_v36 = vpop.f32.mrf.mxu2 }
 0x8e7   : > { %v5262_v24 = vadd.f32 %v8771_v37, %v5261_v36 }
 0x8e8   : > { %v5430_v9 = vpop.f32.mrf.mxu3 }
 0x8e9   : > { %v5431_v23 = vadd.f32 %v5430_v9, %v5262_v24 }
 0x8eb   : > { %5512 = vst.msk [vmem:[%s8568_s22 + $0x1a8] sm:$0xff] %vm5458_vm0, %v5431_v23 }
 0x8ee   : > { %v5264_v18 = vpop.f32.mrf.mxu2 }
 0x8ef   : > { %v5265_v10 = vadd.f32 %v8771_v37, %v5264_v18 }
 0x8f0   : > { %v5433_v34 = vpop.f32.mrf.mxu3 }
 0x8f1   : > { %v5434_v22 = vadd.f32 %v5433_v34, %v5265_v10 }
 0x8f3   : > { %5513 = vst.msk [vmem:[%s8568_s22 + $0x1b0] sm:$0xff] %vm5458_vm0, %v5434_v22 }
 0x8f6   : > { %v5266_v7 = vpop.f32.mrf.mxu2 }
 0x8f7   : > { %v5267_v55 = vadd.f32 %v8771_v37, %v5266_v7 }
 0x8f8   : > { %v5435_v60 = vpop.f32.mrf.mxu3 }
 0x8f9   : > { %v5436_v0 = vadd.f32 %v5435_v60, %v5267_v55 }
 0x8fb   : > { %5514 = vst.msk [vmem:[%s8568_s22 + $0x1b8] sm:$0xff] %vm5458_vm0, %v5436_v0 }
 0x8fe   : > { %v5269_v57 = vpop.f32.mrf.mxu2 }
 0x8ff   : > { %v5270_v8 = vadd.f32 %v8771_v37, %v5269_v57 }
 0x900   : > { %v5438_v1 = vpop.f32.mrf.mxu3 }
 0x901   : > { %v5439_v11 = vadd.f32 %v5438_v1, %v5270_v8 }
 0x903   : > { %5515 = vst.msk [vmem:[%s8568_s22 + $0x1c0] sm:$0xff] %vm5458_vm0, %v5439_v11 }
 0x906   : > { %v5271_v20 = vpop.f32.mrf.mxu2 }
 0x907   : > { %v5272_v13 = vadd.f32 %v8771_v37, %v5271_v20 }
 0x908   : > { %v5440_v62 = vpop.f32.mrf.mxu3 }
 0x909   : > { %v5441_v39 = vadd.f32 %v5440_v62, %v5272_v13 }
 0x90b   : > { %5516 = vst.msk [vmem:[%s8568_s22 + $0x1c8] sm:$0xff] %vm5458_vm0, %v5441_v39 }
 0x90e   : > { %v5274_v42 = vpop.f32.mrf.mxu2 }
 0x90f   : > { %v5275_v29 = vadd.f32 %v8771_v37, %v5274_v42 }
 0x910   : > { %v5443_v15 = vpop.f32.mrf.mxu3 }
 0x911   : > { %v5444_v6 = vadd.f32 %v5443_v15, %v5275_v29 }
 0x913   : > { %5517 = vst.msk [vmem:[%s8568_s22 + $0x1d0] sm:$0xff] %vm5458_vm0, %v5444_v6 }
 0x916   : > { %v5276_v16 = vpop.f32.mrf.mxu2 }
 0x917   : > { %v5277_v4 = vadd.f32 %v8771_v37, %v5276_v16 }
 0x918   : > { %v5445_v3 = vpop.f32.mrf.mxu3 }
 0x919   : > { %v5446_v49 = vadd.f32 %v5445_v3, %v5277_v4 }
 0x91b   : > { %5518 = vst.msk [vmem:[%s8568_s22 + $0x1d8] sm:$0xff] %vm5458_vm0, %v5446_v49 }
 0x91e   : > { %v5279_v47 = vpop.f32.mrf.mxu2 }
 0x91f   : > { %v5280_v12 = vadd.f32 %v8771_v37, %v5279_v47 }
 0x920   : > { %v5448_v58 = vpop.f32.mrf.mxu3 }
 0x921   : > { %v5449_v51 = vadd.f32 %v5448_v58, %v5280_v12 }
 0x923   : > { %5519 = vst.msk [vmem:[%s8568_s22 + $0x1e0] sm:$0xff] %vm5458_vm0, %v5449_v51 }
 0x926   : > { %v5281_v40 = vpop.f32.mrf.mxu2 }
 0x927   : > { %v5282_v48 = vadd.f32 %v8771_v37, %v5281_v40 }
 0x928   : > { %v5450_v50 = vpop.f32.mrf.mxu3 }
 0x929   : > { %v5451_v17 = vadd.f32 %v5450_v50, %v5282_v48 }
 0x92b   : > { %5520 = vst.msk [vmem:[%s8568_s22 + $0x1e8] sm:$0xff] %vm5458_vm0, %v5451_v17 }
 0x92e   : > { %v5284_v61 = vpop.f32.mrf.mxu2 }
 0x92f   : > { %v5285_v46 = vadd.f32 %v8771_v37, %v5284_v61 }
 0x930   : > { %v5453_v26 = vpop.f32.mrf.mxu3 }
 0x931   : > { %v5454_v43 = vadd.f32 %v5453_v26, %v5285_v46 }
 0x933   : > { %5521 = vst.msk [vmem:[%s8568_s22 + $0x1f0] sm:$0xff] %vm5458_vm0, %v5454_v43 }
 0x936   : > { %v5286_v35 = vpop.f32.mrf.mxu2 }
 0x937   : > { %v5287_v44 = vadd.f32 %v8771_v37, %v5286_v35 }
 0x938   : > { %v5455_v41 = vpop.f32.mrf.mxu3 }
 0x939   : > { %v5456_v31 = vadd.f32 %v5455_v41, %v5287_v44 }
 0x93b   : > { %5522 = vst.msk [vmem:[%s8568_s22 + $0x1f8] sm:$0xff] %vm5458_vm0, %v5456_v31 }
 0x93c PF: > { %s21_s17 = sadd.s32 1, %s6409_s17  }
 0x93d   : > { %p18_p4 = scmp.ge.s32.totalorder %s21_s17, 4  }
 0x93f   :  { %20 = sbr.rel (!%p18_p4) target bundleno = 1 (0x1), region = 94 }

</bundles_post_ra>
